<compile_context>
chip_gen: v6e
topology: v6e:2x2x1
jax: 0.10.0
libtpu: 0.0.40
codegen_flags: <defaults>
</compile_context>

<pallas_src>
import math

import jax
import jax.numpy as jnp
import numpy as np
from jax import lax
from jax.experimental import pallas as pl
from jax.experimental.pallas import tpu as pltpu

NEG_SLOPE = 0.01   # F.leaky_relu default
BN_EPS = 1e-5      # nn.BatchNorm default
W_IN = 8           # board width (fixed by the module: x is (N, 2, row_size, 8))
C0 = 8             # channels after the first_fc split/cat reshuffle
CC = 64            # conv output channels

FC1_W_IDX = 14     # position of the fc1 weight inside the packed tuple


# --------------------------------------------------------------------------
# In-kernel helpers
# --------------------------------------------------------------------------
def _bn_rows_lrelu(y, gamma, beta, inv_n):
    """BatchNorm1d (train-mode batch stats over rows) + leaky_relu.

    Single-pass moments (two independent row reductions), gamma folded into
    the scale so normalization is one FMA per element."""
    mean = jnp.sum(y, axis=0, keepdims=True) * inv_n
    m2 = jnp.sum(y * y, axis=0, keepdims=True) * inv_n
    var = m2 - mean * mean
    scale = lax.rsqrt(var + BN_EPS) * gamma
    offset = beta - mean * scale
    z = y * scale + offset
    return jnp.where(z > 0, z, NEG_SLOPE * z)


def _bn_conv_lrelu(y, n_wblocks, inv_count, gamma_c, beta_c):
    """BatchNorm2d (train) + leaky_relu on a (rows, n_wblocks*64) slab.

    Lane index is (w_out, channel); stats are pooled over all rows and the
    n_wblocks 64-wide lane blocks.  The lane-block fold and the per-channel
    broadcast are tiny MXU matmuls against tiled identities built in-register
    from iota (avoids unaligned 64-offset lane slices and any identity DMA).
    Variance is computed from moments (E[y^2] - mean^2); conv outputs here are
    near zero-mean so there is no cancellation issue in f32."""
    f32 = jnp.float32
    wc = n_wblocks * CC

    # t_fold: (wc, 64), t_fold[j, c] = (j mod 64 == c)  -> folds lane blocks
    jj = lax.broadcasted_iota(jnp.int32, (wc, CC), 0)
    cc = lax.broadcasted_iota(jnp.int32, (wc, CC), 1)
    t_fold = (jnp.bitwise_and(jj, CC - 1) == cc).astype(f32)
    # t_bcast: (64, wc), t_bcast[c, j] = (j mod 64 == c) -> broadcasts stats
    jb = lax.broadcasted_iota(jnp.int32, (CC, wc), 1)
    cb = lax.broadcasted_iota(jnp.int32, (CC, wc), 0)
    t_bcast = (jnp.bitwise_and(jb, CC - 1) == cb).astype(f32)

    s1 = jnp.sum(y, axis=0, keepdims=True)                               # (1, wc)
    s2 = jnp.sum(y * y, axis=0, keepdims=True)                           # (1, wc)
    mean = jnp.dot(s1, t_fold, preferred_element_type=f32) * inv_count   # (1, 64)
    m2 = jnp.dot(s2, t_fold, preferred_element_type=f32) * inv_count     # (1, 64)
    var = m2 - mean * mean
    scale_c = lax.rsqrt(var + BN_EPS) * gamma_c                          # (1, 64)
    offset_c = beta_c - mean * scale_c                                   # (1, 64)
    scale = jnp.dot(scale_c, t_bcast, preferred_element_type=f32)        # (1, wc)
    offset = jnp.dot(offset_c, t_bcast, preferred_element_type=f32)      # (1, wc)
    z = y * scale + offset
    return jnp.where(z > 0, z, NEG_SLOPE * z)


# --------------------------------------------------------------------------
# Fused kernel
# --------------------------------------------------------------------------
def make_fused_kernel(n, h):
    """Whole-network kernel. Activation layout: rows = (h, n), lanes = (w, c)."""
    ho1, wo1 = h - 2, W_IN - 2
    ho2, wo2 = h - 4, W_IN - 4
    inv1 = 1.0 / float(n * ho1 * wo1)
    inv2 = 1.0 / float(n * ho2 * wo2)
    inv_n = 1.0 / float(n)
    f32 = jnp.float32
    bf16 = jnp.bfloat16

    def kernel(x_ref, x1_ref,
               wfc_ref, bfc_ref,
               g1_ref, b1_ref, gm1_ref, bt1_ref,
               g2_ref, b2_ref, gm2_ref, bt2_ref,
               wh_ref, bh_ref, gmh_ref, bth_ref,
               wfc1_hbm, bfc1_ref, gm3_ref, bt3_ref,
               wfc2_ref, bfc2_ref,
               o_ref,
               wfc1_vmem, fc1_sem):
        # Kick off the dominant fc1-weight DMA so it overlaps with the whole
        # conv front-end (manual double-buffer-style overlap, single grid step).
        fc1_copy = pltpu.make_async_copy(wfc1_hbm, wfc1_vmem, fc1_sem)
        fc1_copy.start()

        # ---- first_fc: (h*n, 16) @ (16, 64), f32 ------------------------
        a0 = jnp.dot(x_ref[...], wfc_ref[...],
                     preferred_element_type=f32) + bfc_ref[...]          # (h*n, 64)

        # ---- conv1: 3 banded bf16 matmuls over vertical taps + BN + leaky
        a0b = a0.astype(bf16)
        y1 = jnp.dot(a0b[0:ho1 * n, :], g1_ref[0], preferred_element_type=f32)
        for i in range(1, 3):
            y1 = y1 + jnp.dot(a0b[i * n:(i + ho1) * n, :], g1_ref[i],
                              preferred_element_type=f32)
        y1 = y1 + b1_ref[...]                                            # (ho1*n, wo1*64)
        y1 = _bn_conv_lrelu(y1, wo1, inv1, gm1_ref[...], bt1_ref[...])

        # ---- conv2 -------------------------------------------------------
        y1b = y1.astype(bf16)
        y2 = jnp.dot(y1b[0:ho2 * n, :], g2_ref[0], preferred_element_type=f32)
        for i in range(1, 3):
            y2 = y2 + jnp.dot(y1b[i * n:(i + ho2) * n, :], g2_ref[i],
                              preferred_element_type=f32)
        y2 = y2 + b2_ref[...]                                            # (ho2*n, wo2*64)
        y2 = _bn_conv_lrelu(y2, wo2, inv2, gm2_ref[...], bt2_ref[...])

        # TODO(synk): dropout1 (p=0.25) is identity (train-mode randomness).

        # ---- heur branch: Linear(12,256) + BN + leaky (f32) --------------
        hh = jnp.dot(x1_ref[...], wh_ref[...],
                     preferred_element_type=f32) + bh_ref[...]           # (n, 256)
        hh = _bn_rows_lrelu(hh, gmh_ref[...], bth_ref[...], inv_n)

        # ---- fc1: flatten-free (one matmul per ho row-block of y2 + heur),
        #      bf16 operands, f32 accumulation.  Weight arrives via the async
        #      copy started above — wait only now. ---------------------------
        fc1_copy.wait()
        blk = wo2 * CC                                                   # 256
        z = jnp.dot(hh.astype(bf16),
                    wfc1_vmem[ho2 * blk:(ho2 + 1) * blk, :],
                    preferred_element_type=f32)
        for k in range(ho2):
            z = z + jnp.dot(y2[k * n:(k + 1) * n, :].astype(bf16),
                            wfc1_vmem[k * blk:(k + 1) * blk, :],
                            preferred_element_type=f32)
        z = z + bfc1_ref[...]                                            # (n, 1024)
        z = _bn_rows_lrelu(z, gm3_ref[...], bt3_ref[...], inv_n)

        # TODO(synk): dropout2 (p=0.5) is identity (train-mode randomness).

        # ---- fc2: bf16, output padded to 128 lanes (wrapper slices :12) ---
        o_ref[...] = jnp.dot(z.astype(bf16), wfc2_ref[...],
                             preferred_element_type=f32) + bfc2_ref[...]

    return kernel


# --------------------------------------------------------------------------
# Parameter init (PyTorch layout) and one-time packing for the kernel
# --------------------------------------------------------------------------
def xavier_uniform(key, shape, fan_in, fan_out):
    lim = math.sqrt(6.0 / (fan_in + fan_out))
    return jax.random.uniform(key, shape, jnp.float32, -lim, lim)


def bias_init(key, shape, fan_in):
    lim = 1.0 / math.sqrt(fan_in)
    return jax.random.uniform(key, shape, jnp.float32, -lim, lim)


def init_params(key, row_size):
    flat = (row_size - 4) * 4 * 64
    ks = jax.random.split(key, 12)
    p = {
        "first_fc_w": xavier_uniform(ks[0], (64, 16), 16, 64),
        "first_fc_b": bias_init(ks[1], (64,), 16),
        "conv1_w": xavier_uniform(ks[2], (64, 8, 3, 3), 8 * 9, 64 * 9),
        "conv1_b": bias_init(ks[3], (64,), 8 * 9),
        "conv2_w": xavier_uniform(ks[4], (64, 64, 3, 3), 64 * 9, 64 * 9),
        "conv2_b": bias_init(ks[5], (64,), 64 * 9),
        "heur_w": xavier_uniform(ks[6], (256, 12), 12, 256),
        "heur_b": bias_init(ks[7], (256,), 12),
        "fc1_w": xavier_uniform(ks[8], (1024, flat + 256), flat + 256, 1024),
        "fc1_b": bias_init(ks[9], (1024,), flat + 256),
        "fc2_w": xavier_uniform(ks[10], (12, 1024), 1024, 12),
        "fc2_b": bias_init(ks[11], (12,), 1024),
        "bn1_g": jnp.ones((64,), jnp.float32), "bn1_b": jnp.zeros((64,), jnp.float32),
        "bn2_g": jnp.ones((64,), jnp.float32), "bn2_b": jnp.zeros((64,), jnp.float32),
        "hbn_g": jnp.ones((256,), jnp.float32), "hbn_b": jnp.zeros((256,), jnp.float32),
        "bn3_g": jnp.ones((1024,), jnp.float32), "bn3_b": jnp.zeros((1024,), jnp.float32),
    }
    return p


def pack_params(params, row_size):
    """One-time host-side packing: transposes, banded conv matrices (bf16),
    row permutation of fc1 (so no activation transposes/reshapes are needed
    in the kernel), bias tiling, fc2 padded to 128 lanes, bf16 casts."""
    h = row_size
    ho2, wo1, wo2 = h - 4, W_IN - 2, W_IN - 4
    f32 = np.float32

    # first_fc: columns reordered from PyTorch's (c, w) chunk order to (w, c)
    wf = np.asarray(params["first_fc_w"], f32)                           # (64, 16)
    wfc = wf.T.reshape(16, C0, W_IN).transpose(0, 2, 1).reshape(16, C0 * W_IN)
    bfc = np.asarray(params["first_fc_b"], f32).reshape(C0, W_IN).T.reshape(1, -1)

    # conv1 -> 3 banded matrices (one per vertical tap):
    #   g1[i, w_in*C0 + cin, wo*CC + cout] = conv1_w[cout, cin, i, w_in - wo]
    w1 = np.asarray(params["conv1_w"], f32)                              # (64, 8, 3, 3)
    g1 = np.zeros((3, W_IN * C0, wo1 * CC), f32)
    for i in range(3):
        for j in range(3):
            for wo in range(wo1):
                wi = wo + j
                g1[i, wi * C0:(wi + 1) * C0, wo * CC:(wo + 1) * CC] = w1[:, :, i, j].T
    b1t = np.tile(np.asarray(params["conv1_b"], f32), wo1).reshape(1, -1)
    gm1 = np.asarray(params["bn1_g"], f32).reshape(1, -1)                # per-channel
    bt1 = np.asarray(params["bn1_b"], f32).reshape(1, -1)

    # conv2 -> 3 banded matrices
    w2 = np.asarray(params["conv2_w"], f32)                              # (64, 64, 3, 3)
    g2 = np.zeros((3, wo1 * CC, wo2 * CC), f32)
    for i in range(3):
        for j in range(3):
            for wo in range(wo2):
                wi = wo + j
                g2[i, wi * CC:(wi + 1) * CC, wo * CC:(wo + 1) * CC] = w2[:, :, i, j].T
    b2t = np.tile(np.asarray(params["conv2_b"], f32), wo2).reshape(1, -1)
    gm2 = np.asarray(params["bn2_g"], f32).reshape(1, -1)
    bt2 = np.asarray(params["bn2_b"], f32).reshape(1, -1)

    # heur branch
    wh = np.asarray(params["heur_w"], f32).T                             # (12, 256)
    bh = np.asarray(params["heur_b"], f32).reshape(1, -1)
    gmh = np.asarray(params["hbn_g"], f32).reshape(1, -1)
    bth = np.asarray(params["hbn_b"], f32).reshape(1, -1)

    # fc1: rows permuted from PyTorch NCHW-flatten order (c, ho, wo) to the
    # kernel's (ho, wo, c) row-block order; heur rows appended; stored bf16.
    flat = ho2 * wo2 * CC
    wfc1 = np.asarray(params["fc1_w"], f32)                              # (1024, flat+256)
    n_out = wfc1.shape[0]
    wc = wfc1[:, :flat].reshape(n_out, CC, ho2, wo2)
    wc = np.transpose(wc, (2, 3, 1, 0)).reshape(flat, n_out)
    whr = wfc1[:, flat:].T                                               # (256, 1024)
    wfc1_p = np.concatenate([wc, whr], axis=0)                           # (flat+256, 1024)
    bfc1 = np.asarray(params["fc1_b"], f32).reshape(1, -1)
    gm3 = np.asarray(params["bn3_g"], f32).reshape(1, -1)
    bt3 = np.asarray(params["bn3_b"], f32).reshape(1, -1)

    # fc2: transposed, zero-padded to 128 output lanes (dense DMA + lane-dense
    # output store), stored bf16.
    wfc2 = np.zeros((1024, 128), f32)
    wfc2[:, :12] = np.asarray(params["fc2_w"], f32).T
    bfc2 = np.zeros((1, 128), f32)
    bfc2[0, :12] = np.asarray(params["fc2_b"], f32)

    def as_f32(a):
        return jnp.asarray(a, jnp.float32)

    def as_bf16(a):
        return jnp.asarray(a, jnp.bfloat16)

    packed = (
        as_f32(wfc), as_f32(bfc),
        as_bf16(g1), as_f32(b1t), as_f32(gm1), as_f32(bt1),
        as_bf16(g2), as_f32(b2t), as_f32(gm2), as_f32(bt2),
        as_f32(wh), as_f32(bh), as_f32(gmh), as_f32(bth),
        as_bf16(wfc1_p), as_f32(bfc1), as_f32(gm3), as_f32(bt3),
        as_bf16(wfc2), as_f32(bfc2),
    )
    assert packed[FC1_W_IDX].shape == (flat + 256, 1024)
    return packed


# --------------------------------------------------------------------------
# Forward pass: single fused pallas_call (everything VMEM-resident)
# --------------------------------------------------------------------------
def forward(packed, x, x1):
    n, _, h, _ = x.shape
    # Guard: banded-conv row slabs start at multiples of n; keep them
    # sublane-aligned (f32 sublane tile = 8) to avoid relayout copies.
    assert n % 8 == 0, "batch size must be a multiple of 8"

    # tensor_split(x, 2, dim=1) + cat(dim=3): (N, 2, H, 8) -> (N, H, 16);
    # laid out h-major so in-kernel conv row-slabs are contiguous row slices.
    xc = jnp.concatenate([x[:, 0], x[:, 1]], axis=-1)                    # (N, H, 16)
    x2d = jnp.transpose(xc, (1, 0, 2)).reshape(h * n, 16)                # rows = (h, n)

    flat = (h - 4) * (W_IN - 4) * CC
    kernel = make_fused_kernel(n, h)
    vmem = pl.BlockSpec(memory_space=pltpu.MemorySpace.VMEM)
    in_specs = [vmem] * (2 + len(packed))
    # fc1 weight stays in HBM; the kernel streams it into a VMEM scratch with
    # an async copy overlapped with the conv front-end.
    in_specs[2 + FC1_W_IDX] = pl.BlockSpec(memory_space=pl.ANY)

    out = pl.pallas_call(
        kernel,
        out_shape=jax.ShapeDtypeStruct((n, 128), jnp.float32),
        in_specs=in_specs,
        out_specs=vmem,
        scratch_shapes=[
            pltpu.VMEM((flat + 256, 1024), jnp.bfloat16),   # fc1 weight buffer
            pltpu.SemaphoreType.DMA(()),                    # its completion sem
        ],
    )(x2d, x1, *packed)
    return out[:, :12]


forward_jit = jax.jit(forward)


# --------------------------------------------------------------------------
# Pure-JAX reference (PyTorch semantics, for correctness checking only)
# --------------------------------------------------------------------------
def _leaky(v):
    return jnp.where(v > 0, v, NEG_SLOPE * v)


def _bn(v, g, b, axes):
    m = jnp.mean(v, axis=axes, keepdims=True)
    var = jnp.mean((v - m) ** 2, axis=axes, keepdims=True)
    return (v - m) * lax.rsqrt(var + BN_EPS) * g + b


def ref_forward(params, x, x1):
    N, _, H, _ = x.shape
    xc = jnp.concatenate([x[:, 0], x[:, 1]], axis=-1)[:, None]           # (N,1,H,16)
    h = jnp.matmul(xc, params["first_fc_w"].T) + params["first_fc_b"]    # (N,1,H,64)
    h = jnp.concatenate(jnp.split(h, 8, axis=3), axis=1)                 # (N,8,H,8)

    def conv(v, w, b):
        y = lax.conv_general_dilated(v, w, (1, 1), "VALID",
                                     dimension_numbers=("NCHW", "OIHW", "NCHW"))
        return y + b.reshape(1, -1, 1, 1)

    c1 = _leaky(_bn(conv(h, params["conv1_w"], params["conv1_b"]),
                    params["bn1_g"].reshape(1, -1, 1, 1),
                    params["bn1_b"].reshape(1, -1, 1, 1), (0, 2, 3)))
    c2 = _leaky(_bn(conv(c1, params["conv2_w"], params["conv2_b"]),
                    params["bn2_g"].reshape(1, -1, 1, 1),
                    params["bn2_b"].reshape(1, -1, 1, 1), (0, 2, 3)))
    flat = c2.reshape(N, -1)
    hh = _leaky(_bn(x1 @ params["heur_w"].T + params["heur_b"],
                    params["hbn_g"], params["hbn_b"], (0,)))
    cat = jnp.concatenate([flat, hh], axis=1)
    z = _leaky(_bn(cat @ params["fc1_w"].T + params["fc1_b"],
                   params["bn3_g"], params["bn3_b"], (0,)))
    return z @ params["fc2_w"].T + params["fc2_b"]


# --------------------------------------------------------------------------
if __name__ == "__main__":
    N, ROW = 8, 8                        # batch=8, row_size=8 -> fc1 in = 1280
    root = jax.random.PRNGKey(0)
    kp, kx, kx1 = jax.random.split(root, 3)

    params = init_params(kp, ROW)
    packed = pack_params(params, ROW)

    x = jax.random.normal(kx, (N, 2, ROW, 8), jnp.float32)
    x1 = jax.random.normal(kx1, (N, 12), jnp.float32)

    out = forward_jit(packed, x, x1)
    out = jax.block_until_ready(out)

    assert out.shape == (N, 12)
    assert bool(jnp.all(jnp.isfinite(out)))

    ref = ref_forward(params, x, x1)
    # Tolerance accounts for the bf16 matmul path (f32 accumulation, f32 BN).
    np.testing.assert_allclose(np.asarray(out), np.asarray(ref),
                               rtol=6e-2, atol=6e-2)

    print("KERNEL_OK")
</pallas_src>

<mosaic_0001>
module attributes {stable_mosaic.version = 11 : i64} {
  func.func @kernel(%arg0: memref<64x16xf32, #tpu.memory_space<vmem>>, %arg1: memref<8x12xf32, #tpu.memory_space<vmem>>, %arg2: memref<16x64xf32, #tpu.memory_space<vmem>>, %arg3: memref<1x64xf32, #tpu.memory_space<vmem>>, %arg4: memref<3x64x384xbf16, #tpu.memory_space<vmem>>, %arg5: memref<1x384xf32, #tpu.memory_space<vmem>>, %arg6: memref<1x64xf32, #tpu.memory_space<vmem>>, %arg7: memref<1x64xf32, #tpu.memory_space<vmem>>, %arg8: memref<3x384x256xbf16, #tpu.memory_space<vmem>>, %arg9: memref<1x256xf32, #tpu.memory_space<vmem>>, %arg10: memref<1x64xf32, #tpu.memory_space<vmem>>, %arg11: memref<1x64xf32, #tpu.memory_space<vmem>>, %arg12: memref<12x256xf32, #tpu.memory_space<vmem>>, %arg13: memref<1x256xf32, #tpu.memory_space<vmem>>, %arg14: memref<1x256xf32, #tpu.memory_space<vmem>>, %arg15: memref<1x256xf32, #tpu.memory_space<vmem>>, %arg16: memref<1280x1024xbf16, #tpu.memory_space<any>>, %arg17: memref<1x1024xf32, #tpu.memory_space<vmem>>, %arg18: memref<1x1024xf32, #tpu.memory_space<vmem>>, %arg19: memref<1x1024xf32, #tpu.memory_space<vmem>>, %arg20: memref<1024x128xbf16, #tpu.memory_space<vmem>>, %arg21: memref<1x128xf32, #tpu.memory_space<vmem>>, %arg22: memref<8x128xf32, #tpu.memory_space<vmem>>, %arg23: memref<1280x1024xbf16, #tpu.memory_space<vmem>>, %arg24: memref<!tpu.dma_semaphore, #tpu.memory_space<semaphore_mem>>) attributes {dimension_semantics = [], scalar_prefetch = 0 : i64, scratch_operands = 2 : i64, tpu.core_type = #tpu.core_type<tc>} {
    tpu.enqueue_dma source(%arg16 : memref<1280x1024xbf16, #tpu.memory_space<any>>) target(%arg23 : memref<1280x1024xbf16, #tpu.memory_space<vmem>>) target_semaphore(%arg24 : memref<!tpu.dma_semaphore, #tpu.memory_space<semaphore_mem>>)
    %c0 = arith.constant 0 : index
    %c0_0 = arith.constant 0 : index
    %0 = vector.load %arg0[%c0, %c0_0] : memref<64x16xf32, #tpu.memory_space<vmem>>, vector<64x16xf32>
    %c0_1 = arith.constant 0 : index
    %c0_2 = arith.constant 0 : index
    %1 = vector.load %arg2[%c0_1, %c0_2] : memref<16x64xf32, #tpu.memory_space<vmem>>, vector<16x64xf32>
    %cst = arith.constant dense<0.000000e+00> : vector<64x64xf32>
    %2 = tpu.matmul %0, %1, %cst {dimension_numbers = #tpu.dot_dimension_numbers<[1], [0], [0], [1], [0, 0, 1, 1], [], []>} : vector<64x16xf32>, vector<16x64xf32>, vector<64x64xf32> -> vector<64x64xf32>
    %c0_3 = arith.constant 0 : index
    %c0_4 = arith.constant 0 : index
    %3 = vector.load %arg3[%c0_3, %c0_4] : memref<1x64xf32, #tpu.memory_space<vmem>>, vector<1x64xf32>
    %4 = vector.broadcast %3 : vector<1x64xf32> to vector<64x64xf32>
    %5 = arith.addf %2, %4 : vector<64x64xf32>
    %6 = arith.truncf %5 : vector<64x64xf32> to vector<64x64xbf16>
    %7 = vector.extract_strided_slice %6 {offsets = [0, 0], sizes = [48, 64], strides = [1, 1]} : vector<64x64xbf16> to vector<48x64xbf16>
    %c0_5 = arith.constant 0 : index
    %c0_6 = arith.constant 0 : index
    %c0_7 = arith.constant 0 : index
    %8 = vector.load %arg4[%c0_5, %c0_6, %c0_7] : memref<3x64x384xbf16, #tpu.memory_space<vmem>>, vector<1x64x384xbf16>
    %9 = vector.shape_cast %8 : vector<1x64x384xbf16> to vector<64x384xbf16>
    %cst_8 = arith.constant dense<0.000000e+00> : vector<48x384xf32>
    %10 = tpu.matmul %7, %9, %cst_8 {dimension_numbers = #tpu.dot_dimension_numbers<[1], [0], [0], [1], [0, 0, 1, 1], [], []>} : vector<48x64xbf16>, vector<64x384xbf16>, vector<48x384xf32> -> vector<48x384xf32>
    %11 = vector.extract_strided_slice %6 {offsets = [8, 0], sizes = [48, 64], strides = [1, 1]} : vector<64x64xbf16> to vector<48x64xbf16>
    %c1 = arith.constant 1 : index
    %c0_9 = arith.constant 0 : index
    %c0_10 = arith.constant 0 : index
    %12 = vector.load %arg4[%c1, %c0_9, %c0_10] : memref<3x64x384xbf16, #tpu.memory_space<vmem>>, vector<1x64x384xbf16>
    %13 = vector.shape_cast %12 : vector<1x64x384xbf16> to vector<64x384xbf16>
    %cst_11 = arith.constant dense<0.000000e+00> : vector<48x384xf32>
    %14 = tpu.matmul %11, %13, %cst_11 {dimension_numbers = #tpu.dot_dimension_numbers<[1], [0], [0], [1], [0, 0, 1, 1], [], []>} : vector<48x64xbf16>, vector<64x384xbf16>, vector<48x384xf32> -> vector<48x384xf32>
    %15 = arith.addf %10, %14 : vector<48x384xf32>
    %16 = vector.extract_strided_slice %6 {offsets = [16, 0], sizes = [48, 64], strides = [1, 1]} : vector<64x64xbf16> to vector<48x64xbf16>
    %c2 = arith.constant 2 : index
    %c0_12 = arith.constant 0 : index
    %c0_13 = arith.constant 0 : index
    %17 = vector.load %arg4[%c2, %c0_12, %c0_13] : memref<3x64x384xbf16, #tpu.memory_space<vmem>>, vector<1x64x384xbf16>
    %18 = vector.shape_cast %17 : vector<1x64x384xbf16> to vector<64x384xbf16>
    %cst_14 = arith.constant dense<0.000000e+00> : vector<48x384xf32>
    %19 = tpu.matmul %16, %18, %cst_14 {dimension_numbers = #tpu.dot_dimension_numbers<[1], [0], [0], [1], [0, 0, 1, 1], [], []>} : vector<48x64xbf16>, vector<64x384xbf16>, vector<48x384xf32> -> vector<48x384xf32>
    %20 = arith.addf %15, %19 : vector<48x384xf32>
    %c0_15 = arith.constant 0 : index
    %c0_16 = arith.constant 0 : index
    %21 = vector.load %arg5[%c0_15, %c0_16] : memref<1x384xf32, #tpu.memory_space<vmem>>, vector<1x384xf32>
    %22 = vector.broadcast %21 : vector<1x384xf32> to vector<48x384xf32>
    %23 = arith.addf %20, %22 : vector<48x384xf32>
    %c0_17 = arith.constant 0 : index
    %c0_18 = arith.constant 0 : index
    %24 = vector.load %arg6[%c0_17, %c0_18] : memref<1x64xf32, #tpu.memory_space<vmem>>, vector<1x64xf32>
    %c0_19 = arith.constant 0 : index
    %c0_20 = arith.constant 0 : index
    %25 = vector.load %arg7[%c0_19, %c0_20] : memref<1x64xf32, #tpu.memory_space<vmem>>, vector<1x64xf32>
    %26 = tpu.iota {dimensions = array<i32: 0>} : vector<384x64xi32>
    %27 = tpu.iota {dimensions = array<i32: 1>} : vector<384x64xi32>
    %c63_i32 = arith.constant 63 : i32
    %28 = vector.broadcast %c63_i32 : i32 to vector<384x64xi32>
    %29 = arith.andi %26, %28 : vector<384x64xi32>
    %30 = arith.cmpi eq, %29, %27 : vector<384x64xi32>
    %31 = arith.extui %30 : vector<384x64xi1> to vector<384x64xi32>
    %32 = arith.sitofp %31 : vector<384x64xi32> to vector<384x64xf32>
    %33 = tpu.iota {dimensions = array<i32: 1>} : vector<64x384xi32>
    %34 = tpu.iota {dimensions = array<i32: 0>} : vector<64x384xi32>
    %c63_i32_21 = arith.constant 63 : i32
    %35 = vector.broadcast %c63_i32_21 : i32 to vector<64x384xi32>
    %36 = arith.andi %33, %35 : vector<64x384xi32>
    %37 = arith.cmpi eq, %36, %34 : vector<64x384xi32>
    %38 = arith.extui %37 : vector<64x384xi1> to vector<64x384xi32>
    %39 = arith.sitofp %38 : vector<64x384xi32> to vector<64x384xf32>
    %cst_22 = arith.constant dense<0.000000e+00> : vector<384xf32>
    %40 = vector.multi_reduction <add>, %23, %cst_22 [0] : vector<48x384xf32> to vector<384xf32>
    %41 = vector.shape_cast %40 : vector<384xf32> to vector<1x384xf32>
    %42 = arith.mulf %23, %23 : vector<48x384xf32>
    %cst_23 = arith.constant dense<0.000000e+00> : vector<384xf32>
    %43 = vector.multi_reduction <add>, %42, %cst_23 [0] : vector<48x384xf32> to vector<384xf32>
    %44 = vector.shape_cast %43 : vector<384xf32> to vector<1x384xf32>
    %cst_24 = arith.constant dense<0.000000e+00> : vector<1x64xf32>
    %45 = tpu.matmul %41, %32, %cst_24 {dimension_numbers = #tpu.dot_dimension_numbers<[1], [0], [0], [1], [0, 0, 1, 1], [], []>} : vector<1x384xf32>, vector<384x64xf32>, vector<1x64xf32> -> vector<1x64xf32>
    %cst_25 = arith.constant 0.00347222225 : f32
    %46 = vector.broadcast %cst_25 : f32 to vector<1x64xf32>
    %47 = arith.mulf %45, %46 : vector<1x64xf32>
    %cst_26 = arith.constant dense<0.000000e+00> : vector<1x64xf32>
    %48 = tpu.matmul %44, %32, %cst_26 {dimension_numbers = #tpu.dot_dimension_numbers<[1], [0], [0], [1], [0, 0, 1, 1], [], []>} : vector<1x384xf32>, vector<384x64xf32>, vector<1x64xf32> -> vector<1x64xf32>
    %cst_27 = arith.constant 0.00347222225 : f32
    %49 = vector.broadcast %cst_27 : f32 to vector<1x64xf32>
    %50 = arith.mulf %48, %49 : vector<1x64xf32>
    %51 = arith.mulf %47, %47 : vector<1x64xf32>
    %52 = arith.subf %50, %51 : vector<1x64xf32>
    %cst_28 = arith.constant 9.99999974E-6 : f32
    %53 = vector.broadcast %cst_28 : f32 to vector<1x64xf32>
    %54 = arith.addf %52, %53 : vector<1x64xf32>
    %55 = math.rsqrt %54 : vector<1x64xf32>
    %56 = arith.mulf %55, %24 : vector<1x64xf32>
    %57 = arith.mulf %47, %56 : vector<1x64xf32>
    %58 = arith.subf %25, %57 : vector<1x64xf32>
    %cst_29 = arith.constant dense<0.000000e+00> : vector<1x384xf32>
    %59 = tpu.matmul %56, %39, %cst_29 {dimension_numbers = #tpu.dot_dimension_numbers<[1], [0], [0], [1], [0, 0, 1, 1], [], []>} : vector<1x64xf32>, vector<64x384xf32>, vector<1x384xf32> -> vector<1x384xf32>
    %cst_30 = arith.constant dense<0.000000e+00> : vector<1x384xf32>
    %60 = tpu.matmul %58, %39, %cst_30 {dimension_numbers = #tpu.dot_dimension_numbers<[1], [0], [0], [1], [0, 0, 1, 1], [], []>} : vector<1x64xf32>, vector<64x384xf32>, vector<1x384xf32> -> vector<1x384xf32>
    %61 = vector.broadcast %59 : vector<1x384xf32> to vector<48x384xf32>
    %62 = arith.mulf %23, %61 : vector<48x384xf32>
    %63 = vector.broadcast %60 : vector<1x384xf32> to vector<48x384xf32>
    %64 = arith.addf %62, %63 : vector<48x384xf32>
    %cst_31 = arith.constant 0.000000e+00 : f32
    %65 = vector.broadcast %cst_31 : f32 to vector<48x384xf32>
    %66 = arith.cmpf ogt, %64, %65 : vector<48x384xf32>
    %cst_32 = arith.constant 0.00999999977 : f32
    %67 = vector.broadcast %cst_32 : f32 to vector<48x384xf32>
    %68 = arith.mulf %67, %64 : vector<48x384xf32>
    %69 = arith.select %66, %64, %68 : vector<48x384xi1>, vector<48x384xf32>
    %70 = arith.truncf %69 : vector<48x384xf32> to vector<48x384xbf16>
    %71 = vector.extract_strided_slice %70 {offsets = [0, 0], sizes = [32, 384], strides = [1, 1]} : vector<48x384xbf16> to vector<32x384xbf16>
    %c0_33 = arith.constant 0 : index
    %c0_34 = arith.constant 0 : index
    %c0_35 = arith.constant 0 : index
    %72 = vector.load %arg8[%c0_33, %c0_34, %c0_35] : memref<3x384x256xbf16, #tpu.memory_space<vmem>>, vector<1x384x256xbf16>
    %73 = vector.shape_cast %72 : vector<1x384x256xbf16> to vector<384x256xbf16>
    %cst_36 = arith.constant dense<0.000000e+00> : vector<32x256xf32>
    %74 = tpu.matmul %71, %73, %cst_36 {dimension_numbers = #tpu.dot_dimension_numbers<[1], [0], [0], [1], [0, 0, 1, 1], [], []>} : vector<32x384xbf16>, vector<384x256xbf16>, vector<32x256xf32> -> vector<32x256xf32>
    %75 = vector.extract_strided_slice %70 {offsets = [8, 0], sizes = [32, 384], strides = [1, 1]} : vector<48x384xbf16> to vector<32x384xbf16>
    %c1_37 = arith.constant 1 : index
    %c0_38 = arith.constant 0 : index
    %c0_39 = arith.constant 0 : index
    %76 = vector.load %arg8[%c1_37, %c0_38, %c0_39] : memref<3x384x256xbf16, #tpu.memory_space<vmem>>, vector<1x384x256xbf16>
    %77 = vector.shape_cast %76 : vector<1x384x256xbf16> to vector<384x256xbf16>
    %cst_40 = arith.constant dense<0.000000e+00> : vector<32x256xf32>
    %78 = tpu.matmul %75, %77, %cst_40 {dimension_numbers = #tpu.dot_dimension_numbers<[1], [0], [0], [1], [0, 0, 1, 1], [], []>} : vector<32x384xbf16>, vector<384x256xbf16>, vector<32x256xf32> -> vector<32x256xf32>
    %79 = arith.addf %74, %78 : vector<32x256xf32>
    %80 = vector.extract_strided_slice %70 {offsets = [16, 0], sizes = [32, 384], strides = [1, 1]} : vector<48x384xbf16> to vector<32x384xbf16>
    %c2_41 = arith.constant 2 : index
    %c0_42 = arith.constant 0 : index
    %c0_43 = arith.constant 0 : index
    %81 = vector.load %arg8[%c2_41, %c0_42, %c0_43] : memref<3x384x256xbf16, #tpu.memory_space<vmem>>, vector<1x384x256xbf16>
    %82 = vector.shape_cast %81 : vector<1x384x256xbf16> to vector<384x256xbf16>
    %cst_44 = arith.constant dense<0.000000e+00> : vector<32x256xf32>
    %83 = tpu.matmul %80, %82, %cst_44 {dimension_numbers = #tpu.dot_dimension_numbers<[1], [0], [0], [1], [0, 0, 1, 1], [], []>} : vector<32x384xbf16>, vector<384x256xbf16>, vector<32x256xf32> -> vector<32x256xf32>
    %84 = arith.addf %79, %83 : vector<32x256xf32>
    %c0_45 = arith.constant 0 : index
    %c0_46 = arith.constant 0 : index
    %85 = vector.load %arg9[%c0_45, %c0_46] : memref<1x256xf32, #tpu.memory_space<vmem>>, vector<1x256xf32>
    %86 = vector.broadcast %85 : vector<1x256xf32> to vector<32x256xf32>
    %87 = arith.addf %84, %86 : vector<32x256xf32>
    %c0_47 = arith.constant 0 : index
    %c0_48 = arith.constant 0 : index
    %88 = vector.load %arg10[%c0_47, %c0_48] : memref<1x64xf32, #tpu.memory_space<vmem>>, vector<1x64xf32>
    %c0_49 = arith.constant 0 : index
    %c0_50 = arith.constant 0 : index
    %89 = vector.load %arg11[%c0_49, %c0_50] : memref<1x64xf32, #tpu.memory_space<vmem>>, vector<1x64xf32>
    %90 = tpu.iota {dimensions = array<i32: 0>} : vector<256x64xi32>
    %91 = tpu.iota {dimensions = array<i32: 1>} : vector<256x64xi32>
    %c63_i32_51 = arith.constant 63 : i32
    %92 = vector.broadcast %c63_i32_51 : i32 to vector<256x64xi32>
    %93 = arith.andi %90, %92 : vector<256x64xi32>
    %94 = arith.cmpi eq, %93, %91 : vector<256x64xi32>
    %95 = arith.extui %94 : vector<256x64xi1> to vector<256x64xi32>
    %96 = arith.sitofp %95 : vector<256x64xi32> to vector<256x64xf32>
    %97 = tpu.iota {dimensions = array<i32: 1>} : vector<64x256xi32>
    %98 = tpu.iota {dimensions = array<i32: 0>} : vector<64x256xi32>
    %c63_i32_52 = arith.constant 63 : i32
    %99 = vector.broadcast %c63_i32_52 : i32 to vector<64x256xi32>
    %100 = arith.andi %97, %99 : vector<64x256xi32>
    %101 = arith.cmpi eq, %100, %98 : vector<64x256xi32>
    %102 = arith.extui %101 : vector<64x256xi1> to vector<64x256xi32>
    %103 = arith.sitofp %102 : vector<64x256xi32> to vector<64x256xf32>
    %cst_53 = arith.constant dense<0.000000e+00> : vector<256xf32>
    %104 = vector.multi_reduction <add>, %87, %cst_53 [0] : vector<32x256xf32> to vector<256xf32>
    %105 = vector.shape_cast %104 : vector<256xf32> to vector<1x256xf32>
    %106 = arith.mulf %87, %87 : vector<32x256xf32>
    %cst_54 = arith.constant dense<0.000000e+00> : vector<256xf32>
    %107 = vector.multi_reduction <add>, %106, %cst_54 [0] : vector<32x256xf32> to vector<256xf32>
    %108 = vector.shape_cast %107 : vector<256xf32> to vector<1x256xf32>
    %cst_55 = arith.constant dense<0.000000e+00> : vector<1x64xf32>
    %109 = tpu.matmul %105, %96, %cst_55 {dimension_numbers = #tpu.dot_dimension_numbers<[1], [0], [0], [1], [0, 0, 1, 1], [], []>} : vector<1x256xf32>, vector<256x64xf32>, vector<1x64xf32> -> vector<1x64xf32>
    %cst_56 = arith.constant 7.812500e-03 : f32
    %110 = vector.broadcast %cst_56 : f32 to vector<1x64xf32>
    %111 = arith.mulf %109, %110 : vector<1x64xf32>
    %cst_57 = arith.constant dense<0.000000e+00> : vector<1x64xf32>
    %112 = tpu.matmul %108, %96, %cst_57 {dimension_numbers = #tpu.dot_dimension_numbers<[1], [0], [0], [1], [0, 0, 1, 1], [], []>} : vector<1x256xf32>, vector<256x64xf32>, vector<1x64xf32> -> vector<1x64xf32>
    %cst_58 = arith.constant 7.812500e-03 : f32
    %113 = vector.broadcast %cst_58 : f32 to vector<1x64xf32>
    %114 = arith.mulf %112, %113 : vector<1x64xf32>
    %115 = arith.mulf %111, %111 : vector<1x64xf32>
    %116 = arith.subf %114, %115 : vector<1x64xf32>
    %cst_59 = arith.constant 9.99999974E-6 : f32
    %117 = vector.broadcast %cst_59 : f32 to vector<1x64xf32>
    %118 = arith.addf %116, %117 : vector<1x64xf32>
    %119 = math.rsqrt %118 : vector<1x64xf32>
    %120 = arith.mulf %119, %88 : vector<1x64xf32>
    %121 = arith.mulf %111, %120 : vector<1x64xf32>
    %122 = arith.subf %89, %121 : vector<1x64xf32>
    %cst_60 = arith.constant dense<0.000000e+00> : vector<1x256xf32>
    %123 = tpu.matmul %120, %103, %cst_60 {dimension_numbers = #tpu.dot_dimension_numbers<[1], [0], [0], [1], [0, 0, 1, 1], [], []>} : vector<1x64xf32>, vector<64x256xf32>, vector<1x256xf32> -> vector<1x256xf32>
    %cst_61 = arith.constant dense<0.000000e+00> : vector<1x256xf32>
    %124 = tpu.matmul %122, %103, %cst_61 {dimension_numbers = #tpu.dot_dimension_numbers<[1], [0], [0], [1], [0, 0, 1, 1], [], []>} : vector<1x64xf32>, vector<64x256xf32>, vector<1x256xf32> -> vector<1x256xf32>
    %125 = vector.broadcast %123 : vector<1x256xf32> to vector<32x256xf32>
    %126 = arith.mulf %87, %125 : vector<32x256xf32>
    %127 = vector.broadcast %124 : vector<1x256xf32> to vector<32x256xf32>
    %128 = arith.addf %126, %127 : vector<32x256xf32>
    %cst_62 = arith.constant 0.000000e+00 : f32
    %129 = vector.broadcast %cst_62 : f32 to vector<32x256xf32>
    %130 = arith.cmpf ogt, %128, %129 : vector<32x256xf32>
    %cst_63 = arith.constant 0.00999999977 : f32
    %131 = vector.broadcast %cst_63 : f32 to vector<32x256xf32>
    %132 = arith.mulf %131, %128 : vector<32x256xf32>
    %133 = arith.select %130, %128, %132 : vector<32x256xi1>, vector<32x256xf32>
    %c0_64 = arith.constant 0 : index
    %c0_65 = arith.constant 0 : index
    %134 = vector.load %arg1[%c0_64, %c0_65] : memref<8x12xf32, #tpu.memory_space<vmem>>, vector<8x12xf32>
    %c0_66 = arith.constant 0 : index
    %c0_67 = arith.constant 0 : index
    %135 = vector.load %arg12[%c0_66, %c0_67] : memref<12x256xf32, #tpu.memory_space<vmem>>, vector<12x256xf32>
    %cst_68 = arith.constant dense<0.000000e+00> : vector<8x256xf32>
    %136 = tpu.matmul %134, %135, %cst_68 {dimension_numbers = #tpu.dot_dimension_numbers<[1], [0], [0], [1], [0, 0, 1, 1], [], []>} : vector<8x12xf32>, vector<12x256xf32>, vector<8x256xf32> -> vector<8x256xf32>
    %c0_69 = arith.constant 0 : index
    %c0_70 = arith.constant 0 : index
    %137 = vector.load %arg13[%c0_69, %c0_70] : memref<1x256xf32, #tpu.memory_space<vmem>>, vector<1x256xf32>
    %138 = vector.broadcast %137 : vector<1x256xf32> to vector<8x256xf32>
    %139 = arith.addf %136, %138 : vector<8x256xf32>
    %c0_71 = arith.constant 0 : index
    %c0_72 = arith.constant 0 : index
    %140 = vector.load %arg14[%c0_71, %c0_72] : memref<1x256xf32, #tpu.memory_space<vmem>>, vector<1x256xf32>
    %c0_73 = arith.constant 0 : index
    %c0_74 = arith.constant 0 : index
    %141 = vector.load %arg15[%c0_73, %c0_74] : memref<1x256xf32, #tpu.memory_space<vmem>>, vector<1x256xf32>
    %cst_75 = arith.constant dense<0.000000e+00> : vector<256xf32>
    %142 = vector.multi_reduction <add>, %139, %cst_75 [0] : vector<8x256xf32> to vector<256xf32>
    %143 = vector.shape_cast %142 : vector<256xf32> to vector<1x256xf32>
    %cst_76 = arith.constant 1.250000e-01 : f32
    %144 = vector.broadcast %cst_76 : f32 to vector<1x256xf32>
    %145 = arith.mulf %143, %144 : vector<1x256xf32>
    %146 = arith.mulf %139, %139 : vector<8x256xf32>
    %cst_77 = arith.constant dense<0.000000e+00> : vector<256xf32>
    %147 = vector.multi_reduction <add>, %146, %cst_77 [0] : vector<8x256xf32> to vector<256xf32>
    %148 = vector.shape_cast %147 : vector<256xf32> to vector<1x256xf32>
    %cst_78 = arith.constant 1.250000e-01 : f32
    %149 = vector.broadcast %cst_78 : f32 to vector<1x256xf32>
    %150 = arith.mulf %148, %149 : vector<1x256xf32>
    %151 = arith.mulf %145, %145 : vector<1x256xf32>
    %152 = arith.subf %150, %151 : vector<1x256xf32>
    %cst_79 = arith.constant 9.99999974E-6 : f32
    %153 = vector.broadcast %cst_79 : f32 to vector<1x256xf32>
    %154 = arith.addf %152, %153 : vector<1x256xf32>
    %155 = math.rsqrt %154 : vector<1x256xf32>
    %156 = arith.mulf %155, %140 : vector<1x256xf32>
    %157 = arith.mulf %145, %156 : vector<1x256xf32>
    %158 = arith.subf %141, %157 : vector<1x256xf32>
    %159 = vector.broadcast %156 : vector<1x256xf32> to vector<8x256xf32>
    %160 = arith.mulf %139, %159 : vector<8x256xf32>
    %161 = vector.broadcast %158 : vector<1x256xf32> to vector<8x256xf32>
    %162 = arith.addf %160, %161 : vector<8x256xf32>
    %cst_80 = arith.constant 0.000000e+00 : f32
    %163 = vector.broadcast %cst_80 : f32 to vector<8x256xf32>
    %164 = arith.cmpf ogt, %162, %163 : vector<8x256xf32>
    %cst_81 = arith.constant 0.00999999977 : f32
    %165 = vector.broadcast %cst_81 : f32 to vector<8x256xf32>
    %166 = arith.mulf %165, %162 : vector<8x256xf32>
    %167 = arith.select %164, %162, %166 : vector<8x256xi1>, vector<8x256xf32>
    tpu.wait_dma2 semaphore(%arg24 : memref<!tpu.dma_semaphore, #tpu.memory_space<semaphore_mem>>) src(%arg16 : memref<1280x1024xbf16, #tpu.memory_space<any>>) dst(%arg23 : memref<1280x1024xbf16, #tpu.memory_space<vmem>>)
    %168 = arith.truncf %167 : vector<8x256xf32> to vector<8x256xbf16>
    %c1024 = arith.constant 1024 : index
    %c0_82 = arith.constant 0 : index
    %169 = vector.load %arg23[%c1024, %c0_82] : memref<1280x1024xbf16, #tpu.memory_space<vmem>>, vector<256x1024xbf16>
    %cst_83 = arith.constant dense<0.000000e+00> : vector<8x1024xf32>
    %170 = tpu.matmul %168, %169, %cst_83 {dimension_numbers = #tpu.dot_dimension_numbers<[1], [0], [0], [1], [0, 0, 1, 1], [], []>} : vector<8x256xbf16>, vector<256x1024xbf16>, vector<8x1024xf32> -> vector<8x1024xf32>
    %171 = vector.extract_strided_slice %133 {offsets = [0, 0], sizes = [8, 256], strides = [1, 1]} : vector<32x256xf32> to vector<8x256xf32>
    %172 = arith.truncf %171 : vector<8x256xf32> to vector<8x256xbf16>
    %c0_84 = arith.constant 0 : index
    %c0_85 = arith.constant 0 : index
    %173 = vector.load %arg23[%c0_84, %c0_85] : memref<1280x1024xbf16, #tpu.memory_space<vmem>>, vector<256x1024xbf16>
    %cst_86 = arith.constant dense<0.000000e+00> : vector<8x1024xf32>
    %174 = tpu.matmul %172, %173, %cst_86 {dimension_numbers = #tpu.dot_dimension_numbers<[1], [0], [0], [1], [0, 0, 1, 1], [], []>} : vector<8x256xbf16>, vector<256x1024xbf16>, vector<8x1024xf32> -> vector<8x1024xf32>
    %175 = arith.addf %170, %174 : vector<8x1024xf32>
    %176 = vector.extract_strided_slice %133 {offsets = [8, 0], sizes = [8, 256], strides = [1, 1]} : vector<32x256xf32> to vector<8x256xf32>
    %177 = arith.truncf %176 : vector<8x256xf32> to vector<8x256xbf16>
    %c256 = arith.constant 256 : index
    %c0_87 = arith.constant 0 : index
    %178 = vector.load %arg23[%c256, %c0_87] : memref<1280x1024xbf16, #tpu.memory_space<vmem>>, vector<256x1024xbf16>
    %cst_88 = arith.constant dense<0.000000e+00> : vector<8x1024xf32>
    %179 = tpu.matmul %177, %178, %cst_88 {dimension_numbers = #tpu.dot_dimension_numbers<[1], [0], [0], [1], [0, 0, 1, 1], [], []>} : vector<8x256xbf16>, vector<256x1024xbf16>, vector<8x1024xf32> -> vector<8x1024xf32>
    %180 = arith.addf %175, %179 : vector<8x1024xf32>
    %181 = vector.extract_strided_slice %133 {offsets = [16, 0], sizes = [8, 256], strides = [1, 1]} : vector<32x256xf32> to vector<8x256xf32>
    %182 = arith.truncf %181 : vector<8x256xf32> to vector<8x256xbf16>
    %c512 = arith.constant 512 : index
    %c0_89 = arith.constant 0 : index
    %183 = vector.load %arg23[%c512, %c0_89] : memref<1280x1024xbf16, #tpu.memory_space<vmem>>, vector<256x1024xbf16>
    %cst_90 = arith.constant dense<0.000000e+00> : vector<8x1024xf32>
    %184 = tpu.matmul %182, %183, %cst_90 {dimension_numbers = #tpu.dot_dimension_numbers<[1], [0], [0], [1], [0, 0, 1, 1], [], []>} : vector<8x256xbf16>, vector<256x1024xbf16>, vector<8x1024xf32> -> vector<8x1024xf32>
    %185 = arith.addf %180, %184 : vector<8x1024xf32>
    %186 = vector.extract_strided_slice %133 {offsets = [24, 0], sizes = [8, 256], strides = [1, 1]} : vector<32x256xf32> to vector<8x256xf32>
    %187 = arith.truncf %186 : vector<8x256xf32> to vector<8x256xbf16>
    %c768 = arith.constant 768 : index
    %c0_91 = arith.constant 0 : index
    %188 = vector.load %arg23[%c768, %c0_91] : memref<1280x1024xbf16, #tpu.memory_space<vmem>>, vector<256x1024xbf16>
    %cst_92 = arith.constant dense<0.000000e+00> : vector<8x1024xf32>
    %189 = tpu.matmul %187, %188, %cst_92 {dimension_numbers = #tpu.dot_dimension_numbers<[1], [0], [0], [1], [0, 0, 1, 1], [], []>} : vector<8x256xbf16>, vector<256x1024xbf16>, vector<8x1024xf32> -> vector<8x1024xf32>
    %190 = arith.addf %185, %189 : vector<8x1024xf32>
    %c0_93 = arith.constant 0 : index
    %c0_94 = arith.constant 0 : index
    %191 = vector.load %arg17[%c0_93, %c0_94] : memref<1x1024xf32, #tpu.memory_space<vmem>>, vector<1x1024xf32>
    %192 = vector.broadcast %191 : vector<1x1024xf32> to vector<8x1024xf32>
    %193 = arith.addf %190, %192 : vector<8x1024xf32>
    %c0_95 = arith.constant 0 : index
    %c0_96 = arith.constant 0 : index
    %194 = vector.load %arg18[%c0_95, %c0_96] : memref<1x1024xf32, #tpu.memory_space<vmem>>, vector<1x1024xf32>
    %c0_97 = arith.constant 0 : index
    %c0_98 = arith.constant 0 : index
    %195 = vector.load %arg19[%c0_97, %c0_98] : memref<1x1024xf32, #tpu.memory_space<vmem>>, vector<1x1024xf32>
    %cst_99 = arith.constant dense<0.000000e+00> : vector<1024xf32>
    %196 = vector.multi_reduction <add>, %193, %cst_99 [0] : vector<8x1024xf32> to vector<1024xf32>
    %197 = vector.shape_cast %196 : vector<1024xf32> to vector<1x1024xf32>
    %cst_100 = arith.constant 1.250000e-01 : f32
    %198 = vector.broadcast %cst_100 : f32 to vector<1x1024xf32>
    %199 = arith.mulf %197, %198 : vector<1x1024xf32>
    %200 = arith.mulf %193, %193 : vector<8x1024xf32>
    %cst_101 = arith.constant dense<0.000000e+00> : vector<1024xf32>
    %201 = vector.multi_reduction <add>, %200, %cst_101 [0] : vector<8x1024xf32> to vector<1024xf32>
    %202 = vector.shape_cast %201 : vector<1024xf32> to vector<1x1024xf32>
    %cst_102 = arith.constant 1.250000e-01 : f32
    %203 = vector.broadcast %cst_102 : f32 to vector<1x1024xf32>
    %204 = arith.mulf %202, %203 : vector<1x1024xf32>
    %205 = arith.mulf %199, %199 : vector<1x1024xf32>
    %206 = arith.subf %204, %205 : vector<1x1024xf32>
    %cst_103 = arith.constant 9.99999974E-6 : f32
    %207 = vector.broadcast %cst_103 : f32 to vector<1x1024xf32>
    %208 = arith.addf %206, %207 : vector<1x1024xf32>
    %209 = math.rsqrt %208 : vector<1x1024xf32>
    %210 = arith.mulf %209, %194 : vector<1x1024xf32>
    %211 = arith.mulf %199, %210 : vector<1x1024xf32>
    %212 = arith.subf %195, %211 : vector<1x1024xf32>
    %213 = vector.broadcast %210 : vector<1x1024xf32> to vector<8x1024xf32>
    %214 = arith.mulf %193, %213 : vector<8x1024xf32>
    %215 = vector.broadcast %212 : vector<1x1024xf32> to vector<8x1024xf32>
    %216 = arith.addf %214, %215 : vector<8x1024xf32>
    %cst_104 = arith.constant 0.000000e+00 : f32
    %217 = vector.broadcast %cst_104 : f32 to vector<8x1024xf32>
    %218 = arith.cmpf ogt, %216, %217 : vector<8x1024xf32>
    %cst_105 = arith.constant 0.00999999977 : f32
    %219 = vector.broadcast %cst_105 : f32 to vector<8x1024xf32>
    %220 = arith.mulf %219, %216 : vector<8x1024xf32>
    %221 = arith.select %218, %216, %220 : vector<8x1024xi1>, vector<8x1024xf32>
    %222 = arith.truncf %221 : vector<8x1024xf32> to vector<8x1024xbf16>
    %c0_106 = arith.constant 0 : index
    %c0_107 = arith.constant 0 : index
    %223 = vector.load %arg20[%c0_106, %c0_107] : memref<1024x128xbf16, #tpu.memory_space<vmem>>, vector<1024x128xbf16>
    %cst_108 = arith.constant dense<0.000000e+00> : vector<8x128xf32>
    %224 = tpu.matmul %222, %223, %cst_108 {dimension_numbers = #tpu.dot_dimension_numbers<[1], [0], [0], [1], [0, 0, 1, 1], [], []>} : vector<8x1024xbf16>, vector<1024x128xbf16>, vector<8x128xf32> -> vector<8x128xf32>
    %c0_109 = arith.constant 0 : index
    %c0_110 = arith.constant 0 : index
    %225 = vector.load %arg21[%c0_109, %c0_110] : memref<1x128xf32, #tpu.memory_space<vmem>>, vector<1x128xf32>
    %226 = vector.broadcast %225 : vector<1x128xf32> to vector<8x128xf32>
    %227 = arith.addf %224, %226 : vector<8x128xf32>
    %c0_111 = arith.constant 0 : index
    %c0_112 = arith.constant 0 : index
    %228 = vector.load %arg22[%c0_111, %c0_112] : memref<8x128xf32, #tpu.memory_space<vmem>>, vector<8x128xf32>
    tpu.vector_store %arg22[%c0_111, %c0_112], %227 {strides = array<i32>} : memref<8x128xf32, #tpu.memory_space<vmem>>, vector<8x128xf32>,
    return
  }
}

</mosaic_0001>

<bundles_post_ra>
// kernel: forward.1
= control target key start
LH: loop header
LB: loop body
LE: loop exit
PB: predicated region body
PF: predicated region fallthrough
CT: control target
= control target key end

     0   :  { %s14856_s0 = inlined_call_operand.vmem [shape: f32[64,16], index: 0, kind: input, shape index: {}]   ;;  %s14857_s1 = inlined_call_operand.hbm [shape: f32[8,12], index: 1, kind: input, shape index: {}]   ;;  %s14858_s2 = inlined_call_operand.hbm [shape: f32[16,64], index: 2, kind: input, shape index: {}]   ;;  %s14859_s3 = inlined_call_operand.hbm [shape: f32[1,64], index: 3, kind: input, shape index: {}]   ;;  %s14860_s4 = inlined_call_operand.hbm [shape: bf16[3,64,384], index: 4, kind: input, shape index: {}]   ;;  %s14861_s5 = inlined_call_operand.hbm [shape: f32[1,384], index: 5, kind: input, shape index: {}]   ;;  %s14862_s6 = inlined_call_operand.hbm [shape: f32[1,64], index: 6, kind: input, shape index: {}]   ;;  %s14863_s7 = inlined_call_operand.hbm [shape: f32[1,64], index: 7, kind: input, shape index: {}]   ;;  %s14864_s8 = inlined_call_operand.hbm [shape: bf16[3,384,256], index: 8, kind: input, shape index: {}]   ;;  %s14865_s9 = inlined_call_operand.hbm [shape: f32[1,256], index: 9, kind: input, shape index: {}]   ;;  %s14866_s10 = inlined_call_operand.hbm [shape: f32[1,64], index: 10, kind: input, shape index: {}]   ;;  %s14867_s11 = inlined_call_operand.hbm [shape: f32[1,64], index: 11, kind: input, shape index: {}]   ;;  %s14868_s12 = inlined_call_operand.hbm [shape: f32[12,256], index: 12, kind: input, shape index: {}]   ;;  %s14869_s13 = inlined_call_operand.hbm [shape: f32[1,256], index: 13, kind: input, shape index: {}]   ;;  %s14870_s14 = inlined_call_operand.hbm [shape: f32[1,256], index: 14, kind: input, shape index: {}]   ;;  %s14871_s15 = inlined_call_operand.hbm [shape: f32[1,256], index: 15, kind: input, shape index: {}]   ;;  %s14872_s16 = inlined_call_operand.hbm [shape: bf16[1280,1024], index: 16, kind: input, shape index: {}]   ;;  %s14873_s17 = inlined_call_operand.hbm [shape: f32[1,1024], index: 17, kind: input, shape index: {}]   ;;  %s14874_s18 = inlined_call_operand.hbm [shape: f32[1,1024], index: 18, kind: input, shape index: {}]   ;;  %s14875_s19 = inlined_call_operand.hbm [shape: f32[1,1024], index: 19, kind: input, shape index: {}]   ;;  %s14876_s20 = inlined_call_operand.hbm [shape: bf16[1024,128], index: 20, kind: input, shape index: {}]   ;;  %s14877_s21 = inlined_call_operand.hbm [shape: f32[1,128], index: 21, kind: input, shape index: {}]   ;;  %s14878_s22 = inlined_call_operand.hbm [shape: f32[8,128], index: 22, kind: output, shape index: {}]  }
   0x1   :  { %15067 = sst [smem:[#allocation106_spill]] %s14856_s0 }
   0x2   :  { %15068 = sst [smem:[#allocation107_spill]] %s14857_s1 }
   0x3   :  { %15069 = sst [smem:[#allocation108_spill]] %s14858_s2 }
   0x4   :  { %15070 = sst [smem:[#allocation109_spill]] %s14859_s3 }
   0x5   :  { %15071 = sst [smem:[#allocation110_spill]] %s14860_s4 }
   0x6   :  { %15072 = sst [smem:[#allocation111_spill]] %s14861_s5 }
   0x7   :  { %15073 = sst [smem:[#allocation112_spill]] %s14862_s6 }
   0x8   :  { %15074 = sst [smem:[#allocation113_spill]] %s14878_s22 }
   0x9   :  { %27 = vsyncpa [#allocation5], 0 }
   0xa   :  { %28 = vsyncpa [#allocation8], 0 }
   0xb   :  { %29 = vsyncpa [#allocation11], 0 }
   0xc   :  { %30 = vsyncpa [#allocation14], 0 }
   0xd   :  { %31 = vsyncpa [#allocation17], 0 }
   0xe   :  { %32 = vsyncpa [#allocation20], 0 }
   0xf   :  { %33 = vsyncpa [#allocation23], 0 }
  0x10   :  { %34 = vsyncpa [#allocation26], 0 }
  0x11   :  { %35 = vsyncpa [#allocation29], 0 }
  0x12   :  { %36 = vsyncpa [#allocation32], 0 }
  0x13   :  { %37 = vsyncpa [#allocation35], 0 }
  0x14   :  { %38 = vsyncpa [#allocation6], 0  ;;  %s12544_s3 = smov [#allocation7]  }
  0x15   :  { %s56_s28 = sshll.u32 %s12544_s3, 4  ;;  %s57_s28 = int_to_ptr.vmem [resolvable:$true] %s56_s28 }
  0x16   :  { %s12086_s29 = scalar_lea.vmem %s57_s28, 256  ;;  %p12091_p1 = scmp.lt.s32.totalorder %s57_s28, %s57_s28 }
  0x17   :  { %p12087_p0 = scmp.ne.s32.totalorder %s57_s28, %s12086_s29  ;;  %p12092_p2 = scmp.lt.s32.totalorder %s12086_s29, %s12086_s29 }
  0x19   :  { %p12093_p3 = por %p12092_p2, %p12091_p1 }
  0x1b   :  { %p12094_p4 = pnand %p12093_p3, %p12087_p0 }
  0x1d   :  { %12097 = shalt.err (!%p12094_p4)
}
  0x1e   :  { %s14880_s30 = smov 128   ;;  %s12546_s4 = smov 8  }
  0x1f   :  { %s15075_s1 = sld [smem:[#allocation108_spill]]  ;;  %s12547_s5 = smov [#allocation10]  }
  0x20   :  { %s78_s24 = sshll.u32 %s12547_s5, 4  ;;  %s79_s24 = int_to_ptr.vmem [resolvable:$true] %s78_s24 }
  0x21   :  { %s12106_s6 = scalar_lea.vmem %s79_s24, 4608  ;;  %p12111_p6 = scmp.lt.s32.totalorder %s79_s24, %s79_s24 }
  0x22   :  { %p12107_p5 = scmp.ne.s32.totalorder %s79_s24, %s12106_s6  ;;  %p12112_p7 = scmp.lt.s32.totalorder %s12106_s6, %s12106_s6 }
  0x24   :  { %p12113_p8 = por %p12112_p7, %p12111_p6 }
  0x25   :  { %62 = dma.hbm_to_vmem [thread:$0]  %s15075_s1, 256, %s57_s28, [#allocation8], %s14880_s30, %s14880_s30, %s12546_s4  }
  0x26   :  { %p12114_p9 = pnand %p12113_p8, %p12107_p5 }
  0x28   :  { %12117 = shalt.err (!%p12114_p9)
}
  0x29   :  { %s12548_s25 = smov 192   ;;  %s12549_s26 = smov 12  }
  0x2a   :  { %s15076_s3 = sld [smem:[#allocation110_spill]]  ;;  %s12550_s29 = smov [#allocation13]  }
  0x2b   :  { %s101_s22 = sshll.u32 %s12550_s29, 4  ;;  %s12551_s0 = smov [#allocation16]   ;;  %s102_s22 = int_to_ptr.vmem [resolvable:$true] %s101_s22 }
  0x2c   :  { %s120_s28 = sshll.u32 %s12551_s0, 4  ;;  %s12126_s23 = scalar_lea.vmem %s102_s22, 16  ;;  %s121_s28 = int_to_ptr.vmem [resolvable:$true] %s120_s28 }
  0x2d   :  { %p12127_p10 = scmp.ne.s32.totalorder %s102_s22, %s12126_s23  ;;  %s12130_s1 = scalar_lea.vmem %s102_s22, 32 }
  0x2e   :  { %p12131_p11 = scmp.lt.s32.totalorder %s102_s22, %s102_s22  ;;  %p12132_p12 = scmp.lt.s32.totalorder %s12130_s1, %s12126_s23 }
  0x30   :  { %84 = dma.hbm_to_vmem [thread:$0]  %s15076_s3, 4608, %s79_s24, [#allocation11], %s12548_s25, %s12548_s25, %s12549_s26  }
  0x31   :  { %p12133_p13 = por %p12132_p12, %p12131_p11 }
  0x33   :  { %p12134_p0 = pnand %p12133_p13, %p12127_p10 }
  0x35   :  { %12137 = shalt.err (!%p12134_p0)
}
  0x36   :  { %s15077_s30 = sld [smem:[#allocation112_spill]]  ;;  %s12146_s2 = scalar_lea.vmem %s121_s28, 18432 }
  0x37   :  { %p12147_p1 = scmp.ne.s32.totalorder %s121_s28, %s12146_s2  ;;  %p12151_p2 = scmp.lt.s32.totalorder %s121_s28, %s121_s28 }
  0x38   :  { %p12152_p3 = scmp.lt.s32.totalorder %s12146_s2, %s12146_s2 }
  0x3a   :  { %p12153_p4 = por %p12152_p3, %p12151_p2 }
  0x3c   :  { %104 = dma.hbm_to_vmem [thread:$0]  %s15077_s30, 16, %s102_s22, [#allocation14]  }
  0x3d   :  { %p12154_p5 = pnand %p12153_p4, %p12147_p1 }
  0x3f   :  { %12157 = shalt.err (!%p12154_p5)
}
  0x40   :  { %s15078_s24 = smov 128   ;;  %s12552_s27 = smov [#allocation19]  }
  0x41   :  { %126 = dma.hbm_to_vmem [thread:$0]  %s14864_s8, 18432, %s121_s28, [#allocation17], %s15078_s24, %s15078_s24, %s12546_s4  }
  0x42   :  { %s143_s3 = sshll.u32 %s12552_s27, 4  ;;  %s12553_s29 = smov [#allocation22]   ;;  %s144_s3 = int_to_ptr.vmem [resolvable:$true] %s143_s3 }
  0x43   :  { %s162_s0 = sshll.u32 %s12553_s29, 4  ;;  %s12166_s22 = scalar_lea.vmem %s144_s3, 16  ;;  %s163_s0 = int_to_ptr.vmem [resolvable:$true] %s162_s0 }
  0x44   :  { %p12167_p6 = scmp.ne.s32.totalorder %s144_s3, %s12166_s22  ;;  %s12170_s30 = scalar_lea.vmem %s144_s3, 32 }
  0x45   :  { %p12171_p7 = scmp.lt.s32.totalorder %s144_s3, %s144_s3  ;;  %p12172_p8 = scmp.lt.s32.totalorder %s12170_s30, %s12166_s22 }
  0x47   :  { %p12173_p9 = por %p12172_p8, %p12171_p7 }
  0x49   :  { %p12174_p10 = pnand %p12173_p9, %p12167_p6 }
  0x4b   :  { %12177 = shalt.err (!%p12174_p10)
}
  0x4c   :  { %146 = dma.hbm_to_vmem [thread:$0]  %s14866_s10, 16, %s144_s3, [#allocation20]  }
  0x4d   :  { %s12186_s5 = scalar_lea.vmem %s163_s0, 512  ;;  %p12191_p12 = scmp.lt.s32.totalorder %s163_s0, %s163_s0 }
  0x4e   :  { %p12187_p11 = scmp.ne.s32.totalorder %s163_s0, %s12186_s5  ;;  %p12192_p13 = scmp.lt.s32.totalorder %s12186_s5, %s12186_s5 }
  0x50   :  { %p12193_p0 = por %p12192_p13, %p12191_p12 }
  0x52   :  { %p12194_p1 = pnand %p12193_p0, %p12187_p11 }
  0x54   :  { %12197 = shalt.err (!%p12194_p1)
}
  0x55   :  { %s12554_s8 = smov 256   ;;  %s12555_s4 = smov 16  }
  0x56   :  { %168 = dma.hbm_to_vmem [thread:$0]  %s14868_s12, 512, %s163_s0, [#allocation23], %s12554_s8, %s12554_s8, %s12555_s4  }
  0x57   :  { %s12556_s2 = smov [#allocation25]   ;;  %s12557_s25 = smov [#allocation28]  }
  0x58   :  { %s185_s24 = sshll.u32 %s12556_s2, 4  ;;  %s205_s26 = sshll.u32 %s12557_s25, 4  ;;  %s186_s24 = int_to_ptr.vmem [resolvable:$true] %s185_s24  ;;  %s206_s26 = int_to_ptr.vmem [resolvable:$true] %s205_s26 }
  0x59   :  { %s12206_s10 = scalar_lea.vmem %s186_s24, 32  ;;  %p12211_p3 = scmp.lt.s32.totalorder %s186_s24, %s186_s24 }
  0x5a   :  { %p12207_p2 = scmp.ne.s32.totalorder %s186_s24, %s12206_s10  ;;  %p12212_p4 = scmp.lt.s32.totalorder %s12206_s10, %s12206_s10 }
  0x5c   :  { %p12213_p5 = por %p12212_p4, %p12211_p3 }
  0x5e   :  { %p12214_p6 = pnand %p12213_p5, %p12207_p2 }
  0x60   :  { %12217 = shalt.err (!%p12214_p6)
}
  0x61   :  { %188 = dma.hbm_to_vmem [thread:$0]  %s14870_s14, 32, %s186_s24, [#allocation26]  }
  0x62   :  { %s12226_s29 = scalar_lea.vmem %s206_s26, 128  ;;  %p12231_p8 = scmp.lt.s32.totalorder %s206_s26, %s206_s26 }
  0x63   :  { %p12227_p7 = scmp.ne.s32.totalorder %s206_s26, %s12226_s29  ;;  %p12232_p9 = scmp.lt.s32.totalorder %s12226_s29, %s12226_s29 }
  0x65   :  { %p12233_p10 = por %p12232_p9, %p12231_p8 }
  0x67   :  { %p12234_p11 = pnand %p12233_p10, %p12227_p7 }
  0x69   :  { %12237 = shalt.err (!%p12234_p11)
}
  0x6a   :  { %208 = dma.hbm_to_vmem [thread:$0]  %s14873_s17, 128, %s206_s26, [#allocation29]  }
  0x6b   :  { %s12558_s22 = smov [#allocation31]   ;;  %s12559_s23 = smov [#allocation4]  }
  0x6c   :  { %s225_s30 = sshll.u32 %s12558_s22, 4  ;;  %s47_s1 = sshll.u32 %s12559_s23, 4  ;;  %s226_s30 = int_to_ptr.vmem [resolvable:$true] %s225_s30  ;;  %s48_s1 = int_to_ptr.vmem [resolvable:$true] %s47_s1 }
  0x6d   :  { %s12246_s5 = scalar_lea.vmem %s226_s30, 128  ;;  %p12251_p13 = scmp.lt.s32.totalorder %s226_s30, %s226_s30 }
  0x6e   :  { %p12247_p12 = scmp.ne.s32.totalorder %s226_s30, %s12246_s5  ;;  %p12252_p0 = scmp.lt.s32.totalorder %s12246_s5, %s12246_s5 }
  0x70   :  { %p12253_p1 = por %p12252_p0, %p12251_p13 }
  0x72   :  { %p12254_p2 = pnand %p12253_p1, %p12247_p12 }
  0x74   :  { %12257 = shalt.err (!%p12254_p2)
}
  0x75   :  { %228 = dma.hbm_to_vmem [thread:$0]  %s14875_s19, 128, %s226_s30, [#allocation32]  }
  0x76   :  { %s12266_s4 = scalar_lea.vmem %s48_s1, 128  ;;  %p12271_p4 = scmp.lt.s32.totalorder %s48_s1, %s48_s1 }
  0x77   :  { %p12267_p3 = scmp.ne.s32.totalorder %s48_s1, %s12266_s4  ;;  %p12272_p5 = scmp.lt.s32.totalorder %s12266_s4, %s12266_s4 }
  0x79   :  { %p12273_p6 = por %p12272_p5, %p12271_p4 }
  0x7b   :  { %p12274_p7 = pnand %p12273_p6, %p12267_p3 }
  0x7d   :  { %12277 = shalt.err (!%p12274_p7)
}
  0x7e   :  { %s15079_s6 = sld [smem:[#allocation107_spill]]  ;;  %s12560_s2 = smov [#allocation9]  }
  0x7f   :  { %s69_s24 = sshll.u32 %s12560_s2, 4  ;;  %s12561_s25 = smov [#allocation12]   ;;  %s70_s24 = int_to_ptr.vmem [resolvable:$true] %s69_s24 }
  0x80   :  { %s91_s26 = sshll.u32 %s12561_s25, 4  ;;  %s12286_s10 = scalar_lea.vmem %s70_s24, 16  ;;  %s92_s26 = int_to_ptr.vmem [resolvable:$true] %s91_s26 }
  0x81   :  { %p12287_p8 = scmp.ne.s32.totalorder %s70_s24, %s12286_s10  ;;  %s12290_s19 = scalar_lea.vmem %s70_s24, 32 }
  0x82   :  { %p12291_p9 = scmp.lt.s32.totalorder %s70_s24, %s70_s24  ;;  %p12292_p10 = scmp.lt.s32.totalorder %s12290_s19, %s12286_s10 }
  0x84   :  { %50 = dma.hbm_to_vmem [thread:$0]  %s15079_s6, 128, %s48_s1, [#allocation5]  }
  0x85   :  { %p12293_p11 = por %p12292_p10, %p12291_p9 }
  0x87   :  { %p12294_p12 = pnand %p12293_p11, %p12287_p8 }
  0x89   :  { %12297 = shalt.err (!%p12294_p12)
}
  0x8a   :  { %s15080_s29 = sld [smem:[#allocation109_spill]]  ;;  %s12306_s12 = scalar_lea.vmem %s92_s26, 48 }
  0x8b   :  { %p12307_p13 = scmp.ne.s32.totalorder %s92_s26, %s12306_s12  ;;  %s12310_s0 = scalar_lea.vmem %s92_s26, 64 }
  0x8c   :  { %p12311_p0 = scmp.lt.s32.totalorder %s92_s26, %s92_s26  ;;  %p12312_p1 = scmp.lt.s32.totalorder %s12310_s0, %s12306_s12 }
  0x8e   :  { %p12313_p2 = por %p12312_p1, %p12311_p0 }
  0x90   :  { %72 = dma.hbm_to_vmem [thread:$0]  %s15080_s29, 16, %s70_s24, [#allocation8]  }
  0x91   :  { %p12314_p3 = pnand %p12313_p2, %p12307_p13 }
  0x93   :  { %12317 = shalt.err (!%p12314_p3)
}
  0x94   :  { %s15081_s23 = sld [smem:[#allocation111_spill]]  ;;  %s12562_s1 = smov [#allocation15]  }
  0x95   :  { %s111_s5 = sshll.u32 %s12562_s1, 4  ;;  %s12563_s14 = smov [#allocation18]   ;;  %s112_s5 = int_to_ptr.vmem [resolvable:$true] %s111_s5 }
  0x96   :  { %s133_s8 = sshll.u32 %s12563_s14, 4  ;;  %s12326_s4 = scalar_lea.vmem %s112_s5, 16  ;;  %s134_s8 = int_to_ptr.vmem [resolvable:$true] %s133_s8 }
  0x97   :  { %p12327_p4 = scmp.ne.s32.totalorder %s112_s5, %s12326_s4  ;;  %s12330_s17 = scalar_lea.vmem %s112_s5, 32 }
  0x98   :  { %p12331_p5 = scmp.lt.s32.totalorder %s112_s5, %s112_s5  ;;  %p12332_p6 = scmp.lt.s32.totalorder %s12330_s17, %s12326_s4 }
  0x9a   :  { %94 = dma.hbm_to_vmem [thread:$0]  %s15081_s23, 48, %s92_s26, [#allocation11]  }
  0x9b   :  { %p12333_p7 = por %p12332_p6, %p12331_p5 }
  0x9d   :  { %p12334_p8 = pnand %p12333_p7, %p12327_p4 }
  0x9f   :  { %12337 = shalt.err (!%p12334_p8)
}
  0xa0   :  { %114 = dma.hbm_to_vmem [thread:$0]  %s14863_s7, 16, %s112_s5, [#allocation14]  }
  0xa1   :  { %s12346_s2 = scalar_lea.vmem %s134_s8, 32  ;;  %p12351_p10 = scmp.lt.s32.totalorder %s134_s8, %s134_s8 }
  0xa2   :  { %p12347_p9 = scmp.ne.s32.totalorder %s134_s8, %s12346_s2  ;;  %p12352_p11 = scmp.lt.s32.totalorder %s12346_s2, %s12346_s2 }
  0xa4   :  { %p12353_p12 = por %p12352_p11, %p12351_p10 }
  0xa6   :  { %p12354_p13 = pnand %p12353_p12, %p12347_p9 }
  0xa8   :  { %12357 = shalt.err (!%p12354_p13)
}
  0xa9   :  { %136 = dma.hbm_to_vmem [thread:$0]  %s14865_s9, 32, %s134_s8, [#allocation17]  }
  0xaa   :  { %s12564_s26 = smov [#allocation21]   ;;  %s12565_s19 = smov [#allocation24]  }
  0xab   :  { %s153_s10 = sshll.u32 %s12564_s26, 4  ;;  %s175_s27 = sshll.u32 %s12565_s19, 4  ;;  %s154_s10 = int_to_ptr.vmem [resolvable:$true] %s153_s10  ;;  %s176_s27 = int_to_ptr.vmem [resolvable:$true] %s175_s27 }
  0xac   :  { %s12366_s3 = scalar_lea.vmem %s154_s10, 16  ;;  %s12370_s7 = scalar_lea.vmem %s154_s10, 32 }
  0xad   :  { %p12367_p0 = scmp.ne.s32.totalorder %s154_s10, %s12366_s3  ;;  %p12371_p1 = scmp.lt.s32.totalorder %s154_s10, %s154_s10 }
  0xae   :  { %p12372_p2 = scmp.lt.s32.totalorder %s12370_s7, %s12366_s3 }
  0xb0   :  { %p12373_p3 = por %p12372_p2, %p12371_p1 }
  0xb2   :  { %p12374_p4 = pnand %p12373_p3, %p12367_p0 }
  0xb4   :  { %12377 = shalt.err (!%p12374_p4)
}
  0xb5   :  { %156 = dma.hbm_to_vmem [thread:$0]  %s14867_s11, 16, %s154_s10, [#allocation20]  }
  0xb6   :  { %s12386_s0 = scalar_lea.vmem %s176_s27, 32  ;;  %p12391_p6 = scmp.lt.s32.totalorder %s176_s27, %s176_s27 }
  0xb7   :  { %p12387_p5 = scmp.ne.s32.totalorder %s176_s27, %s12386_s0  ;;  %p12392_p7 = scmp.lt.s32.totalorder %s12386_s0, %s12386_s0 }
  0xb9   :  { %p12393_p8 = por %p12392_p7, %p12391_p6 }
  0xbb   :  { %p12394_p9 = pnand %p12393_p8, %p12387_p5 }
  0xbd   :  { %12397 = shalt.err (!%p12394_p9)
}
  0xbe   :  { %178 = dma.hbm_to_vmem [thread:$0]  %s14869_s13, 32, %s176_s27, [#allocation23]  }
  0xbf   :  { %s12566_s30 = smov [#allocation27]   ;;  %s12567_s1 = smov [#allocation30]  }
  0xc0   :  { %s195_s23 = sshll.u32 %s12566_s30, 4  ;;  %s215_s5 = sshll.u32 %s12567_s1, 4  ;;  %s196_s23 = int_to_ptr.vmem [resolvable:$true] %s195_s23  ;;  %s216_s5 = int_to_ptr.vmem [resolvable:$true] %s215_s5 }
  0xc1   :  { %s12406_s14 = scalar_lea.vmem %s196_s23, 32  ;;  %p12411_p11 = scmp.lt.s32.totalorder %s196_s23, %s196_s23 }
  0xc2   :  { %p12407_p10 = scmp.ne.s32.totalorder %s196_s23, %s12406_s14  ;;  %p12412_p12 = scmp.lt.s32.totalorder %s12406_s14, %s12406_s14 }
  0xc4   :  { %p12413_p13 = por %p12412_p12, %p12411_p11 }
  0xc6   :  { %p12414_p0 = pnand %p12413_p13, %p12407_p10 }
  0xc8   :  { %12417 = shalt.err (!%p12414_p0)
}
  0xc9   :  { %198 = dma.hbm_to_vmem [thread:$0]  %s14871_s15, 32, %s196_s23, [#allocation26]  }
  0xca   :  { %s12426_s4 = scalar_lea.vmem %s216_s5, 128  ;;  %p12431_p2 = scmp.lt.s32.totalorder %s216_s5, %s216_s5 }
  0xcb   :  { %p12427_p1 = scmp.ne.s32.totalorder %s216_s5, %s12426_s4  ;;  %p12432_p3 = scmp.lt.s32.totalorder %s12426_s4, %s12426_s4 }
  0xcd   :  { %p12433_p4 = por %p12432_p3, %p12431_p2 }
  0xcf   :  { %p12434_p5 = pnand %p12433_p4, %p12427_p1 }
  0xd1   :  { %12437 = shalt.err (!%p12434_p5)
}
  0xd2   :  { %218 = dma.hbm_to_vmem [thread:$0]  %s14874_s18, 128, %s216_s5, [#allocation29]  }
  0xd3   :  { %s12568_s28 = smov [#allocation33]  }
  0xd4   :  { %s234_s6 = sshll.u32 %s12568_s28, 4  ;;  %s235_s6 = int_to_ptr.vmem [resolvable:$true] %s234_s6 }
  0xd5   :  { %s12446_s2 = scalar_lea.vmem %s235_s6, 8192  ;;  %p12451_p7 = scmp.lt.s32.totalorder %s235_s6, %s235_s6 }
  0xd6   :  { %p12447_p6 = scmp.ne.s32.totalorder %s235_s6, %s12446_s2  ;;  %p12452_p8 = scmp.lt.s32.totalorder %s12446_s2, %s12446_s2 }
  0xd8   :  { %p12453_p9 = por %p12452_p8, %p12451_p7 }
  0xda   :  { %p12454_p10 = pnand %p12453_p9, %p12447_p6 }
  0xdc   :  { %12457 = shalt.err (!%p12454_p10)
}
  0xdd   :  { %s12569_s15 = smov 64   ;;  %s12570_s24 = smov 4  }
  0xde   :  { %240 = dma.hbm_to_vmem [thread:$0]  %s14876_s20, 8192, %s235_s6, [#allocation32], %s12569_s15, %s12569_s15, %s12570_s24  }
  0xdf   :  { %s12571_s10 = smov [#allocation34]  }
  0xe0   :  { %s247_s19 = sshll.u32 %s12571_s10, 4  ;;  %s248_s19 = int_to_ptr.vmem [resolvable:$true] %s247_s19 }
  0xe1   :  { %s12466_s18 = scalar_lea.vmem %s248_s19, 16  ;;  %s12470_s27 = scalar_lea.vmem %s248_s19, 32 }
  0xe2   :  { %p12467_p11 = scmp.ne.s32.totalorder %s248_s19, %s12466_s18  ;;  %p12471_p12 = scmp.lt.s32.totalorder %s248_s19, %s248_s19 }
  0xe3   :  { %p12472_p13 = scmp.lt.s32.totalorder %s12470_s27, %s12466_s18 }
  0xe5   :  { %p12473_p0 = por %p12472_p13, %p12471_p12 }
  0xe7   :  { %p12474_p1 = pnand %p12473_p0, %p12467_p11 }
  0xe9   :  { %12477 = shalt.err (!%p12474_p1)
}
  0xea   :  { %250 = dma.hbm_to_vmem [thread:$0]  %s14877_s21, 16, %s248_s19, [#allocation35]  }
  0xeb   :  { %12518 = dma.done.wait [#allocation5], 128  }
  0xec   :  { %12519 = vsyncadd [#allocation5], 4294967168 }
  0xed   :  { %12520 = dma.done.wait [#allocation8], 272  }
  0xee   :  { %12521 = vsyncadd [#allocation8], 4294967024 }
  0xef   :  { %12522 = dma.done.wait [#allocation11], 4656  }
  0xf0   :  { %12523 = vsyncadd [#allocation11], 4294962640 }
  0xf1   :  { %12524 = dma.done.wait [#allocation14], 32  }
  0xf2   :  { %12525 = vsyncadd [#allocation14], 4294967264 }
  0xf3   :  { %12526 = dma.done.wait [#allocation17], 18464  }
  0xf4   :  { %12527 = vsyncadd [#allocation17], 4294948832 }
  0xf5   :  { %12528 = dma.done.wait [#allocation20], 32  }
  0xf6   :  { %12529 = vsyncadd [#allocation20], 4294967264 }
  0xf7   :  { %12530 = dma.done.wait [#allocation23], 544  }
  0xf8   :  { %12531 = vsyncadd [#allocation23], 4294966752 }
  0xf9   :  { %12532 = dma.done.wait [#allocation26], 64  }
  0xfa   :  { %12533 = vsyncadd [#allocation26], 4294967232 }
  0xfb   :  { %12534 = dma.done.wait [#allocation29], 256  }
  0xfc   :  { %12535 = vsyncadd [#allocation29], 4294967040 }
  0xfd   :  { %12536 = dma.done.wait [#allocation32], 8320  }
  0xfe   :  { %12537 = vsyncadd [#allocation32], 4294958976 }
  0xff   :  { %12538 = dma.done.wait [#allocation35], 16  }
 0x100   :  { %12539 = vsyncadd [#allocation35], 4294967280  ;;  %vm340_vm0 = vcmask 130048   ;;  %v332_v0 = vld [vmem:[#allocation7 + $0x8] sm:$0xff]  ;;  %v331_v1 = vld [vmem:[#allocation7] sm:$0xff]  ;;  %s15082_s29 = sld [smem:[#allocation106_spill]] }
 0x101   :  { %11507 = vmatprep.subr.mxu0 %v332_v0  ;;  %v11726_v6 = vld [vmem:[#allocation10 + $0xac] ss:$12 sps:$4 sm:$0xff]   ;;  %v11728_v7 = vld [vmem:[#allocation10 + $0xa8] ss:$12 sps:$4 sm:$0xff]   ;;  %v14940_v9 = vmov 0.0   ;;  %v14938_v23 = vmov 0  }
 0x102   :  { %11508 = vmatpush3.msra.mxu0 %v332_v0  ;;  %v11729_v10 = vld [vmem:[#allocation10 + $0xb0] ss:$12 sps:$4 sm:$0xff]   ;;  %601 = vmatprep.subr.bf16.mxu1 %v11726_v6  ;;  %v11730_v14 = vld [vmem:[#allocation10 + $0x94] ss:$12 sps:$4 sm:$0xff]   ;;  %v11733_v16 = vld [vmem:[#allocation10 + $0x98] ss:$12 sps:$4 sm:$0xff]  }
 0x103   :  { %11509 = vmatprep.subr.mxu0 %v331_v1  ;;  %602 = vmatpush1.bf16.msra.mxu1 %v11728_v7  ;;  %v11732_v15 = vld [vmem:[#allocation10 + $0x90] ss:$12 sps:$4 sm:$0xff]   ;;  %v11736_v18 = vld [vmem:[#allocation10 + $0x78] ss:$12 sps:$4 sm:$0xff]   ;;  %v11737_v19 = vld [vmem:[#allocation10 + $0x80] ss:$12 sps:$4 sm:$0xff]  }
 0x104   :  { %11510 = vmatpush3.msra.mxu0 %v331_v1  ;;  %603 = vmatprep.subr.bf16.mxu1 %v11730_v14  ;;  %v11734_v17 = vld [vmem:[#allocation10 + $0x7c] ss:$12 sps:$4 sm:$0xff]   ;;  %v11738_v20 = vld [vmem:[#allocation10 + $0x64] ss:$12 sps:$4 sm:$0xff]   ;;  %v11740_v21 = vld [vmem:[#allocation10 + $0x60] ss:$12 sps:$4 sm:$0xff]  }
 0x105   :  { %11523 = vmatprep.subr.bf16.mxu0 %v14940_v9  ;;  %v11741_v22 = vld [vmem:[#allocation10 + $0x68] ss:$12 sps:$4 sm:$0xff]   ;;  %625 = vmatprep.mubr.bf16.mxu1 %v14938_v23  ;;  %vm14883_vm1 = vmmov 0   ;;  %v11744_v24 = vld [vmem:[#allocation10 + $0x4c] ss:$12 sps:$4 sm:$0xff]   ;;  %vm14881_vm2 = vcmask 1043456  }
 0x106   :  { %v323_v2 = vld [vmem:[%s15082_s29] sm:$0xff]  ;;  %v324_v3 = vld [vmem:[%s15082_s29 + $0x8] sm:$0xff]  ;;  %v325_v4 = vld [vmem:[%s15082_s29 + $0x10] sm:$0xff]  ;;  %vm14882_vm3 = vcmask 523264   ;;  %s12577_s28 = smov [#allocation2]  }
 0x107   :  { %11511 = vmatprep.mubr.msk.f32.mxu0 %vm340_vm0, %v323_v2  ;;  %v326_v5 = vld [vmem:[%s15082_s29 + $0x18] sm:$0xff]  ;;  %v327_v8 = vld [vmem:[%s15082_s29 + $0x20] sm:$0xff]  ;;  %v328_v11 = vld [vmem:[%s15082_s29 + $0x28] sm:$0xff]  ;;  %604 = vmatpush1.bf16.msra.mxu1 %v11732_v15  ;;  %s319_s6 = sshll.u32 %s12577_s28, 4  ;;  %s320_s6 = int_to_ptr.vmem [resolvable:$true] %s319_s6 }
 0x108   :  { %11512 = vmatmul.mubr.msk.f32.vlgmr.msra.gmra.mxu0 %vm340_vm0, %v324_v3  ;;  %v329_v12 = vld [vmem:[%s15082_s29 + $0x30] sm:$0xff]  ;;  %v330_v13 = vld [vmem:[%s15082_s29 + $0x38] sm:$0xff]  ;;  %605 = vmatprep.subr.bf16.mxu1 %v11734_v17  ;;  %s12486_s2 = scalar_lea.vmem %s320_s6, 81920  ;;  %p12491_p3 = scmp.lt.s32.totalorder %s320_s6, %s320_s6 }
 0x109   :  { %11514 = vmatprep.mubr.msk.f32.mxu0 %vm340_vm0, %v325_v4  ;;  %11524 = vmatpush3.bf16.msra.mxu0 %v11729_v10  ;;  %v9962_v26 = vld [vmem:[#allocation9] ss:$0 sm:$0xff]  ;;  %v11742_v41 = vld [vmem:[#allocation10 + $0x48] ss:$12 sps:$4 sm:$0xff]   ;;  %v11752_v54 = vld [vmem:[#allocation10 + $0x38] ss:$12 sps:$4 sm:$0xff]   ;;  %p12487_p2 = scmp.ne.s32.totalorder %s320_s6, %s12486_s2  ;;  %p12492_p4 = scmp.lt.s32.totalorder %s12486_s2, %s12486_s2 }
 0x10a   :  { %11525 = vmatprep.subr.bf16.mxu0 %v14940_v9  ;;  %v11747_v44 = vld [vmem:[#allocation10 + $0x34] ss:$12 sps:$4 sm:$0xff]   ;;  %v11748_v47 = vld [vmem:[#allocation10 + $0x50] ss:$12 sps:$4 sm:$0xff]   ;;  %v11749_v55 = vld [vmem:[#allocation10 + $0x18] ss:$12 sps:$4 sm:$0xff]  }
 0x10b   :  { %606 = vmatpush1.bf16.msra.mxu1 %v11736_v18  ;;  %v11745_v49 = vld [vmem:[#allocation10 + $0x30] ss:$12 sps:$4 sm:$0xff]   ;;  %v11756_v59 = vld [vmem:[#allocation10 + $0x20] ss:$12 sps:$4 sm:$0xff]   ;;  %v11757_v63 = vld [vmem:[#allocation10 + $0x8] ss:$12 sps:$4 sm:$0xff]   ;;  %p12493_p5 = por %p12492_p4, %p12491_p3 }
 0x10c   :  { %11515 = vmatmul.mubr.msk.f32.gmra.mxu0 %vm340_vm0, %v326_v5  ;;  %607 = vmatprep.subr.bf16.mxu1 %v11738_v20  ;;  %v11751_v50 = vld [vmem:[#allocation10 + $0x1c] ss:$12 sps:$4 sm:$0xff]   ;;  %v11755_v58 = vld [vmem:[#allocation10 + $0x4] ss:$12 sps:$4 sm:$0xff]   ;;  %v11753_v60 = vld [vmem:[#allocation10] ss:$12 sps:$4 sm:$0xff]  }
 0x10d   :  { %11517 = vmatprep.mubr.msk.f32.mxu0 %vm340_vm0, %v327_v8  ;;  %11526 = vmatpush3.bf16.msra.mxu0 %v11733_v16  ;;  %v11760_v61 = vld [vmem:[#allocation10 + $0x10c] ss:$12 sps:$4 sm:$0xff]   ;;  %v11758_v1 = vld [vmem:[#allocation10 + $0x108] ss:$12 sps:$4 sm:$0xff]   ;;  %v11764_v3 = vld [vmem:[#allocation10 + $0x110] ss:$12 sps:$4 sm:$0xff]   ;;  %p12494_p6 = pnand %p12493_p5, %p12487_p2 }
 0x10e   :  { %11527 = vmatprep.subr.bf16.mxu0 %v14940_v9  ;;  %v11763_v2 = vld [vmem:[#allocation10 + $0xf4] ss:$12 sps:$4 sm:$0xff]   ;;  %v11761_v4 = vld [vmem:[#allocation10 + $0xf0] ss:$12 sps:$4 sm:$0xff]   ;;  %v11768_v6 = vld [vmem:[#allocation10 + $0xf8] ss:$12 sps:$4 sm:$0xff]  }
 0x10f   :  { %608 = vmatpush1.bf16.msra.mxu1 %v11740_v21  ;;  %v11767_v5 = vld [vmem:[#allocation10 + $0xdc] ss:$12 sps:$4 sm:$0xff]   ;;  %v11765_v7 = vld [vmem:[#allocation10 + $0xd8] ss:$12 sps:$4 sm:$0xff]   ;;  %v11772_v10 = vld [vmem:[#allocation10 + $0xe0] ss:$12 sps:$4 sm:$0xff]  }
 0x110   :  { %11518 = vmatmul.mubr.msk.f32.gmra.mxu0 %vm340_vm0, %v328_v11  ;;  %794 = vmatprep.subr.bf16.mxu1 %v11744_v24  ;;  %v11771_v8 = vld [vmem:[#allocation10 + $0xc4] ss:$12 sps:$4 sm:$0xff]   ;;  %v11769_v11 = vld [vmem:[#allocation10 + $0xc0] ss:$12 sps:$4 sm:$0xff]  }
 0x111   :  { %11520 = vmatprep.mubr.msk.f32.mxu0 %vm340_vm0, %v329_v12  ;;  %11528 = vmatpush3.bf16.msra.mxu0 %v11737_v19  ;;  %v11773_v12 = vld [vmem:[#allocation10 + $0xc8] ss:$12 sps:$4 sm:$0xff]  }
 0x112   :  { %11529 = vmatprep.subr.bf16.mxu0 %v14940_v9 }
 0x114   :  { %11521 = vmatmul.mubr.msk.f32.gmra.mxu0 %vm340_vm0, %v330_v13  ;;  %v1130_v13 = vlaneseq }
 0x115   :  { %11530 = vmatpush3.bf16.msra.mxu0 %v11741_v22  ;;  %11531 = vmatprep.mubr.msk.bf16.mxu0 %vm14883_vm1, %v14940_v9 }
 0x116   :  { %11543 = vmatprep.subr.bf16.mxu0 %v14940_v9  ;;  %v12879_v14 = vshrl.u32 %v1130_v13, 7  ;;  %v12882_v16 = vand.u32 127, %v1130_v13 }
 0x118   :  { %15083 = vst [vmem:[#allocation54_spill] sm:$0xff] %v12879_v14  ;;  %v1213_v15 = vadd.s32 376, %v12879_v14  ;;  %15084 = vst [vmem:[#allocation55_spill] sm:$0xff] %v12882_v16  ;;  %v1197_v18 = vadd.s32 248, %v12879_v14  ;;  %v1212_v19 = vadd.s32 368, %v12879_v14  ;;  %v1181_v20 = vadd.s32 120, %v12879_v14 }
 0x119   :  { %v1175_v13 = vadd.s32 72, %v12879_v14 }
 0x11a   :  { %v1263_v17 = vand.u32 63, %v1213_v15  ;;  %v1247_v22 = vand.u32 63, %v1197_v18  ;;  %v1262_v24 = vand.u32 63, %v1212_v19  ;;  %v1190_v15 = vadd.s32 192, %v12879_v14 }
 0x11b   :  { %v15131_v18 = vmov 0  ;;  %v1205_v19 = vadd.s32 312, %v12879_v14 }
 0x11c   :  { %vm12888_vm4 = vcmp.eq.s32.totalorder %v1263_v17, %v12882_v16  ;;  %vm12900_vm5 = vcmp.eq.s32.totalorder %v1247_v22, %v12882_v16  ;;  %vm12905_vm6 = vcmp.eq.s32.totalorder %v1262_v24, %v12882_v16  ;;  %v15128_v17 = vmov 0 }
 0x11d   :  { %v15134_v22 = vmov 0 }
 0x1c8   :  { %v11513_v25 = vpop.f32.mrf.mxu0 }
 0x1c9   :  { %v437_v30 = vadd.f32 %v11513_v25, %v9962_v26  ;;  %v14956_v25 = vmov 1.0  }
 0x1ca   :  { %v431_v27 = vpop.f32.mrf.mxu0 }
 0x1cb   :  { %v432_v28 = vadd.f32 %v9962_v26, %v431_v27  ;;  %v1196_v27 = vadd.s32 240, %v12879_v14 }
 0x1cc   :  { %v11516_v29 = vpop.f32.mrf.mxu0 }
 0x1cd   :  { %v12800_v32 = vpack.c.bf16 %v437_v30, %v432_v28  ;;  %v447_v33 = vadd.f32 %v11516_v29, %v9962_v26  ;;  %v1211_v28 = vadd.s32 360, %v12879_v14  ;;  %v1180_v29 = vadd.s32 112, %v12879_v14 }
 0x1ce   :  { %v441_v31 = vpop.f32.mrf.mxu0  ;;  %v15087_v30 = vmov 0 }
 0x1cf   :  { %v442_v34 = vadd.f32 %v9962_v26, %v441_v31  ;;  %v512_v39 = vrot.slane %v12800_v32, 4  ;;  %v15088_v30 = vsel %vm12900_vm5, 4294967295, %v15087_v30 }
 0x1d0   :  { %v11519_v35 = vpop.f32.mrf.mxu0  ;;  %15089 = vst [vmem:[#allocation56_spill] sm:$0xff] %v15088_v30 }
 0x1d1   :  { %v12802_v36 = vpack.c.bf16 %v447_v33, %v442_v34  ;;  %v457_v37 = vadd.f32 %v11519_v35, %v9962_v26  ;;  %v1210_v33 = vadd.s32 352, %v12879_v14  ;;  %v1246_v35 = vand.u32 63, %v1196_v27 }
 0x1d2   :  { %v451_v38 = vpop.f32.mrf.mxu0  ;;  %v1240_v27 = vand.u32 63, %v1190_v15  ;;  %v15176_v15 = vmov 0 }
 0x1d3   :  { %v452_v40 = vadd.f32 %v9962_v26, %v451_v38  ;;  %v513_v42 = vrot.slane %v12802_v36, 4  ;;  %vm12929_vm8 = vcmp.eq.s32.totalorder %v1246_v35, %v12882_v16  ;;  %v15137_v35 = vmov 0 }
 0x1d4   :  { %v11522_v43 = vpop.f32.mrf.mxu0 }
 0x1d5   :  { %v12806_v45 = vpack.c.bf16 %v457_v37, %v452_v40  ;;  %v514_v46 = vsel %vm14881_vm2, %v512_v39, %v513_v42  ;;  %v467_v51 = vadd.f32 %v11522_v43, %v9962_v26  ;;  %v1230_v37 = vand.u32 63, %v1180_v29 }
 0x1d6   :  { %v461_v48 = vpop.f32.mrf.mxu0  ;;  %9983 = vmatmul.mubr.msk.bf16.vlgmr.msra.gmra.mxu1 %vm14882_vm3, %v514_v46  ;;  %11532 = vmatmul.mubr.msk.bf16.vlgmr.msra.gmra.mxu0 %vm14882_vm3, %v514_v46  ;;  %v1260_v39 = vand.u32 63, %v1210_v33  ;;  %v1179_v40 = vadd.s32 104, %v12879_v14  ;;  %v1204_v33 = vadd.s32 304, %v12879_v14 }
 0x1d7   :  { %795 = vmatpush1.bf16.msra.mxu1 %v11742_v41  ;;  %635 = vmatprep.mubr.bf16.mxu1 %v14938_v23  ;;  %v462_v52 = vadd.f32 %v9962_v26, %v461_v48  ;;  %v515_v53 = vrot.slane %v12806_v45, 4  ;;  %v1231_v26 = vand.u32 63, %v1181_v20  ;;  %v1194_v41 = vadd.s32 224, %v12879_v14 }
 0x1d8   :  { %796 = vmatprep.subr.bf16.mxu1 %v11747_v44  ;;  %11535 = vmatprep.mubr.msk.bf16.mxu0 %vm14883_vm1, %v14940_v9  ;;  %vm12939_vm10 = vcmp.eq.s32.totalorder %v1230_v37, %v12882_v16  ;;  %vm12956_vm12 = vcmp.eq.s32.totalorder %v1260_v39, %v12882_v16  ;;  %v1229_v48 = vand.u32 63, %v1179_v40  ;;  %v1174_v20 = vadd.s32 64, %v12879_v14 }
 0x1d9   :  { %11544 = vmatpush3.bf16.msra.mxu0 %v11748_v47  ;;  %v12816_v56 = vpack.c.bf16 %v467_v51, %v462_v52  ;;  %v516_v57 = vsel %vm14881_vm2, %v513_v42, %v515_v53  ;;  %vm12918_vm7 = vcmp.eq.s32.totalorder %v1231_v26, %v12882_v16  ;;  %v1178_v51 = vadd.s32 96, %v12879_v14 }
 0x1da   :  { %11545 = vmatprep.subr.bf16.mxu0 %v14940_v9  ;;  %v1193_v52 = vadd.s32 216, %v12879_v14  ;;  %vm12974_vm13 = vcmp.eq.s32.totalorder %v1229_v48, %v12882_v16  ;;  %v1225_v26 = vand.u32 63, %v1175_v13  ;;  %v1224_v29 = vand.u32 63, %v1174_v20 }
 0x1db   :  { %797 = vmatpush1.bf16.msra.mxu1 %v11745_v49  ;;  %v517_v62 = vrot.slane %v12816_v56, 4  ;;  %v1244_v49 = vand.u32 63, %v1194_v41  ;;  %v15143_v37 = vmov 0  ;;  %v15147_v39 = vmov 0 }
 0x1dc   :  { %798 = vmatprep.subr.bf16.mxu1 %v11751_v50  ;;  %v15150_v40 = vmov 0  ;;  %v15173_v13 = vmov 0 }
 0x1dd   :  { %11546 = vmatpush3.bf16.msra.mxu0 %v11752_v54  ;;  %v518_v0 = vsel %vm14881_vm2, %v515_v53, %v517_v62  ;;  %v1208_v53 = vadd.s32 336, %v12879_v14  ;;  %v15104_v54 = vmov 0  ;;  %vm12979_vm14 = vcmp.eq.s32.totalorder %v1244_v49, %v12882_v16 }
 0x1de   :  { %9984 = vmatmul.mubr.msk.bf16.gmra.mxu1 %vm14882_vm3, %v516_v57  ;;  %11536 = vmatmul.mubr.msk.bf16.gmra.mxu0 %vm14882_vm3, %v516_v57  ;;  %v15105_v54 = vsel %vm12974_vm13, 4294967295, %v15104_v54  ;;  %v1192_v57 = vadd.s32 208, %v12879_v14  ;;  %v1188_v49 = vadd.s32 176, %v12879_v14 }
 0x1df   :  { %799 = vmatpush1.bf16.msra.mxu1 %v11749_v55  ;;  %645 = vmatprep.mubr.bf16.mxu1 %v14938_v23  ;;  %15106 = vst [vmem:[#allocation57_spill] sm:$0xff] %v15105_v54  ;;  %v15107_v55 = vmov 0 }
 0x1e0   :  { %11539 = vmatprep.mubr.msk.bf16.mxu0 %vm14883_vm1, %v14940_v9  ;;  %11547 = vmatprep.subr.bf16.mxu0 %v14940_v9  ;;  %v15108_v55 = vsel %vm12979_vm14, 4294967295, %v15107_v55 }
 0x1e1   :  { %800 = vmatprep.subr.bf16.mxu1 %v11755_v58  ;;  %11548 = vmatpush3.bf16.msra.mxu0 %v11756_v59  ;;  %15109 = vst [vmem:[#allocation58_spill] sm:$0xff] %v15108_v55  ;;  %v15110_v58 = vmov 0  ;;  %v1228_v59 = vand.u32 63, %v1178_v51  ;;  %v13119_v51 = vadd.s32 48, %v12879_v14 }
 0x1e2   :  { %11549 = vmatprep.subr.bf16.mxu0 %v14940_v9 }
 0x1e3   :  { %801 = vmatpush1.bf16.msra.mxu1 %v11753_v60  ;;  %v1243_v60 = vand.u32 63, %v1193_v52  ;;  %vm13003_vm0 = vcmp.eq.s32.totalorder %v1228_v59, %v12882_v16  ;;  %15153 = vst [vmem:[#allocation74_spill] sm:$0xff] %v13119_v51  ;;  %v15154_v52 = vmov 0  ;;  %v15160_v59 = vmov 0 }
 0x1e4   :  { %998 = vmatprep.subr.bf16.mxu1 %v11760_v61  ;;  %v1258_v61 = vand.u32 63, %v1208_v53  ;;  %v15157_v53 = vmov 0 }
 0x1e5   :  { %11550 = vmatpush3.bf16.msra.mxu0 %v11757_v63  ;;  %v1242_v63 = vand.u32 63, %v1192_v57  ;;  %vm13009_vm2 = vcmp.eq.s32.totalorder %v1243_v60, %v12882_v16  ;;  %v1202_v57 = vadd.s32 288, %v12879_v14  ;;  %v1238_v60 = vand.u32 63, %v1188_v49 }
 0x1e6   :  { %9985 = vmatmul.mubr.msk.bf16.gmra.mxu1 %vm14882_vm3, %v518_v0  ;;  %11540 = vmatmul.mubr.msk.bf16.gmra.mxu0 %vm14882_vm3, %v518_v0  ;;  %v1207_v0 = vadd.s32 328, %v12879_v14 }
 0x1e7   :  { %818 = vmatprep.mubr.bf16.mxu1 %v14938_v23  ;;  %11551 = vmatprep.mubr.msk.bf16.mxu0 %vm14883_vm1, %v14940_v9 }
 0x1e8   :  { %11563 = vmatprep.subr.bf16.mxu0 %v14940_v9 }
 0x1ee   :  { %10001 = vmatmul.mubr.msk.bf16.vlgmr.msra.gmra.mxu1 %vm14882_vm3, %v12800_v32  ;;  %11552 = vmatmul.mubr.msk.bf16.vlgmr.msra.gmra.mxu0 %vm14882_vm3, %v12800_v32  ;;  %v1195_v32 = vadd.s32 232, %v12879_v14 }
 0x1ef   :  { %999 = vmatpush1.bf16.msra.mxu1 %v11758_v1  ;;  %828 = vmatprep.mubr.bf16.mxu1 %v14938_v23  ;;  %v1176_v1 = vadd.s32 80, %v12879_v14 }
 0x1f0   :  { %1000 = vmatprep.subr.bf16.mxu1 %v11763_v2  ;;  %11555 = vmatprep.mubr.msk.bf16.mxu0 %vm14883_vm1, %v14940_v9  ;;  %v1245_v38 = vand.u32 63, %v1195_v32  ;;  %v15113_v2 = vmov 0  ;;  %v1189_v32 = vadd.s32 184, %v12879_v14 }
 0x1f1   :  { %11564 = vmatpush3.bf16.msra.mxu0 %v11764_v3  ;;  %v15114_v2 = vsel %vm13003_vm0, 4294967295, %v15113_v2  ;;  %v15116_v3 = vmov 0 }
 0x1f2   :  { %11565 = vmatprep.subr.bf16.mxu0 %v14940_v9  ;;  %vm12951_vm11 = vcmp.eq.s32.totalorder %v1245_v38, %v12882_v16  ;;  %15115 = vst [vmem:[#allocation60_spill] sm:$0xff] %v15114_v2  ;;  %v15117_v3 = vsel %vm13009_vm2, 4294967295, %v15116_v3  ;;  %v13093_v38 = vadd.s32 56, %v12879_v14  ;;  %v1239_v41 = vand.u32 63, %v1189_v32 }
 0x1f3   :  { %1001 = vmatpush1.bf16.msra.mxu1 %v11761_v4  ;;  %15118 = vst [vmem:[#allocation61_spill] sm:$0xff] %v15117_v3  ;;  %v15119_v4 = vmov 0  ;;  %v15183_v32 = vmov 0 }
 0x1f4   :  { %1002 = vmatprep.subr.bf16.mxu1 %v11767_v5  ;;  %v1191_v5 = vadd.s32 200, %v12879_v14  ;;  %15146 = vst [vmem:[#allocation71_spill] sm:$0xff] %v13093_v38  ;;  %v1223_v48 = vand.u32 63, %v13093_v38 }
 0x1f5   :  { %11566 = vmatpush3.bf16.msra.mxu0 %v11768_v6  ;;  %v15122_v6 = vmov 0 }
 0x1f6   :  { %10002 = vmatmul.mubr.msk.bf16.gmra.mxu1 %vm14882_vm3, %v12802_v36  ;;  %11556 = vmatmul.mubr.msk.bf16.gmra.mxu0 %vm14882_vm3, %v12802_v36 }
 0x1f7   :  { %1003 = vmatpush1.bf16.msra.mxu1 %v11765_v7  ;;  %838 = vmatprep.mubr.bf16.mxu1 %v14938_v23  ;;  %v15125_v7 = vmov 0 }
 0x1f8   :  { %11559 = vmatprep.mubr.msk.bf16.mxu0 %vm14883_vm1, %v14940_v9  ;;  %11567 = vmatprep.subr.bf16.mxu0 %v14940_v9 }
 0x1f9   :  { %1004 = vmatprep.subr.bf16.mxu1 %v11771_v8  ;;  %11568 = vmatpush3.bf16.msra.mxu0 %v11772_v10  ;;  %v1257_v8 = vand.u32 63, %v1207_v0  ;;  %v1226_v10 = vand.u32 63, %v1176_v1  ;;  %v1252_v0 = vand.u32 63, %v1202_v57  ;;  %v13156_v1 = vadd.s32 40, %v12879_v14 }
 0x1fa   :  { %11569 = vmatprep.subr.bf16.mxu0 %v14940_v9 }
 0x1fb   :  { %1005 = vmatpush1.bf16.msra.mxu1 %v11769_v11  ;;  %v1241_v11 = vand.u32 63, %v1191_v5  ;;  %15163 = vst [vmem:[#allocation78_spill] sm:$0xff] %v13156_v1  ;;  %v1186_v5 = vadd.s32 160, %v12879_v14 }
 0x1fc   :  { %11227 = vmatprep.subr.msk.mxu1 %vm12900_vm5, %v14956_v25 }
 0x1fd   :  { %11570 = vmatpush3.bf16.msra.mxu0 %v11773_v12  ;;  %v1206_v12 = vadd.s32 320, %v12879_v14  ;;  %v1236_v20 = vand.u32 63, %v1186_v5  ;;  %v1183_v5 = vadd.s32 136, %v12879_v14 }
 0x1fe   :  { %10003 = vmatmul.mubr.msk.bf16.gmra.mxu1 %vm14882_vm3, %v12806_v45  ;;  %11560 = vmatmul.mubr.msk.bf16.gmra.mxu0 %vm14882_vm3, %v12806_v45 }
 0x1ff   :  { %1022 = vmatprep.mubr.bf16.mxu1 %v14938_v23  ;;  %11571 = vmatprep.mubr.msk.bf16.mxu0 %vm14883_vm1, %v14940_v9  ;;  %v1256_v24 = vand.u32 63, %v1206_v12  ;;  %v1201_v12 = vadd.s32 280, %v12879_v14 }
 0x200   :  { %11583 = vmatprep.subr.mxu0 %v14940_v9 }
 0x206   :  { %10019 = vmatmul.mubr.msk.bf16.vlgmr.msra.gmra.mxu1 %vm14882_vm3, %v12802_v36  ;;  %11572 = vmatmul.mubr.msk.bf16.vlgmr.msra.gmra.mxu0 %vm14882_vm3, %v12802_v36  ;;  %v1261_v36 = vand.u32 63, %v1211_v28  ;;  %v1255_v28 = vand.u32 63, %v1205_v19  ;;  %v1221_v19 = vand.u32 63, %v13156_v1 }
 0x207   :  { %1032 = vmatprep.mubr.bf16.mxu1 %v14938_v23  ;;  %11575 = vmatprep.mubr.msk.bf16.mxu0 %vm14883_vm1, %v14940_v9 }
 0x208   :  { %11584 = vmatpush3.msk.msra.mxu0 %vm12888_vm4, %v14956_v25  ;;  %11228 = vmatpush3.msk.msra.mxu1 %vm12918_vm7, %v14956_v25  ;;  %vm12934_vm9 = vcmp.eq.s32.totalorder %v1261_v36, %v12882_v16  ;;  %v15140_v36 = vmov 0 }
 0x209   :  { %11585 = vmatprep.subr.mxu0 %v14940_v9  ;;  %11229 = vmatprep.subr.msk.mxu1 %vm12929_vm8, %v14956_v25 }
 0x20a   :  { %11586 = vmatpush3.msk.msra.mxu0 %vm12905_vm6, %v14956_v25  ;;  %11230 = vmatpush3.msk.msra.mxu1 %vm12939_vm10, %v14956_v25 }
 0x20b   :  { %11587 = vmatprep.subr.mxu0 %v14940_v9  ;;  %11231 = vmatprep.subr.msk.mxu1 %vm12951_vm11, %v14956_v25 }
 0x20c   :  { %11588 = vmatpush3.msk.msra.mxu0 %vm12934_vm9, %v14956_v25  ;;  %11232 = vmatpush3.msk.msra.mxu1 %vm12974_vm13, %v14956_v25 }
 0x20d   :  { %11589 = vmatprep.subr.mxu0 %v14940_v9  ;;  %11233 = vmatprep.subr.msk.mxu1 %vm12979_vm14, %v14956_v25 }
 0x20e   :  { %10020 = vmatmul.mubr.msk.bf16.gmra.mxu1 %vm14882_vm3, %v12806_v45  ;;  %11576 = vmatmul.mubr.msk.bf16.gmra.mxu0 %vm14882_vm3, %v12806_v45  ;;  %v1209_v45 = vadd.s32 344, %v12879_v14 }
 0x20f   :  { %1042 = vmatprep.mubr.bf16.mxu1 %v14938_v23  ;;  %11579 = vmatprep.mubr.msk.bf16.mxu0 %vm14883_vm1, %v14940_v9 }
 0x210   :  { %v1259_v50 = vand.u32 63, %v1209_v45  ;;  %11590 = vmatpush3.msk.msra.mxu0 %vm12956_vm12, %v14956_v25  ;;  %11234 = vmatpush3.msk.msra.mxu1 %vm13003_vm0, %v14956_v25  ;;  %vm13107_vm0 = vcmp.eq.s32.totalorder %v1224_v29, %v12882_v16  ;;  %v1254_v45 = vand.u32 63, %v1204_v33  ;;  %v15180_v29 = vmov 0 }
 0x211   :  { %11591 = vmatprep.subr.mxu0 %v14940_v9  ;;  %11235 = vmatprep.subr.msk.mxu1 %vm13009_vm2, %v14956_v25  ;;  %vm13051_vm2 = vcmp.eq.s32.totalorder %v1226_v10, %v12882_v16  ;;  %v15151_v40 = vsel %vm13107_vm0, 4294967295, %v15150_v40  ;;  %v15167_v10 = vmov 0  ;;  %v13219_v33 = vadd.s32 24, %v12879_v14 }
 0x212   :  { %vm12990_vm15 = vcmp.eq.s32.totalorder %v1259_v50, %v12882_v16  ;;  %v15132_v18 = vsel %vm13051_vm2, 4294967295, %v15131_v18  ;;  %15152 = vst [vmem:[#allocation73_spill] sm:$0xff] %v15151_v40  ;;  %v1203_v50 = vadd.s32 296, %v12879_v14 }
 0x213   :  { %v15111_v58 = vsel %vm12990_vm15, 4294967295, %v15110_v58  ;;  %11592 = vmatpush3.msk.msra.mxu0 %vm12990_vm15, %v14956_v25  ;;  %vm13031_vm15 = vcmp.eq.s32.totalorder %v1242_v63, %v12882_v16  ;;  %15133 = vst [vmem:[#allocation66_spill] sm:$0xff] %v15132_v18  ;;  %15186 = vst [vmem:[#allocation87_spill] sm:$0xff] %v13219_v33  ;;  %v13391_v18 = vsub.s32 2, %v12879_v14 }
 0x214   :  { %15112 = vst [vmem:[#allocation59_spill] sm:$0xff] %v15111_v58  ;;  %11593 = vmatprep.subr.mxu0 %v14940_v9  ;;  %v15126_v7 = vsel %vm13031_vm15, 4294967295, %v15125_v7 }
 0x215   :  { %15127 = vst [vmem:[#allocation64_spill] sm:$0xff] %v15126_v7  ;;  %15229 = vst [vmem:[#allocation104_spill] sm:$0xff] %v13391_v18 }
 0x216   :  { %10021 = vmatmul.mubr.msk.bf16.gmra.mxu1 %vm14882_vm3, %v12816_v56  ;;  %11580 = vmatmul.mubr.msk.bf16.gmra.mxu0 %vm14882_vm3, %v12816_v56  ;;  %v1177_v56 = vadd.s32 88, %v12879_v14  ;;  %vm13014_vm3 = vcmp.eq.s32.totalorder %v1258_v61, %v12882_v16  ;;  %v1253_v61 = vand.u32 63, %v1203_v50 }
 0x217   :  { %11615 = vmatprep.mubr.msk.f32.mxu0 %vm14883_vm1, %v14940_v9  ;;  %v15120_v4 = vsel %vm13014_vm3, 4294967295, %v15119_v4  ;;  %11594 = vmatpush3.msk.msra.mxu0 %vm13014_vm3, %v14956_v25  ;;  %vm13046_vm3 = vcmp.eq.s32.totalorder %v1257_v8, %v12882_v16  ;;  %v15164_v8 = vmov 0 }
 0x218   :  { %v1227_v62 = vand.u32 63, %v1177_v56  ;;  %15121 = vst [vmem:[#allocation62_spill] sm:$0xff] %v15120_v4  ;;  %11595 = vmatprep.subr.mxu0 %v14940_v9  ;;  %v15129_v17 = vsel %vm13046_vm3, 4294967295, %v15128_v17  ;;  %v1187_v56 = vadd.s32 168, %v12879_v14 }
 0x219   :  { %15130 = vst [vmem:[#allocation65_spill] sm:$0xff] %v15129_v17  ;;  %11596 = vmatpush3.msk.msra.mxu0 %vm13046_vm3, %v14956_v25  ;;  %vm13078_vm3 = vcmp.eq.s32.totalorder %v1256_v24, %v12882_v16  ;;  %v1251_v24 = vand.u32 63, %v1201_v12  ;;  %v15200_v12 = vmov 0  ;;  %v15366_v42 = vld [vmem:[#allocation73_spill] sm:$0xff] }
 0x21a   :  { %vm13026_vm1 = vcmp.eq.s32.totalorder %v1227_v62, %v12882_v16  ;;  %11597 = vmatprep.subr.mxu0 %v14940_v9  ;;  %v15138_v35 = vsel %vm13078_vm3, 4294967295, %v15137_v35  ;;  %v1222_v62 = vand.u32 63, %v13119_v51  ;;  %v1237_v63 = vand.u32 63, %v1187_v56 }
 0x21b   :  { %v15123_v6 = vsel %vm13026_vm1, 4294967295, %v15122_v6  ;;  %11236 = vmatpush3.msk.msra.mxu1 %vm13026_vm1, %v14956_v25  ;;  %vm13064_vm1 = vcmp.eq.s32.totalorder %v1241_v11, %v12882_v16  ;;  %15139 = vst [vmem:[#allocation68_spill] sm:$0xff] %v15138_v35  ;;  %11598 = vmatpush3.msk.msra.mxu0 %vm13078_vm3, %v14956_v25  ;;  %v15170_v11 = vmov 0  ;;  %vm13188_vm3 = vcmp.eq.s32.totalorder %v1252_v0, %v12882_v16 }
 0x21c   :  { %15124 = vst [vmem:[#allocation63_spill] sm:$0xff] %v15123_v6  ;;  %11237 = vmatprep.subr.msk.mxu1 %vm13031_vm15, %v14956_v25  ;;  %v15135_v22 = vsel %vm13064_vm1, 4294967295, %v15134_v22  ;;  %vm13083_vm15 = vcmp.eq.s32.totalorder %v1225_v26, %v12882_v16  ;;  %11599 = vmatprep.subr.mxu0 %v14940_v9  ;;  %v15177_v15 = vsel %vm13188_vm3, 4294967295, %v15176_v15  ;;  %v13198_v26 = vadd.s32 32, %v12879_v14 }
 0x21d   :  { %15136 = vst [vmem:[#allocation67_spill] sm:$0xff] %v15135_v22  ;;  %11238 = vmatpush3.msk.msra.mxu1 %vm13051_vm2, %v14956_v25  ;;  %v15141_v36 = vsel %vm13083_vm15, 4294967295, %v15140_v36  ;;  %vm13088_vm2 = vcmp.eq.s32.totalorder %v1240_v27, %v12882_v16  ;;  %15178 = vst [vmem:[#allocation83_spill] sm:$0xff] %v15177_v15  ;;  %v1185_v27 = vadd.s32 152, %v12879_v14  ;;  %v1219_v56 = vand.u32 63, %v13219_v33 }
 0x21e   :  { %11239 = vmatprep.subr.msk.mxu1 %vm13064_vm1, %v14956_v25  ;;  %15142 = vst [vmem:[#allocation69_spill] sm:$0xff] %v15141_v36  ;;  %v15144_v37 = vsel %vm13088_vm2, 4294967295, %v15143_v37  ;;  %vm13102_vm1 = vcmp.eq.s32.totalorder %v1255_v28, %v12882_v16  ;;  %15179 = vst [vmem:[#allocation84_spill] sm:$0xff] %v13198_v26  ;;  %v1200_v28 = vadd.s32 272, %v12879_v14  ;;  %v15197_v0 = vmov 0 }
 0x21f   :  { %15145 = vst [vmem:[#allocation70_spill] sm:$0xff] %v15144_v37  ;;  %11240 = vmatpush3.msk.msra.mxu1 %vm13083_vm15, %v14956_v25  ;;  %v15148_v39 = vsel %vm13102_vm1, 4294967295, %v15147_v39  ;;  %11600 = vmatpush3.msk.msra.mxu0 %vm13102_vm1, %v14956_v25  ;;  %vm13128_vm15 = vcmp.eq.s32.totalorder %v1239_v41, %v12882_v16  ;;  %vm13183_vm1 = vcmp.eq.s32.totalorder %v1237_v63, %v12882_v16  ;;  %v1184_v41 = vadd.s32 144, %v12879_v14  ;;  %v1128_v22 = vld [vmem:[#allocation12] sm:$0x7] }
 0x220   :  { %15149 = vst [vmem:[#allocation72_spill] sm:$0xff] %v15148_v39  ;;  %11241 = vmatprep.subr.msk.mxu1 %vm13088_vm2, %v14956_v25  ;;  %v15155_v52 = vsel %vm13128_vm15, 4294967295, %v15154_v52  ;;  %vm13133_vm2 = vcmp.eq.s32.totalorder %v1254_v45, %v12882_v16  ;;  %11601 = vmatprep.subr.mxu0 %v14940_v9  ;;  %v15174_v13 = vsel %vm13183_vm1, 4294967295, %v15173_v13  ;;  %v15187_v45 = vmov 0 }
 0x221   :  { %11242 = vmatpush3.msk.msra.mxu1 %vm13107_vm0, %v14956_v25  ;;  %15156 = vst [vmem:[#allocation75_spill] sm:$0xff] %v15155_v52  ;;  %v15158_v53 = vsel %vm13133_vm2, 4294967295, %v15157_v53  ;;  %vm13144_vm0 = vcmp.eq.s32.totalorder %v1223_v48, %v12882_v16  ;;  %11602 = vmatpush3.msk.msra.mxu0 %vm13133_vm2, %v14956_v25  ;;  %vm13166_vm2 = vcmp.eq.s32.totalorder %v1253_v61, %v12882_v16  ;;  %15175 = vst [vmem:[#allocation82_spill] sm:$0xff] %v15174_v13  ;;  %v15194_v63 = vmov 0 }
 0x222   :  { %15159 = vst [vmem:[#allocation76_spill] sm:$0xff] %v15158_v53  ;;  %11243 = vmatprep.subr.msk.mxu1 %vm13128_vm15, %v14956_v25  ;;  %v15161_v59 = vsel %vm13144_vm0, 4294967295, %v15160_v59  ;;  %11603 = vmatprep.subr.mxu0 %v14940_v9  ;;  %vm13161_vm15 = vcmp.eq.s32.totalorder %v1238_v60, %v12882_v16  ;;  %v15168_v10 = vsel %vm13166_vm2, 4294967295, %v15167_v10  ;;  %v1220_v48 = vand.u32 63, %v13198_v26 }
 0x223   :  { %15162 = vst [vmem:[#allocation77_spill] sm:$0xff] %v15161_v59  ;;  %11244 = vmatpush3.msk.msra.mxu1 %vm13144_vm0, %v14956_v25  ;;  %v15165_v8 = vsel %vm13161_vm15, 4294967295, %v15164_v8  ;;  %15169 = vst [vmem:[#allocation80_spill] sm:$0xff] %v15168_v10  ;;  %vm13171_vm0 = vcmp.eq.s32.totalorder %v1222_v62, %v12882_v16  ;;  %11604 = vmatpush3.msk.msra.mxu0 %vm13166_vm2, %v14956_v25  ;;  %vm13214_vm2 = vcmp.eq.s32.totalorder %v1236_v20, %v12882_v16  ;;  %v15191_v62 = vmov 0 }
 0x224   :  { %15166 = vst [vmem:[#allocation79_spill] sm:$0xff] %v15165_v8  ;;  %v15171_v11 = vsel %vm13171_vm0, 4294967295, %v15170_v11  ;;  %11245 = vmatprep.subr.msk.mxu1 %vm13161_vm15, %v14956_v25  ;;  %11605 = vmatprep.subr.mxu0 %v14940_v9  ;;  %v15184_v32 = vsel %vm13214_vm2, 4294967295, %v15183_v32  ;;  %v1235_v49 = vand.u32 63, %v1185_v27  ;;  %v1250_v50 = vand.u32 63, %v1200_v28 }
 0x225   :  { %15172 = vst [vmem:[#allocation81_spill] sm:$0xff] %v15171_v11  ;;  %11246 = vmatpush3.msk.msra.mxu1 %vm13171_vm0, %v14956_v25  ;;  %11606 = vmatpush3.msk.msra.mxu0 %vm13188_vm3, %v14956_v25  ;;  %vm13209_vm0 = vcmp.eq.s32.totalorder %v1221_v19, %v12882_v16  ;;  %15185 = vst [vmem:[#allocation86_spill] sm:$0xff] %v15184_v32  ;;  %vm13227_vm3 = vcmp.eq.s32.totalorder %v1251_v24, %v12882_v16  ;;  %v1234_v57 = vand.u32 63, %v1184_v41  ;;  %v15203_v19 = vmov 0 }
 0x226   :  { %11247 = vmatprep.subr.msk.mxu1 %vm13183_vm1, %v14956_v25  ;;  %v15181_v29 = vsel %vm13209_vm0, 4294967295, %v15180_v29  ;;  %11607 = vmatprep.subr.mxu0 %v14940_v9  ;;  %v15188_v45 = vsel %vm13227_vm3, 4294967295, %v15187_v45  ;;  %v1199_v60 = vadd.s32 264, %v12879_v14  ;;  %v13241_v61 = vadd.s32 16, %v12879_v14  ;;  %v15364_v34 = vld [vmem:[#allocation70_spill] sm:$0xff] }
 0x227   :  { %15182 = vst [vmem:[#allocation85_spill] sm:$0xff] %v15181_v29  ;;  %11248 = vmatpush3.msk.msra.mxu1 %vm13209_vm0, %v14956_v25  ;;  %15189 = vst [vmem:[#allocation88_spill] sm:$0xff] %v15188_v45  ;;  %11608 = vmatpush3.msk.msra.mxu0 %vm13227_vm3, %v14956_v25  ;;  %vm13244_vm0 = vcmp.eq.s32.totalorder %v1220_v48, %v12882_v16  ;;  %vm13255_vm3 = vcmp.eq.s32.totalorder %v1250_v50, %v12882_v16  ;;  %v1233_v27 = vand.u32 63, %v1183_v5  ;;  %v15210_v50 = vmov 0 }
 0x228   :  { %11249 = vmatprep.subr.msk.mxu1 %vm13214_vm2, %v14956_v25  ;;  %15190 = vst [vmem:[#allocation89_spill] sm:$0xff] %v13241_v61  ;;  %v15192_v62 = vsel %vm13244_vm0, 4294967295, %v15191_v62  ;;  %11609 = vmatprep.subr.mxu0 %v14940_v9  ;;  %vm13250_vm2 = vcmp.eq.s32.totalorder %v1235_v49, %v12882_v16  ;;  %v15198_v0 = vsel %vm13255_vm3, 4294967295, %v15197_v0  ;;  %vm13267_vm1 = vcmp.eq.s32.totalorder %v1219_v56, %v12882_v16  ;;  %v15368_v44 = vld [vmem:[#allocation75_spill] sm:$0xff] }
 0x229   :  { %15193 = vst [vmem:[#allocation90_spill] sm:$0xff] %v15192_v62  ;;  %v15195_v63 = vsel %vm13250_vm2, 4294967295, %v15194_v63  ;;  %15199 = vst [vmem:[#allocation92_spill] sm:$0xff] %v15198_v0  ;;  %11250 = vmatpush3.msk.msra.mxu1 %vm13244_vm0, %v14956_v25  ;;  %11610 = vmatpush3.msk.msra.mxu0 %vm13255_vm3, %v14956_v25  ;;  %v15201_v12 = vsel %vm13267_vm1, 4294967295, %v15200_v12  ;;  %vm13272_vm15 = vcmp.eq.s32.totalorder %v1234_v57, %v12882_v16  ;;  %v1249_v20 = vand.u32 63, %v1199_v60 }
 0x22a   :  { %15196 = vst [vmem:[#allocation91_spill] sm:$0xff] %v15195_v63  ;;  %15202 = vst [vmem:[#allocation93_spill] sm:$0xff] %v15201_v12  ;;  %v15204_v19 = vsel %vm13272_vm15, 4294967295, %v15203_v19  ;;  %v1218_v24 = vand.u32 63, %v13241_v61  ;;  %11251 = vmatprep.subr.msk.mxu1 %vm13250_vm2, %v14956_v25  ;;  %11611 = vmatprep.subr.mxu0 %v14940_v9  ;;  %v1198_v28 = vadd.s32 256, %v12879_v14  ;;  %v13283_v41 = vadd.s32 8, %v12879_v14 }
 0x22b   :  { %15205 = vst [vmem:[#allocation94_spill] sm:$0xff] %v15204_v19  ;;  %v1182_v48 = vadd.s32 128, %v12879_v14  ;;  %11252 = vmatpush3.msk.msra.mxu1 %vm13267_vm1, %v14956_v25  ;;  %vm13290_vm3 = vcmp.eq.s32.totalorder %v1249_v20, %v12882_v16  ;;  %v15207_v49 = vmov 0  ;;  %v1216_v56 = vand.u32 63, %v12879_v14  ;;  %v15370_v46 = vld [vmem:[#allocation77_spill] sm:$0xff] }
 0x22c   :  { %15206 = vst [vmem:[#allocation95_spill] sm:$0xff] %v13283_v41  ;;  %v15208_v49 = vsel %vm13290_vm3, 4294967295, %v15207_v49  ;;  %vm13295_vm2 = vcmp.eq.s32.totalorder %v1218_v24, %v12882_v16  ;;  %11253 = vmatprep.subr.msk.mxu1 %vm13272_vm15, %v14956_v25  ;;  %11612 = vmatpush3.msk.msra.mxu0 %vm13290_vm3, %v14956_v25  ;;  %vm13307_vm1 = vcmp.eq.s32.totalorder %v1233_v27, %v12882_v16  ;;  %v15213_v57 = vmov 0 }
 0x22d   :  { %15209 = vst [vmem:[#allocation96_spill] sm:$0xff] %v15208_v49  ;;  %v15211_v50 = vsel %vm13295_vm2, 4294967295, %v15210_v50  ;;  %v15214_v57 = vsel %vm13307_vm1, 4294967295, %v15213_v57  ;;  %v1248_v60 = vand.u32 63, %v1198_v28  ;;  %v1217_v5 = vand.u32 63, %v13283_v41  ;;  %11254 = vmatpush3.msk.msra.mxu1 %vm13295_vm2, %v14956_v25  ;;  %11613 = vmatprep.subr.mxu0 %v14940_v9 }
 0x22e   :  { %15212 = vst [vmem:[#allocation97_spill] sm:$0xff] %v15211_v50  ;;  %15215 = vst [vmem:[#allocation98_spill] sm:$0xff] %v15214_v57  ;;  %v1232_v20 = vand.u32 63, %v1182_v48  ;;  %11255 = vmatprep.subr.msk.mxu1 %vm13307_vm1, %v14956_v25  ;;  %v15216_v24 = vmov 0  ;;  %v15219_v27 = vmov 0  ;;  %v15222_v28 = vmov 0 }
 0x22f   :  { %vm13320_vm3 = vcmp.eq.s32.totalorder %v1248_v60, %v12882_v16  ;;  %vm13325_vm15 = vcmp.eq.s32.totalorder %v1217_v5, %v12882_v16  ;;  %vm13335_vm2 = vcmp.eq.s32.totalorder %v1216_v56, %v12882_v16  ;;  %v15225_v48 = vmov 0 }
 0x230   :  { %v15217_v24 = vsel %vm13320_vm3, 4294967295, %v15216_v24  ;;  %v15220_v27 = vsel %vm13325_vm15, 4294967295, %v15219_v27  ;;  %vm13330_vm0 = vcmp.eq.s32.totalorder %v1232_v20, %v12882_v16  ;;  %v15226_v48 = vsel %vm13335_vm2, 4294967295, %v15225_v48  ;;  %11614 = vmatpush3.msk.msra.mxu0 %vm13320_vm3, %v14956_v25  ;;  %11256 = vmatpush3.msk.msra.mxu1 %vm13325_vm15, %v14956_v25 }
 0x231   :  { %15218 = vst [vmem:[#allocation99_spill] sm:$0xff] %v15217_v24  ;;  %15221 = vst [vmem:[#allocation100_spill] sm:$0xff] %v15220_v27  ;;  %v15223_v28 = vsel %vm13330_vm0, 4294967295, %v15222_v28  ;;  %11618 = vmatprep.subr.mxu0 %v14940_v9  ;;  %11257 = vmatprep.subr.msk.mxu1 %vm13330_vm0, %v14956_v25 }
 0x232   :  { %15224 = vst [vmem:[#allocation101_spill] sm:$0xff] %v15223_v28  ;;  %15227 = vst [vmem:[#allocation102_spill] sm:$0xff] %v15226_v48  ;;  %11258 = vmatpush3.msk.msra.mxu1 %vm13335_vm2, %v14956_v25 }
 0x233   :  { %11279 = vmatprep.subr.msk.mxu1 %vm12900_vm5, %v14956_v25 }
 0x296   :  { %v13355_v56 = vpop.f32.mrf.mxu1  ;;  %v13357_v60 = vpop.f32.mrf.mxu0 }
 0x298   :  { %v629_v5 = vpop.f32.mrf.mxu1  ;;  %v11533_v20 = vpop.f32.mrf.mxu0 }
 0x29a   :  { %v631_v23 = vpop.f32.mrf.mxu1  ;;  %v13359_v9 = vpop.f32.mrf.mxu0 }
 0x29c   :  { %v633_v41 = vpop.f32.mrf.mxu1  ;;  %v11534_v61 = vpop.f32.mrf.mxu0 }
 0x29e   :  { %v13361_v33 = vpop.f32.mrf.mxu1  ;;  %v13363_v26 = vpop.f32.mrf.mxu0 }
 0x2a0   :  { %v13365_v1 = vpop.f32.mrf.mxu1  ;;  %v11537_v51 = vpop.f32.mrf.mxu0 }
 0x2a2   :  { %v13367_v30 = vpop.f32.mrf.mxu1  ;;  %v13369_v25 = vpop.f32.mrf.mxu0 }
 0x2a4   :  { %v13371_v38 = vpop.f32.mrf.mxu1  ;;  %v11538_v16 = vpop.f32.mrf.mxu0 }
 0x2a6   :  { %v13373_v20 = vpop.f32.mrf.mxu1  ;;  %v13375_v48 = vpop.f32.mrf.mxu0 }
 0x2a8   :  { %v13377_v28 = vpop.f32.mrf.mxu1  ;;  %v11541_v61 = vpop.f32.mrf.mxu0 }
 0x2aa   :  { %v13379_v27 = vpop.f32.mrf.mxu1  ;;  %v13381_v24 = vpop.f32.mrf.mxu0 }
 0x2ac   :  { %v13383_v57 = vpop.f32.mrf.mxu1  ;;  %v11542_v51 = vpop.f32.mrf.mxu0 }
 0x2ae   :  { %v820_v50 = vpop.f32.mrf.mxu1  ;;  %v883_v49 = vpop.f32.mrf.mxu0 }
 0x2af   :  { %v821_v2 = vadd.f32 %v820_v50, %v13355_v56 }
 0x2b0   :  { %v822_v19 = vpop.f32.mrf.mxu1  ;;  %v11553_v12 = vpop.f32.mrf.mxu0 }
 0x2b1   :  { %v823_v7 = vadd.f32 %v822_v19, %v629_v5 }
 0x2b2   :  { %v824_v0 = vpop.f32.mrf.mxu1  ;;  %v886_v16 = vpop.f32.mrf.mxu0 }
 0x2b3   :  { %v825_v58 = vadd.f32 %v824_v0, %v631_v23  ;;  %v887_v54 = vadd.f32 %v886_v16, %v13359_v9 }
 0x2b4   :  { %v826_v63 = vpop.f32.mrf.mxu1  ;;  %v11554_v62 = vpop.f32.mrf.mxu0 }
 0x2b5   :  { %v13388_v62 = vsub.s32 0, %v12879_v14  ;;  %v827_v6 = vadd.f32 %v826_v63, %v633_v41 }
 0x2b6   :  { %v830_v45 = vpop.f32.mrf.mxu1  ;;  %v891_v32 = vpop.f32.mrf.mxu0 }
 0x2b7   :  { %15228 = vst [vmem:[#allocation103_spill] sm:$0xff] %v13388_v62 }
 0x2b8   :  { %v832_v29 = vpop.f32.mrf.mxu1  ;;  %v11557_v15 = vpop.f32.mrf.mxu0 }
 0x2b9   :  { %v833_v23 = vadd.f32 %v832_v29, %v13365_v1 }
 0x2ba   :  { %v834_v61 = vpop.f32.mrf.mxu1  ;;  %v894_v13 = vpop.f32.mrf.mxu0 }
 0x2bb   :  { %v835_v50 = vadd.f32 %v834_v61, %v13367_v30 }
 0x2bc   :  { %v836_v11 = vpop.f32.mrf.mxu1  ;;  %v11558_v10 = vpop.f32.mrf.mxu0 }
 0x2bd   :  { %v13394_v10 = vsub.s32 1, %v12879_v14  ;;  %v884_v14 = vadd.f32 %v883_v49, %v13357_v60  ;;  %v837_v56 = vadd.f32 %v836_v11, %v13371_v38 }
 0x2be   :  { %v840_v8 = vpop.f32.mrf.mxu1  ;;  %v899_v59 = vpop.f32.mrf.mxu0 }
 0x2bf   :  { %15230 = vst [vmem:[#allocation105_spill] sm:$0xff] %v13394_v10  ;;  %v13404_v55 = vrot.slane %v1128_v22, %v13394_v10  ;;  %v900_v38 = vadd.f32 %v899_v59, %v13375_v48 }
 0x2c0   :  { %v842_v53 = vpop.f32.mrf.mxu1  ;;  %v11561_v51 = vpop.f32.mrf.mxu0 }
 0x2c2   :  { %v844_v52 = vpop.f32.mrf.mxu1  ;;  %v902_v40 = vpop.f32.mrf.mxu0 }
 0x2c3   :  { %v903_v29 = vadd.f32 %v902_v40, %v13381_v24 }
 0x2c4   :  { %v13385_v39 = vpop.f32.mrf.mxu1  ;;  %v11562_v12 = vpop.f32.mrf.mxu0 }
 0x2c5   :  { %v13397_v12 = vrot.slane %v1128_v22, %v13388_v62  ;;  %v831_v62 = vadd.f32 %v830_v45, %v13361_v33 }
 0x2c6   :  { %v1024_v37 = vpop.f32.mrf.mxu1  ;;  %v1087_v36 = vpop.f32.mrf.mxu0 }
 0x2c8   :  { %v1026_v35 = vpop.f32.mrf.mxu1  ;;  %v11573_v15 = vpop.f32.mrf.mxu0 }
 0x2c9   :  { %v13401_v15 = vrot.slane %v1128_v22, %v13391_v18  ;;  %v1111_v19 = vadd.f32 %v1026_v35, %v823_v7  ;;  %v895_v22 = vadd.f32 %v894_v13, %v13369_v25  ;;  %v1112_v7 = vadd.f32 %v1087_v36, %v884_v14 }
 0x2ca   :  { %v1028_v51 = vpop.f32.mrf.mxu1  ;;  %v1090_v17 = vpop.f32.mrf.mxu0  ;;  %v845_v14 = vadd.f32 %v844_v52, %v13379_v27 }
 0x2cb   :  { %v1113_v0 = vadd.f32 %v1028_v51, %v825_v58  ;;  %v1115_v49 = vadd.f32 %v1090_v17, %v887_v54  ;;  %v13416_v33 = vadd.f32 %v13404_v55, %v1111_v19  ;;  %v843_v54 = vadd.f32 %v842_v53, %v13377_v28 }
 0x2cc   :  { %v1030_v4 = vpop.f32.mrf.mxu1  ;;  %v11574_v3 = vpop.f32.mrf.mxu0  ;;  %v13441_v52 = vadd.f32 %v13401_v15, %v1112_v7 }
 0x2cd   :  { %v1114_v63 = vadd.f32 %v1030_v4, %v827_v6  ;;  %v892_v3 = vadd.f32 %v891_v32, %v13363_v26  ;;  %v841_v4 = vadd.f32 %v840_v8, %v13373_v20  ;;  %v1110_v6 = vadd.f32 %v1024_v37, %v821_v2 }
 0x2ce   :  { %v1034_v41 = vpop.f32.mrf.mxu1  ;;  %v1095_v5 = vpop.f32.mrf.mxu0  ;;  %v13424_v17 = vadd.f32 %v13397_v12, %v1113_v0  ;;  %v13428_v36 = vadd.f32 %v13401_v15, %v1115_v49  ;;  %v1519_v45 = vmul.f32 %v13416_v33, %v13416_v33 }
 0x2cf   :  { %v1116_v35 = vadd.f32 %v1034_v41, %v831_v62  ;;  %v13419_v1 = vadd.f32 %v13404_v55, %v1114_v63  ;;  %v1118_v58 = vadd.f32 %v1095_v5, %v892_v3  ;;  %v13435_v59 = vadd.f32 %v13397_v12, %v1110_v6 }
 0x2d0   :  { %v1036_v60 = vpop.f32.mrf.mxu1  ;;  %v11577_v9 = vpop.f32.mrf.mxu0  ;;  %v1507_v62 = vadd.f32 %v13428_v36, %v13441_v52  ;;  %v847_v3 = vadd.f32 %v13385_v39, %v13383_v57 }
 0x2d1   :  { %v1117_v30 = vadd.f32 %v1036_v60, %v833_v23  ;;  %v13438_v53 = vadd.f32 %v13397_v12, %v1116_v35  ;;  %v1522_v27 = vmul.f32 %v13419_v1, %v13419_v1  ;;  %v13448_v28 = vadd.f32 %v13401_v15, %v1118_v58 }
 0x2d2   :  { %v1038_v26 = vpop.f32.mrf.mxu1  ;;  %v1098_v25 = vpop.f32.mrf.mxu0  ;;  %v1485_v48 = vadd.f32 %v13424_v17, %v13435_v59  ;;  %v1496_v23 = vadd.f32 %v13419_v1, %v13416_v33 }
 0x2d3   :  { %v1119_v2 = vadd.f32 %v1038_v26, %v835_v50  ;;  %v13431_v37 = vadd.f32 %v13404_v55, %v1117_v30  ;;  %v1121_v8 = vadd.f32 %v1098_v25, %v895_v22  ;;  %v1547_v22 = vadd.f32 %v1522_v27, %v1519_v45 }
 0x2d4   :  { %v1040_v11 = vpop.f32.mrf.mxu1  ;;  %v11578_v13 = vpop.f32.mrf.mxu0  ;;  %v1486_v0 = vadd.f32 %v1485_v48, %v13438_v53 }
 0x2d5   :  { %v1120_v32 = vadd.f32 %v1040_v11, %v837_v56  ;;  %v13453_v20 = vadd.f32 %v13397_v12, %v1119_v2  ;;  %v1525_v51 = vmul.f32 %v13431_v37, %v13431_v37  ;;  %v13463_v19 = vadd.f32 %v13401_v15, %v1121_v8 }
 0x2d6   :  { %v1044_v40 = vpop.f32.mrf.mxu1  ;;  %v1103_v24 = vpop.f32.mrf.mxu0  ;;  %v1508_v56 = vadd.f32 %v1507_v62, %v13448_v28  ;;  %v1497_v6 = vadd.f32 %v1496_v23, %v13431_v37 }
 0x2d7   :  { %v13456_v16 = vadd.f32 %v13404_v55, %v1120_v32  ;;  %v1122_v61 = vadd.f32 %v1044_v40, %v841_v4  ;;  %v1124_v63 = vadd.f32 %v1103_v24, %v900_v38  ;;  %v1487_v39 = vadd.f32 %v1486_v0, %v13453_v20 }
 0x2d8   :  { %v1046_v41 = vpop.f32.mrf.mxu1  ;;  %v11581_v5 = vpop.f32.mrf.mxu0  ;;  %v1548_v35 = vadd.f32 %v1547_v22, %v1525_v51  ;;  %v1509_v58 = vadd.f32 %v1508_v56, %v13463_v19 }
 0x2d9   :  { %v13471_v50 = vadd.f32 %v13397_v12, %v1122_v61  ;;  %v13475_v49 = vadd.f32 %v13401_v15, %v1124_v63  ;;  %v1123_v60 = vadd.f32 %v1046_v41, %v843_v54  ;;  %v1528_v57 = vmul.f32 %v13456_v16, %v13456_v16 }
 0x2da   :  { %v1048_v9 = vpop.f32.mrf.mxu1  ;;  %v1106_v4 = vpop.f32.mrf.mxu0  ;;  %v1498_v54 = vadd.f32 %v1497_v6, %v13456_v16  ;;  %v1520_v6 = vmul.f32 %v13441_v52, %v13441_v52 }
 0x2db   :  { %v1125_v7 = vadd.f32 %v1048_v9, %v845_v14  ;;  %v13483_v30 = vadd.f32 %v13404_v55, %v1123_v60  ;;  %v1127_v26 = vadd.f32 %v1106_v4, %v903_v29  ;;  %v1488_v2 = vadd.f32 %v1487_v39, %v13471_v50 }
 0x2dc   :  { %v1050_v25 = vpop.f32.mrf.mxu1  ;;  %v11582_v38 = vpop.f32.mrf.mxu0  ;;  %v1510_v13 = vadd.f32 %v1509_v58, %v13475_v49  ;;  %v1549_v45 = vadd.f32 %v1548_v35, %v1528_v57  ;;  %v1523_v9 = vmul.f32 %v13428_v36, %v13428_v36  ;;  %v1526_v35 = vmul.f32 %v13448_v28, %v13448_v28 }
 0x2dd   :  { %v13488_v8 = vadd.f32 %v13397_v12, %v1125_v7  ;;  %v1126_v11 = vadd.f32 %v1050_v25, %v847_v3  ;;  %v1531_v14 = vmul.f32 %v13483_v30, %v13483_v30  ;;  %v13494_v32 = vadd.f32 %v13401_v15, %v1127_v26 }
 0x2de   :  { %v1499_v29 = vadd.f32 %v1498_v54, %v13483_v30  ;;  %v1521_v7 = vmul.f32 %v13424_v17, %v13424_v17  ;;  %v1518_v54 = vmul.f32 %v13435_v59, %v13435_v59 }
 0x2df   :  { %v1489_v27 = vadd.f32 %v1488_v2, %v13488_v8  ;;  %v13499_v40 = vadd.f32 %v13404_v55, %v1126_v11  ;;  %v1511_v12 = vadd.f32 %v1510_v13, %v13494_v32  ;;  %v1550_v24 = vadd.f32 %v1549_v45, %v1531_v14 }
 0x2e0   :  { %v1558_v2 = vadd.f32 %v1523_v9, %v1520_v6  ;;  %v1524_v11 = vmul.f32 %v13438_v53, %v13438_v53  ;;  %v1529_v14 = vmul.f32 %v13463_v19, %v13463_v19  ;;  %v15237_v9 = vld [vmem:[#allocation60_spill] sm:$0xff]  ;;  %v15241_v6 = vld [vmem:[#allocation62_spill] sm:$0xff] }
 0x2e1   :  { %v1490_v48 = vrot.slane %v1489_v27, 4  ;;  %v1500_v61 = vadd.f32 %v1499_v29, %v13499_v40  ;;  %v1534_v62 = vmul.f32 %v13499_v40, %v13499_v40  ;;  %v1512_v51 = vrot.slane %v1511_v12, 4 }
 0x2e3   :  { %v1491_v15 = vadd.f32 %v1490_v48, %v1489_v27  ;;  %v1501_v63 = vrot.slane %v1500_v61, 4  ;;  %v1551_v41 = vadd.f32 %v1550_v24, %v1534_v62  ;;  %v1513_v5 = vadd.f32 %v1512_v51, %v1511_v12 }
 0x2e4   :  { %v1536_v27 = vadd.f32 %v1521_v7, %v1518_v54  ;;  %v1559_v12 = vadd.f32 %v1558_v2, %v1526_v35  ;;  %v1527_v48 = vmul.f32 %v13453_v20, %v13453_v20  ;;  %v15231_v62 = vmov 1.0   ;;  %v15245_v7 = vld [vmem:[#allocation64_spill] sm:$0xff]  ;;  %v15247_v35 = vld [vmem:[#allocation65_spill] sm:$0xff] }
 0x2e5   :  { %v1492_v3 = vrot.slane %v1491_v15, 2  ;;  %v1502_v23 = vadd.f32 %v1501_v63, %v1500_v61  ;;  %v1552_v0 = vrot.slane %v1551_v41, 4  ;;  %v1514_v22 = vrot.slane %v1513_v5, 2  ;;  %v15255_v54 = vld [vmem:[#allocation69_spill] sm:$0xff] }
 0x2e6   :  { %v1532_v61 = vmul.f32 %v13475_v49, %v13475_v49  ;;  %v15232_v63 = vmov 0.0  }
 0x2e7   :  { %v1493_v55 = vadd.f32 %v1492_v3, %v1491_v15  ;;  %v1503_v56 = vrot.slane %v1502_v23, 2  ;;  %v1553_v60 = vadd.f32 %v1552_v0, %v1551_v41  ;;  %v1515_v4 = vadd.f32 %v1514_v22, %v1513_v5 }
 0x2e8   :  { %v1537_v15 = vadd.f32 %v1536_v27, %v1524_v11  ;;  %v1560_v41 = vadd.f32 %v1559_v12, %v1529_v14  ;;  %v1530_v5 = vmul.f32 %v13471_v50, %v13471_v50  ;;  %v1535_v3 = vmul.f32 %v13494_v32, %v13494_v32  ;;  %v15257_v11 = vld [vmem:[#allocation70_spill] sm:$0xff]  ;;  %v15261_v14 = vld [vmem:[#allocation73_spill] sm:$0xff] }
 0x2e9   :  { %v1504_v39 = vadd.f32 %v1503_v56, %v1502_v23  ;;  %v1554_v57 = vrot.slane %v1553_v60, 2  ;;  %v1494_v58 = vrot.slane %v1493_v55, 1  ;;  %v1516_v26 = vrot.slane %v1515_v4, 1  ;;  %v15234_v56 = vld [vmem:[#allocation58_spill] sm:$0xff]  ;;  %v15267_v12 = vld [vmem:[#allocation77_spill] sm:$0xff] }
 0x2ea   :  { %v1538_v21 = vadd.f32 %v1537_v15, %v1527_v48  ;;  %v1561_v23 = vadd.f32 %v1560_v41, %v1532_v61  ;;  %v1533_v0 = vmul.f32 %v13488_v8, %v13488_v8  ;;  %v15271_v48 = vld [vmem:[#allocation80_spill] sm:$0xff]  ;;  %v15275_v15 = vld [vmem:[#allocation82_spill] sm:$0xff]  ;;  %v15277_v41 = vld [vmem:[#allocation83_spill] sm:$0xff] }
 0x2eb   :  { %v1505_v25 = vrot.slane %v1504_v39, 1  ;;  %v1555_v38 = vadd.f32 %v1554_v57, %v1553_v60  ;;  %v1517_v13 = vadd.f32 %v1516_v26, %v1515_v4  ;;  %v1495_v24 = vadd.f32 %v1494_v58, %v1493_v55  ;;  %v15235_v60 = vld [vmem:[#allocation59_spill] sm:$0xff]  ;;  %v15239_v4 = vld [vmem:[#allocation61_spill] sm:$0xff]  ;;  %v15249_v58 = vld [vmem:[#allocation66_spill] sm:$0xff] }
 0x2ec   :  { %v1539_v31 = vadd.f32 %v1538_v21, %v1530_v5  ;;  %v1562_v22 = vadd.f32 %v1561_v23, %v1535_v3  ;;  %v15279_v3 = vld [vmem:[#allocation85_spill] sm:$0xff]  ;;  %v15281_v21 = vld [vmem:[#allocation86_spill] sm:$0xff]  ;;  %v15283_v23 = vld [vmem:[#allocation88_spill] sm:$0xff] }
 0x2ed   :  { %v1506_v45 = vadd.f32 %v1505_v25, %v1504_v39  ;;  %v1556_v29 = vrot.slane %v1555_v38, 1  ;;  %11616 = vmatmul.mubr.f32.vlgmr.msra.gmra.mxu0 %v1517_v13  ;;  %v15243_v39 = vld [vmem:[#allocation63_spill] sm:$0xff]  ;;  %v15259_v13 = vld [vmem:[#allocation72_spill] sm:$0xff] }
 0x2ee   :  { %11619 = vmatpush3.msk.msra.mxu0 %vm12888_vm4, %v15231_v62  ;;  %v1540_v43 = vadd.f32 %v1539_v31, %v1533_v0  ;;  %vm15236_vm4 = vnez %v15235_v60  ;;  %v1563_v47 = vrot.slane %v1562_v22, 4  ;;  %v15251_v25 = vld [vmem:[#allocation67_spill] sm:$0xff]  ;;  %v15285_v31 = vld [vmem:[#allocation90_spill] sm:$0xff] }
 0x2ef   :  { %1633 = vmatprep.mubr.f32.mxu1 %v1506_v45  ;;  %v1557_v51 = vadd.f32 %v1556_v29, %v1555_v38  ;;  %11620 = vmatprep.subr.mxu0 %v15232_v63  ;;  %v15253_v38 = vld [vmem:[#allocation68_spill] sm:$0xff]  ;;  %v15263_v45 = vld [vmem:[#allocation75_spill] sm:$0xff] }
 0x2f0   :  { %1634 = vmatmul.mubr.f32.vlgmr.msra.gmra.mxu1 %v1495_v24  ;;  %11621 = vmatpush3.msk.msra.mxu0 %vm12905_vm6, %v15231_v62  ;;  %vm15238_vm6 = vnez %v15237_v9  ;;  %v1541_v57 = vrot.slane %v1540_v43, 4  ;;  %v1564_v26 = vadd.f32 %v1563_v47, %v1562_v22  ;;  %v15265_v29 = vld [vmem:[#allocation76_spill] sm:$0xff]  ;;  %v15269_v24 = vld [vmem:[#allocation79_spill] sm:$0xff]  ;;  %v15291_v47 = vld [vmem:[#allocation93_spill] sm:$0xff] }
 0x2f1   :  { %11280 = vmatpush3.msk.msra.mxu1 %vm12918_vm7, %v15231_v62  ;;  %11622 = vmatprep.subr.mxu0 %v15232_v63  ;;  %v15287_v22 = vld [vmem:[#allocation91_spill] sm:$0xff] }
 0x2f2   :  { %11281 = vmatprep.subr.msk.mxu1 %vm12929_vm8, %v15231_v62  ;;  %1774 = vmatprep.mubr.f32.mxu1 %v1557_v51  ;;  %v1542_v2 = vadd.f32 %v1541_v57, %v1540_v43  ;;  %v1565_v27 = vrot.slane %v1564_v26, 2  ;;  %v15273_v51 = vld [vmem:[#allocation81_spill] sm:$0xff]  ;;  %v15289_v43 = vld [vmem:[#allocation92_spill] sm:$0xff]  ;;  %v15372_v55 = vld [vmem:[#allocation79_spill] sm:$0xff] }
 0x2f3   :  { %11623 = vmatpush3.msk.msra.mxu0 %vm12934_vm9, %v15231_v62  ;;  %11282 = vmatpush3.msk.msra.mxu1 %vm12939_vm10, %v15231_v62  ;;  %vm15240_vm9 = vnez %v15239_v4  ;;  %v15295_v57 = vld [vmem:[#allocation96_spill] sm:$0xff] }
 0x2f4   :  { %11624 = vmatprep.subr.mxu0 %v15232_v63  ;;  %11283 = vmatprep.subr.msk.mxu1 %vm12951_vm11, %v15231_v62  ;;  %v1543_v61 = vrot.slane %v1542_v2, 2  ;;  %v1566_v5 = vadd.f32 %v1565_v27, %v1564_v26  ;;  %v15297_v26 = vld [vmem:[#allocation97_spill] sm:$0xff] }
 0x2f5   :  { %11625 = vmatpush3.msk.msra.mxu0 %vm12956_vm12, %v15231_v62  ;;  %11284 = vmatpush3.msk.msra.mxu1 %vm12974_vm13, %v15231_v62  ;;  %vm15242_vm12 = vnez %v15241_v6  ;;  %v15293_v6 = vld [vmem:[#allocation94_spill] sm:$0xff] }
 0x2f6   :  { %11626 = vmatprep.subr.mxu0 %v15232_v63  ;;  %11285 = vmatprep.subr.msk.mxu1 %vm12979_vm14, %v15231_v62  ;;  %vm15244_vm14 = vnez %v15243_v39  ;;  %v1544_v0 = vadd.f32 %v1543_v61, %v1542_v2  ;;  %v1567_v60 = vrot.slane %v1566_v5, 1  ;;  %v15308_v2 = vld [vmem:[#allocation78_spill] sm:$0xff] }
 0x2f7   :  { %11627 = vmatpush3.msk.msra.mxu0 %vm15236_vm4, %v15231_v62  ;;  %11286 = vmatpush3.msk.msra.mxu1 %vm15238_vm6, %v15231_v62  ;;  %vm15246_vm4 = vnez %v15245_v7  ;;  %vm15248_vm6 = vnez %v15247_v35 }
 0x2f8   :  { %11628 = vmatprep.subr.mxu0 %v15232_v63  ;;  %11287 = vmatprep.subr.msk.mxu1 %vm15240_vm9, %v15231_v62  ;;  %vm15250_vm9 = vnez %v15249_v58  ;;  %v1545_v35 = vrot.slane %v1544_v0, 1 }
 0x2f9   :  { %11629 = vmatpush3.msk.msra.mxu0 %vm15242_vm12, %v15231_v62  ;;  %11288 = vmatpush3.msk.msra.mxu1 %vm15244_vm14, %v15231_v62  ;;  %vm15252_vm12 = vnez %v15251_v25  ;;  %vm15254_vm14 = vnez %v15253_v38 }
 0x2fa   :  { %11630 = vmatprep.subr.mxu0 %v15232_v63  ;;  %11289 = vmatprep.subr.msk.mxu1 %vm15246_vm4, %v15231_v62  ;;  %vm15256_vm4 = vnez %v15255_v54 }
 0x2fb   :  { %11631 = vmatpush3.msk.msra.mxu0 %vm15248_vm6, %v15231_v62  ;;  %11290 = vmatpush3.msk.msra.mxu1 %vm15250_vm9, %v15231_v62  ;;  %vm15258_vm6 = vnez %v15257_v11  ;;  %vm15260_vm9 = vnez %v15259_v13  ;;  %v1568_v13 = vadd.f32 %v1567_v60, %v1566_v5 }
 0x2fc   :  { %11632 = vmatprep.subr.mxu0 %v15232_v63  ;;  %11291 = vmatprep.subr.msk.mxu1 %vm15252_vm12, %v15231_v62  ;;  %vm15262_vm12 = vnez %v15261_v14 }
 0x2fd   :  { %11633 = vmatpush3.msk.msra.mxu0 %vm15254_vm14, %v15231_v62  ;;  %11292 = vmatpush3.msk.msra.mxu1 %vm15256_vm4, %v15231_v62  ;;  %vm15264_vm14 = vnez %v15263_v45  ;;  %vm15266_vm4 = vnez %v15265_v29  ;;  %v1163_v45 = vld [vmem:[#allocation13] sm:$0x1] }
 0x2fe   :  { %11634 = vmatprep.subr.mxu0 %v15232_v63  ;;  %11293 = vmatprep.subr.msk.mxu1 %vm15258_vm6, %v15231_v62  ;;  %vm15268_vm6 = vnez %v15267_v12 }
 0x2ff   :  { %11635 = vmatpush3.msk.msra.mxu0 %vm15260_vm9, %v15231_v62  ;;  %11294 = vmatpush3.msk.msra.mxu1 %vm15262_vm12, %v15231_v62  ;;  %vm15270_vm9 = vnez %v15269_v24  ;;  %vm15272_vm12 = vnez %v15271_v48  ;;  %v1546_v48 = vadd.f32 %v1545_v35, %v1544_v0  ;;  %v15307_v35 = vld [vmem:[#allocation74_spill] sm:$0xff] }
 0x300   :  { %11636 = vmatprep.subr.mxu0 %v15232_v63  ;;  %11295 = vmatprep.subr.msk.mxu1 %vm15264_vm14, %v15231_v62  ;;  %vm15274_vm14 = vnez %v15273_v51 }
 0x301   :  { %11637 = vmatpush3.msk.msra.mxu0 %vm15266_vm4, %v15231_v62  ;;  %11296 = vmatpush3.msk.msra.mxu1 %vm15268_vm6, %v15231_v62  ;;  %vm15276_vm4 = vnez %v15275_v15  ;;  %vm15278_vm6 = vnez %v15277_v41  ;;  %v15305_v41 = vld [vmem:[#allocation55_spill] sm:$0xff] }
 0x302   :  { %11638 = vmatprep.subr.mxu0 %v15232_v63  ;;  %11297 = vmatprep.subr.msk.mxu1 %vm15270_vm9, %v15231_v62  ;;  %vm15280_vm9 = vnez %v15279_v3  ;;  %v1408_v5 = vadd.s32 128, %v15305_v41  ;;  %v13696_v0 = vand.u32 63, %v15305_v41 }
 0x303   :  { %11639 = vmatpush3.msk.msra.mxu0 %vm15272_vm12, %v15231_v62  ;;  %11298 = vmatpush3.msk.msra.mxu1 %vm15274_vm14, %v15231_v62  ;;  %vm15282_vm12 = vnez %v15281_v21  ;;  %vm15284_vm14 = vnez %v15283_v23  ;;  %v1409_v23 = vadd.s32 256, %v15305_v41  ;;  %v15314_v41 = vld [vmem:[#allocation89_spill] sm:$0xff] }
 0x304   :  { %11640 = vmatprep.subr.mxu0 %v15232_v63  ;;  %11299 = vmatprep.subr.msk.mxu1 %vm15276_vm4, %v15231_v62  ;;  %vm15286_vm4 = vnez %v15285_v31 }
 0x305   :  { %11641 = vmatpush3.msk.msra.mxu0 %vm15278_vm6, %v15231_v62  ;;  %11300 = vmatpush3.msk.msra.mxu1 %vm15280_vm9, %v15231_v62  ;;  %vm15288_vm6 = vnez %v15287_v22  ;;  %vm15290_vm9 = vnez %v15289_v43  ;;  %v13693_v43 = vand.u32 63, %v1408_v5  ;;  %v13698_v60 = vand.u32 63, %v1409_v23  ;;  %v15316_v5 = vld [vmem:[#allocation95_spill] sm:$0xff]  ;;  %v15318_v23 = vld [vmem:[#allocation54_spill] sm:$0xff] }
 0x306   :  { %11642 = vmatprep.subr.mxu0 %v15232_v63  ;;  %11301 = vmatprep.subr.msk.mxu1 %vm15282_vm12, %v15231_v62  ;;  %vm15292_vm12 = vnez %v15291_v47 }
 0x307   :  { %11643 = vmatpush3.msk.msra.mxu0 %vm15284_vm14, %v15231_v62  ;;  %11302 = vmatpush3.msk.msra.mxu1 %vm15286_vm4, %v15231_v62  ;;  %vm15294_vm14 = vnez %v15293_v6  ;;  %vm15296_vm4 = vnez %v15295_v57  ;;  %v15306_v57 = vld [vmem:[#allocation71_spill] sm:$0xff] }
 0x308   :  { %11644 = vmatprep.subr.mxu0 %v15232_v63  ;;  %11303 = vmatprep.subr.msk.mxu1 %vm15288_vm6, %v15231_v62  ;;  %vm15298_vm6 = vnez %v15297_v26 }
 0x309   :  { %11645 = vmatpush3.msk.msra.mxu0 %vm15290_vm9, %v15231_v62  ;;  %11304 = vmatpush3.msk.msra.mxu1 %vm15292_vm12, %v15231_v62  ;;  %vm15301_vm9 = vmmov 0  }
 0x30a   :  { %11646 = vmatprep.subr.mxu0 %v15232_v63  ;;  %11305 = vmatprep.subr.msk.mxu1 %vm15294_vm14, %v15231_v62 }
 0x30b   :  { %11647 = vmatpush3.msk.msra.mxu0 %vm15296_vm4, %v15231_v62  ;;  %11306 = vmatpush3.msk.msra.mxu1 %vm15298_vm6, %v15231_v62  ;;  %vm15043_vm4 = vcmp.eq.s32.totalorder %v13696_v0, %v15306_v57 }
 0x30c   :  { %11648 = vmatprep.subr.mxu0 %v15232_v63  ;;  %11307 = vmatprep.subr.msk.mxu1 %vm13307_vm1, %v15231_v62  ;;  %vm15047_vm1 = vcmp.eq.s32.totalorder %v13693_v43, %v15308_v2 }
 0x30d   :  { %11649 = vmatpush3.msk.msra.mxu0 %vm13320_vm3, %v15231_v62  ;;  %11650 = vmatprep.mubr.msk.f32.mxu0 %vm15301_vm9, %v15232_v63  ;;  %vm15040_vm3 = vcmp.eq.s32.totalorder %v13693_v43, %v15306_v57 }
 0x30e   :  { %11308 = vmatpush3.msk.msra.mxu1 %vm13325_vm15, %v15231_v62  ;;  %11651 = vmatmul.mubr.f32.vlgmr.msra.gmra.mxu0 %v1568_v13  ;;  %v15310_v13 = vld [vmem:[#allocation84_spill] sm:$0xff] }
 0x30f   :  { %11309 = vmatprep.subr.msk.mxu1 %vm13330_vm0, %v15231_v62  ;;  %11653 = vmatprep.subr.mxu0 %v15232_v63  ;;  %vm15045_vm0 = vcmp.eq.s32.totalorder %v13693_v43, %v15307_v35  ;;  %vm15050_vm15 = vcmp.eq.s32.totalorder %v13696_v0, %v15310_v13 }
 0x310   :  { %11310 = vmatpush3.msk.msra.mxu1 %vm13335_vm2, %v15231_v62  ;;  %11669 = vmatprep.mubr.msk.f32.mxu0 %vm15301_vm9, %v15232_v63  ;;  %vm15044_vm2 = vcmp.eq.s32.totalorder %v13698_v60, %v15306_v57 }
 0x311   :  { %1775 = vmatmul.mubr.f32.vlgmr.msra.gmra.mxu1 %v1546_v48  ;;  %10193 = vmatprep.subr.msk.mxu1 %vm15040_vm3, %v15231_v62  ;;  %vm15046_vm3 = vcmp.eq.s32.totalorder %v13698_v60, %v15307_v35  ;;  %v15312_v48 = vld [vmem:[#allocation87_spill] sm:$0xff] }
 0x312   :  { %1925 = vmatprep.mubr.f32.mxu1 %v15232_v63  ;;  %10194 = vmatpush1.msk.msra.mxu1 %vm15043_vm4, %v15231_v62  ;;  %vm15048_vm4 = vcmp.eq.s32.totalorder %v13696_v0, %v15308_v2 }
 0x313   :  { %11654 = vmatpush3.msk.msra.mxu0 %vm15044_vm2, %v15231_v62  ;;  %10195 = vmatprep.subr.msk.mxu1 %vm15045_vm0, %v15231_v62  ;;  %vm15309_vm2 = vcmp.eq.s32.totalorder %v13696_v0, %v15307_v35  ;;  %vm15049_vm0 = vcmp.eq.s32.totalorder %v13693_v43, %v15310_v13 }
 0x314   :  { %11655 = vmatprep.subr.mxu0 %v15232_v63  ;;  %10196 = vmatpush1.msk.msra.mxu1 %vm15309_vm2, %v15231_v62  ;;  %vm15052_vm2 = vcmp.eq.s32.totalorder %v13696_v0, %v15312_v48 }
 0x315   :  { %11656 = vmatpush3.msk.msra.mxu0 %vm15046_vm3, %v15231_v62  ;;  %10197 = vmatprep.subr.msk.mxu1 %vm15047_vm1, %v15231_v62  ;;  %vm15311_vm3 = vcmp.eq.s32.totalorder %v13698_v60, %v15308_v2  ;;  %vm15051_vm1 = vcmp.eq.s32.totalorder %v13693_v43, %v15312_v48 }
 0x316   :  { %11657 = vmatprep.subr.mxu0 %v15232_v63  ;;  %10198 = vmatpush1.msk.msra.mxu1 %vm15048_vm4, %v15231_v62  ;;  %vm15054_vm4 = vcmp.eq.s32.totalorder %v13696_v0, %v15314_v41 }
 0x317   :  { %11658 = vmatpush3.msk.msra.mxu0 %vm15311_vm3, %v15231_v62  ;;  %10199 = vmatprep.subr.msk.mxu1 %vm15049_vm0, %v15231_v62  ;;  %vm15313_vm3 = vcmp.eq.s32.totalorder %v13698_v60, %v15310_v13  ;;  %vm15053_vm0 = vcmp.eq.s32.totalorder %v13693_v43, %v15314_v41 }
 0x318   :  { %11659 = vmatprep.subr.mxu0 %v15232_v63  ;;  %10200 = vmatpush1.msk.msra.mxu1 %vm15050_vm15, %v15231_v62  ;;  %vm15062_vm15 = vcmp.eq.s32.totalorder %v13696_v0, %v15316_v5 }
 0x319   :  { %11660 = vmatpush3.msk.msra.mxu0 %vm15313_vm3, %v15231_v62  ;;  %10201 = vmatprep.subr.msk.mxu1 %vm15051_vm1, %v15231_v62  ;;  %vm15315_vm3 = vcmp.eq.s32.totalorder %v13698_v60, %v15312_v48  ;;  %vm15063_vm1 = vcmp.eq.s32.totalorder %v13693_v43, %v15316_v5 }
 0x31a   :  { %11661 = vmatprep.subr.mxu0 %v15232_v63  ;;  %10202 = vmatpush1.msk.msra.mxu1 %vm15052_vm2, %v15231_v62  ;;  %vm15060_vm2 = vcmp.eq.s32.totalorder %v13696_v0, %v15318_v23 }
 0x31b   :  { %11662 = vmatpush3.msk.msra.mxu0 %vm15315_vm3, %v15231_v62  ;;  %10203 = vmatprep.subr.msk.mxu1 %vm15053_vm0, %v15231_v62  ;;  %vm15317_vm3 = vcmp.eq.s32.totalorder %v13698_v60, %v15314_v41  ;;  %vm15061_vm0 = vcmp.eq.s32.totalorder %v13693_v43, %v15318_v23 }
 0x31c   :  { %11663 = vmatprep.subr.mxu0 %v15232_v63  ;;  %10204 = vmatpush1.msk.msra.mxu1 %vm15054_vm4, %v15231_v62  ;;  %vm15059_vm4 = vcmp.eq.s32.totalorder %v13698_v60, %v15318_v23 }
 0x31d   :  { %11664 = vmatpush3.msk.msra.mxu0 %vm15317_vm3, %v15231_v62  ;;  %10205 = vmatprep.subr.msk.mxu1 %vm15063_vm1, %v15231_v62  ;;  %vm15319_vm3 = vcmp.eq.s32.totalorder %v13698_v60, %v15316_v5 }
 0x31e   :  { %11665 = vmatprep.subr.mxu0 %v15232_v63  ;;  %10206 = vmatpush1.msk.msra.mxu1 %vm15062_vm15, %v15231_v62  ;;  %vm15325_vm15 = vcmp.eq.s32.totalorder %v13693_v43, %v15307_v35 }
 0x31f   :  { %11666 = vmatpush3.msk.msra.mxu0 %vm15319_vm3, %v15231_v62  ;;  %10207 = vmatprep.subr.msk.mxu1 %vm15061_vm0, %v15231_v62  ;;  %vm15320_vm3 = vcmp.eq.s32.totalorder %v13693_v43, %v15306_v57  ;;  %vm15324_vm0 = vcmp.eq.s32.totalorder %v13698_v60, %v15306_v57 }
 0x320   :  { %11667 = vmatprep.subr.mxu0 %v15232_v63  ;;  %10208 = vmatpush1.msk.msra.mxu1 %vm15060_vm2, %v15231_v62  ;;  %vm15323_vm2 = vcmp.eq.s32.totalorder %v13696_v0, %v15306_v57 }
 0x321   :  { %11668 = vmatpush3.msk.msra.mxu0 %vm15059_vm4, %v15231_v62  ;;  %10219 = vmatprep.subr.msk.mxu1 %vm15320_vm3, %v15231_v62  ;;  %vm15321_vm3 = vcmask 523264  }
 0x322   :  { %11672 = vmatprep.subr.mxu0 %v15232_v63  ;;  %vm15322_vm4 = vmmov %vm15321_vm3 }
 0x3ad   :  { %v1705_v18 = vpop.f32.mrf.mxu0 }
 0x3af   :  { %v11617_v10 = vpop.f32.mrf.mxu0 }
 0x3b0   :  { %v11259_v61 = vpop.f32.mrf.mxu1  ;;  %v1164_v10 = vld [vmem:[#allocation15] sm:$0x1] }
 0x3b2   :  { %v11260_v27 = vpop.f32.mrf.mxu1 }
 0x3b3   :  { %v11261_v29 = vadd.f32 %v11260_v27, %v11259_v61  ;;  %v11791_v27 = vld [vmem:[#allocation16 + $0x1a4] ss:$8 sps:$4 sm:$0xff]   ;;  %v11789_v61 = vld [vmem:[#allocation16 + $0x1a0] ss:$8 sps:$4 sm:$0xff]  }
 0x3b5   :  { %v1706_v26 = vadd.f32 %v11261_v29, %v1705_v18  ;;  %v11786_v29 = vld [vmem:[#allocation16 + $0x1b0] ss:$8 sps:$4 sm:$0xff]  }
 0x3b7   :  { %v1709_v31 = vmul.f32 0.0034722222, %v1706_v26  ;;  %v11783_v26 = vld [vmem:[#allocation16 + $0x1c0] ss:$8 sps:$4 sm:$0xff]  }
 0x3b9   :  { %v1851_v15 = vmul.f32 %v1709_v31, %v1709_v31 }
 0x3ce   :  { %v1846_v38 = vpop.f32.mrf.mxu0 }
 0x3d0   :  { %v11652_v6 = vpop.f32.mrf.mxu0 }
 0x3d1   :  { %v11311_v47 = vpop.f32.mrf.mxu1  ;;  %v11785_v6 = vld [vmem:[#allocation16 + $0x1c4] ss:$8 sps:$4 sm:$0xff]  }
 0x3d3   :  { %v11312_v22 = vpop.f32.mrf.mxu1 }
 0x3d4   :  { %v11313_v21 = vadd.f32 %v11312_v22, %v11311_v47  ;;  %v15347_v22 = vmov 0   ;;  %v11780_v47 = vld [vmem:[#allocation16 + $0x1d0] ss:$8 sps:$4 sm:$0xff]  }
 0x3d6   :  { %v1847_v3 = vadd.f32 %v11313_v21, %v1846_v38  ;;  %v11804_v21 = vld [vmem:[#allocation16 + $0x2e0] ss:$8 sps:$4 sm:$0xff]   ;;  %v11788_v38 = vld [vmem:[#allocation16 + $0x1b4] ss:$8 sps:$4 sm:$0xff]  }
 0x3d8   :  { %v1850_v51 = vmul.f32 0.0034722222, %v1847_v3  ;;  %v11777_v3 = vld [vmem:[#allocation16 + $0x1e0] ss:$8 sps:$4 sm:$0xff]  }
 0x3da   :  { %v1852_v24 = vsub.f32 %v1850_v51, %v1851_v15  ;;  %v11779_v51 = vld [vmem:[#allocation16 + $0x1e4] ss:$8 sps:$4 sm:$0xff]  }
 0x3db   :  { %v11806_v15 = vld [vmem:[#allocation16 + $0x2e4] ss:$8 sps:$4 sm:$0xff]  }
 0x3dc   :  { %v1853_v12 = vadd.f32 1e-05, %v1852_v24  ;;  %v11798_v24 = vld [vmem:[#allocation16 + $0x2f0] ss:$8 sps:$4 sm:$0xff]  }
 0x3de   :  { %11990 = vrsqrt.f32 %v1853_v12  ;;  %v11774_v12 = vld [vmem:[#allocation16 + $0x1f0] ss:$8 sps:$4 sm:$0xff]  }
 0x3eb   :  { %v11991_v14 = vpop.eup %11990 }
 0x3ec   :  { %v1855_v11 = vmul.f32 %v11991_v14, %v1163_v45  ;;  %v11800_v14 = vld [vmem:[#allocation16 + $0x2f4] ss:$8 sps:$4 sm:$0xff]  }
 0x3ee   :  { %10209 = vmatmul.mubr.msk.f32.vlgmr.msra.gmra.mxu1 %vm15321_vm3, %v1855_v11  ;;  %11670 = vmatmul.mubr.msk.f32.vlgmr.msra.gmra.mxu0 %vm15322_vm4, %v1855_v11  ;;  %vm15326_vm4 = vcmp.eq.s32.totalorder %v13696_v0, %v15307_v35  ;;  %vm15330_vm3 = vcmp.eq.s32.totalorder %v13698_v60, %v15308_v2  ;;  %v1856_v18 = vmul.f32 %v1855_v11, %v1709_v31  ;;  %v11776_v11 = vld [vmem:[#allocation16 + $0x1f4] ss:$8 sps:$4 sm:$0xff]  }
 0x3ef   :  { %10220 = vmatpush1.msk.msra.mxu1 %vm15323_vm2, %v15231_v62  ;;  %11673 = vmatpush3.msk.msra.mxu0 %vm15324_vm0, %v15231_v62  ;;  %vm15327_vm2 = vcmp.eq.s32.totalorder %v13698_v60, %v15307_v35  ;;  %vm15328_vm0 = vcmp.eq.s32.totalorder %v13693_v43, %v15308_v2  ;;  %v11782_v31 = vld [vmem:[#allocation16 + $0x1d4] ss:$8 sps:$4 sm:$0xff]  }
 0x3f0   :  { %10221 = vmatprep.subr.msk.mxu1 %vm15325_vm15, %v15231_v62  ;;  %11674 = vmatprep.subr.mxu0 %v15232_v63  ;;  %vm15329_vm15 = vcmp.eq.s32.totalorder %v13696_v0, %v15308_v2  ;;  %v1857_v45 = vsub.f32 %v1164_v10, %v1856_v18  ;;  %v11792_v18 = vld [vmem:[#allocation16 + $0x190] ss:$8 sps:$4 sm:$0xff]   ;;  %v11797_v10 = vld [vmem:[#allocation16 + $0x184] ss:$8 sps:$4 sm:$0xff]  }
 0x3f1   :  { %10222 = vmatpush1.msk.msra.mxu1 %vm15326_vm4, %v15231_v62  ;;  %11675 = vmatpush3.msk.msra.mxu0 %vm15327_vm2, %v15231_v62  ;;  %vm15331_vm4 = vcmp.eq.s32.totalorder %v13693_v43, %v15310_v13  ;;  %vm15332_vm2 = vcmp.eq.s32.totalorder %v13696_v0, %v15310_v13 }
 0x3f2   :  { %10223 = vmatprep.subr.msk.mxu1 %vm15328_vm0, %v15231_v62  ;;  %11676 = vmatprep.subr.mxu0 %v15232_v63  ;;  %vm15333_vm0 = vcmp.eq.s32.totalorder %v13698_v60, %v15310_v13 }
 0x3f3   :  { %10224 = vmatpush1.msk.msra.mxu1 %vm15329_vm15, %v15231_v62  ;;  %11677 = vmatpush3.msk.msra.mxu0 %vm15330_vm3, %v15231_v62  ;;  %vm15334_vm15 = vcmp.eq.s32.totalorder %v13693_v43, %v15312_v48  ;;  %vm15335_vm3 = vcmp.eq.s32.totalorder %v13696_v0, %v15312_v48 }
 0x3f4   :  { %10225 = vmatprep.subr.msk.mxu1 %vm15331_vm4, %v15231_v62  ;;  %11678 = vmatprep.subr.mxu0 %v15232_v63  ;;  %vm15336_vm4 = vcmp.eq.s32.totalorder %v13698_v60, %v15312_v48 }
 0x3f5   :  { %10226 = vmatpush1.msk.msra.mxu1 %vm15332_vm2, %v15231_v62  ;;  %11679 = vmatpush3.msk.msra.mxu0 %vm15333_vm0, %v15231_v62  ;;  %vm15337_vm2 = vcmp.eq.s32.totalorder %v13693_v43, %v15314_v41  ;;  %vm15338_vm0 = vcmp.eq.s32.totalorder %v13696_v0, %v15314_v41 }
 0x3f6   :  { %10227 = vmatprep.subr.msk.mxu1 %vm15334_vm15, %v15231_v62  ;;  %11680 = vmatprep.subr.mxu0 %v15232_v63  ;;  %vm15339_vm15 = vcmp.eq.s32.totalorder %v13698_v60, %v15314_v41 }
 0x3f7   :  { %10228 = vmatpush1.msk.msra.mxu1 %vm15335_vm3, %v15231_v62  ;;  %11681 = vmatpush3.msk.msra.mxu0 %vm15336_vm4, %v15231_v62  ;;  %vm15340_vm3 = vcmp.eq.s32.totalorder %v13696_v0, %v15316_v5  ;;  %vm15341_vm4 = vcmp.eq.s32.totalorder %v13698_v60, %v15316_v5 }
 0x3f8   :  { %10229 = vmatprep.subr.msk.mxu1 %vm15337_vm2, %v15231_v62  ;;  %11682 = vmatprep.subr.mxu0 %v15232_v63  ;;  %vm15342_vm2 = vcmp.eq.s32.totalorder %v13693_v43, %v15318_v23 }
 0x3f9   :  { %10230 = vmatpush1.msk.msra.mxu1 %vm15338_vm0, %v15231_v62  ;;  %11683 = vmatpush3.msk.msra.mxu0 %vm15339_vm15, %v15231_v62  ;;  %vm15343_vm0 = vcmp.eq.s32.totalorder %v13696_v0, %v15318_v23  ;;  %vm15344_vm15 = vcmp.eq.s32.totalorder %v13698_v60, %v15318_v23  ;;  %v11794_v60 = vld [vmem:[#allocation16 + $0x194] ss:$8 sps:$4 sm:$0xff]  }
 0x3fa   :  { %10231 = vmatprep.subr.msk.mxu1 %vm15063_vm1, %v15231_v62  ;;  %11684 = vmatprep.subr.mxu0 %v15232_v63 }
 0x3fb   :  { %10232 = vmatpush1.msk.msra.mxu1 %vm15340_vm3, %v15231_v62  ;;  %11685 = vmatpush3.msk.msra.mxu0 %vm15341_vm4, %v15231_v62  ;;  %vm15345_vm3 = vcmask 523264  }
 0x3fc   :  { %10233 = vmatprep.subr.msk.mxu1 %vm15342_vm2, %v15231_v62  ;;  %11686 = vmatprep.subr.mxu0 %v15232_v63  ;;  %vm15346_vm4 = vmmov %vm15345_vm3 }
 0x3fd   :  { %10234 = vmatpush1.msk.msra.mxu1 %vm15343_vm0, %v15231_v62  ;;  %2069 = vmatprep.mubr.f32.mxu1 %v15232_v63 }
 0x3fe   :  { %11687 = vmatpush3.msk.msra.mxu0 %vm15344_vm15, %v15231_v62  ;;  %11688 = vmatprep.mubr.msk.f32.mxu0 %vm15301_vm9, %v15232_v63 }
 0x3ff   :  { %10235 = vmatmul.mubr.msk.f32.vlgmr.msra.gmra.mxu1 %vm15345_vm3, %v1857_v45  ;;  %11689 = vmatmul.mubr.msk.f32.vlgmr.msra.gmra.mxu0 %vm15346_vm4, %v1857_v45  ;;  %v11801_v45 = vld [vmem:[#allocation16 + $0x270] ss:$8 sps:$4 sm:$0xff]  }
 0x400   :  { %2636 = vmatprep.subr.bf16.mxu1 %v11776_v11  ;;  %2689 = vmatprep.subr.bf16.mxu0 %v11800_v14  ;;  %v11795_v11 = vld [vmem:[#allocation16 + $0x180] ss:$8 sps:$4 sm:$0xff]   ;;  %v11803_v14 = vld [vmem:[#allocation16 + $0x274] ss:$8 sps:$4 sm:$0xff]  }
 0x401   :  { %2637 = vmatpush1.bf16.msra.mxu1 %v11774_v12  ;;  %2690 = vmatpush1.bf16.msra.mxu0 %v11798_v24  ;;  %v11809_v12 = vld [vmem:[#allocation16 + $0x264] ss:$8 sps:$4 sm:$0xff]   ;;  %v11807_v24 = vld [vmem:[#allocation16 + $0x260] ss:$8 sps:$4 sm:$0xff]  }
 0x402   :  { %2638 = vmatprep.subr.bf16.mxu1 %v11779_v51  ;;  %2691 = vmatprep.subr.bf16.mxu0 %v11806_v15  ;;  %v11812_v51 = vld [vmem:[#allocation16 + $0x2d4] ss:$8 sps:$4 sm:$0xff]   ;;  %v11810_v15 = vld [vmem:[#allocation16 + $0x2d0] ss:$8 sps:$4 sm:$0xff]  }
 0x403   :  { %2721 = vmatprep.mubr.bf16.mxu0 %v15347_v22 }
 0x405   :  { %2639 = vmatpush1.bf16.msra.mxu1 %v11777_v3  ;;  %2692 = vmatpush1.bf16.msra.mxu0 %v11804_v21  ;;  %v11815_v3 = vld [vmem:[#allocation16 + $0x254] ss:$8 sps:$4 sm:$0xff]   ;;  %v11813_v21 = vld [vmem:[#allocation16 + $0x250] ss:$8 sps:$4 sm:$0xff]  }
 0x406   :  { %2640 = vmatprep.subr.bf16.mxu1 %v11782_v31  ;;  %2693 = vmatprep.subr.bf16.mxu0 %v11812_v51  ;;  %v11818_v31 = vld [vmem:[#allocation16 + $0x2c4] ss:$8 sps:$4 sm:$0xff]  }
 0x407   :  { %v11842_v51 = vld [vmem:[#allocation16 + $0x284] ss:$8 sps:$4 sm:$0xff]  }
 0x409   :  { %2641 = vmatpush1.bf16.msra.mxu1 %v11780_v47  ;;  %2694 = vmatpush1.bf16.msra.mxu0 %v11810_v15  ;;  %v11816_v47 = vld [vmem:[#allocation16 + $0x2c0] ss:$8 sps:$4 sm:$0xff]  }
 0x40a   :  { %2642 = vmatprep.subr.bf16.mxu1 %v11785_v6  ;;  %v11821_v6 = vld [vmem:[#allocation16 + $0x244] ss:$8 sps:$4 sm:$0xff]   ;;  %2695 = vmatprep.subr.bf16.mxu0 %v11818_v31  ;;  %v11840_v15 = vld [vmem:[#allocation16 + $0x280] ss:$8 sps:$4 sm:$0xff]  }
 0x40b   :  { %v11843_v31 = vld [vmem:[#allocation16 + $0x200] ss:$8 sps:$4 sm:$0xff]  }
 0x40d   :  { %2643 = vmatpush1.bf16.msra.mxu1 %v11783_v26  ;;  %v11824_v26 = vld [vmem:[#allocation16 + $0x2b4] ss:$8 sps:$4 sm:$0xff]   ;;  %2696 = vmatpush1.bf16.msra.mxu0 %v11816_v47 }
 0x40e   :  { %2644 = vmatprep.subr.bf16.mxu1 %v11788_v38  ;;  %v11819_v38 = vld [vmem:[#allocation16 + $0x240] ss:$8 sps:$4 sm:$0xff]   ;;  %2697 = vmatprep.subr.bf16.mxu0 %v11824_v26  ;;  %v11851_v47 = vld [vmem:[#allocation16 + $0x174] ss:$8 sps:$4 sm:$0xff]  }
 0x411   :  { %2645 = vmatpush1.bf16.msra.mxu1 %v11786_v29  ;;  %v11822_v29 = vld [vmem:[#allocation16 + $0x2b0] ss:$8 sps:$4 sm:$0xff]  }
 0x412   :  { %2646 = vmatprep.subr.bf16.mxu1 %v11791_v27  ;;  %v11827_v27 = vld [vmem:[#allocation16 + $0x234] ss:$8 sps:$4 sm:$0xff]   ;;  %2698 = vmatpush1.bf16.msra.mxu0 %v11822_v29 }
 0x415   :  { %2647 = vmatpush1.bf16.msra.mxu1 %v11789_v61  ;;  %v11825_v61 = vld [vmem:[#allocation16 + $0x230] ss:$8 sps:$4 sm:$0xff]  }
 0x416   :  { %2648 = vmatprep.subr.bf16.mxu1 %v11794_v60  ;;  %v11830_v60 = vld [vmem:[#allocation16 + $0x2a4] ss:$8 sps:$4 sm:$0xff]  }
 0x417   :  { %2699 = vmatprep.subr.bf16.mxu0 %v11830_v60 }
 0x419   :  { %2649 = vmatpush1.bf16.msra.mxu1 %v11792_v18  ;;  %v11828_v18 = vld [vmem:[#allocation16 + $0x2a0] ss:$8 sps:$4 sm:$0xff]  }
 0x41a   :  { %2650 = vmatprep.subr.bf16.mxu1 %v11797_v10  ;;  %2700 = vmatpush1.bf16.msra.mxu0 %v11828_v18  ;;  %v11833_v10 = vld [vmem:[#allocation16 + $0x224] ss:$8 sps:$4 sm:$0xff]  }
 0x41d   :  { %2651 = vmatpush1.bf16.msra.mxu1 %v11795_v11  ;;  %v11831_v11 = vld [vmem:[#allocation16 + $0x220] ss:$8 sps:$4 sm:$0xff]  }
 0x41e   :  { %2652 = vmatprep.subr.bf16.mxu1 %v11803_v14  ;;  %v11836_v14 = vld [vmem:[#allocation16 + $0x294] ss:$8 sps:$4 sm:$0xff]  }
 0x41f   :  { %2701 = vmatprep.subr.bf16.mxu0 %v11836_v14 }
 0x421   :  { %2653 = vmatpush2.bf16.msra.mxu1 %v11801_v45  ;;  %v11834_v45 = vld [vmem:[#allocation16 + $0x290] ss:$8 sps:$4 sm:$0xff]  }
 0x422   :  { %2654 = vmatprep.subr.bf16.mxu1 %v11809_v12  ;;  %v11839_v12 = vld [vmem:[#allocation16 + $0x214] ss:$8 sps:$4 sm:$0xff]   ;;  %2702 = vmatpush1.bf16.msra.mxu0 %v11834_v45 }
 0x423   :  { %2703 = vmatprep.subr.bf16.mxu0 %v11842_v51 }
 0x425   :  { %2655 = vmatpush2.bf16.msra.mxu1 %v11807_v24  ;;  %v11837_v24 = vld [vmem:[#allocation16 + $0x210] ss:$8 sps:$4 sm:$0xff]  }
 0x426   :  { %2656 = vmatprep.subr.bf16.mxu1 %v11815_v3  ;;  %v11845_v3 = vld [vmem:[#allocation16 + $0x204] ss:$8 sps:$4 sm:$0xff]   ;;  %2704 = vmatpush1.bf16.msra.mxu0 %v11840_v15 }
 0x429   :  { %2657 = vmatpush2.bf16.msra.mxu1 %v11813_v21  ;;  %v11848_v21 = vld [vmem:[#allocation16 + $0x74] ss:$8 sps:$4 sm:$0xff]  }
 0x42a   :  { %2658 = vmatprep.subr.bf16.mxu1 %v11821_v6  ;;  %2982 = vmatprep.subr.bf16.mxu0 %v11848_v21 }
 0x42d   :  { %2659 = vmatpush2.bf16.msra.mxu1 %v11819_v38 }
 0x42e   :  { %2660 = vmatprep.subr.bf16.mxu1 %v11827_v27  ;;  %v15348_v27 = vld [vmem:[#allocation103_spill] sm:$0xff] }
 0x431   :  { %2661 = vmatpush2.bf16.msra.mxu1 %v11825_v61 }
 0x432   :  { %2662 = vmatprep.subr.bf16.mxu1 %v11833_v10 }
 0x435   :  { %2663 = vmatpush2.bf16.msra.mxu1 %v11831_v11 }
 0x436   :  { %2664 = vmatprep.subr.bf16.mxu1 %v11839_v12 }
 0x439   :  { %2665 = vmatpush2.bf16.msra.mxu1 %v11837_v24 }
 0x43a   :  { %2666 = vmatprep.subr.bf16.mxu1 %v11845_v3 }
 0x43d   :  { %2667 = vmatpush2.bf16.msra.mxu1 %v11843_v31 }
 0x43e   :  { %3035 = vmatprep.subr.bf16.mxu1 %v11851_v47 }
 0x4ae   :  { %v1998_v6 = vpop.f32.mrf.mxu0  ;;  %v1927_v38 = vpop.f32.mrf.mxu1 }
 0x4af   :  { %v2149_v61 = vrot.slane %v1927_v38, %v15348_v27  ;;  %v2157_v60 = vrot.slane %v1998_v6, %v15348_v27 }
 0x4b0   :  { %v11671_v26 = vpop.f32.mrf.mxu0  ;;  %v1929_v29 = vpop.f32.mrf.mxu1 }
 0x4b1   :  { %v2153_v18 = vrot.slane %v1929_v29, %v15348_v27  ;;  %v2164_v10 = vmul.f32 %v2149_v61, %v13438_v53  ;;  %v2167_v11 = vmul.f32 %v2149_v61, %v13453_v20  ;;  %v2166_v14 = vmul.f32 %v2157_v60, %v13448_v28 }
 0x4b2   :  { %v2169_v45 = vmul.f32 %v2157_v60, %v13463_v19  ;;  %v2160_v12 = vmul.f32 %v2157_v60, %v13441_v52  ;;  %v2163_v24 = vmul.f32 %v2157_v60, %v13428_v36  ;;  %v2158_v51 = vmul.f32 %v2149_v61, %v13435_v59 }
 0x4b3   :  { %v2161_v15 = vmul.f32 %v2149_v61, %v13424_v17  ;;  %v2159_v31 = vmul.f32 %v2153_v18, %v13416_v33  ;;  %v13976_v53 = vmul.f32 %v2157_v60, %v13475_v49  ;;  %v13979_v20 = vmul.f32 %v2157_v60, %v13494_v32 }
 0x4b4   :  { %v13982_v28 = vmul.f32 %v2149_v61, %v13471_v50  ;;  %v2162_v17 = vmul.f32 %v2153_v18, %v13419_v1  ;;  %v2165_v59 = vmul.f32 %v2153_v18, %v13431_v37  ;;  %v2168_v49 = vmul.f32 %v2153_v18, %v13456_v16 }
 0x4b5   :  { %v2171_v32 = vmul.f32 %v2153_v18, %v13483_v30  ;;  %v2174_v47 = vmul.f32 %v2153_v18, %v13499_v40  ;;  %v13996_v50 = vmul.f32 %v2149_v61, %v13488_v8 }
 0x4bf   :  { %v2071_v3 = vpop.f32.mrf.mxu1  ;;  %v2142_v21 = vpop.f32.mrf.mxu0 }
 0x4c0   :  { %v13985_v52 = vrot.slane %v2071_v3, %v15348_v27  ;;  %v13988_v36 = vrot.slane %v2142_v21, %v15348_v27 }
 0x4c1   :  { %v2073_v33 = vpop.f32.mrf.mxu1  ;;  %v11690_v19 = vpop.f32.mrf.mxu0 }
 0x4c2   :  { %v2183_v6 = vrot.slane %v2073_v33, %v15348_v27  ;;  %v2190_v26 = vadd.f32 %v13988_v36, %v2160_v12  ;;  %v2193_v38 = vadd.f32 %v13988_v36, %v2163_v24  ;;  %v2196_v1 = vadd.f32 %v13988_v36, %v2166_v14 }
 0x4c3   :  { %v2199_v37 = vadd.f32 %v13988_v36, %v2169_v45  ;;  %v2188_v29 = vadd.f32 %v13985_v52, %v2158_v51  ;;  %v2191_v16 = vadd.f32 %v13985_v52, %v2161_v15  ;;  %v14006_v30 = vadd.f32 %v13985_v52, %v2164_v10 }
 0x4c4   :  { %vm2208_vm9 = vcmp.gt.f32.partialorder %v2190_v26, 0.0  ;;  %vm2211_vm2 = vcmp.gt.f32.partialorder %v2193_v38, 0.0  ;;  %vm2214_vm0 = vcmp.gt.f32.partialorder %v2196_v1, 0.0  ;;  %v2226_v8 = vmul.f32 0.01, %v2190_v26 }
 0x4c5   :  { %vm2217_vm15 = vcmp.gt.f32.partialorder %v2199_v37, 0.0  ;;  %v2229_v40 = vmul.f32 0.01, %v2193_v38  ;;  %v2232_v61 = vmul.f32 0.01, %v2196_v1  ;;  %v2189_v60 = vadd.f32 %v2183_v6, %v2159_v31 }
 0x4c6   :  { %v2235_v18 = vmul.f32 0.01, %v2199_v37  ;;  %v2244_v12 = vsel %vm2208_vm9, %v2190_v26, %v2226_v8  ;;  %v2192_v14 = vadd.f32 %v2183_v6, %v2162_v17  ;;  %v2195_v24 = vadd.f32 %v2183_v6, %v2165_v59  ;;  %v11846_v59 = vld [vmem:[#allocation16 + $0x70] ss:$8 sps:$4 sm:$0xff]  }
 0x4c7   :  { %v2247_v45 = vsel %vm2211_vm2, %v2193_v38, %v2229_v40  ;;  %v2250_v3 = vsel %vm2214_vm0, %v2196_v1, %v2232_v61  ;;  %v2198_v51 = vadd.f32 %v2183_v6, %v2168_v49  ;;  %vm2207_vm3 = vcmp.gt.f32.partialorder %v2189_v60, 0.0  ;;  %v11854_v61 = vld [vmem:[#allocation16 + $0x64] ss:$8 sps:$4 sm:$0xff]  }
 0x4c8   :  { %v2253_v15 = vsel %vm2217_vm15, %v2199_v37, %v2235_v18  ;;  %v14008_v21 = vpack.c.bf16 %v2247_v45, %v2244_v12  ;;  %vm2210_vm4 = vcmp.gt.f32.partialorder %v2192_v14, 0.0  ;;  %vm2213_vm1 = vcmp.gt.f32.partialorder %v2195_v24, 0.0 }
 0x4c9   :  { %v14010_v10 = vpack.c.bf16 %v2253_v15, %v2250_v3  ;;  %vm2216_vm6 = vcmp.gt.f32.partialorder %v2198_v51, 0.0  ;;  %v2225_v33 = vmul.f32 0.01, %v2189_v60  ;;  %v2228_v19 = vmul.f32 0.01, %v2192_v14 }
 0x4ca   :  { %v2381_v31 = vrot.slane %v14008_v21, 4  ;;  %v2231_v23 = vmul.f32 0.01, %v2195_v24  ;;  %v2234_v26 = vmul.f32 0.01, %v2198_v51  ;;  %v2197_v17 = vadd.f32 %v13985_v52, %v2167_v11 }
 0x4cb   :  { %v2382_v49 = vrot.slane %v14010_v10, 4  ;;  %v2243_v38 = vsel %vm2207_vm3, %v2189_v60, %v2225_v33  ;;  %v2246_v1 = vsel %vm2210_vm4, %v2192_v14, %v2228_v19  ;;  %vm2206_vm9 = vcmp.gt.f32.partialorder %v2188_v29, 0.0  ;;  %v11852_v11 = vld [vmem:[#allocation16 + $0x60] ss:$8 sps:$4 sm:$0xff]  }
 0x4cc   :  { %v2249_v37 = vsel %vm2213_vm1, %v2195_v24, %v2231_v23  ;;  %v2252_v8 = vsel %vm2216_vm6, %v2198_v51, %v2234_v26  ;;  %v14015_v40 = vpack.c.bf16 %v2246_v1, %v2243_v38  ;;  %vm2209_vm2 = vcmp.gt.f32.partialorder %v2191_v16, 0.0  ;;  %v11860_v26 = vld [vmem:[#allocation16 + $0x54] ss:$8 sps:$4 sm:$0xff]  }
 0x4cd   :  { %vm15349_vm0 = vcmask 1043456   ;;  %v14020_v12 = vpack.c.bf16 %v2252_v8, %v2249_v37  ;;  %vm2212_vm15 = vcmp.gt.f32.partialorder %v14006_v30, 0.0  ;;  %vm2215_vm14 = vcmp.gt.f32.partialorder %v2197_v17, 0.0  ;;  %v11858_v37 = vld [vmem:[#allocation16 + $0x50] ss:$8 sps:$4 sm:$0xff]  }
 0x4ce   :  { %v2383_v18 = vsel %vm15349_vm0, %v2381_v31, %v2382_v49  ;;  %v2378_v60 = vrot.slane %v14015_v40, 4  ;;  %v2224_v14 = vmul.f32 0.01, %v2188_v29  ;;  %v2227_v23 = vmul.f32 0.01, %v2191_v16  ;;  %vm15350_vm6 = vmmov %vm15349_vm0 }
 0x4cf   :  { %2722 = vmatmul.mubr.bf16.vlgmr.msra.gmra.mxu0 %v2383_v18  ;;  %v2201_v24 = vadd.f32 %v2183_v6, %v2171_v32  ;;  %v2379_v45 = vrot.slane %v14020_v12, 4  ;;  %v2230_v3 = vmul.f32 0.01, %v14006_v30  ;;  %v2233_v51 = vmul.f32 0.01, %v2197_v17 }
 0x4d0   :  { %2983 = vmatpush1.bf16.msra.mxu0 %v11846_v59  ;;  %v2204_v15 = vadd.f32 %v2183_v6, %v2174_v47  ;;  %2731 = vmatprep.mubr.bf16.mxu0 %v15347_v22  ;;  %v2242_v33 = vsel %vm2206_vm9, %v2188_v29, %v2224_v14  ;;  %v2245_v19 = vsel %vm2209_vm2, %v2191_v16, %v2227_v23  ;;  %v11866_v23 = vld [vmem:[#allocation16 + $0x44] ss:$8 sps:$4 sm:$0xff]   ;;  %vm15351_vm9 = vmmov %vm15349_vm0 }
 0x4d1   :  { %2984 = vmatprep.subr.bf16.mxu0 %v11854_v61  ;;  %vm2219_vm1 = vcmp.gt.f32.partialorder %v2201_v24, 0.0  ;;  %v2237_v31 = vmul.f32 0.01, %v2201_v24  ;;  %v2380_v38 = vsel %vm15350_vm6, %v2378_v60, %v2379_v45  ;;  %v2248_v32 = vsel %vm2212_vm15, %v14006_v30, %v2230_v3  ;;  %v11849_v61 = vld [vmem:[#allocation16 + $0x170] ss:$8 sps:$4 sm:$0xff]   ;;  %vm15352_vm15 = vmmov %vm15350_vm6 }
 0x4d2   :  { %v2251_v59 = vsel %vm2215_vm14, %v2197_v17, %v2233_v51  ;;  %v14034_v1 = vpack.c.bf16 %v2245_v19, %v2242_v33  ;;  %2668 = vmatprep.mubr.bf16.mxu1 %v2380_v38  ;;  %vm2222_vm3 = vcmp.gt.f32.partialorder %v2204_v15, 0.0  ;;  %v2240_v6 = vmul.f32 0.01, %v2204_v15  ;;  %v11872_v19 = vld [vmem:[#allocation16 + $0x34] ss:$8 sps:$4 sm:$0xff]  }
 0x4d3   :  { %v14036_v47 = vpack.c.bf16 %v2251_v59, %v2248_v32  ;;  %v2255_v29 = vsel %vm2219_vm1, %v2201_v24, %v2237_v31  ;;  %v2202_v8 = vadd.f32 %v13988_v36, %v13976_v53  ;;  %v2205_v30 = vadd.f32 %v13988_v36, %v13979_v20  ;;  %v11857_v24 = vld [vmem:[#allocation16 + $0x164] ss:$8 sps:$4 sm:$0xff]   ;;  %v11863_v38 = vld [vmem:[#allocation16 + $0x154] ss:$8 sps:$4 sm:$0xff]   ;;  %vm15353_vm1 = vmmov %vm15350_vm6 }
 0x4d4   :  { %v2375_v16 = vrot.slane %v14034_v1, 4  ;;  %2985 = vmatpush1.bf16.msra.mxu0 %v11852_v11  ;;  %v2200_v17 = vadd.f32 %v13985_v52, %v13982_v28  ;;  %v2258_v60 = vsel %vm2222_vm3, %v2204_v15, %v2240_v6  ;;  %v2203_v14 = vadd.f32 %v13985_v52, %v13996_v50  ;;  %v11864_v28 = vld [vmem:[#allocation16 + $0x40] ss:$8 sps:$4 sm:$0xff]   ;;  %vm15354_vm6 = vmmov %vm15353_vm1 }
 0x4d5   :  { %v2376_v18 = vrot.slane %v14036_v47, 4  ;;  %2986 = vmatprep.subr.bf16.mxu0 %v11860_v26  ;;  %v14048_v11 = vpack.c.bf16 %v2258_v60, %v2255_v29  ;;  %vm2220_vm14 = vcmp.gt.f32.partialorder %v2202_v8, 0.0  ;;  %vm2223_vm4 = vcmp.gt.f32.partialorder %v2205_v30, 0.0  ;;  %v11855_v50 = vld [vmem:[#allocation16 + $0x160] ss:$8 sps:$4 sm:$0xff]  }
 0x4d6   :  { %v2238_v53 = vmul.f32 0.01, %v2202_v8  ;;  %v2241_v36 = vmul.f32 0.01, %v2205_v30  ;;  %vm2218_vm2 = vcmp.gt.f32.partialorder %v2200_v17, 0.0  ;;  %vm2221_vm0 = vcmp.gt.f32.partialorder %v2203_v14, 0.0 }
 0x4d7   :  { %v2377_v20 = vsel %vm15351_vm9, %v2375_v16, %v2376_v18  ;;  %v2386_v3 = vrot.slane %v14048_v11, 4  ;;  %v2236_v15 = vmul.f32 0.01, %v2200_v17  ;;  %v2239_v52 = vmul.f32 0.01, %v2203_v14 }
 0x4d8   :  { %2669 = vmatmul.mubr.bf16.vlgmr.msra.gmra.mxu1 %v2377_v20  ;;  %v2256_v51 = vsel %vm2220_vm14, %v2202_v8, %v2238_v53  ;;  %2987 = vmatpush1.bf16.msra.mxu0 %v11858_v37  ;;  %v2259_v33 = vsel %vm2223_vm4, %v2205_v30, %v2241_v36  ;;  %v11861_v16 = vld [vmem:[#allocation16 + $0x150] ss:$8 sps:$4 sm:$0xff]   ;;  %v11869_v30 = vld [vmem:[#allocation16 + $0x144] ss:$8 sps:$4 sm:$0xff]   ;;  %v11867_v60 = vld [vmem:[#allocation16 + $0x140] ss:$8 sps:$4 sm:$0xff]   ;;  %vm15356_vm3 = vnez %v15234_v56  ;;  %vm15363_vm14 = vnez %v15255_v54 }
 0x4d9   :  { %3036 = vmatpush1.bf16.msra.mxu1 %v11849_v61  ;;  %2988 = vmatprep.subr.bf16.mxu0 %v11866_v23  ;;  %v2387_v31 = vsel %vm15352_vm15, %v2379_v45, %v2386_v3  ;;  %v14053_v26 = vpack.c.bf16 %v2259_v33, %v2256_v51  ;;  %v2254_v32 = vsel %vm2218_vm2, %v2200_v17, %v2236_v15  ;;  %v11870_v8 = vld [vmem:[#allocation16 + $0x30] ss:$8 sps:$4 sm:$0xff]   ;;  %v11878_v17 = vld [vmem:[#allocation16 + $0x24] ss:$8 sps:$4 sm:$0xff]   ;;  %v11875_v23 = vld [vmem:[#allocation16 + $0x134] ss:$8 sps:$4 sm:$0xff]  }
 0x4da   :  { %3037 = vmatprep.subr.bf16.mxu1 %v11857_v24  ;;  %v2257_v59 = vsel %vm2221_vm0, %v2203_v14, %v2239_v52  ;;  %2678 = vmatprep.mubr.bf16.mxu1 %v2387_v31  ;;  %v11876_v14 = vld [vmem:[#allocation16 + $0x20] ss:$8 sps:$4 sm:$0xff]   ;;  %v11884_v24 = vld [vmem:[#allocation16 + $0x14] ss:$8 sps:$4 sm:$0xff]   ;;  %v11882_v53 = vld [vmem:[#allocation16 + $0x10] ss:$8 sps:$4 sm:$0xff]   ;;  %vm15365_vm4 = vnez %v15364_v34  ;;  %vm15367_vm9 = vnez %v15366_v42  ;;  %vm15369_vm2 = vnez %v15368_v44 }
 0x4db   :  { %v14057_v6 = vpack.c.bf16 %v2257_v59, %v2254_v32  ;;  %v2388_v29 = vrot.slane %v14053_v26, 4  ;;  %v11881_v20 = vld [vmem:[#allocation16 + $0x124] ss:$8 sps:$4 sm:$0xff]   ;;  %v11888_v36 = vld [vmem:[#allocation16] ss:$8 sps:$4 sm:$0xff]   ;;  %vm15371_vm0 = vnez %v15370_v46  ;;  %vm15373_vm15 = vnez %v15372_v55 }
 0x4dc   :  { %2989 = vmatpush1.bf16.msra.mxu0 %v11864_v28  ;;  %v11887_v28 = vld [vmem:[#allocation16 + $0x114] ss:$8 sps:$4 sm:$0xff]   ;;  %v11885_v51 = vld [vmem:[#allocation16 + $0x110] ss:$8 sps:$4 sm:$0xff]   ;;  %v11893_v52 = vld [vmem:[#allocation16 + $0x104] ss:$8 sps:$4 sm:$0xff]  }
 0x4dd   :  { %3038 = vmatpush1.bf16.msra.mxu1 %v11855_v50  ;;  %v2384_v37 = vrot.slane %v14057_v6, 4  ;;  %2990 = vmatprep.subr.bf16.mxu0 %v11872_v19  ;;  %v2389_v45 = vsel %vm15353_vm1, %v2382_v49, %v2388_v29  ;;  %v11873_v49 = vld [vmem:[#allocation16 + $0x130] ss:$8 sps:$4 sm:$0xff]   ;;  %v11896_v3 = vld [vmem:[#allocation16 + $0xf4] ss:$8 sps:$4 sm:$0xff]   ;;  %v15374_v56 = vld [vmem:[#allocation81_spill] sm:$0xff] }
 0x4de   :  { %3039 = vmatprep.subr.bf16.mxu1 %v11863_v38  ;;  %2732 = vmatmul.mubr.bf16.gmra.mxu0 %v2389_v45  ;;  %v11894_v15 = vld [vmem:[#allocation16 + $0xf0] ss:$8 sps:$4 sm:$0xff]   ;;  %v11902_v50 = vld [vmem:[#allocation16 + $0xe4] ss:$8 sps:$4 sm:$0xff]   ;;  %v11891_v33 = vld [vmem:[#allocation16 + $0x100] ss:$8 sps:$4 sm:$0xff]   ;;  %vm15375_vm1 = vnez %v15374_v56 }
 0x4df   :  { %v2385_v61 = vsel %vm15354_vm6, %v2376_v18, %v2384_v37  ;;  %3014 = vmatprep.mubr.bf16.mxu0 %v14015_v40  ;;  %v11890_v18 = vld [vmem:[#allocation16 + $0x4] ss:$8 sps:$4 sm:$0xff]   ;;  %v11879_v40 = vld [vmem:[#allocation16 + $0x120] ss:$8 sps:$4 sm:$0xff]   ;;  %v11899_v31 = vld [vmem:[#allocation16 + $0x374] ss:$8 sps:$4 sm:$0xff]  }
 0x4e0   :  { %2679 = vmatmul.mubr.bf16.gmra.mxu1 %v2385_v61  ;;  %2991 = vmatpush1.bf16.msra.mxu0 %v11870_v8  ;;  %v11900_v19 = vld [vmem:[#allocation16 + $0xe0] ss:$8 sps:$4 sm:$0xff]   ;;  %v11908_v38 = vld [vmem:[#allocation16 + $0xd4] ss:$8 sps:$4 sm:$0xff]   ;;  %v11897_v32 = vld [vmem:[#allocation16 + $0x370] ss:$8 sps:$4 sm:$0xff]  }
 0x4e1   :  { %3040 = vmatpush1.bf16.msra.mxu1 %v11861_v16  ;;  %2992 = vmatprep.subr.bf16.mxu0 %v11878_v17  ;;  %v11906_v59 = vld [vmem:[#allocation16 + $0xd0] ss:$8 sps:$4 sm:$0xff]   ;;  %v11905_v29 = vld [vmem:[#allocation16 + $0x364] ss:$8 sps:$4 sm:$0xff]   ;;  %v11903_v37 = vld [vmem:[#allocation16 + $0x360] ss:$8 sps:$4 sm:$0xff]  }
 0x4e2   :  { %3041 = vmatprep.subr.bf16.mxu1 %v11869_v30  ;;  %3067 = vmatprep.mubr.bf16.mxu1 %v15347_v22  ;;  %v11914_v16 = vld [vmem:[#allocation16 + $0xc4] ss:$8 sps:$4 sm:$0xff]   ;;  %v11912_v8 = vld [vmem:[#allocation16 + $0xc0] ss:$8 sps:$4 sm:$0xff]   ;;  %v11911_v45 = vld [vmem:[#allocation16 + $0x354] ss:$8 sps:$4 sm:$0xff]  }
 0x4e3   :  { %v11920_v30 = vld [vmem:[#allocation16 + $0xb4] ss:$8 sps:$4 sm:$0xff]   ;;  %v11909_v17 = vld [vmem:[#allocation16 + $0x350] ss:$8 sps:$4 sm:$0xff]   ;;  %v11917_v61 = vld [vmem:[#allocation16 + $0x344] ss:$8 sps:$4 sm:$0xff]  }
 0x4e4   :  { %2993 = vmatpush1.bf16.msra.mxu0 %v11876_v14  ;;  %v11926_v14 = vld [vmem:[#allocation16 + $0xa4] ss:$8 sps:$4 sm:$0xff]  }
 0x4e5   :  { %3042 = vmatpush1.bf16.msra.mxu1 %v11867_v60  ;;  %2994 = vmatprep.subr.bf16.mxu0 %v11884_v24  ;;  %v11918_v60 = vld [vmem:[#allocation16 + $0xb0] ss:$8 sps:$4 sm:$0xff]   ;;  %v11924_v24 = vld [vmem:[#allocation16 + $0xa0] ss:$8 sps:$4 sm:$0xff]  }
 0x4e6   :  { %3043 = vmatprep.subr.bf16.mxu1 %v11875_v23  ;;  %v11923_v23 = vld [vmem:[#allocation16 + $0x334] ss:$8 sps:$4 sm:$0xff]  }
 0x4e7   :  { %v15387_v54 = vld [vmem:[#allocation94_spill] sm:$0xff] }
 0x4e8   :  { %2995 = vmatpush1.bf16.msra.mxu0 %v11882_v53  ;;  %v11921_v53 = vld [vmem:[#allocation16 + $0x330] ss:$8 sps:$4 sm:$0xff]  }
 0x4e9   :  { %3044 = vmatpush1.bf16.msra.mxu1 %v11873_v49  ;;  %2996 = vmatprep.subr.bf16.mxu0 %v11890_v18  ;;  %v11932_v49 = vld [vmem:[#allocation16 + $0x94] ss:$8 sps:$4 sm:$0xff]   ;;  %v11930_v18 = vld [vmem:[#allocation16 + $0x90] ss:$8 sps:$4 sm:$0xff]  }
 0x4ea   :  { %3045 = vmatprep.subr.bf16.mxu1 %v11881_v20  ;;  %v11929_v20 = vld [vmem:[#allocation16 + $0x324] ss:$8 sps:$4 sm:$0xff]  }
 0x4ec   :  { %2997 = vmatpush1.bf16.msra.mxu0 %v11888_v36  ;;  %v11927_v36 = vld [vmem:[#allocation16 + $0x320] ss:$8 sps:$4 sm:$0xff]  }
 0x4ed   :  { %3046 = vmatpush1.bf16.msra.mxu1 %v11879_v40  ;;  %2998 = vmatprep.subr.bf16.mxu0 %v11896_v3  ;;  %v11938_v40 = vld [vmem:[#allocation16 + $0x84] ss:$8 sps:$4 sm:$0xff]   ;;  %v11936_v3 = vld [vmem:[#allocation16 + $0x80] ss:$8 sps:$4 sm:$0xff]  }
 0x4ee   :  { %3047 = vmatprep.subr.bf16.mxu1 %v11887_v28  ;;  %v11935_v28 = vld [vmem:[#allocation16 + $0x314] ss:$8 sps:$4 sm:$0xff]  }
 0x4f0   :  { %2999 = vmatpush2.bf16.msra.mxu0 %v11894_v15  ;;  %v11933_v15 = vld [vmem:[#allocation16 + $0x310] ss:$8 sps:$4 sm:$0xff]  }
 0x4f1   :  { %3048 = vmatpush1.bf16.msra.mxu1 %v11885_v51  ;;  %3000 = vmatprep.subr.bf16.mxu0 %v11902_v50  ;;  %v11944_v51 = vld [vmem:[#allocation16 + $0x474] ss:$8 sps:$4 sm:$0xff]   ;;  %v11942_v50 = vld [vmem:[#allocation16 + $0x470] ss:$8 sps:$4 sm:$0xff]  }
 0x4f2   :  { %3049 = vmatprep.subr.bf16.mxu1 %v11893_v52  ;;  %v11941_v52 = vld [vmem:[#allocation16 + $0x304] ss:$8 sps:$4 sm:$0xff]  }
 0x4f4   :  { %3001 = vmatpush2.bf16.msra.mxu0 %v11900_v19  ;;  %v11939_v19 = vld [vmem:[#allocation16 + $0x300] ss:$8 sps:$4 sm:$0xff]  }
 0x4f5   :  { %3050 = vmatpush1.bf16.msra.mxu1 %v11891_v33  ;;  %3002 = vmatprep.subr.bf16.mxu0 %v11908_v38  ;;  %v11950_v33 = vld [vmem:[#allocation16 + $0x464] ss:$8 sps:$4 sm:$0xff]   ;;  %v11948_v38 = vld [vmem:[#allocation16 + $0x460] ss:$8 sps:$4 sm:$0xff]  }
 0x4f6   :  { %3377 = vmatprep.subr.bf16.mxu1 %v11899_v31  ;;  %v11947_v31 = vld [vmem:[#allocation16 + $0x3f4] ss:$8 sps:$4 sm:$0xff]  }
 0x4f8   :  { %3068 = vmatmul.mubr.bf16.vlgmr.msra.gmra.mxu1 %v14008_v21  ;;  %3003 = vmatpush2.bf16.msra.mxu0 %v11906_v59  ;;  %v11915_v21 = vld [vmem:[#allocation16 + $0x340] ss:$8 sps:$4 sm:$0xff]   ;;  %v11945_v59 = vld [vmem:[#allocation16 + $0x3f0] ss:$8 sps:$4 sm:$0xff]  }
 0x4f9   :  { %3378 = vmatpush1.bf16.msra.mxu1 %v11897_v32  ;;  %3077 = vmatprep.mubr.bf16.mxu1 %v15347_v22  ;;  %v11956_v32 = vld [vmem:[#allocation16 + $0x454] ss:$8 sps:$4 sm:$0xff]  }
 0x4fa   :  { %3379 = vmatprep.subr.bf16.mxu1 %v11905_v29  ;;  %3004 = vmatprep.subr.bf16.mxu0 %v11914_v16  ;;  %v11953_v29 = vld [vmem:[#allocation16 + $0x3e4] ss:$8 sps:$4 sm:$0xff]   ;;  %v11954_v16 = vld [vmem:[#allocation16 + $0x450] ss:$8 sps:$4 sm:$0xff]  }
 0x4fc   :  { %3005 = vmatpush2.bf16.msra.mxu0 %v11912_v8  ;;  %v11951_v8 = vld [vmem:[#allocation16 + $0x3e0] ss:$8 sps:$4 sm:$0xff]  }
 0x4fd   :  { %3380 = vmatpush1.bf16.msra.mxu1 %v11903_v37  ;;  %3006 = vmatprep.subr.bf16.mxu0 %v11920_v30  ;;  %v11962_v37 = vld [vmem:[#allocation16 + $0x444] ss:$8 sps:$4 sm:$0xff]   ;;  %v11957_v30 = vld [vmem:[#allocation16 + $0x3d0] ss:$8 sps:$4 sm:$0xff]  }
 0x4fe   :  { %3381 = vmatprep.subr.bf16.mxu1 %v11911_v45  ;;  %v11968_v45 = vld [vmem:[#allocation16 + $0x434] ss:$8 sps:$4 sm:$0xff]  }
 0x500   :  { %3078 = vmatmul.mubr.bf16.gmra.mxu1 %v14010_v10  ;;  %3007 = vmatpush2.bf16.msra.mxu0 %v11918_v60  ;;  %v11974_v60 = vld [vmem:[#allocation16 + $0x424] ss:$8 sps:$4 sm:$0xff]  }
 0x501   :  { %3382 = vmatpush1.bf16.msra.mxu1 %v11909_v17  ;;  %3409 = vmatprep.mubr.bf16.mxu1 %v14020_v12  ;;  %v11965_v17 = vld [vmem:[#allocation16 + $0x3c4] ss:$8 sps:$4 sm:$0xff]  }
 0x502   :  { %3383 = vmatprep.subr.bf16.mxu1 %v11917_v61  ;;  %3008 = vmatprep.subr.bf16.mxu0 %v11926_v14  ;;  %v11966_v61 = vld [vmem:[#allocation16 + $0x430] ss:$8 sps:$4 sm:$0xff]   ;;  %v11963_v14 = vld [vmem:[#allocation16 + $0x3c0] ss:$8 sps:$4 sm:$0xff]  }
 0x504   :  { %3009 = vmatpush2.bf16.msra.mxu0 %v11924_v24  ;;  %v11980_v24 = vld [vmem:[#allocation16 + $0x414] ss:$8 sps:$4 sm:$0xff]  }
 0x505   :  { %3384 = vmatpush1.bf16.msra.mxu1 %v11915_v21  ;;  %3010 = vmatprep.subr.bf16.mxu0 %v11932_v49  ;;  %v11971_v21 = vld [vmem:[#allocation16 + $0x3b4] ss:$8 sps:$4 sm:$0xff]   ;;  %v11969_v49 = vld [vmem:[#allocation16 + $0x3b0] ss:$8 sps:$4 sm:$0xff]  }
 0x506   :  { %3385 = vmatprep.subr.bf16.mxu1 %v11923_v23  ;;  %v11972_v23 = vld [vmem:[#allocation16 + $0x420] ss:$8 sps:$4 sm:$0xff]  }
 0x508   :  { %3011 = vmatpush2.bf16.msra.mxu0 %v11930_v18  ;;  %v11986_v18 = vld [vmem:[#allocation16 + $0x404] ss:$8 sps:$4 sm:$0xff]  }
 0x509   :  { %3386 = vmatpush1.bf16.msra.mxu1 %v11921_v53  ;;  %3012 = vmatprep.subr.bf16.mxu0 %v11938_v40  ;;  %v11977_v53 = vld [vmem:[#allocation16 + $0x3a4] ss:$8 sps:$4 sm:$0xff]   ;;  %v11975_v40 = vld [vmem:[#allocation16 + $0x3a0] ss:$8 sps:$4 sm:$0xff]  }
 0x50a   :  { %3387 = vmatprep.subr.bf16.mxu1 %v11929_v20  ;;  %v11978_v20 = vld [vmem:[#allocation16 + $0x410] ss:$8 sps:$4 sm:$0xff]  }
 0x50c   :  { %3013 = vmatpush2.bf16.msra.mxu0 %v11936_v3  ;;  %v11981_v3 = vld [vmem:[#allocation16 + $0x390] ss:$8 sps:$4 sm:$0xff]  }
 0x50d   :  { %3388 = vmatpush1.bf16.msra.mxu1 %v11927_v36  ;;  %3430 = vmatprep.subr.bf16.mxu0 %v11944_v51  ;;  %v11983_v36 = vld [vmem:[#allocation16 + $0x394] ss:$8 sps:$4 sm:$0xff]   ;;  %v11989_v51 = vld [vmem:[#allocation16 + $0x384] ss:$8 sps:$4 sm:$0xff]  }
 0x50e   :  { %3389 = vmatprep.subr.bf16.mxu1 %v11935_v28  ;;  %v11984_v28 = vld [vmem:[#allocation16 + $0x400] ss:$8 sps:$4 sm:$0xff]  }
 0x50f   :  { %3015 = vmatmul.mubr.bf16.vlgmr.msra.gmra.mxu0 %v14034_v1  ;;  %v11959_v1 = vld [vmem:[#allocation16 + $0x3d4] ss:$8 sps:$4 sm:$0xff]  }
 0x510   :  { %3024 = vmatprep.mubr.bf16.mxu0 %v14020_v12  ;;  %3431 = vmatpush1.bf16.msra.mxu0 %v11942_v50  ;;  %v11960_v12 = vld [vmem:[#allocation16 + $0x440] ss:$8 sps:$4 sm:$0xff]  }
 0x511   :  { %3390 = vmatpush1.bf16.msra.mxu1 %v11933_v15  ;;  %3432 = vmatprep.subr.bf16.mxu0 %v11950_v33 }
 0x512   :  { %3391 = vmatprep.subr.bf16.mxu1 %v11941_v52  ;;  %v11987_v52 = vld [vmem:[#allocation16 + $0x380] ss:$8 sps:$4 sm:$0xff]  }
 0x514   :  { %3433 = vmatpush1.bf16.msra.mxu0 %v11948_v38 }
 0x515   :  { %3392 = vmatpush1.bf16.msra.mxu1 %v11939_v19  ;;  %3434 = vmatprep.subr.bf16.mxu0 %v11956_v32 }
 0x516   :  { %3393 = vmatprep.subr.bf16.mxu1 %v11947_v31 }
 0x517   :  { %3025 = vmatmul.mubr.bf16.gmra.mxu0 %v14036_v47 }
 0x518   :  { %3462 = vmatprep.mubr.bf16.mxu0 %v15347_v22  ;;  %3435 = vmatpush1.bf16.msra.mxu0 %v11954_v16 }
 0x519   :  { %3394 = vmatpush2.bf16.msra.mxu1 %v11945_v59  ;;  %3436 = vmatprep.subr.bf16.mxu0 %v11962_v37 }
 0x51a   :  { %3395 = vmatprep.subr.bf16.mxu1 %v11953_v29 }
 0x51c   :  { %3437 = vmatpush1.bf16.msra.mxu0 %v11960_v12 }
 0x51d   :  { %3396 = vmatpush2.bf16.msra.mxu1 %v11951_v8  ;;  %3438 = vmatprep.subr.bf16.mxu0 %v11968_v45 }
 0x51e   :  { %3397 = vmatprep.subr.bf16.mxu1 %v11959_v1 }
 0x520   :  { %3439 = vmatpush1.bf16.msra.mxu0 %v11966_v61 }
 0x521   :  { %3398 = vmatpush2.bf16.msra.mxu1 %v11957_v30  ;;  %3440 = vmatprep.subr.bf16.mxu0 %v11974_v60 }
 0x522   :  { %3399 = vmatprep.subr.bf16.mxu1 %v11965_v17 }
 0x524   :  { %3441 = vmatpush1.bf16.msra.mxu0 %v11972_v23 }
 0x525   :  { %3400 = vmatpush2.bf16.msra.mxu1 %v11963_v14  ;;  %3442 = vmatprep.subr.bf16.mxu0 %v11980_v24 }
 0x526   :  { %3401 = vmatprep.subr.bf16.mxu1 %v11971_v21 }
 0x528   :  { %3443 = vmatpush1.bf16.msra.mxu0 %v11978_v20 }
 0x529   :  { %3402 = vmatpush2.bf16.msra.mxu1 %v11969_v49  ;;  %3444 = vmatprep.subr.bf16.mxu0 %v11986_v18 }
 0x52a   :  { %3403 = vmatprep.subr.bf16.mxu1 %v11977_v53 }
 0x52c   :  { %3445 = vmatpush1.bf16.msra.mxu0 %v11984_v28 }
 0x52d   :  { %3404 = vmatpush2.bf16.msra.mxu1 %v11975_v40  ;;  %11349 = vmatprep.subr.msk.mxu0 %vm12900_vm5, %v15231_v62 }
 0x52e   :  { %3405 = vmatprep.subr.bf16.mxu1 %v11983_v36 }
 0x52f   :  { %3463 = vmatmul.mubr.bf16.vlgmr.msra.gmra.mxu0 %v14010_v10  ;;  %v15391_v10 = vld [vmem:[#allocation98_spill] sm:$0xff] }
 0x530   :  { %3472 = vmatprep.mubr.bf16.mxu0 %v15347_v22  ;;  %11350 = vmatpush3.msk.msra.mxu0 %vm12918_vm7, %v15231_v62  ;;  %v15389_v22 = vld [vmem:[#allocation97_spill] sm:$0xff] }
 0x531   :  { %3406 = vmatpush2.bf16.msra.mxu1 %v11981_v3  ;;  %11351 = vmatprep.subr.msk.mxu0 %vm12929_vm8, %v15231_v62 }
 0x532   :  { %3407 = vmatprep.subr.bf16.mxu1 %v11989_v51  ;;  %11352 = vmatpush3.msk.msra.mxu0 %vm12939_vm10, %v15231_v62 }
 0x533   :  { %11353 = vmatprep.subr.msk.mxu0 %vm12951_vm11, %v15231_v62 }
 0x534   :  { %11354 = vmatpush3.msk.msra.mxu0 %vm12974_vm13, %v15231_v62 }
 0x535   :  { %3408 = vmatpush2.bf16.msra.mxu1 %v11987_v52  ;;  %11355 = vmatprep.subr.msk.mxu0 %vm15356_vm3, %v15231_v62 }
 0x536   :  { %11384 = vmatprep.subr.msk.mxu1 %vm12900_vm5, %v15231_v62  ;;  %vm15357_vm5 = vnez %v15237_v9  ;;  %v15376_v9 = vld [vmem:[#allocation82_spill] sm:$0xff] }
 0x537   :  { %3473 = vmatmul.mubr.bf16.gmra.mxu0 %v14053_v26  ;;  %vm15377_vm6 = vnez %v15376_v9  ;;  %v15397_v26 = vld [vmem:[#allocation102_spill] sm:$0xff] }
 0x538   :  { %3410 = vmatmul.mubr.bf16.vlgmr.msra.gmra.mxu1 %v14036_v47  ;;  %11356 = vmatpush3.msk.msra.mxu0 %vm15357_vm5, %v15231_v62  ;;  %v15393_v47 = vld [vmem:[#allocation100_spill] sm:$0xff] }
 0x539   :  { %3419 = vmatprep.mubr.bf16.mxu1 %v14048_v11  ;;  %11385 = vmatpush3.msk.msra.mxu1 %vm12918_vm7, %v15231_v62  ;;  %vm15358_vm7 = vnez %v15239_v4  ;;  %v15378_v4 = vld [vmem:[#allocation85_spill] sm:$0xff] }
 0x53a   :  { %11386 = vmatprep.subr.msk.mxu1 %vm12929_vm8, %v15231_v62  ;;  %11357 = vmatprep.subr.msk.mxu0 %vm15358_vm7, %v15231_v62  ;;  %vm15359_vm8 = vnez %v15243_v39  ;;  %v15380_v39 = vld [vmem:[#allocation86_spill] sm:$0xff]  ;;  %v15395_v11 = vld [vmem:[#allocation101_spill] sm:$0xff] }
 0x53b   :  { %11387 = vmatpush3.msk.msra.mxu1 %vm12939_vm10, %v15231_v62  ;;  %11358 = vmatpush3.msk.msra.mxu0 %vm15359_vm8, %v15231_v62  ;;  %vm15360_vm10 = vnez %v15245_v7  ;;  %v15382_v7 = vld [vmem:[#allocation90_spill] sm:$0xff] }
 0x53c   :  { %11388 = vmatprep.subr.msk.mxu1 %vm12951_vm11, %v15231_v62  ;;  %11359 = vmatprep.subr.msk.mxu0 %vm15360_vm10, %v15231_v62  ;;  %vm15361_vm11 = vnez %v15249_v58  ;;  %v15384_v58 = vld [vmem:[#allocation91_spill] sm:$0xff] }
 0x53d   :  { %11389 = vmatpush3.msk.msra.mxu1 %vm12974_vm13, %v15231_v62  ;;  %11360 = vmatpush3.msk.msra.mxu0 %vm15361_vm11, %v15231_v62  ;;  %vm15362_vm13 = vnez %v15251_v25 }
 0x53e   :  { %11390 = vmatprep.subr.msk.mxu1 %vm15356_vm3, %v15231_v62  ;;  %11361 = vmatprep.subr.msk.mxu0 %vm15362_vm13, %v15231_v62  ;;  %vm15379_vm3 = vnez %v15378_v4 }
 0x53f   :  { %11391 = vmatpush3.msk.msra.mxu1 %vm15357_vm5, %v15231_v62  ;;  %11362 = vmatpush3.msk.msra.mxu0 %vm15363_vm14, %v15231_v62  ;;  %vm15381_vm5 = vnez %v15380_v39 }
 0x540   :  { %3420 = vmatmul.mubr.bf16.gmra.mxu1 %v14057_v6  ;;  %11392 = vmatprep.subr.msk.mxu1 %vm15358_vm7, %v15231_v62  ;;  %vm15383_vm7 = vnez %v15382_v7  ;;  %v3914_v6 = vld [vmem:[#allocation22 + $0x18] sm:$0xf] }
 0x541   :  { %11393 = vmatpush3.msk.msra.mxu1 %vm15359_vm8, %v15231_v62  ;;  %11363 = vmatprep.subr.msk.mxu0 %vm15365_vm4, %v15231_v62  ;;  %vm15385_vm8 = vnez %v15384_v58 }
 0x542   :  { %11394 = vmatprep.subr.msk.mxu1 %vm15360_vm10, %v15231_v62  ;;  %11364 = vmatpush3.msk.msra.mxu0 %vm15367_vm9, %v15231_v62  ;;  %vm15388_vm10 = vnez %v15387_v54 }
 0x543   :  { %11395 = vmatpush3.msk.msra.mxu1 %vm15361_vm11, %v15231_v62  ;;  %11365 = vmatprep.subr.msk.mxu0 %vm15369_vm2, %v15231_v62  ;;  %vm15390_vm11 = vnez %v15389_v22 }
 0x544   :  { %11396 = vmatprep.subr.msk.mxu1 %vm15362_vm13, %v15231_v62  ;;  %11366 = vmatpush3.msk.msra.mxu0 %vm15371_vm0, %v15231_v62  ;;  %vm15392_vm13 = vnez %v15391_v10 }
 0x545   :  { %11397 = vmatpush3.msk.msra.mxu1 %vm15363_vm14, %v15231_v62  ;;  %11367 = vmatprep.subr.msk.mxu0 %vm15373_vm15, %v15231_v62  ;;  %vm15394_vm14 = vnez %v15393_v47 }
 0x546   :  { %11398 = vmatprep.subr.msk.mxu1 %vm15365_vm4, %v15231_v62  ;;  %11368 = vmatpush3.msk.msra.mxu0 %vm15375_vm1, %v15231_v62  ;;  %vm15396_vm4 = vnez %v15395_v11  ;;  %v3491_v11 = vld [vmem:[#allocation18] sm:$0x3] }
 0x547   :  { %11399 = vmatpush3.msk.msra.mxu1 %vm15367_vm9, %v15231_v62  ;;  %11369 = vmatprep.subr.msk.mxu0 %vm15377_vm6, %v15231_v62  ;;  %vm15399_vm9 = vcmp.eq.s32.totalorder %v13693_v43, %v15306_v57 }
 0x548   :  { %11400 = vmatprep.subr.msk.mxu1 %vm15369_vm2, %v15231_v62  ;;  %11370 = vmatpush3.msk.msra.mxu0 %vm15379_vm3, %v15231_v62  ;;  %vm15400_vm2 = vcmask 1043456  }
 0x549   :  { %11401 = vmatpush3.msk.msra.mxu1 %vm15371_vm0, %v15231_v62  ;;  %11371 = vmatprep.subr.msk.mxu0 %vm15381_vm5, %v15231_v62  ;;  %vm15402_vm0 = vcmp.eq.s32.totalorder %v13696_v0, %v15306_v57 }
 0x54a   :  { %11402 = vmatprep.subr.msk.mxu1 %vm15373_vm15, %v15231_v62  ;;  %11372 = vmatpush3.msk.msra.mxu0 %vm15383_vm7, %v15231_v62  ;;  %vm15403_vm15 = vcmp.eq.s32.totalorder %v13693_v43, %v15307_v35 }
 0x54b   :  { %11403 = vmatpush3.msk.msra.mxu1 %vm15375_vm1, %v15231_v62  ;;  %11373 = vmatprep.subr.msk.mxu0 %vm15385_vm8, %v15231_v62  ;;  %vm15404_vm1 = vmmov %vm15400_vm2 }
 0x54c   :  { %11404 = vmatprep.subr.msk.mxu1 %vm15377_vm6, %v15231_v62  ;;  %11374 = vmatpush3.msk.msra.mxu0 %vm15292_vm12, %v15231_v62  ;;  %vm3927_vm6 = vcmask 97280  }
 0x54d   :  { %11405 = vmatpush3.msk.msra.mxu1 %vm15379_vm3, %v15231_v62  ;;  %11375 = vmatprep.subr.msk.mxu0 %vm15388_vm10, %v15231_v62  ;;  %vm15405_vm3 = vcmp.eq.s32.totalorder %v13696_v0, %v15307_v35 }
 0x54e   :  { %11406 = vmatprep.subr.msk.mxu1 %vm15381_vm5, %v15231_v62  ;;  %11376 = vmatpush3.msk.msra.mxu0 %vm15390_vm11, %v15231_v62  ;;  %vm15406_vm5 = vcmp.eq.s32.totalorder %v13693_v43, %v15308_v2 }
 0x54f   :  { %11407 = vmatpush3.msk.msra.mxu1 %vm15383_vm7, %v15231_v62  ;;  %11377 = vmatprep.subr.msk.mxu0 %vm15392_vm13, %v15231_v62  ;;  %vm15407_vm7 = vcmp.eq.s32.totalorder %v13696_v0, %v15308_v2 }
 0x550   :  { %11408 = vmatprep.subr.msk.mxu1 %vm15385_vm8, %v15231_v62  ;;  %11378 = vmatpush3.msk.msra.mxu0 %vm15394_vm14, %v15231_v62  ;;  %vm15408_vm8 = vcmp.eq.s32.totalorder %v13693_v43, %v15310_v13 }
 0x551   :  { %11409 = vmatpush3.msk.msra.mxu1 %vm15292_vm12, %v15231_v62  ;;  %11379 = vmatprep.subr.msk.mxu0 %vm15396_vm4, %v15231_v62  ;;  %vm15398_vm12 = vnez %v15397_v26 }
 0x552   :  { %11410 = vmatprep.subr.msk.mxu1 %vm15388_vm10, %v15231_v62  ;;  %11380 = vmatpush3.msk.msra.mxu0 %vm15398_vm12, %v15231_v62  ;;  %vm15409_vm10 = vcmp.eq.s32.totalorder %v13696_v0, %v15310_v13 }
 0x553   :  { %11411 = vmatpush3.msk.msra.mxu1 %vm15390_vm11, %v15231_v62  ;;  %10453 = vmatprep.subr.msk.mxu0 %vm15399_vm9, %v15231_v62  ;;  %vm15410_vm11 = vcmp.eq.s32.totalorder %v13693_v43, %v15312_v48 }
 0x554   :  { %11412 = vmatprep.subr.msk.mxu1 %vm15392_vm13, %v15231_v62  ;;  %vm15411_vm13 = vcmp.eq.s32.totalorder %v13696_v0, %v15312_v48 }
 0x555   :  { %11413 = vmatpush3.msk.msra.mxu1 %vm15394_vm14, %v15231_v62 }
 0x556   :  { %11414 = vmatprep.subr.msk.mxu1 %vm15396_vm4, %v15231_v62 }
 0x557   :  { %11415 = vmatpush3.msk.msra.mxu1 %vm15398_vm12, %v15231_v62 }
 0x558   :  { %10487 = vmatprep.subr.msk.mxu1 %vm15400_vm2, %v3914_v6 }
 0x58f   :  { %v2723_v50 = vpop.f32.mrf.mxu0 }
 0x591   :  { %v2725_v33 = vpop.f32.mrf.mxu0 }
 0x593   :  { %v2727_v31 = vpop.f32.mrf.mxu0 }
 0x595   :  { %v2729_v32 = vpop.f32.mrf.mxu0 }
 0x598   :  { %v2670_v19 = vpop.f32.mrf.mxu1 }
 0x599   :  { %v2724_v34 = vadd.f32 %v2723_v50, %v2670_v19 }
 0x59a   :  { %v2672_v38 = vpop.f32.mrf.mxu1 }
 0x59b   :  { %v2726_v55 = vadd.f32 %v2725_v33, %v2672_v38  ;;  %v3496_v38 = vrot.slane %v3491_v11, %v15348_v27 }
 0x59c   :  { %v2674_v59 = vpop.f32.mrf.mxu1 }
 0x59d   :  { %v2728_v46 = vadd.f32 %v2727_v31, %v2674_v59 }
 0x59e   :  { %v2733_v29 = vpop.f32.mrf.mxu0  ;;  %v2676_v16 = vpop.f32.mrf.mxu1 }
 0x59f   :  { %v2730_v39 = vadd.f32 %v2729_v32, %v2676_v16 }
 0x5a0   :  { %v2735_v37 = vpop.f32.mrf.mxu0  ;;  %v2680_v8 = vpop.f32.mrf.mxu1 }
 0x5a1   :  { %v2734_v22 = vadd.f32 %v2733_v29, %v2680_v8 }
 0x5a2   :  { %v2737_v1 = vpop.f32.mrf.mxu0  ;;  %v2682_v12 = vpop.f32.mrf.mxu1 }
 0x5a3   :  { %v2736_v31 = vadd.f32 %v2735_v37, %v2682_v12 }
 0x5a4   :  { %v2739_v45 = vpop.f32.mrf.mxu0  ;;  %v2684_v30 = vpop.f32.mrf.mxu1 }
 0x5a5   :  { %v2738_v29 = vadd.f32 %v2737_v1, %v2684_v30 }
 0x5a6   :  { %v2686_v61 = vpop.f32.mrf.mxu1 }
 0x5a7   :  { %v2740_v8 = vadd.f32 %v2739_v45, %v2686_v61 }
 0x5b8   :  { %v3069_v14 = vpop.f32.mrf.mxu1 }
 0x5ba   :  { %v3071_v23 = vpop.f32.mrf.mxu1 }
 0x5bc   :  { %v3073_v49 = vpop.f32.mrf.mxu1 }
 0x5be   :  { %v3075_v20 = vpop.f32.mrf.mxu1 }
 0x5c0   :  { %v3079_v40 = vpop.f32.mrf.mxu1 }
 0x5c2   :  { %v3081_v28 = vpop.f32.mrf.mxu1 }
 0x5c4   :  { %v3083_v51 = vpop.f32.mrf.mxu1 }
 0x5c6   :  { %v3085_v42 = vpop.f32.mrf.mxu1 }
 0x5cf   :  { %v3016_v17 = vpop.f32.mrf.mxu0 }
 0x5d0   :  { %v3017_v56 = vadd.f32 %v3016_v17, %v2724_v34 }
 0x5d1   :  { %v3018_v60 = vpop.f32.mrf.mxu0 }
 0x5d2   :  { %v3019_v58 = vadd.f32 %v3018_v60, %v2726_v55  ;;  %v3070_v26 = vadd.f32 %v3069_v14, %v3017_v56 }
 0x5d3   :  { %v3020_v21 = vpop.f32.mrf.mxu0 }
 0x5d4   :  { %v3021_v7 = vadd.f32 %v3020_v21, %v2728_v46  ;;  %v3072_v33 = vadd.f32 %v3071_v23, %v3019_v58 }
 0x5d5   :  { %v3022_v24 = vpop.f32.mrf.mxu0 }
 0x5d6   :  { %v3023_v10 = vadd.f32 %v3022_v24, %v2730_v39  ;;  %v3074_v5 = vadd.f32 %v3073_v49, %v3021_v7 }
 0x5d7   :  { %v3026_v53 = vpop.f32.mrf.mxu0 }
 0x5d8   :  { %v3027_v50 = vadd.f32 %v3026_v53, %v2734_v22  ;;  %v3076_v16 = vadd.f32 %v3075_v20, %v3023_v10 }
 0x5d9   :  { %v3028_v18 = vpop.f32.mrf.mxu0 }
 0x5da   :  { %v3029_v24 = vadd.f32 %v3028_v18, %v2736_v31  ;;  %v3080_v49 = vadd.f32 %v3079_v40, %v3027_v50 }
 0x5db   :  { %v3030_v36 = vpop.f32.mrf.mxu0 }
 0x5dc   :  { %v3031_v37 = vadd.f32 %v3030_v36, %v2738_v29  ;;  %v3082_v1 = vadd.f32 %v3081_v28, %v3029_v24 }
 0x5dd   :  { %v3032_v3 = vpop.f32.mrf.mxu0 }
 0x5de   :  { %v3033_v55 = vadd.f32 %v3032_v3, %v2740_v8  ;;  %v3084_v40 = vadd.f32 %v3083_v51, %v3031_v37 }
 0x5e0   :  { %v3086_v39 = vadd.f32 %v3085_v42, %v3033_v55 }
 0x5ef   :  { %v3464_v15 = vpop.f32.mrf.mxu0 }
 0x5f1   :  { %v3466_v52 = vpop.f32.mrf.mxu0 }
 0x5f3   :  { %v3468_v44 = vpop.f32.mrf.mxu0 }
 0x5f5   :  { %v3470_v4 = vpop.f32.mrf.mxu0 }
 0x5f7   :  { %v3474_v54 = vpop.f32.mrf.mxu0 }
 0x5f8   :  { %v3411_v9 = vpop.f32.mrf.mxu1 }
 0x5f9   :  { %v3465_v47 = vadd.f32 %v3464_v15, %v3411_v9  ;;  %v3476_v32 = vpop.f32.mrf.mxu0  ;;  %v15401_v15 = vld [vmem:[#allocation105_spill] sm:$0xff] }
 0x5fa   :  { %v3413_v25 = vpop.f32.mrf.mxu1  ;;  %v3500_v14 = vrot.slane %v3491_v11, %v15401_v15 }
 0x5fb   :  { %v3467_v19 = vadd.f32 %v3466_v52, %v3413_v25  ;;  %v3483_v17 = vadd.f32 %v3465_v47, %v3070_v26  ;;  %v3478_v23 = vpop.f32.mrf.mxu0 }
 0x5fc   :  { %v3415_v6 = vpop.f32.mrf.mxu1 }
 0x5fd   :  { %v3469_v41 = vadd.f32 %v3468_v44, %v3415_v6  ;;  %v3484_v53 = vadd.f32 %v3467_v19, %v3072_v33  ;;  %v14282_v20 = vadd.f32 %v3496_v38, %v3483_v17  ;;  %v3480_v9 = vpop.f32.mrf.mxu0 }
 0x5fe   :  { %v3417_v59 = vpop.f32.mrf.mxu1 }
 0x5ff   :  { %v3485_v60 = vadd.f32 %v3469_v41, %v3074_v5  ;;  %v3471_v21 = vadd.f32 %v3470_v4, %v3417_v59  ;;  %v14286_v61 = vadd.f32 %v3500_v14, %v3484_v53  ;;  %v3531_v7 = vmul.f32 %v14282_v20, %v14282_v20 }
 0x600   :  { %v3421_v34 = vpop.f32.mrf.mxu1 }
 0x601   :  { %v3486_v52 = vadd.f32 %v3471_v21, %v3076_v16  ;;  %v3475_v44 = vadd.f32 %v3474_v54, %v3421_v34  ;;  %v14280_v12 = vadd.f32 %v3496_v38, %v3485_v60  ;;  %v3532_v10 = vmul.f32 %v14286_v61, %v14286_v61 }
 0x602   :  { %v3423_v46 = vpop.f32.mrf.mxu1 }
 0x603   :  { %v14284_v41 = vadd.f32 %v3500_v14, %v3486_v52  ;;  %v3487_v5 = vadd.f32 %v3475_v44, %v3080_v49  ;;  %v3477_v45 = vadd.f32 %v3476_v32, %v3423_v46  ;;  %v3533_v36 = vmul.f32 %v14280_v12, %v14280_v12 }
 0x604   :  { %v3425_v30 = vpop.f32.mrf.mxu1  ;;  %v3513_v25 = vadd.f32 %v14280_v12, %v14282_v20 }
 0x605   :  { %v14288_v18 = vadd.f32 %v3496_v38, %v3487_v5  ;;  %v3488_v56 = vadd.f32 %v3477_v45, %v3082_v1  ;;  %v3479_v4 = vadd.f32 %v3478_v23, %v3425_v30  ;;  %v3534_v28 = vmul.f32 %v14284_v41, %v14284_v41 }
 0x606   :  { %v3427_v3 = vpop.f32.mrf.mxu1  ;;  %v3522_v42 = vadd.f32 %v14284_v41, %v14286_v61  ;;  %v3539_v11 = vadd.f32 %v3533_v36, %v3531_v7 }
 0x607   :  { %v3481_v58 = vadd.f32 %v3480_v9, %v3427_v3  ;;  %v3535_v51 = vmul.f32 %v14288_v18, %v14288_v18  ;;  %v14300_v54 = vadd.f32 %v3500_v14, %v3488_v56  ;;  %v3489_v22 = vadd.f32 %v3479_v4, %v3084_v40 }
 0x608   :  { %v3514_v26 = vadd.f32 %v3513_v25, %v14288_v18  ;;  %v3548_v19 = vadd.f32 %v3534_v28, %v3532_v10  ;;  %v3913_v28 = vld [vmem:[#allocation22 + $0x10] sm:$0xf]  ;;  %v3911_v25 = vld [vmem:[#allocation22] sm:$0xff] }
 0x609   :  { %v3490_v47 = vadd.f32 %v3481_v58, %v3086_v39  ;;  %v3536_v6 = vmul.f32 %v14300_v54, %v14300_v54  ;;  %v14309_v50 = vadd.f32 %v3496_v38, %v3489_v22  ;;  %v3523_v31 = vadd.f32 %v3522_v42, %v14300_v54  ;;  %v3912_v58 = vld [vmem:[#allocation22 + $0x8] sm:$0xff]  ;;  %v15412_v22 = vld [vmem:[#allocation89_spill] sm:$0xff]  ;;  %v15415_v10 = vld [vmem:[#allocation95_spill] sm:$0xff] }
 0x60a   :  { %v3540_v59 = vadd.f32 %v3539_v11, %v3535_v51  ;;  %v3910_v51 = vld [vmem:[#allocation4] sm:$0xff]  ;;  %vm15413_vm14 = vcmp.eq.s32.totalorder %v13693_v43, %v15412_v22  ;;  %vm15414_vm4 = vcmp.eq.s32.totalorder %v13696_v0, %v15412_v22  ;;  %vm15416_vm12 = vcmp.eq.s32.totalorder %v13693_v43, %v15415_v10  ;;  %v15418_v42 = vld [vmem:[#allocation54_spill] sm:$0xff]  ;;  %v3915_v11 = vld [vmem:[#allocation24] sm:$0x3] }
 0x60b   :  { %v14312_v33 = vadd.f32 %v3500_v14, %v3490_v47  ;;  %v3515_v32 = vadd.f32 %v3514_v26, %v14309_v50  ;;  %v3537_v16 = vmul.f32 %v14309_v50, %v14309_v50  ;;  %v3549_v17 = vadd.f32 %v3548_v19, %v3536_v6 }
 0x60c   :  { %vm15417_vm9 = vcmp.eq.s32.totalorder %v13696_v0, %v15415_v10  ;;  %vm15419_vm2 = vcmp.eq.s32.totalorder %v13693_v43, %v15418_v42 }
 0x60d   :  { %v3524_v60 = vadd.f32 %v3523_v31, %v14312_v33  ;;  %v3538_v21 = vmul.f32 %v14312_v33, %v14312_v33  ;;  %v3516_v29 = vrot.slane %v3515_v32, 4  ;;  %v3541_v38 = vadd.f32 %v3540_v59, %v3537_v16 }
 0x60e   :  { %v3920_v31 = vrot.slane %v3915_v11, %v15348_v27 }
 0x60f   :  { %v3525_v8 = vrot.slane %v3524_v60, 4  ;;  %v3550_v24 = vadd.f32 %v3549_v17, %v3538_v21  ;;  %v3517_v34 = vadd.f32 %v3516_v29, %v3515_v32  ;;  %v3542_v49 = vrot.slane %v3541_v38, 4 }
 0x610   :  { %v3924_v17 = vrot.slane %v3915_v11, %v15401_v15 }
 0x611   :  { %v3526_v14 = vadd.f32 %v3525_v8, %v3524_v60  ;;  %v3551_v53 = vrot.slane %v3550_v24, 4  ;;  %v3518_v52 = vrot.slane %v3517_v34, 2  ;;  %v3543_v44 = vadd.f32 %v3542_v49, %v3541_v38 }
 0x613   :  { %v3527_v37 = vrot.slane %v3526_v14, 2  ;;  %v3552_v23 = vadd.f32 %v3551_v53, %v3550_v24  ;;  %v3519_v46 = vadd.f32 %v3518_v52, %v3517_v34  ;;  %v3544_v55 = vrot.slane %v3543_v44, 2 }
 0x615   :  { %v3528_v5 = vadd.f32 %v3527_v37, %v3526_v14  ;;  %v3553_v1 = vrot.slane %v3552_v23, 2  ;;  %v3520_v45 = vrot.slane %v3519_v46, 1  ;;  %v3545_v30 = vadd.f32 %v3544_v55, %v3543_v44 }
 0x617   :  { %v3529_v40 = vrot.slane %v3528_v5, 1  ;;  %v3554_v36 = vadd.f32 %v3553_v1, %v3552_v23  ;;  %v3546_v56 = vrot.slane %v3545_v30, 1  ;;  %v3521_v3 = vadd.f32 %v3520_v45, %v3519_v46 }
 0x619   :  { %v3530_v9 = vadd.f32 %v3529_v40, %v3528_v5  ;;  %v3555_v4 = vrot.slane %v3554_v36, 1  ;;  %v3547_v7 = vadd.f32 %v3546_v56, %v3545_v30 }
 0x61b   :  { %3621 = vmatprep.mubr.f32.mxu0 %v3530_v9  ;;  %v3556_v39 = vadd.f32 %v3555_v4, %v3554_v36 }
 0x61c   :  { %3622 = vmatmul.mubr.f32.vlgmr.msra.gmra.mxu0 %v3521_v3 }
 0x61d   :  { %3692 = vmatprep.mubr.f32.mxu1 %v3556_v39  ;;  %10454 = vmatpush1.msk.msra.mxu0 %vm15402_vm0, %v15231_v62  ;;  %vm15420_vm0 = vcmp.eq.s32.totalorder %v13696_v0, %v15418_v42 }
 0x61e   :  { %3693 = vmatmul.mubr.f32.vlgmr.msra.gmra.mxu1 %v3547_v7  ;;  %10455 = vmatprep.subr.msk.mxu0 %vm15403_vm15, %v15231_v62  ;;  %vm15421_vm15 = vcmp.eq.s32.totalorder %v13693_v43, %v15306_v57 }
 0x61f   :  { %10488 = vmatpush1.msk.msra.mxu1 %vm15404_vm1, %v3913_v28  ;;  %4002 = vmatprep.mubr.f32.mxu1 %v15232_v63  ;;  %vm15422_vm1 = vcmask 523264  }
 0x620   :  { %3968 = vmatprep.subr.mxu1 %v3912_v58  ;;  %10456 = vmatpush1.msk.msra.mxu0 %vm15405_vm3, %v15231_v62  ;;  %vm15424_vm3 = vcmp.eq.s32.totalorder %v13693_v43, %v15307_v35 }
 0x621   :  { %3969 = vmatpush1.msra.mxu1 %v3911_v25  ;;  %10457 = vmatprep.subr.msk.mxu0 %vm15406_vm5, %v15231_v62  ;;  %vm15425_vm5 = vcmp.eq.s32.totalorder %v13696_v0, %v15307_v35 }
 0x622   :  { %10489 = vmatmul.mubr.msk.f32.vlgmr.msra.gmra.mxu1 %vm3927_vm6, %v3910_v51  ;;  %10458 = vmatpush1.msk.msra.mxu0 %vm15407_vm7, %v15231_v62  ;;  %vm15423_vm6 = vcmp.eq.s32.totalorder %v13696_v0, %v15306_v57  ;;  %vm15426_vm7 = vcmp.eq.s32.totalorder %v13693_v43, %v15308_v2 }
 0x623   :  { %10459 = vmatprep.subr.msk.mxu0 %vm15408_vm8, %v15231_v62  ;;  %3773 = vmatprep.mubr.f32.mxu0 %v15232_v63  ;;  %vm15427_vm8 = vcmp.eq.s32.totalorder %v13696_v0, %v15308_v2  ;;  %v3512_v2 = vld [vmem:[#allocation21] sm:$0x1] }
 0x624   :  { %10460 = vmatpush1.msk.msra.mxu0 %vm15409_vm10, %v15231_v62  ;;  %vm15428_vm10 = vcmp.eq.s32.totalorder %v13693_v43, %v15310_v13 }
 0x625   :  { %10461 = vmatprep.subr.msk.mxu0 %vm15410_vm11, %v15231_v62  ;;  %vm15429_vm11 = vcmp.eq.s32.totalorder %v13696_v0, %v15310_v13  ;;  %v12576_v13 = vmov 1966171168  }
 0x626   :  { %10462 = vmatpush1.msk.msra.mxu0 %vm15411_vm13, %v15231_v62  ;;  %vm15430_vm13 = vcmp.eq.s32.totalorder %v13693_v43, %v15312_v48 }
 0x627   :  { %10463 = vmatprep.subr.msk.mxu0 %vm15413_vm14, %v15231_v62  ;;  %vm15431_vm14 = vcmp.eq.s32.totalorder %v13696_v0, %v15312_v48 }
 0x628   :  { %10464 = vmatpush1.msk.msra.mxu0 %vm15414_vm4, %v15231_v62  ;;  %vm15432_vm4 = vcmp.eq.s32.totalorder %v13693_v43, %v15412_v22 }
 0x629   :  { %10465 = vmatprep.subr.msk.mxu0 %vm15416_vm12, %v15231_v62  ;;  %vm15433_vm12 = vcmp.eq.s32.totalorder %v13696_v0, %v15412_v22 }
 0x62a   :  { %10466 = vmatpush1.msk.msra.mxu0 %vm15417_vm9, %v15231_v62  ;;  %vm15434_vm9 = vcmp.eq.s32.totalorder %v13693_v43, %v15415_v10 }
 0x62b   :  { %10467 = vmatprep.subr.msk.mxu0 %vm15419_vm2, %v15231_v62  ;;  %vm15435_vm2 = vcmp.eq.s32.totalorder %v13696_v0, %v15415_v10 }
 0x62c   :  { %10468 = vmatpush1.msk.msra.mxu0 %vm15420_vm0, %v15231_v62  ;;  %vm15436_vm0 = vcmp.eq.s32.totalorder %v13693_v43, %v15418_v42 }
 0x62d   :  { %10470 = vmatprep.subr.msk.mxu0 %vm15421_vm15, %v15231_v62  ;;  %vm15437_vm15 = vcmp.eq.s32.totalorder %v13696_v0, %v15418_v42 }
 0x6dc   :  { %v11381_v47 = vpop.f32.mrf.mxu0 }
 0x6de   :  { %v11382_v26 = vpop.f32.mrf.mxu0  ;;  %v11416_v6 = vpop.f32.mrf.mxu1 }
 0x6df   :  { %v11383_v19 = vadd.f32 %v11382_v26, %v11381_v47 }
 0x6e0   :  { %v11417_v59 = vpop.f32.mrf.mxu1 }
 0x6e1   :  { %v14388_v32 = vmul.f32 0.0078125, %v11383_v19  ;;  %v11418_v16 = vadd.f32 %v11417_v59, %v11416_v6 }
 0x6e2   :  { %v4004_v60 = vpop.f32.mrf.mxu1 }
 0x6e3   :  { %v3699_v21 = vmul.f32 %v14388_v32, %v14388_v32  ;;  %v3698_v29 = vmul.f32 0.0078125, %v11418_v16  ;;  %v14393_v38 = vadd.f32 %v4004_v60, %v3920_v31  ;;  %v3511_v31 = vld [vmem:[#allocation19] sm:$0x1] }
 0x6e4   :  { %v4006_v8 = vpop.f32.mrf.mxu1 }
 0x6e5   :  { %v3700_v24 = vsub.f32 %v3698_v29, %v3699_v21  ;;  %v4011_v34 = vrot.slane %v14393_v38, 4  ;;  %v4025_v49 = vmul.f32 %v14393_v38, %v14393_v38  ;;  %v14398_v14 = vadd.f32 %v4006_v8, %v3924_v17 }
 0x6e7   :  { %v3701_v53 = vadd.f32 1e-05, %v3700_v24  ;;  %v4012_v52 = vadd.f32 %v4011_v34, %v14393_v38  ;;  %v4027_v44 = vrot.slane %v4025_v49, 4  ;;  %v4017_v37 = vrot.slane %v14398_v14, 4 }
 0x6e8   :  { %v4026_v23 = vmul.f32 %v14398_v14, %v14398_v14 }
 0x6e9   :  { %11992 = vrsqrt.f32 %v3701_v53  ;;  %v4013_v46 = vrot.slane %v4012_v52, 2  ;;  %v4028_v55 = vadd.f32 %v4027_v44, %v4025_v49  ;;  %v4018_v5 = vadd.f32 %v4017_v37, %v14398_v14 }
 0x6ea   :  { %v4033_v1 = vrot.slane %v4026_v23, 4  ;;  %v4068_v49 = vunpack.c.l.s4 %v12576_v13 }
 0x6eb   :  { %v4014_v45 = vadd.f32 %v4013_v46, %v4012_v52  ;;  %v4029_v30 = vrot.slane %v4028_v55, 2  ;;  %v4019_v40 = vrot.slane %v4018_v5, 2 }
 0x6ec   :  { %v4034_v36 = vadd.f32 %v4033_v1, %v4026_v23  ;;  %v4069_v52 = vunpack.c.0.s8 %v4068_v49 }
 0x6ed   :  { %v4015_v56 = vrot.slane %v4014_v45, 1  ;;  %v4030_v9 = vadd.f32 %v4029_v30, %v4028_v55  ;;  %v4020_v4 = vadd.f32 %v4019_v40, %v4018_v5 }
 0x6ee   :  { %v4035_v3 = vrot.slane %v4034_v36, 2  ;;  %v14472_v46 = vsub.s32 %v4069_v52, %v15418_v42 }
 0x6ef   :  { %v4016_v39 = vadd.f32 %v4015_v56, %v4014_v45  ;;  %v4031_v7 = vrot.slane %v4030_v9, 1  ;;  %v4021_v28 = vrot.slane %v4020_v4, 1  ;;  %v4010_v45 = vld [vmem:[#allocation27] sm:$0x3] }
 0x6f0   :  { %v4036_v58 = vadd.f32 %v4035_v3, %v4034_v36 }
 0x6f1   :  { %v4023_v25 = vmul.f32 0.125, %v4016_v39  ;;  %v4032_v51 = vadd.f32 %v4031_v7, %v4030_v9  ;;  %v4022_v47 = vadd.f32 %v4021_v28, %v4020_v4 }
 0x6f2   :  { %v4037_v11 = vrot.slane %v4036_v58, 1 }
 0x6f3   :  { %v4039_v26 = vmul.f32 0.125, %v4032_v51  ;;  %v4041_v6 = vmul.f32 %v4023_v25, %v4023_v25  ;;  %v4024_v19 = vmul.f32 0.125, %v4022_v47 }
 0x6f4   :  { %v4038_v59 = vadd.f32 %v4037_v11, %v4036_v58 }
 0x6f5   :  { %v4043_v16 = vsub.f32 %v4039_v26, %v4041_v6  ;;  %v4042_v17 = vmul.f32 %v4024_v19, %v4024_v19 }
 0x6f6   :  { %v11993_v60 = vpop.eup %11992  ;;  %v4040_v21 = vmul.f32 0.125, %v4038_v59 }
 0x6f7   :  { %v3703_v29 = vmul.f32 %v11993_v60, %v3511_v31  ;;  %v4045_v8 = vadd.f32 1e-05, %v4043_v16 }
 0x6f8   :  { %v4044_v24 = vsub.f32 %v4040_v21, %v4042_v17 }
 0x6f9   :  { %10469 = vmatmul.mubr.msk.f32.vlgmr.msra.gmra.mxu0 %vm15422_vm1, %v3703_v29  ;;  %11994 = vrsqrt.f32 %v4045_v8  ;;  %v3704_v57 = vmul.f32 %v3703_v29, %v14388_v32 }
 0x6fa   :  { %10471 = vmatpush1.msk.msra.mxu0 %vm15423_vm6, %v15231_v62  ;;  %3847 = vmatprep.mubr.f32.mxu0 %v15232_v63  ;;  %v4046_v34 = vadd.f32 1e-05, %v4044_v24  ;;  %v4009_v63 = vld [vmem:[#allocation25] sm:$0x3] }
 0x6fb   :  { %10472 = vmatprep.subr.msk.mxu0 %vm15424_vm3, %v15231_v62  ;;  %v4053_v35 = vrot.slane %v4009_v63, %v15348_v27  ;;  %v4057_v32 = vrot.slane %v4009_v63, %v15401_v15  ;;  %v3705_v22 = vsub.f32 %v3512_v2, %v3704_v57 }
 0x6fc   :  { %10473 = vmatpush1.msk.msra.mxu0 %vm15425_vm5, %v15231_v62  ;;  %11996 = vrsqrt.f32 %v4046_v34 }
 0x6fd   :  { %10474 = vmatprep.subr.msk.mxu0 %vm15426_vm7, %v15231_v62 }
 0x6fe   :  { %10475 = vmatpush1.msk.msra.mxu0 %vm15427_vm8, %v15231_v62 }
 0x6ff   :  { %10476 = vmatprep.subr.msk.mxu0 %vm15428_vm10, %v15231_v62 }
 0x700   :  { %10477 = vmatpush1.msk.msra.mxu0 %vm15429_vm11, %v15231_v62 }
 0x701   :  { %10478 = vmatprep.subr.msk.mxu0 %vm15430_vm13, %v15231_v62 }
 0x702   :  { %10479 = vmatpush1.msk.msra.mxu0 %vm15431_vm14, %v15231_v62 }
 0x703   :  { %10480 = vmatprep.subr.msk.mxu0 %vm15432_vm4, %v15231_v62 }
 0x704   :  { %10481 = vmatpush1.msk.msra.mxu0 %vm15433_vm12, %v15231_v62 }
 0x705   :  { %10482 = vmatprep.subr.msk.mxu0 %vm15434_vm9, %v15231_v62 }
 0x706   :  { %v11995_v48 = vpop.eup %11994  ;;  %10483 = vmatpush1.msk.msra.mxu0 %vm15435_vm2, %v15231_v62 }
 0x707   :  { %10484 = vmatprep.subr.msk.mxu0 %vm15436_vm0, %v15231_v62  ;;  %v4060_v53 = vmul.f32 %v11995_v48, %v4053_v35 }
 0x708   :  { %10485 = vmatpush1.msk.msra.mxu0 %vm15437_vm15, %v15231_v62 }
 0x709   :  { %v11997_v44 = vpop.eup %11996  ;;  %10486 = vmatmul.mubr.msk.f32.vlgmr.msra.gmra.mxu0 %vm15422_vm1, %v3705_v22  ;;  %v4062_v10 = vmul.f32 %v4060_v53, %v4023_v25  ;;  %v4086_v43 = vrot.slane %v4060_v53, %v15348_v27 }
 0x70a   :  { %v4061_v37 = vmul.f32 %v11997_v44, %v4057_v32 }
 0x70b   :  { %v4091_v0 = vmul.f32 %v4086_v43, %v14393_v38 }
 0x70c   :  { %v4063_v23 = vmul.f32 %v4061_v37, %v4024_v19  ;;  %v4090_v1 = vrot.slane %v4061_v37, %v15348_v27 }
 0x70e   :  { %v4066_v55 = vcombine.low %v4062_v10, %v4063_v23  ;;  %v4092_v40 = vmul.f32 %v4090_v1, %v14398_v14 }
 0x710   :  { %v4073_v5 = vrot.slane %v4066_v55, %v14472_v46 }
 0x712   :  { %v4080_v62 = vrot.slane %v4073_v5, %v14472_v46 }
 0x714   :  { %v4082_v30 = vsub.f32 %v4010_v45, %v4080_v62 }
 0x716   :  { %v4097_v36 = vrot.slane %v4082_v30, %v15348_v27  ;;  %v4101_v56 = vrot.slane %v4082_v30, %v15401_v15 }
 0x718   :  { %v4104_v9 = vadd.f32 %v4097_v36, %v4091_v0  ;;  %v4105_v4 = vadd.f32 %v4101_v56, %v4092_v40 }
 0x71a   :  { %vm4106_vm6 = vcmp.gt.f32.partialorder %v4104_v9, 0.0  ;;  %vm4107_vm3 = vcmp.gt.f32.partialorder %v4105_v4, 0.0  ;;  %v4108_v3 = vmul.f32 0.01, %v4104_v9  ;;  %v4109_v39 = vmul.f32 0.01, %v4105_v4 }
 0x71c   :  { %v14482_v7 = vsel %vm4106_vm6, %v4104_v9, %v4108_v3  ;;  %v14484_v28 = vsel %vm4107_vm3, %v4105_v4, %v4109_v39 }
 0x71d   :  { %12497 = shalt.err (!%p12494_p6)  }
 0x71e   :  { %322 = dma.hbm_to_vmem [thread:$0]  %s14872_s16, 81920, %s320_s6, [#allocation3] }
 0x7b9   :  { %v3775_v38 = vpop.f32.mrf.mxu0 }
 0x7ba   :  { %v3857_v58 = vrot.slane %v3775_v38, %v15348_v27 }
 0x7bb   :  { %v3777_v14 = vpop.f32.mrf.mxu0 }
 0x7bc   :  { %v3861_v25 = vrot.slane %v3777_v14, %v15348_v27  ;;  %v3862_v51 = vmul.f32 %v3857_v58, %v14282_v20  ;;  %v3864_v11 = vmul.f32 %v3857_v58, %v14280_v12  ;;  %v3866_v26 = vmul.f32 %v3857_v58, %v14288_v18 }
 0x7bd   :  { %v3868_v6 = vmul.f32 %v3857_v58, %v14309_v50 }
 0x7be   :  { %v3863_v31 = vmul.f32 %v3861_v25, %v14286_v61  ;;  %v3865_v29 = vmul.f32 %v3861_v25, %v14284_v41  ;;  %v3867_v20 = vmul.f32 %v3861_v25, %v14300_v54  ;;  %v3869_v8 = vmul.f32 %v3861_v25, %v14312_v33 }
 0x7c9   :  { %v3849_v47 = vpop.f32.mrf.mxu0 }
 0x7ca   :  { %v3873_v19 = vrot.slane %v3849_v47, %v15348_v27 }
 0x7cb   :  { %v3851_v59 = vpop.f32.mrf.mxu0 }
 0x7cc   :  { %v3878_v16 = vadd.f32 %v3873_v19, %v3862_v51  ;;  %v3880_v17 = vadd.f32 %v3873_v19, %v3864_v11  ;;  %v3882_v60 = vadd.f32 %v3873_v19, %v3866_v26  ;;  %v3884_v21 = vadd.f32 %v3873_v19, %v3868_v6 }
 0x7cd   :  { %v3877_v12 = vrot.slane %v3851_v59, %v15348_v27 }
 0x7ce   :  { %vm3886_vm5 = vcmp.gt.f32.partialorder %v3878_v16, 0.0  ;;  %vm3888_vm7 = vcmp.gt.f32.partialorder %v3880_v17, 0.0  ;;  %vm3890_vm8 = vcmp.gt.f32.partialorder %v3882_v60, 0.0  ;;  %vm3892_vm10 = vcmp.gt.f32.partialorder %v3884_v21, 0.0 }
 0x7cf   :  { %v3894_v18 = vmul.f32 0.01, %v3878_v16  ;;  %v3896_v50 = vmul.f32 0.01, %v3880_v17  ;;  %v3898_v61 = vmul.f32 0.01, %v3882_v60  ;;  %v3879_v24 = vadd.f32 %v3877_v12, %v3863_v31 }
 0x7d0   :  { %v3900_v34 = vmul.f32 0.01, %v3884_v21  ;;  %v3881_v63 = vadd.f32 %v3877_v12, %v3865_v29  ;;  %v3883_v57 = vadd.f32 %v3877_v12, %v3867_v20  ;;  %v3885_v35 = vadd.f32 %v3877_v12, %v3869_v8 }
 0x7d1   :  { %v14501_v2 = vsel %vm3886_vm5, %v3878_v16, %v3894_v18  ;;  %v14503_v41 = vsel %vm3888_vm7, %v3880_v17, %v3896_v50  ;;  %v14505_v54 = vsel %vm3890_vm8, %v3882_v60, %v3898_v61  ;;  %vm3887_vm11 = vcmp.gt.f32.partialorder %v3879_v24, 0.0 }
 0x7d2   :  { %v14507_v33 = vsel %vm3892_vm10, %v3884_v21, %v3900_v34  ;;  %vm3889_vm13 = vcmp.gt.f32.partialorder %v3881_v63, 0.0  ;;  %vm3891_vm14 = vcmp.gt.f32.partialorder %v3883_v57, 0.0  ;;  %vm3893_vm4 = vcmp.gt.f32.partialorder %v3885_v35, 0.0 }
 0x7d3   :  { %v3895_v13 = vmul.f32 0.01, %v3879_v24  ;;  %v3897_v49 = vmul.f32 0.01, %v3881_v63  ;;  %v3899_v48 = vmul.f32 0.01, %v3883_v57 }
 0x7d4   :  { %v3901_v32 = vmul.f32 0.01, %v3885_v35 }
 0x7d5   :  { %v3903_v22 = vsel %vm3887_vm11, %v3879_v24, %v3895_v13  ;;  %v14509_v53 = vsel %vm3889_vm13, %v3881_v63, %v3897_v49  ;;  %v14511_v52 = vsel %vm3891_vm14, %v3883_v57, %v3899_v48 }
 0x7d6   :  { %v14513_v44 = vsel %vm3893_vm4, %v3885_v35, %v3901_v32 }
 0x7d7   :  { %12540 = dma.done.wait [#allocation3], 81920 }
 0x7d8   :  { %12541 = vsyncadd [#allocation3], 4294885376  ;;  %v14515_v10 = vpack.c.bf16 %v3903_v22, %v3903_v22  ;;  %v4304_v37 = vld [vmem:[#allocation2 + $0x1c0] sm:$0xff]  ;;  %v4305_v55 = vld [vmem:[#allocation2 + $0x1c8] sm:$0xff]  ;;  %s12578_s16 = smov [#allocation36]  }
 0x7d9   :  { %v4308_v23 = vld [vmem:[#allocation2 + $0x1e0] sm:$0xff]  ;;  %v4309_v5 = vld [vmem:[#allocation2 + $0x1e8] sm:$0xff]  ;;  %s9937_s25 = sshll.u32 %s12578_s16, 4  ;;  %s9938_s25 = int_to_ptr.vmem [resolvable:$true] %s9937_s25 }
 0x7da   :  { %5048 = vmatprep.mubr.bf16.mxu0 %v14515_v10  ;;  %5089 = vmatprep.mubr.bf16.mxu1 %v14515_v10  ;;  %v10547_v43 = vcombine.high %v4304_v37, %v4308_v23  ;;  %v10546_v1 = vcombine.low %v4304_v37, %v4308_v23  ;;  %v4296_v45 = vld [vmem:[#allocation2 + $0x180] sm:$0xff]  ;;  %v10549_v0 = vcombine.high %v4305_v55, %v4309_v5  ;;  %v4297_v36 = vld [vmem:[#allocation2 + $0x188] sm:$0xff]  ;;  %s12498_s26 = scalar_lea.vmem %s9938_s25, 128  ;;  %p12503_p8 = scmp.lt.s32.totalorder %s9938_s25, %s9938_s25 }
 0x7db   :  { %v4300_v62 = vld [vmem:[#allocation2 + $0x1a0] sm:$0xff]  ;;  %v10548_v30 = vcombine.low %v4305_v55, %v4309_v5  ;;  %v4301_v56 = vld [vmem:[#allocation2 + $0x1a8] sm:$0xff]  ;;  %p12499_p7 = scmp.ne.s32.totalorder %s9938_s25, %s12498_s26  ;;  %p12504_p9 = scmp.lt.s32.totalorder %s12498_s26, %s12498_s26 }
 0x7dc   :  { %v10539_v40 = vcombine.high %v4296_v45, %v4300_v62  ;;  %v4288_v9 = vld [vmem:[#allocation2 + $0x140] sm:$0xff]  ;;  %5016 = vmatprep.subr.bf16.mxu0 %v10547_v43  ;;  %v10541_v4 = vcombine.high %v4297_v36, %v4301_v56  ;;  %v4289_v39 = vld [vmem:[#allocation2 + $0x148] sm:$0xff]  ;;  %5057 = vmatprep.subr.bf16.mxu1 %v10549_v0  ;;  %v10538_v14 = vcombine.low %v4296_v45, %v4300_v62 }
 0x7dd   :  { %v4292_v3 = vld [vmem:[#allocation2 + $0x160] sm:$0xff]  ;;  %v4293_v38 = vld [vmem:[#allocation2 + $0x168] sm:$0xff]  ;;  %5017 = vmatpush1.bf16.msra.mxu0 %v10546_v1  ;;  %5058 = vmatpush1.bf16.msra.mxu1 %v10548_v30  ;;  %v10540_v58 = vcombine.low %v4297_v36, %v4301_v56  ;;  %p12505_p10 = por %p12504_p9, %p12503_p8 }
 0x7de   :  { %5018 = vmatprep.subr.bf16.mxu0 %v10539_v40  ;;  %v10531_v25 = vcombine.high %v4288_v9, %v4292_v3  ;;  %5059 = vmatprep.subr.bf16.mxu1 %v10541_v4  ;;  %v10533_v51 = vcombine.high %v4289_v39, %v4293_v38  ;;  %v4280_v47 = vld [vmem:[#allocation2 + $0x100] sm:$0xff]  ;;  %v4281_v26 = vld [vmem:[#allocation2 + $0x108] sm:$0xff]  ;;  %v10530_v19 = vcombine.low %v4288_v9, %v4292_v3 }
 0x7df   :  { %v4284_v11 = vld [vmem:[#allocation2 + $0x120] sm:$0xff]  ;;  %v4285_v6 = vld [vmem:[#allocation2 + $0x128] sm:$0xff]  ;;  %v10532_v31 = vcombine.low %v4289_v39, %v4293_v38  ;;  %p12506_p11 = pnand %p12505_p10, %p12499_p7 }
 0x7e0   :  { %v10523_v59 = vcombine.high %v4280_v47, %v4284_v11  ;;  %v10525_v16 = vcombine.high %v4281_v26, %v4285_v6  ;;  %v4272_v17 = vld [vmem:[#allocation2 + $0xc0] sm:$0xff]  ;;  %v4273_v21 = vld [vmem:[#allocation2 + $0xc8] sm:$0xff]  ;;  %v10522_v20 = vcombine.low %v4280_v47, %v4284_v11  ;;  %v10524_v8 = vcombine.low %v4281_v26, %v4285_v6 }
 0x7e1   :  { %5019 = vmatpush1.bf16.msra.mxu0 %v10538_v14  ;;  %5060 = vmatpush1.bf16.msra.mxu1 %v10540_v58  ;;  %v4276_v60 = vld [vmem:[#allocation2 + $0xe0] sm:$0xff]  ;;  %v4277_v29 = vld [vmem:[#allocation2 + $0xe8] sm:$0xff] }
 0x7e2   :  { %5020 = vmatprep.subr.bf16.mxu0 %v10531_v25  ;;  %5061 = vmatprep.subr.bf16.mxu1 %v10533_v51  ;;  %v10515_v12 = vcombine.high %v4272_v17, %v4276_v60  ;;  %v10517_v18 = vcombine.high %v4273_v21, %v4277_v29  ;;  %v4264_v50 = vld [vmem:[#allocation2 + $0x80] sm:$0xff]  ;;  %v4265_v24 = vld [vmem:[#allocation2 + $0x88] sm:$0xff]  ;;  %v10514_v63 = vcombine.low %v4272_v17, %v4276_v60 }
 0x7e3   :  { %v4268_v61 = vld [vmem:[#allocation2 + $0xa0] sm:$0xff]  ;;  %v4269_v34 = vld [vmem:[#allocation2 + $0xa8] sm:$0xff]  ;;  %v10516_v57 = vcombine.low %v4273_v21, %v4277_v29 }
 0x7e4   :  { %v10507_v35 = vcombine.high %v4264_v50, %v4268_v61  ;;  %v10509_v13 = vcombine.high %v4265_v24, %v4269_v34  ;;  %v4256_v49 = vld [vmem:[#allocation2 + $0x40] sm:$0xff]  ;;  %v4257_v32 = vld [vmem:[#allocation2 + $0x48] sm:$0xff]  ;;  %v10506_v37 = vcombine.low %v4264_v50, %v4268_v61  ;;  %v10508_v23 = vcombine.low %v4265_v24, %v4269_v34 }
 0x7e5   :  { %5021 = vmatpush1.bf16.msra.mxu0 %v10530_v19  ;;  %5062 = vmatpush1.bf16.msra.mxu1 %v10532_v31  ;;  %v4260_v48 = vld [vmem:[#allocation2 + $0x60] sm:$0xff]  ;;  %v4261_v22 = vld [vmem:[#allocation2 + $0x68] sm:$0xff] }
 0x7e6   :  { %5022 = vmatprep.subr.bf16.mxu0 %v10523_v59  ;;  %5063 = vmatprep.subr.bf16.mxu1 %v10525_v16  ;;  %v10499_v55 = vcombine.high %v4256_v49, %v4260_v48  ;;  %v10501_v43 = vcombine.high %v4257_v32, %v4261_v22  ;;  %v4248_v5 = vld [vmem:[#allocation2] sm:$0xff]  ;;  %v4249_v45 = vld [vmem:[#allocation2 + $0x8] sm:$0xff]  ;;  %v10498_v0 = vcombine.low %v4256_v49, %v4260_v48 }
 0x7e7   :  { %v4252_v1 = vld [vmem:[#allocation2 + $0x20] sm:$0xff]  ;;  %v4253_v62 = vld [vmem:[#allocation2 + $0x28] sm:$0xff]  ;;  %v10500_v30 = vcombine.low %v4257_v32, %v4261_v22 }
 0x7e8   :  { %v10491_v40 = vcombine.high %v4248_v5, %v4252_v1  ;;  %v10493_v36 = vcombine.high %v4249_v45, %v4253_v62  ;;  %v4368_v56 = vld [vmem:[#allocation2 + $0x3c0] sm:$0xff]  ;;  %v4369_v4 = vld [vmem:[#allocation2 + $0x3c8] sm:$0xff]  ;;  %v10490_v39 = vcombine.low %v4248_v5, %v4252_v1  ;;  %v10492_v38 = vcombine.low %v4249_v45, %v4253_v62 }
 0x7e9   :  { %5023 = vmatpush1.bf16.msra.mxu0 %v10522_v20  ;;  %5064 = vmatpush1.bf16.msra.mxu1 %v10524_v8  ;;  %v4372_v9 = vld [vmem:[#allocation2 + $0x3e0] sm:$0xff]  ;;  %v4373_v3 = vld [vmem:[#allocation2 + $0x3e8] sm:$0xff] }
 0x7ea   :  { %5024 = vmatprep.subr.bf16.mxu0 %v10515_v12  ;;  %5065 = vmatprep.subr.bf16.mxu1 %v10517_v18  ;;  %v10611_v14 = vcombine.high %v4368_v56, %v4372_v9  ;;  %v10613_v58 = vcombine.high %v4369_v4, %v4373_v3  ;;  %v4360_v25 = vld [vmem:[#allocation2 + $0x380] sm:$0xff]  ;;  %v4361_v47 = vld [vmem:[#allocation2 + $0x388] sm:$0xff]  ;;  %v10610_v26 = vcombine.low %v4368_v56, %v4372_v9 }
 0x7eb   :  { %v4364_v51 = vld [vmem:[#allocation2 + $0x3a0] sm:$0xff]  ;;  %v4365_v11 = vld [vmem:[#allocation2 + $0x3a8] sm:$0xff]  ;;  %v10612_v6 = vcombine.low %v4369_v4, %v4373_v3 }
 0x7ec   :  { %v10603_v19 = vcombine.high %v4360_v25, %v4364_v51  ;;  %v10605_v31 = vcombine.high %v4361_v47, %v4365_v11  ;;  %v4352_v59 = vld [vmem:[#allocation2 + $0x340] sm:$0xff]  ;;  %v4353_v17 = vld [vmem:[#allocation2 + $0x348] sm:$0xff]  ;;  %v10602_v21 = vcombine.low %v4360_v25, %v4364_v51  ;;  %v10604_v29 = vcombine.low %v4361_v47, %v4365_v11 }
 0x7ed   :  { %5025 = vmatpush1.bf16.msra.mxu0 %v10514_v63  ;;  %5066 = vmatpush1.bf16.msra.mxu1 %v10516_v57  ;;  %v4356_v16 = vld [vmem:[#allocation2 + $0x360] sm:$0xff]  ;;  %v4357_v60 = vld [vmem:[#allocation2 + $0x368] sm:$0xff] }
 0x7ee   :  { %5026 = vmatprep.subr.bf16.mxu0 %v10507_v35  ;;  %5067 = vmatprep.subr.bf16.mxu1 %v10509_v13  ;;  %v10595_v20 = vcombine.high %v4352_v59, %v4356_v16  ;;  %v10597_v8 = vcombine.high %v4353_v17, %v4357_v60  ;;  %v4344_v12 = vld [vmem:[#allocation2 + $0x300] sm:$0xff]  ;;  %v4345_v50 = vld [vmem:[#allocation2 + $0x308] sm:$0xff]  ;;  %v10594_v24 = vcombine.low %v4352_v59, %v4356_v16  ;;  %v4307_v59 = vld [vmem:[#allocation2 + $0x1d8] sm:$0xff] }
 0x7ef   :  { %v4348_v18 = vld [vmem:[#allocation2 + $0x320] sm:$0xff]  ;;  %v4349_v61 = vld [vmem:[#allocation2 + $0x328] sm:$0xff]  ;;  %v10596_v34 = vcombine.low %v4353_v17, %v4357_v60  ;;  %v4311_v16 = vld [vmem:[#allocation2 + $0x1f8] sm:$0xff] }
 0x7f0   :  { %v10587_v63 = vcombine.high %v4344_v12, %v4348_v18  ;;  %v10589_v57 = vcombine.high %v4345_v50, %v4349_v61  ;;  %v4336_v35 = vld [vmem:[#allocation2 + $0x2c0] sm:$0xff]  ;;  %v4337_v49 = vld [vmem:[#allocation2 + $0x2c8] sm:$0xff]  ;;  %v10586_v32 = vcombine.low %v4344_v12, %v4348_v18  ;;  %v10588_v22 = vcombine.low %v4345_v50, %v4349_v61  ;;  %v4299_v18 = vld [vmem:[#allocation2 + $0x198] sm:$0xff] }
 0x7f1   :  { %5027 = vmatpush1.bf16.msra.mxu0 %v10506_v37  ;;  %5068 = vmatpush1.bf16.msra.mxu1 %v10508_v23  ;;  %v4340_v13 = vld [vmem:[#allocation2 + $0x2e0] sm:$0xff]  ;;  %v4341_v48 = vld [vmem:[#allocation2 + $0x2e8] sm:$0xff]  ;;  %v14521_v12 = vpack.c.bf16 %v14501_v2, %v14501_v2  ;;  %v4303_v50 = vld [vmem:[#allocation2 + $0x1b8] sm:$0xff] }
 0x7f2   :  { %5028 = vmatprep.subr.bf16.mxu0 %v10499_v55  ;;  %5069 = vmatprep.subr.bf16.mxu1 %v10501_v43  ;;  %v10579_v37 = vcombine.high %v4336_v35, %v4340_v13  ;;  %v10581_v23 = vcombine.high %v4337_v49, %v4341_v48  ;;  %v4328_v55 = vld [vmem:[#allocation2 + $0x280] sm:$0xff]  ;;  %v4329_v5 = vld [vmem:[#allocation2 + $0x288] sm:$0xff]  ;;  %v10578_v45 = vcombine.low %v4336_v35, %v4340_v13  ;;  %v4291_v35 = vld [vmem:[#allocation2 + $0x158] sm:$0xff] }
 0x7f3   :  { %v4332_v43 = vld [vmem:[#allocation2 + $0x2a0] sm:$0xff]  ;;  %v4333_v1 = vld [vmem:[#allocation2 + $0x2a8] sm:$0xff]  ;;  %v10580_v62 = vcombine.low %v4337_v49, %v4341_v48  ;;  %v10545_v13 = vcombine.high %v4299_v18, %v4303_v50  ;;  %v4295_v49 = vld [vmem:[#allocation2 + $0x178] sm:$0xff]  ;;  %v10544_v48 = vcombine.low %v4299_v18, %v4303_v50 }
 0x7f4   :  { %v4321_v56 = vld [vmem:[#allocation2 + $0x248] sm:$0xff]  ;;  %v10570_v4 = vcombine.low %v4328_v55, %v4332_v43  ;;  %v10572_v3 = vcombine.low %v4329_v5, %v4333_v1 }
 0x7f5   :  { %5029 = vmatpush1.bf16.msra.mxu0 %v10498_v0  ;;  %5070 = vmatpush1.bf16.msra.mxu1 %v10500_v30  ;;  %v10571_v0 = vcombine.high %v4328_v55, %v4332_v43  ;;  %v10573_v30 = vcombine.high %v4329_v5, %v4333_v1  ;;  %v4325_v9 = vld [vmem:[#allocation2 + $0x268] sm:$0xff]  ;;  %v10537_v55 = vcombine.high %v4291_v35, %v4295_v49  ;;  %v4287_v43 = vld [vmem:[#allocation2 + $0x138] sm:$0xff] }
 0x7f6   :  { %5030 = vmatprep.subr.bf16.mxu0 %v10491_v40  ;;  %5071 = vmatprep.subr.bf16.mxu1 %v10493_v36  ;;  %v4320_v40 = vld [vmem:[#allocation2 + $0x240] sm:$0xff]  ;;  %v4313_v25 = vld [vmem:[#allocation2 + $0x208] sm:$0xff]  ;;  %v10564_v11 = vcombine.low %v4321_v56, %v4325_v9  ;;  %v10536_v1 = vcombine.low %v4291_v35, %v4295_v49 }
 0x7f7   :  { %v4324_v36 = vld [vmem:[#allocation2 + $0x260] sm:$0xff]  ;;  %v4317_v51 = vld [vmem:[#allocation2 + $0x228] sm:$0xff] }
 0x7f8   :  { %v10562_v47 = vcombine.low %v4320_v40, %v4324_v36  ;;  %v10556_v60 = vcombine.low %v4313_v25, %v4317_v51 }
 0x7f9   :  { %5031 = vmatpush1.bf16.msra.mxu0 %v10490_v39  ;;  %5072 = vmatpush1.bf16.msra.mxu1 %v10492_v38  ;;  %v10563_v39 = vcombine.high %v4320_v40, %v4324_v36  ;;  %v10565_v38 = vcombine.high %v4321_v56, %v4325_v9  ;;  %v4279_v36 = vld [vmem:[#allocation2 + $0xf8] sm:$0xff] }
 0x7fa   :  { %5032 = vmatprep.subr.bf16.mxu0 %v10611_v14  ;;  %5073 = vmatprep.subr.bf16.mxu1 %v10613_v58  ;;  %v4312_v14 = vld [vmem:[#allocation2 + $0x200] sm:$0xff] }
 0x7fb   :  { %v4316_v58 = vld [vmem:[#allocation2 + $0x220] sm:$0xff] }
 0x7fc   :  { %v10554_v17 = vcombine.low %v4312_v14, %v4316_v58 }
 0x7fd   :  { %5033 = vmatpush2.bf16.msra.mxu0 %v10610_v26  ;;  %5074 = vmatpush2.bf16.msra.mxu1 %v10612_v6  ;;  %v10555_v26 = vcombine.high %v4312_v14, %v4316_v58  ;;  %v10557_v6 = vcombine.high %v4313_v25, %v4317_v51  ;;  %v4271_v14 = vld [vmem:[#allocation2 + $0xb8] sm:$0xff] }
 0x7fe   :  { %5034 = vmatprep.subr.bf16.mxu0 %v10603_v19  ;;  %5075 = vmatprep.subr.bf16.mxu1 %v10605_v31  ;;  %v4306_v19 = vld [vmem:[#allocation2 + $0x1d0] sm:$0xff] }
 0x7ff   :  { %v4310_v31 = vld [vmem:[#allocation2 + $0x1f0] sm:$0xff] }
 0x800   :  { %v10550_v61 = vcombine.low %v4306_v19, %v4310_v31 }
 0x801   :  { %5035 = vmatpush2.bf16.msra.mxu0 %v10602_v21  ;;  %5076 = vmatpush2.bf16.msra.mxu1 %v10604_v29  ;;  %v10551_v21 = vcombine.high %v4306_v19, %v4310_v31  ;;  %v10553_v29 = vcombine.high %v4307_v59, %v4311_v16  ;;  %v4263_v19 = vld [vmem:[#allocation2 + $0x78] sm:$0xff] }
 0x802   :  { %5036 = vmatprep.subr.bf16.mxu0 %v10595_v20  ;;  %5077 = vmatprep.subr.bf16.mxu1 %v10597_v8  ;;  %v4298_v20 = vld [vmem:[#allocation2 + $0x190] sm:$0xff] }
 0x803   :  { %v4302_v8 = vld [vmem:[#allocation2 + $0x1b0] sm:$0xff] }
 0x804   :  { %v10542_v2 = vcombine.low %v4298_v20, %v4302_v8 }
 0x805   :  { %5037 = vmatpush2.bf16.msra.mxu0 %v10594_v24  ;;  %5078 = vmatpush2.bf16.msra.mxu1 %v10596_v34  ;;  %v10552_v24 = vcombine.low %v4307_v59, %v4311_v16  ;;  %v10543_v34 = vcombine.high %v4298_v20, %v4302_v8  ;;  %v4255_v20 = vld [vmem:[#allocation2 + $0x38] sm:$0xff] }
 0x806   :  { %5038 = vmatprep.subr.bf16.mxu0 %v10587_v63  ;;  %5079 = vmatprep.subr.bf16.mxu1 %v10589_v57  ;;  %v4290_v63 = vld [vmem:[#allocation2 + $0x150] sm:$0xff] }
 0x807   :  { %v4294_v57 = vld [vmem:[#allocation2 + $0x170] sm:$0xff] }
 0x808   :  { %v10534_v5 = vcombine.low %v4290_v63, %v4294_v57 }
 0x809   :  { %5039 = vmatpush2.bf16.msra.mxu0 %v10586_v32  ;;  %5080 = vmatpush2.bf16.msra.mxu1 %v10588_v22  ;;  %v10535_v32 = vcombine.high %v4290_v63, %v4294_v57  ;;  %v4282_v22 = vld [vmem:[#allocation2 + $0x110] sm:$0xff]  ;;  %v4375_v57 = vld [vmem:[#allocation2 + $0x3f8] sm:$0xff] }
 0x80a   :  { %5040 = vmatprep.subr.bf16.mxu0 %v10579_v37  ;;  %5081 = vmatprep.subr.bf16.mxu1 %v10581_v23  ;;  %v4286_v37 = vld [vmem:[#allocation2 + $0x130] sm:$0xff]  ;;  %v4283_v23 = vld [vmem:[#allocation2 + $0x118] sm:$0xff] }
 0x80b   :  { %v10529_v40 = vcombine.high %v4283_v23, %v4287_v43  ;;  %v10526_v56 = vcombine.low %v4282_v22, %v4286_v37  ;;  %v10528_v9 = vcombine.low %v4283_v23, %v4287_v43 }
 0x80d   :  { %5041 = vmatpush2.bf16.msra.mxu0 %v10578_v45  ;;  %5082 = vmatpush2.bf16.msra.mxu1 %v10580_v62  ;;  %v10527_v45 = vcombine.high %v4282_v22, %v4286_v37  ;;  %v4274_v62 = vld [vmem:[#allocation2 + $0xd0] sm:$0xff]  ;;  %v4367_v37 = vld [vmem:[#allocation2 + $0x3b8] sm:$0xff] }
 0x80e   :  { %5042 = vmatprep.subr.bf16.mxu0 %v10571_v0  ;;  %5083 = vmatprep.subr.bf16.mxu1 %v10573_v30  ;;  %v4278_v0 = vld [vmem:[#allocation2 + $0xf0] sm:$0xff]  ;;  %v4275_v30 = vld [vmem:[#allocation2 + $0xd8] sm:$0xff] }
 0x80f   :  { %v10518_v58 = vcombine.low %v4274_v62, %v4278_v0  ;;  %v10520_v25 = vcombine.low %v4275_v30, %v4279_v36 }
 0x811   :  { %5043 = vmatpush2.bf16.msra.mxu0 %v10570_v4  ;;  %5084 = vmatpush2.bf16.msra.mxu1 %v10572_v3  ;;  %v10519_v4 = vcombine.high %v4274_v62, %v4278_v0  ;;  %v4266_v3 = vld [vmem:[#allocation2 + $0x90] sm:$0xff]  ;;  %v4359_v0 = vld [vmem:[#allocation2 + $0x378] sm:$0xff] }
 0x812   :  { %5044 = vmatprep.subr.bf16.mxu0 %v10563_v39  ;;  %5085 = vmatprep.subr.bf16.mxu1 %v10565_v38  ;;  %v4267_v39 = vld [vmem:[#allocation2 + $0x98] sm:$0xff]  ;;  %v10521_v38 = vcombine.high %v4275_v30, %v4279_v36 }
 0x813   :  { %v10512_v59 = vcombine.low %v4267_v39, %v4271_v14 }
 0x815   :  { %5045 = vmatpush2.bf16.msra.mxu0 %v10562_v47  ;;  %5086 = vmatpush2.bf16.msra.mxu1 %v10564_v11  ;;  %v4258_v47 = vld [vmem:[#allocation2 + $0x50] sm:$0xff] }
 0x816   :  { %5046 = vmatprep.subr.bf16.mxu0 %v10555_v26  ;;  %5087 = vmatprep.subr.bf16.mxu1 %v10557_v6  ;;  %v4262_v11 = vld [vmem:[#allocation2 + $0x70] sm:$0xff]  ;;  %v4259_v26 = vld [vmem:[#allocation2 + $0x58] sm:$0xff]  ;;  %v10513_v6 = vcombine.high %v4267_v39, %v4271_v14 }
 0x817   :  { %v10503_v16 = vcombine.high %v4258_v47, %v4262_v11  ;;  %v10502_v8 = vcombine.low %v4258_v47, %v4262_v11  ;;  %v10504_v18 = vcombine.low %v4259_v26, %v4263_v19  ;;  %v4343_v11 = vld [vmem:[#allocation2 + $0x2f8] sm:$0xff] }
 0x819   :  { %5047 = vmatpush2.bf16.msra.mxu0 %v10554_v17  ;;  %5088 = vmatpush2.bf16.msra.mxu1 %v10556_v60  ;;  %v4250_v17 = vld [vmem:[#allocation2 + $0x10] sm:$0xff] }
 0x81a   :  { %5098 = vmatprep.subr.bf16.mxu0 %v10551_v21  ;;  %5139 = vmatprep.subr.bf16.mxu1 %v10553_v29  ;;  %v4254_v60 = vld [vmem:[#allocation2 + $0x30] sm:$0xff]  ;;  %v4251_v21 = vld [vmem:[#allocation2 + $0x18] sm:$0xff]  ;;  %v10505_v29 = vcombine.high %v4259_v26, %v4263_v19 }
 0x81b   :  { %v10495_v50 = vcombine.high %v4250_v17, %v4254_v60  ;;  %v10497_v63 = vcombine.high %v4251_v21, %v4255_v20  ;;  %v10494_v35 = vcombine.low %v4250_v17, %v4254_v60  ;;  %v4335_v60 = vld [vmem:[#allocation2 + $0x2b8] sm:$0xff] }
 0x81c   :  { %5049 = vmatmul.mubr.bf16.vlgmr.msra.gmra.mxu0 %v14521_v12  ;;  %5090 = vmatmul.mubr.bf16.vlgmr.msra.gmra.mxu1 %v14521_v12 }
 0x81d   :  { %5099 = vmatpush1.bf16.msra.mxu0 %v10550_v61  ;;  %5140 = vmatpush1.bf16.msra.mxu1 %v10552_v24  ;;  %v4370_v61 = vld [vmem:[#allocation2 + $0x3d0] sm:$0xff] }
 0x81e   :  { %5100 = vmatprep.subr.bf16.mxu0 %v10543_v34  ;;  %5141 = vmatprep.subr.bf16.mxu1 %v10545_v13  ;;  %v4374_v24 = vld [vmem:[#allocation2 + $0x3f0] sm:$0xff]  ;;  %v4371_v34 = vld [vmem:[#allocation2 + $0x3d8] sm:$0xff]  ;;  %v10496_v13 = vcombine.low %v4251_v21, %v4255_v20 }
 0x81f   :  { %5130 = vmatprep.mubr.bf16.mxu0 %v14515_v10  ;;  %5171 = vmatprep.mubr.bf16.mxu1 %v14515_v10  ;;  %v4270_v10 = vld [vmem:[#allocation2 + $0xb0] sm:$0xff]  ;;  %v10615_v49 = vcombine.high %v4370_v61, %v4374_v24  ;;  %v10617_v22 = vcombine.high %v4371_v34, %v4375_v57  ;;  %v10614_v23 = vcombine.low %v4370_v61, %v4374_v24  ;;  %v4327_v24 = vld [vmem:[#allocation2 + $0x278] sm:$0xff] }
 0x820   :  { %v10511_v51 = vcombine.high %v4266_v3, %v4270_v10  ;;  %v10510_v31 = vcombine.low %v4266_v3, %v4270_v10  ;;  %v4351_v10 = vld [vmem:[#allocation2 + $0x338] sm:$0xff] }
 0x821   :  { %5101 = vmatpush1.bf16.msra.mxu0 %v10542_v2  ;;  %5142 = vmatpush1.bf16.msra.mxu1 %v10544_v48  ;;  %v4362_v2 = vld [vmem:[#allocation2 + $0x390] sm:$0xff] }
 0x822   :  { %5102 = vmatprep.subr.bf16.mxu0 %v10535_v32  ;;  %5143 = vmatprep.subr.bf16.mxu1 %v10537_v55  ;;  %v4366_v48 = vld [vmem:[#allocation2 + $0x3b0] sm:$0xff]  ;;  %v4363_v32 = vld [vmem:[#allocation2 + $0x398] sm:$0xff]  ;;  %v10616_v55 = vcombine.low %v4371_v34, %v4375_v57 }
 0x823   :  { %v10607_v43 = vcombine.high %v4362_v2, %v4366_v48  ;;  %v10609_v62 = vcombine.high %v4363_v32, %v4367_v37  ;;  %v10606_v30 = vcombine.low %v4362_v2, %v4366_v48  ;;  %v4319_v48 = vld [vmem:[#allocation2 + $0x238] sm:$0xff] }
 0x825   :  { %5103 = vmatpush1.bf16.msra.mxu0 %v10534_v5  ;;  %5144 = vmatpush1.bf16.msra.mxu1 %v10536_v1  ;;  %v4354_v5 = vld [vmem:[#allocation2 + $0x350] sm:$0xff] }
 0x826   :  { %5104 = vmatprep.subr.bf16.mxu0 %v10527_v45  ;;  %5145 = vmatprep.subr.bf16.mxu1 %v10529_v40  ;;  %v4358_v1 = vld [vmem:[#allocation2 + $0x370] sm:$0xff]  ;;  %v4355_v45 = vld [vmem:[#allocation2 + $0x358] sm:$0xff]  ;;  %v10608_v40 = vcombine.low %v4363_v32, %v4367_v37 }
 0x827   :  { %v10599_v36 = vcombine.high %v4354_v5, %v4358_v1  ;;  %v10601_v3 = vcombine.high %v4355_v45, %v4359_v0  ;;  %v10598_v39 = vcombine.low %v4354_v5, %v4358_v1  ;;  %v4179_v1 = vld [vmem:[#allocation2 + $0x11e8] sm:$0xff] }
 0x829   :  { %5105 = vmatpush1.bf16.msra.mxu0 %v10526_v56  ;;  %5146 = vmatpush1.bf16.msra.mxu1 %v10528_v9  ;;  %v4346_v56 = vld [vmem:[#allocation2 + $0x310] sm:$0xff] }
 0x82a   :  { %5106 = vmatprep.subr.bf16.mxu0 %v10519_v4  ;;  %5147 = vmatprep.subr.bf16.mxu1 %v10521_v38  ;;  %v4350_v9 = vld [vmem:[#allocation2 + $0x330] sm:$0xff]  ;;  %v4347_v4 = vld [vmem:[#allocation2 + $0x318] sm:$0xff]  ;;  %v10600_v38 = vcombine.low %v4355_v45, %v4359_v0 }
 0x82b   :  { %v10591_v14 = vcombine.high %v4346_v56, %v4350_v9  ;;  %v10593_v47 = vcombine.high %v4347_v4, %v4351_v10  ;;  %v10590_v26 = vcombine.low %v4346_v56, %v4350_v9  ;;  %v4171_v9 = vld [vmem:[#allocation2 + $0x11a8] sm:$0xff] }
 0x82d   :  { %5107 = vmatpush1.bf16.msra.mxu0 %v10518_v58  ;;  %5148 = vmatpush1.bf16.msra.mxu1 %v10520_v25  ;;  %v4338_v58 = vld [vmem:[#allocation2 + $0x2d0] sm:$0xff] }
 0x82e   :  { %5108 = vmatprep.subr.bf16.mxu0 %v10511_v51  ;;  %5149 = vmatprep.subr.bf16.mxu1 %v10513_v6  ;;  %v4342_v25 = vld [vmem:[#allocation2 + $0x2f0] sm:$0xff]  ;;  %v4339_v51 = vld [vmem:[#allocation2 + $0x2d8] sm:$0xff]  ;;  %v10592_v6 = vcombine.low %v4347_v4, %v4351_v10 }
 0x82f   :  { %v10583_v19 = vcombine.high %v4338_v58, %v4342_v25  ;;  %v10585_v17 = vcombine.high %v4339_v51, %v4343_v11  ;;  %v10582_v21 = vcombine.low %v4338_v58, %v4342_v25  ;;  %v14529_v58 = vpack.c.bf16 %v14484_v28, %v14484_v28  ;;  %v4159_v25 = vld [vmem:[#allocation2 + $0x1148] sm:$0xff] }
 0x830   :  { %v4151_v28 = vld [vmem:[#allocation2 + $0x1108] sm:$0xff] }
 0x831   :  { %5109 = vmatpush1.bf16.msra.mxu0 %v10510_v31  ;;  %5150 = vmatpush1.bf16.msra.mxu1 %v10512_v59  ;;  %v4330_v31 = vld [vmem:[#allocation2 + $0x290] sm:$0xff] }
 0x832   :  { %5110 = vmatprep.subr.bf16.mxu0 %v10503_v16  ;;  %5151 = vmatprep.subr.bf16.mxu1 %v10505_v29  ;;  %v4334_v59 = vld [vmem:[#allocation2 + $0x2b0] sm:$0xff]  ;;  %v4331_v16 = vld [vmem:[#allocation2 + $0x298] sm:$0xff]  ;;  %v10584_v29 = vcombine.low %v4339_v51, %v4343_v11  ;;  %v4163_v51 = vld [vmem:[#allocation2 + $0x1168] sm:$0xff] }
 0x833   :  { %v10575_v20 = vcombine.high %v4330_v31, %v4334_v59  ;;  %v10577_v61 = vcombine.high %v4331_v16, %v4335_v60  ;;  %v10574_v34 = vcombine.low %v4330_v31, %v4334_v59  ;;  %v4154_v31 = vld [vmem:[#allocation2 + $0x1120] sm:$0xff]  ;;  %v4155_v59 = vld [vmem:[#allocation2 + $0x1128] sm:$0xff] }
 0x835   :  { %5111 = vmatpush1.bf16.msra.mxu0 %v10502_v8  ;;  %5152 = vmatpush1.bf16.msra.mxu1 %v10504_v18  ;;  %v4322_v8 = vld [vmem:[#allocation2 + $0x250] sm:$0xff] }
 0x836   :  { %5112 = vmatprep.subr.bf16.mxu0 %v10495_v50  ;;  %5153 = vmatprep.subr.bf16.mxu1 %v10497_v63  ;;  %v4326_v18 = vld [vmem:[#allocation2 + $0x270] sm:$0xff]  ;;  %v4323_v50 = vld [vmem:[#allocation2 + $0x258] sm:$0xff]  ;;  %v10576_v63 = vcombine.low %v4331_v16, %v4335_v60  ;;  %v10653_v60 = vcombine.high %v4151_v28, %v4155_v59 }
 0x837   :  { %v10567_v57 = vcombine.high %v4322_v8, %v4326_v18  ;;  %v10569_v2 = vcombine.high %v4323_v50, %v4327_v24  ;;  %v10566_v32 = vcombine.low %v4322_v8, %v4326_v18  ;;  %v4147_v8 = vld [vmem:[#allocation2 + $0x10e8] sm:$0xff] }
 0x839   :  { %5113 = vmatpush1.bf16.msra.mxu0 %v10494_v35  ;;  %5154 = vmatpush1.bf16.msra.mxu1 %v10496_v13  ;;  %v4314_v35 = vld [vmem:[#allocation2 + $0x210] sm:$0xff] }
 0x83a   :  { %5114 = vmatprep.subr.bf16.mxu0 %v10615_v49  ;;  %5155 = vmatprep.subr.bf16.mxu1 %v10617_v22  ;;  %v4318_v13 = vld [vmem:[#allocation2 + $0x230] sm:$0xff]  ;;  %v4315_v49 = vld [vmem:[#allocation2 + $0x218] sm:$0xff]  ;;  %v10568_v22 = vcombine.low %v4323_v50, %v4327_v24  ;;  %v10652_v50 = vcombine.low %v4151_v28, %v4155_v59 }
 0x83b   :  { %v10559_v37 = vcombine.high %v4314_v35, %v4318_v13  ;;  %v10561_v5 = vcombine.high %v4315_v49, %v4319_v48  ;;  %v10558_v45 = vcombine.low %v4314_v35, %v4318_v13  ;;  %v4139_v35 = vld [vmem:[#allocation2 + $0x10a8] sm:$0xff] }
 0x83d   :  { %5115 = vmatpush2.bf16.msra.mxu0 %v10614_v23  ;;  %5156 = vmatpush2.bf16.msra.mxu1 %v10616_v55  ;;  %v4174_v23 = vld [vmem:[#allocation2 + $0x11c0] sm:$0xff] }
 0x83e   :  { %5116 = vmatprep.subr.bf16.mxu0 %v10607_v43  ;;  %5157 = vmatprep.subr.bf16.mxu1 %v10609_v62  ;;  %v4178_v55 = vld [vmem:[#allocation2 + $0x11e0] sm:$0xff]  ;;  %v4175_v43 = vld [vmem:[#allocation2 + $0x11c8] sm:$0xff]  ;;  %v10560_v62 = vcombine.low %v4315_v49, %v4319_v48 }
 0x83f   :  { %v10675_v0 = vcombine.high %v4174_v23, %v4178_v55  ;;  %v10677_v56 = vcombine.high %v4175_v43, %v4179_v1  ;;  %v10674_v4 = vcombine.low %v4174_v23, %v4178_v55  ;;  %v4131_v23 = vld [vmem:[#allocation2 + $0x1068] sm:$0xff] }
 0x841   :  { %5117 = vmatpush2.bf16.msra.mxu0 %v10606_v30  ;;  %5158 = vmatpush2.bf16.msra.mxu1 %v10608_v40  ;;  %v4166_v30 = vld [vmem:[#allocation2 + $0x1180] sm:$0xff] }
 0x842   :  { %5118 = vmatprep.subr.bf16.mxu0 %v10599_v36  ;;  %5159 = vmatprep.subr.bf16.mxu1 %v10601_v3  ;;  %v4170_v40 = vld [vmem:[#allocation2 + $0x11a0] sm:$0xff]  ;;  %v4167_v36 = vld [vmem:[#allocation2 + $0x1188] sm:$0xff]  ;;  %v10676_v3 = vcombine.low %v4175_v43, %v4179_v1 }
 0x843   :  { %v10667_v10 = vcombine.high %v4166_v30, %v4170_v40  ;;  %v10668_v11 = vcombine.low %v4167_v36, %v4171_v9 }
 0x845   :  { %5119 = vmatpush2.bf16.msra.mxu0 %v10598_v39  ;;  %5160 = vmatpush2.bf16.msra.mxu1 %v10600_v38  ;;  %v10669_v39 = vcombine.high %v4167_v36, %v4171_v9  ;;  %v4158_v38 = vld [vmem:[#allocation2 + $0x1140] sm:$0xff] }
 0x846   :  { %5120 = vmatprep.subr.bf16.mxu0 %v10591_v14  ;;  %5161 = vmatprep.subr.bf16.mxu1 %v10593_v47  ;;  %v4162_v14 = vld [vmem:[#allocation2 + $0x1160] sm:$0xff]  ;;  %v10666_v47 = vcombine.low %v4166_v30, %v4170_v40  ;;  %v4123_v30 = vld [vmem:[#allocation2 + $0x1028] sm:$0xff] }
 0x847   :  { %v10658_v16 = vcombine.low %v4158_v38, %v4162_v14 }
 0x849   :  { %5121 = vmatpush2.bf16.msra.mxu0 %v10590_v26  ;;  %5162 = vmatpush2.bf16.msra.mxu1 %v10592_v6  ;;  %v10659_v26 = vcombine.high %v4158_v38, %v4162_v14  ;;  %v10661_v6 = vcombine.high %v4159_v25, %v4163_v51 }
 0x84a   :  { %5122 = vmatprep.subr.bf16.mxu0 %v10583_v19  ;;  %5163 = vmatprep.subr.bf16.mxu1 %v10585_v17  ;;  %v4150_v19 = vld [vmem:[#allocation2 + $0x1100] sm:$0xff] }
 0x84b   :  { %v10651_v17 = vcombine.high %v4150_v19, %v4154_v31  ;;  %v10650_v18 = vcombine.low %v4150_v19, %v4154_v31 }
 0x84d   :  { %5123 = vmatpush2.bf16.msra.mxu0 %v10582_v21  ;;  %5164 = vmatpush2.bf16.msra.mxu1 %v10584_v29  ;;  %v4142_v21 = vld [vmem:[#allocation2 + $0x10c0] sm:$0xff] }
 0x84e   :  { %5124 = vmatprep.subr.bf16.mxu0 %v10575_v20  ;;  %5165 = vmatprep.subr.bf16.mxu1 %v10577_v61  ;;  %v4146_v29 = vld [vmem:[#allocation2 + $0x10e0] sm:$0xff]  ;;  %v4143_v20 = vld [vmem:[#allocation2 + $0x10c8] sm:$0xff] }
 0x84f   :  { %v10643_v61 = vcombine.high %v4142_v21, %v4146_v29  ;;  %v10645_v24 = vcombine.high %v4143_v20, %v4147_v8  ;;  %v10642_v13 = vcombine.low %v4142_v21, %v4146_v29  ;;  %v10644_v49 = vcombine.low %v4143_v20, %v4147_v8 }
 0x851   :  { %5125 = vmatpush2.bf16.msra.mxu0 %v10574_v34  ;;  %5166 = vmatpush2.bf16.msra.mxu1 %v10576_v63  ;;  %v4134_v34 = vld [vmem:[#allocation2 + $0x1080] sm:$0xff] }
 0x852   :  { %5126 = vmatprep.subr.bf16.mxu0 %v10567_v57  ;;  %5167 = vmatprep.subr.bf16.mxu1 %v10569_v2  ;;  %v4138_v63 = vld [vmem:[#allocation2 + $0x10a0] sm:$0xff]  ;;  %v4135_v57 = vld [vmem:[#allocation2 + $0x1088] sm:$0xff] }
 0x853   :  { %v10635_v2 = vcombine.high %v4134_v34, %v4138_v63  ;;  %v10637_v48 = vcombine.high %v4135_v57, %v4139_v35  ;;  %v10634_v55 = vcombine.low %v4134_v34, %v4138_v63  ;;  %v10636_v43 = vcombine.low %v4135_v57, %v4139_v35 }
 0x855   :  { %5127 = vmatpush2.bf16.msra.mxu0 %v10566_v32  ;;  %5168 = vmatpush2.bf16.msra.mxu1 %v10568_v22  ;;  %v4126_v32 = vld [vmem:[#allocation2 + $0x1040] sm:$0xff] }
 0x856   :  { %5128 = vmatprep.subr.bf16.mxu0 %v10559_v37  ;;  %5169 = vmatprep.subr.bf16.mxu1 %v10561_v5  ;;  %v4130_v22 = vld [vmem:[#allocation2 + $0x1060] sm:$0xff]  ;;  %v4127_v37 = vld [vmem:[#allocation2 + $0x1048] sm:$0xff] }
 0x857   :  { %v10627_v5 = vcombine.high %v4126_v32, %v4130_v22  ;;  %v10629_v1 = vcombine.high %v4127_v37, %v4131_v23  ;;  %v10626_v40 = vcombine.low %v4126_v32, %v4130_v22  ;;  %v10628_v36 = vcombine.low %v4127_v37, %v4131_v23 }
 0x859   :  { %5129 = vmatpush2.bf16.msra.mxu0 %v10558_v45  ;;  %5170 = vmatpush2.bf16.msra.mxu1 %v10560_v62  ;;  %v4118_v45 = vld [vmem:[#allocation2 + $0x1000] sm:$0xff] }
 0x85a   :  { %5820 = vmatprep.subr.bf16.mxu0 %v10675_v0  ;;  %5861 = vmatprep.subr.bf16.mxu1 %v10677_v56  ;;  %v4122_v62 = vld [vmem:[#allocation2 + $0x1020] sm:$0xff]  ;;  %v4119_v0 = vld [vmem:[#allocation2 + $0x1008] sm:$0xff] }
 0x85b   :  { %v10619_v56 = vcombine.high %v4118_v45, %v4122_v62  ;;  %v10621_v9 = vcombine.high %v4119_v0, %v4123_v30  ;;  %v10618_v38 = vcombine.low %v4118_v45, %v4122_v62  ;;  %v10620_v14 = vcombine.low %v4119_v0, %v4123_v30 }
 0x85c   :  { %5131 = vmatmul.mubr.bf16.vlgmr.msra.gmra.mxu0 %v14521_v12  ;;  %5172 = vmatmul.mubr.bf16.vlgmr.msra.gmra.mxu1 %v14521_v12  ;;  %v10660_v12 = vcombine.low %v4159_v25, %v4163_v51 }
 0x85d   :  { %5821 = vmatpush1.bf16.msra.mxu0 %v10674_v4  ;;  %5862 = vmatpush1.bf16.msra.mxu1 %v10676_v3  ;;  %v4238_v4 = vld [vmem:[#allocation2 + $0x13c0] sm:$0xff] }
 0x85e   :  { %5822 = vmatprep.subr.bf16.mxu0 %v10667_v10  ;;  %5863 = vmatprep.subr.bf16.mxu1 %v10669_v39  ;;  %v4242_v3 = vld [vmem:[#allocation2 + $0x13e0] sm:$0xff]  ;;  %v4239_v10 = vld [vmem:[#allocation2 + $0x13c8] sm:$0xff] }
 0x85f   :  { %5852 = vmatprep.mubr.bf16.mxu0 %v14529_v58  ;;  %5893 = vmatprep.mubr.bf16.mxu1 %v14529_v58  ;;  %v4243_v39 = vld [vmem:[#allocation2 + $0x13e8] sm:$0xff]  ;;  %v10739_v25 = vcombine.high %v4238_v4, %v4242_v3  ;;  %v10738_v19 = vcombine.low %v4238_v4, %v4242_v3 }
 0x860   :  { %v10741_v51 = vcombine.high %v4239_v10, %v4243_v39  ;;  %v10740_v31 = vcombine.low %v4239_v10, %v4243_v39 }
 0x861   :  { %5823 = vmatpush1.bf16.msra.mxu0 %v10666_v47  ;;  %5864 = vmatpush1.bf16.msra.mxu1 %v10668_v11  ;;  %v4230_v47 = vld [vmem:[#allocation2 + $0x1380] sm:$0xff] }
 0x862   :  { %5824 = vmatprep.subr.bf16.mxu0 %v10659_v26  ;;  %5865 = vmatprep.subr.bf16.mxu1 %v10661_v6  ;;  %v4234_v11 = vld [vmem:[#allocation2 + $0x13a0] sm:$0xff]  ;;  %v4231_v26 = vld [vmem:[#allocation2 + $0x1388] sm:$0xff] }
 0x863   :  { %v4235_v6 = vld [vmem:[#allocation2 + $0x13a8] sm:$0xff]  ;;  %v10731_v28 = vcombine.high %v4230_v47, %v4234_v11  ;;  %v10730_v21 = vcombine.low %v4230_v47, %v4234_v11 }
 0x864   :  { %v10733_v59 = vcombine.high %v4231_v26, %v4235_v6  ;;  %v10732_v29 = vcombine.low %v4231_v26, %v4235_v6 }
 0x865   :  { %5825 = vmatpush1.bf16.msra.mxu0 %v10658_v16  ;;  %5866 = vmatpush1.bf16.msra.mxu1 %v10660_v12  ;;  %v4222_v16 = vld [vmem:[#allocation2 + $0x1340] sm:$0xff] }
 0x866   :  { %5826 = vmatprep.subr.bf16.mxu0 %v10651_v17  ;;  %5867 = vmatprep.subr.bf16.mxu1 %v10653_v60  ;;  %v4226_v12 = vld [vmem:[#allocation2 + $0x1360] sm:$0xff]  ;;  %v4223_v17 = vld [vmem:[#allocation2 + $0x1348] sm:$0xff] }
 0x867   :  { %v4227_v60 = vld [vmem:[#allocation2 + $0x1368] sm:$0xff]  ;;  %v10723_v20 = vcombine.high %v4222_v16, %v4226_v12  ;;  %v10722_v34 = vcombine.low %v4222_v16, %v4226_v12 }
 0x868   :  { %v10725_v8 = vcombine.high %v4223_v17, %v4227_v60  ;;  %v10724_v63 = vcombine.low %v4223_v17, %v4227_v60 }
 0x869   :  { %5827 = vmatpush1.bf16.msra.mxu0 %v10650_v18  ;;  %5868 = vmatpush1.bf16.msra.mxu1 %v10652_v50  ;;  %v4214_v18 = vld [vmem:[#allocation2 + $0x1300] sm:$0xff] }
 0x86a   :  { %5828 = vmatprep.subr.bf16.mxu0 %v10643_v61  ;;  %5869 = vmatprep.subr.bf16.mxu1 %v10645_v24  ;;  %v4218_v50 = vld [vmem:[#allocation2 + $0x1320] sm:$0xff]  ;;  %v4215_v61 = vld [vmem:[#allocation2 + $0x1308] sm:$0xff] }
 0x86b   :  { %v4219_v24 = vld [vmem:[#allocation2 + $0x1328] sm:$0xff]  ;;  %v10715_v57 = vcombine.high %v4214_v18, %v4218_v50  ;;  %v10714_v32 = vcombine.low %v4214_v18, %v4218_v50  ;;  %v4173_v18 = vld [vmem:[#allocation2 + $0x11b8] sm:$0xff] }
 0x86c   :  { %v10717_v35 = vcombine.high %v4215_v61, %v4219_v24  ;;  %v10716_v22 = vcombine.low %v4215_v61, %v4219_v24 }
 0x86d   :  { %5829 = vmatpush1.bf16.msra.mxu0 %v10642_v13  ;;  %5870 = vmatpush1.bf16.msra.mxu1 %v10644_v49  ;;  %v4206_v13 = vld [vmem:[#allocation2 + $0x12c0] sm:$0xff] }
 0x86e   :  { %5830 = vmatprep.subr.bf16.mxu0 %v10635_v2  ;;  %5871 = vmatprep.subr.bf16.mxu1 %v10637_v48  ;;  %v4210_v49 = vld [vmem:[#allocation2 + $0x12e0] sm:$0xff]  ;;  %v4207_v2 = vld [vmem:[#allocation2 + $0x12c8] sm:$0xff] }
 0x86f   :  { %v4211_v48 = vld [vmem:[#allocation2 + $0x12e8] sm:$0xff]  ;;  %v10707_v37 = vcombine.high %v4206_v13, %v4210_v49  ;;  %v10706_v45 = vcombine.low %v4206_v13, %v4210_v49  ;;  %v4165_v13 = vld [vmem:[#allocation2 + $0x1178] sm:$0xff] }
 0x870   :  { %v10709_v23 = vcombine.high %v4207_v2, %v4211_v48  ;;  %v10708_v62 = vcombine.low %v4207_v2, %v4211_v48 }
 0x871   :  { %5831 = vmatpush1.bf16.msra.mxu0 %v10634_v55  ;;  %5872 = vmatpush1.bf16.msra.mxu1 %v10636_v43  ;;  %v4198_v55 = vld [vmem:[#allocation2 + $0x1280] sm:$0xff] }
 0x872   :  { %5832 = vmatprep.subr.bf16.mxu0 %v10627_v5  ;;  %5873 = vmatprep.subr.bf16.mxu1 %v10629_v1  ;;  %v4202_v43 = vld [vmem:[#allocation2 + $0x12a0] sm:$0xff]  ;;  %v4199_v5 = vld [vmem:[#allocation2 + $0x1288] sm:$0xff] }
 0x873   :  { %v4203_v1 = vld [vmem:[#allocation2 + $0x12a8] sm:$0xff]  ;;  %v10699_v0 = vcombine.high %v4198_v55, %v4202_v43  ;;  %v10698_v4 = vcombine.low %v4198_v55, %v4202_v43 }
 0x874   :  { %v10701_v30 = vcombine.high %v4199_v5, %v4203_v1  ;;  %v10700_v3 = vcombine.low %v4199_v5, %v4203_v1 }
 0x875   :  { %5833 = vmatpush1.bf16.msra.mxu0 %v10626_v40  ;;  %5874 = vmatpush1.bf16.msra.mxu1 %v10628_v36  ;;  %v4190_v40 = vld [vmem:[#allocation2 + $0x1240] sm:$0xff] }
 0x876   :  { %5834 = vmatprep.subr.bf16.mxu0 %v10619_v56  ;;  %5875 = vmatprep.subr.bf16.mxu1 %v10621_v9  ;;  %v4194_v36 = vld [vmem:[#allocation2 + $0x1260] sm:$0xff]  ;;  %v4191_v56 = vld [vmem:[#allocation2 + $0x1248] sm:$0xff] }
 0x877   :  { %v4195_v9 = vld [vmem:[#allocation2 + $0x1268] sm:$0xff]  ;;  %v10691_v10 = vcombine.high %v4190_v40, %v4194_v36  ;;  %v10690_v47 = vcombine.low %v4190_v40, %v4194_v36 }
 0x878   :  { %v10693_v39 = vcombine.high %v4191_v56, %v4195_v9  ;;  %v10692_v11 = vcombine.low %v4191_v56, %v4195_v9  ;;  %v4136_v9 = vld [vmem:[#allocation2 + $0x1090] sm:$0xff] }
 0x879   :  { %5835 = vmatpush1.bf16.msra.mxu0 %v10618_v38  ;;  %5876 = vmatpush1.bf16.msra.mxu1 %v10620_v14  ;;  %v4182_v38 = vld [vmem:[#allocation2 + $0x1200] sm:$0xff] }
 0x87a   :  { %5836 = vmatprep.subr.bf16.mxu0 %v10739_v25  ;;  %5877 = vmatprep.subr.bf16.mxu1 %v10741_v51  ;;  %v4186_v14 = vld [vmem:[#allocation2 + $0x1220] sm:$0xff]  ;;  %v4183_v25 = vld [vmem:[#allocation2 + $0x1208] sm:$0xff] }
 0x87b   :  { %v4187_v51 = vld [vmem:[#allocation2 + $0x1228] sm:$0xff]  ;;  %v10683_v26 = vcombine.high %v4182_v38, %v4186_v14  ;;  %v10682_v16 = vcombine.low %v4182_v38, %v4186_v14 }
 0x87c   :  { %v10685_v6 = vcombine.high %v4183_v25, %v4187_v51  ;;  %v10684_v12 = vcombine.low %v4183_v25, %v4187_v51  ;;  %v4128_v51 = vld [vmem:[#allocation2 + $0x1050] sm:$0xff] }
 0x87d   :  { %5837 = vmatpush2.bf16.msra.mxu0 %v10738_v19  ;;  %5878 = vmatpush2.bf16.msra.mxu1 %v10740_v31  ;;  %v4176_v19 = vld [vmem:[#allocation2 + $0x11d0] sm:$0xff] }
 0x87e   :  { %5838 = vmatprep.subr.bf16.mxu0 %v10731_v28  ;;  %5879 = vmatprep.subr.bf16.mxu1 %v10733_v59  ;;  %v4180_v31 = vld [vmem:[#allocation2 + $0x11f0] sm:$0xff]  ;;  %v4177_v28 = vld [vmem:[#allocation2 + $0x11d8] sm:$0xff] }
 0x87f   :  { %v4181_v59 = vld [vmem:[#allocation2 + $0x11f8] sm:$0xff]  ;;  %v10679_v17 = vcombine.high %v4176_v19, %v4180_v31  ;;  %v10678_v50 = vcombine.low %v4176_v19, %v4180_v31 }
 0x880   :  { %v10681_v60 = vcombine.high %v4177_v28, %v4181_v59  ;;  %v10680_v61 = vcombine.low %v4177_v28, %v4181_v59  ;;  %v4120_v59 = vld [vmem:[#allocation2 + $0x1010] sm:$0xff] }
 0x881   :  { %5839 = vmatpush2.bf16.msra.mxu0 %v10730_v21  ;;  %5880 = vmatpush2.bf16.msra.mxu1 %v10732_v29  ;;  %v4168_v21 = vld [vmem:[#allocation2 + $0x1190] sm:$0xff] }
 0x882   :  { %5840 = vmatprep.subr.bf16.mxu0 %v10723_v20  ;;  %5881 = vmatprep.subr.bf16.mxu1 %v10725_v8  ;;  %v4172_v29 = vld [vmem:[#allocation2 + $0x11b0] sm:$0xff]  ;;  %v14537_v20 = vpack.c.bf16 %v14482_v7, %v14482_v7  ;;  %v4169_v8 = vld [vmem:[#allocation2 + $0x1198] sm:$0xff] }
 0x883   :  { %v10671_v24 = vcombine.high %v4168_v21, %v4172_v29  ;;  %v10670_v7 = vcombine.low %v4168_v21, %v4172_v29  ;;  %v10672_v49 = vcombine.low %v4169_v8, %v4173_v18 }
 0x885   :  { %5841 = vmatpush2.bf16.msra.mxu0 %v10722_v34  ;;  %5882 = vmatpush2.bf16.msra.mxu1 %v10724_v63  ;;  %v10673_v34 = vcombine.high %v4169_v8, %v4173_v18  ;;  %v4160_v63 = vld [vmem:[#allocation2 + $0x1150] sm:$0xff] }
 0x886   :  { %5842 = vmatprep.subr.bf16.mxu0 %v10715_v57  ;;  %5883 = vmatprep.subr.bf16.mxu1 %v10717_v35  ;;  %v4164_v57 = vld [vmem:[#allocation2 + $0x1170] sm:$0xff]  ;;  %v4161_v35 = vld [vmem:[#allocation2 + $0x1158] sm:$0xff] }
 0x887   :  { %v10663_v2 = vcombine.high %v4160_v63, %v4164_v57  ;;  %v10665_v48 = vcombine.high %v4161_v35, %v4165_v13  ;;  %v10662_v55 = vcombine.low %v4160_v63, %v4164_v57  ;;  %v10664_v43 = vcombine.low %v4161_v35, %v4165_v13  ;;  %v4240_v18 = vld [vmem:[#allocation2 + $0x13d0] sm:$0xff] }
 0x888   :  { %v4232_v13 = vld [vmem:[#allocation2 + $0x1390] sm:$0xff] }
 0x889   :  { %5843 = vmatpush2.bf16.msra.mxu0 %v10714_v32  ;;  %5884 = vmatpush2.bf16.msra.mxu1 %v10716_v22  ;;  %v4152_v32 = vld [vmem:[#allocation2 + $0x1110] sm:$0xff] }
 0x88a   :  { %5844 = vmatprep.subr.bf16.mxu0 %v10707_v37  ;;  %5885 = vmatprep.subr.bf16.mxu1 %v10709_v23  ;;  %v4156_v22 = vld [vmem:[#allocation2 + $0x1130] sm:$0xff]  ;;  %v4153_v37 = vld [vmem:[#allocation2 + $0x1118] sm:$0xff] }
 0x88b   :  { %v4157_v23 = vld [vmem:[#allocation2 + $0x1138] sm:$0xff]  ;;  %v10655_v5 = vcombine.high %v4152_v32, %v4156_v22  ;;  %v10654_v40 = vcombine.low %v4152_v32, %v4156_v22 }
 0x88c   :  { %v10657_v1 = vcombine.high %v4153_v37, %v4157_v23  ;;  %v10656_v36 = vcombine.low %v4153_v37, %v4157_v23  ;;  %v4224_v23 = vld [vmem:[#allocation2 + $0x1350] sm:$0xff] }
 0x88d   :  { %5845 = vmatpush2.bf16.msra.mxu0 %v10706_v45  ;;  %5886 = vmatpush2.bf16.msra.mxu1 %v10708_v62  ;;  %v4144_v45 = vld [vmem:[#allocation2 + $0x10d0] sm:$0xff] }
 0x88e   :  { %5846 = vmatprep.subr.bf16.mxu0 %v10699_v0  ;;  %5887 = vmatprep.subr.bf16.mxu1 %v10701_v30  ;;  %v4148_v62 = vld [vmem:[#allocation2 + $0x10f0] sm:$0xff]  ;;  %v4145_v0 = vld [vmem:[#allocation2 + $0x10d8] sm:$0xff] }
 0x88f   :  { %v4149_v30 = vld [vmem:[#allocation2 + $0x10f8] sm:$0xff]  ;;  %v10647_v56 = vcombine.high %v4144_v45, %v4148_v62 }
 0x890   :  { %v10648_v38 = vcombine.low %v4145_v0, %v4149_v30 }
 0x891   :  { %5847 = vmatpush2.bf16.msra.mxu0 %v10698_v4  ;;  %5888 = vmatpush2.bf16.msra.mxu1 %v10700_v3  ;;  %v4140_v4 = vld [vmem:[#allocation2 + $0x10b0] sm:$0xff]  ;;  %v4137_v3 = vld [vmem:[#allocation2 + $0x1098] sm:$0xff] }
 0x892   :  { %5848 = vmatprep.subr.bf16.mxu0 %v10691_v10  ;;  %5889 = vmatprep.subr.bf16.mxu1 %v10693_v39  ;;  %v4141_v10 = vld [vmem:[#allocation2 + $0x10b8] sm:$0xff]  ;;  %v10646_v39 = vcombine.low %v4144_v45, %v4148_v62  ;;  %v10639_v14 = vcombine.high %v4136_v9, %v4140_v4 }
 0x893   :  { %v10641_v25 = vcombine.high %v4137_v3, %v4141_v10  ;;  %v10640_v19 = vcombine.low %v4137_v3, %v4141_v10  ;;  %v4208_v10 = vld [vmem:[#allocation2 + $0x12d0] sm:$0xff] }
 0x895   :  { %5849 = vmatpush2.bf16.msra.mxu0 %v10690_v47  ;;  %5890 = vmatpush2.bf16.msra.mxu1 %v10692_v11  ;;  %v4132_v47 = vld [vmem:[#allocation2 + $0x1070] sm:$0xff]  ;;  %v4129_v11 = vld [vmem:[#allocation2 + $0x1058] sm:$0xff] }
 0x896   :  { %5850 = vmatprep.subr.bf16.mxu0 %v10683_v26  ;;  %5891 = vmatprep.subr.bf16.mxu1 %v10685_v6  ;;  %v4133_v26 = vld [vmem:[#allocation2 + $0x1078] sm:$0xff]  ;;  %v10638_v6 = vcombine.low %v4136_v9, %v4140_v4  ;;  %v10631_v31 = vcombine.high %v4128_v51, %v4132_v47 }
 0x897   :  { %v10633_v28 = vcombine.high %v4129_v11, %v4133_v26  ;;  %v10632_v21 = vcombine.low %v4129_v11, %v4133_v26  ;;  %v4200_v26 = vld [vmem:[#allocation2 + $0x1290] sm:$0xff] }
 0x899   :  { %5851 = vmatpush2.bf16.msra.mxu0 %v10682_v16  ;;  %5892 = vmatpush2.bf16.msra.mxu1 %v10684_v12  ;;  %v4124_v16 = vld [vmem:[#allocation2 + $0x1030] sm:$0xff]  ;;  %v4121_v12 = vld [vmem:[#allocation2 + $0x1018] sm:$0xff] }
 0x89a   :  { %5902 = vmatprep.subr.bf16.mxu0 %v10679_v17  ;;  %5943 = vmatprep.subr.bf16.mxu1 %v10681_v60  ;;  %v4125_v17 = vld [vmem:[#allocation2 + $0x1038] sm:$0xff]  ;;  %v10630_v60 = vcombine.low %v4128_v51, %v4132_v47  ;;  %v10623_v29 = vcombine.high %v4120_v59, %v4124_v16 }
 0x89b   :  { %v10625_v8 = vcombine.high %v4121_v12, %v4125_v17  ;;  %v10624_v63 = vcombine.low %v4121_v12, %v4125_v17  ;;  %v4192_v17 = vld [vmem:[#allocation2 + $0x1250] sm:$0xff] }
 0x89c   :  { %5853 = vmatmul.mubr.bf16.vlgmr.msra.gmra.mxu0 %v14537_v20  ;;  %5894 = vmatmul.mubr.bf16.vlgmr.msra.gmra.mxu1 %v14537_v20 }
 0x89d   :  { %5903 = vmatpush1.bf16.msra.mxu0 %v10678_v50  ;;  %5944 = vmatpush1.bf16.msra.mxu1 %v10680_v61  ;;  %v4244_v50 = vld [vmem:[#allocation2 + $0x13f0] sm:$0xff]  ;;  %v4241_v61 = vld [vmem:[#allocation2 + $0x13d8] sm:$0xff] }
 0x89e   :  { %5904 = vmatprep.subr.bf16.mxu0 %v10671_v24  ;;  %5945 = vmatprep.subr.bf16.mxu1 %v10673_v34  ;;  %v4245_v24 = vld [vmem:[#allocation2 + $0x13f8] sm:$0xff]  ;;  %v10622_v34 = vcombine.low %v4120_v59, %v4124_v16  ;;  %v10743_v57 = vcombine.high %v4240_v18, %v4244_v50 }
 0x89f   :  { %5934 = vmatprep.mubr.bf16.mxu0 %v14529_v58  ;;  %5975 = vmatprep.mubr.bf16.mxu1 %v14529_v58  ;;  %v10649_v58 = vcombine.high %v4145_v0, %v4149_v30  ;;  %v10745_v35 = vcombine.high %v4241_v61, %v4245_v24  ;;  %v10744_v32 = vcombine.low %v4241_v61, %v4245_v24  ;;  %v4216_v30 = vld [vmem:[#allocation2 + $0x1310] sm:$0xff] }
 0x8a0   :  { %v4184_v24 = vld [vmem:[#allocation2 + $0x1210] sm:$0xff] }
 0x8a1   :  { %5905 = vmatpush1.bf16.msra.mxu0 %v10670_v7  ;;  %5946 = vmatpush1.bf16.msra.mxu1 %v10672_v49  ;;  %v4236_v7 = vld [vmem:[#allocation2 + $0x13b0] sm:$0xff]  ;;  %v4233_v49 = vld [vmem:[#allocation2 + $0x1398] sm:$0xff] }
 0x8a2   :  { %5906 = vmatprep.subr.bf16.mxu0 %v10663_v2  ;;  %5947 = vmatprep.subr.bf16.mxu1 %v10665_v48  ;;  %v4237_v2 = vld [vmem:[#allocation2 + $0x13b8] sm:$0xff]  ;;  %v10742_v48 = vcombine.low %v4240_v18, %v4244_v50  ;;  %v10735_v22 = vcombine.high %v4232_v13, %v4236_v7 }
 0x8a3   :  { %v10737_v37 = vcombine.high %v4233_v49, %v4237_v2  ;;  %v10736_v45 = vcombine.low %v4233_v49, %v4237_v2  ;;  %v6042_v2 = vld [vmem:[#allocation2 + $0x5c0] sm:$0xff] }
 0x8a5   :  { %5907 = vmatpush1.bf16.msra.mxu0 %v10662_v55  ;;  %5948 = vmatpush1.bf16.msra.mxu1 %v10664_v43  ;;  %v4228_v55 = vld [vmem:[#allocation2 + $0x1370] sm:$0xff]  ;;  %v4225_v43 = vld [vmem:[#allocation2 + $0x1358] sm:$0xff] }
 0x8a6   :  { %5908 = vmatprep.subr.bf16.mxu0 %v10655_v5  ;;  %5949 = vmatprep.subr.bf16.mxu1 %v10657_v1  ;;  %v4229_v5 = vld [vmem:[#allocation2 + $0x1378] sm:$0xff]  ;;  %v10734_v1 = vcombine.low %v4232_v13, %v4236_v7  ;;  %v10727_v62 = vcombine.high %v4224_v23, %v4228_v55 }
 0x8a7   :  { %v10729_v0 = vcombine.high %v4225_v43, %v4229_v5  ;;  %v10728_v9 = vcombine.low %v4225_v43, %v4229_v5  ;;  %v6034_v5 = vld [vmem:[#allocation2 + $0x580] sm:$0xff] }
 0x8a9   :  { %5909 = vmatpush1.bf16.msra.mxu0 %v10654_v40  ;;  %5950 = vmatpush1.bf16.msra.mxu1 %v10656_v36  ;;  %v4220_v40 = vld [vmem:[#allocation2 + $0x1330] sm:$0xff]  ;;  %v4217_v36 = vld [vmem:[#allocation2 + $0x1318] sm:$0xff] }
 0x8aa   :  { %5910 = vmatprep.subr.bf16.mxu0 %v10647_v56  ;;  %5951 = vmatprep.subr.bf16.mxu1 %v10649_v58  ;;  %v4221_v56 = vld [vmem:[#allocation2 + $0x1338] sm:$0xff]  ;;  %v10726_v58 = vcombine.low %v4224_v23, %v4228_v55  ;;  %v10719_v4 = vcombine.high %v4216_v30, %v4220_v40 }
 0x8ab   :  { %v10721_v3 = vcombine.high %v4217_v36, %v4221_v56  ;;  %v10720_v51 = vcombine.low %v4217_v36, %v4221_v56  ;;  %v6026_v56 = vld [vmem:[#allocation2 + $0x540] sm:$0xff] }
 0x8ad   :  { %5911 = vmatpush1.bf16.msra.mxu0 %v10646_v39  ;;  %5952 = vmatpush1.bf16.msra.mxu1 %v10648_v38  ;;  %v4212_v39 = vld [vmem:[#allocation2 + $0x12f0] sm:$0xff]  ;;  %v4209_v38 = vld [vmem:[#allocation2 + $0x12d8] sm:$0xff] }
 0x8ae   :  { %5912 = vmatprep.subr.bf16.mxu0 %v10639_v14  ;;  %5953 = vmatprep.subr.bf16.mxu1 %v10641_v25  ;;  %v4213_v14 = vld [vmem:[#allocation2 + $0x12f8] sm:$0xff]  ;;  %v10718_v25 = vcombine.low %v4216_v30, %v4220_v40  ;;  %v10711_v47 = vcombine.high %v4208_v10, %v4212_v39 }
 0x8af   :  { %v10713_v11 = vcombine.high %v4209_v38, %v4213_v14  ;;  %v10712_v59 = vcombine.low %v4209_v38, %v4213_v14 }
 0x8b1   :  { %5913 = vmatpush1.bf16.msra.mxu0 %v10638_v6  ;;  %5954 = vmatpush1.bf16.msra.mxu1 %v10640_v19  ;;  %v4204_v6 = vld [vmem:[#allocation2 + $0x12b0] sm:$0xff]  ;;  %v4201_v19 = vld [vmem:[#allocation2 + $0x1298] sm:$0xff] }
 0x8b2   :  { %5914 = vmatprep.subr.bf16.mxu0 %v10631_v31  ;;  %5955 = vmatprep.subr.bf16.mxu1 %v10633_v28  ;;  %v4205_v31 = vld [vmem:[#allocation2 + $0x12b8] sm:$0xff]  ;;  %v10710_v28 = vcombine.low %v4208_v10, %v4212_v39  ;;  %v10703_v16 = vcombine.high %v4200_v26, %v4204_v6  ;;  %v6031_v10 = vld [vmem:[#allocation2 + $0x568] sm:$0xff] }
 0x8b3   :  { %v10705_v12 = vcombine.high %v4201_v19, %v4205_v31  ;;  %v10704_v18 = vcombine.low %v4201_v19, %v4205_v31  ;;  %v6019_v19 = vld [vmem:[#allocation2 + $0x508] sm:$0xff] }
 0x8b4   :  { %v6023_v31 = vld [vmem:[#allocation2 + $0x528] sm:$0xff] }
 0x8b5   :  { %5915 = vmatpush1.bf16.msra.mxu0 %v10630_v60  ;;  %5956 = vmatpush1.bf16.msra.mxu1 %v10632_v21  ;;  %v4196_v60 = vld [vmem:[#allocation2 + $0x1270] sm:$0xff]  ;;  %v4193_v21 = vld [vmem:[#allocation2 + $0x1258] sm:$0xff] }
 0x8b6   :  { %5916 = vmatprep.subr.bf16.mxu0 %v10623_v29  ;;  %5957 = vmatprep.subr.bf16.mxu1 %v10625_v8  ;;  %v4197_v29 = vld [vmem:[#allocation2 + $0x1278] sm:$0xff]  ;;  %v10702_v8 = vcombine.low %v4200_v26, %v4204_v6  ;;  %v10695_v50 = vcombine.high %v4192_v17, %v4196_v60  ;;  %v6022_v26 = vld [vmem:[#allocation2 + $0x520] sm:$0xff] }
 0x8b7   :  { %v10697_v61 = vcombine.high %v4193_v21, %v4197_v29  ;;  %v10696_v13 = vcombine.low %v4193_v21, %v4197_v29  ;;  %v6010_v21 = vld [vmem:[#allocation2 + $0x4c0] sm:$0xff] }
 0x8b8   :  { %v6014_v29 = vld [vmem:[#allocation2 + $0x4e0] sm:$0xff] }
 0x8b9   :  { %5917 = vmatpush1.bf16.msra.mxu0 %v10622_v34  ;;  %5958 = vmatpush1.bf16.msra.mxu1 %v10624_v63  ;;  %v4188_v34 = vld [vmem:[#allocation2 + $0x1230] sm:$0xff]  ;;  %v4185_v63 = vld [vmem:[#allocation2 + $0x1218] sm:$0xff] }
 0x8ba   :  { %5918 = vmatprep.subr.bf16.mxu0 %v10743_v57  ;;  %5959 = vmatprep.subr.bf16.mxu1 %v10745_v35  ;;  %v4189_v57 = vld [vmem:[#allocation2 + $0x1238] sm:$0xff]  ;;  %v10694_v35 = vcombine.low %v4192_v17, %v4196_v60  ;;  %v10687_v7 = vcombine.high %v4184_v24, %v4188_v34  ;;  %v10781_v60 = vcombine.high %v6019_v19, %v6023_v31 }
 0x8bb   :  { %v10689_v49 = vcombine.high %v4185_v63, %v4189_v57  ;;  %v10688_v23 = vcombine.low %v4185_v63, %v4189_v57  ;;  %v6002_v63 = vld [vmem:[#allocation2 + $0x480] sm:$0xff] }
 0x8bc   :  { %v6006_v57 = vld [vmem:[#allocation2 + $0x4a0] sm:$0xff] }
 0x8bd   :  { %5919 = vmatpush2.bf16.msra.mxu0 %v10742_v48  ;;  %5960 = vmatpush2.bf16.msra.mxu1 %v10744_v32  ;;  %v6046_v48 = vld [vmem:[#allocation2 + $0x5e0] sm:$0xff]  ;;  %v6043_v32 = vld [vmem:[#allocation2 + $0x5c8] sm:$0xff] }
 0x8be   :  { %5920 = vmatprep.subr.bf16.mxu0 %v10735_v22  ;;  %5961 = vmatprep.subr.bf16.mxu1 %v10737_v37  ;;  %v6047_v22 = vld [vmem:[#allocation2 + $0x5e8] sm:$0xff]  ;;  %v10686_v37 = vcombine.low %v4184_v24, %v4188_v34  ;;  %v10803_v55 = vcombine.high %v6042_v2, %v6046_v48  ;;  %v10771_v24 = vcombine.high %v6010_v21, %v6014_v29 }
 0x8bf   :  { %v10805_v43 = vcombine.high %v6043_v32, %v6047_v22  ;;  %v10804_v30 = vcombine.low %v6043_v32, %v6047_v22  ;;  %v5994_v32 = vld [vmem:[#allocation2 + $0x440] sm:$0xff] }
 0x8c0   :  { %v5998_v22 = vld [vmem:[#allocation2 + $0x460] sm:$0xff] }
 0x8c1   :  { %5921 = vmatpush2.bf16.msra.mxu0 %v10734_v1  ;;  %5962 = vmatpush2.bf16.msra.mxu1 %v10736_v45  ;;  %v6038_v1 = vld [vmem:[#allocation2 + $0x5a0] sm:$0xff]  ;;  %v6035_v45 = vld [vmem:[#allocation2 + $0x588] sm:$0xff] }
 0x8c2   :  { %5922 = vmatprep.subr.bf16.mxu0 %v10727_v62  ;;  %5963 = vmatprep.subr.bf16.mxu1 %v10729_v0  ;;  %v6039_v62 = vld [vmem:[#allocation2 + $0x5a8] sm:$0xff]  ;;  %v10802_v0 = vcombine.low %v6042_v2, %v6046_v48  ;;  %v10795_v40 = vcombine.high %v6034_v5, %v6038_v1  ;;  %v10794_v38 = vcombine.low %v6034_v5, %v6038_v1 }
 0x8c3   :  { %v10797_v36 = vcombine.high %v6035_v45, %v6039_v62  ;;  %v10763_v2 = vcombine.high %v6002_v63, %v6006_v57  ;;  %v10755_v5 = vcombine.high %v5994_v32, %v5998_v22 }
 0x8c5   :  { %5923 = vmatpush2.bf16.msra.mxu0 %v10726_v58  ;;  %5964 = vmatpush2.bf16.msra.mxu1 %v10728_v9  ;;  %v6030_v58 = vld [vmem:[#allocation2 + $0x560] sm:$0xff]  ;;  %v14545_v9 = vpack.c.bf16 %v14509_v53, %v14509_v53 }
 0x8c6   :  { %5924 = vmatprep.subr.bf16.mxu0 %v10719_v4  ;;  %5965 = vmatprep.subr.bf16.mxu1 %v10721_v3  ;;  %v6027_v3 = vld [vmem:[#allocation2 + $0x548] sm:$0xff] }
 0x8c9   :  { %5925 = vmatpush2.bf16.msra.mxu0 %v10718_v25  ;;  %5966 = vmatpush2.bf16.msra.mxu1 %v10720_v51  ;;  %v10796_v25 = vcombine.low %v6035_v45, %v6039_v62  ;;  %v10787_v51 = vcombine.high %v6026_v56, %v6030_v58  ;;  %v5986_v45 = vld [vmem:[#allocation2 + $0x400] sm:$0xff] }
 0x8ca   :  { %5926 = vmatprep.subr.bf16.mxu0 %v10711_v47  ;;  %5967 = vmatprep.subr.bf16.mxu1 %v10713_v11  ;;  %v10789_v47 = vcombine.high %v6027_v3, %v6031_v10  ;;  %v6018_v11 = vld [vmem:[#allocation2 + $0x500] sm:$0xff] }
 0x8cb   :  { %v5990_v62 = vld [vmem:[#allocation2 + $0x420] sm:$0xff] }
 0x8cd   :  { %5927 = vmatpush2.bf16.msra.mxu0 %v10710_v28  ;;  %5968 = vmatpush2.bf16.msra.mxu1 %v10712_v59  ;;  %v10786_v28 = vcombine.low %v6026_v56, %v6030_v58  ;;  %v10747_v56 = vcombine.high %v5986_v45, %v5990_v62 }
 0x8ce   :  { %5928 = vmatprep.subr.bf16.mxu0 %v10703_v16  ;;  %5969 = vmatprep.subr.bf16.mxu1 %v10705_v12  ;;  %v10788_v16 = vcombine.low %v6027_v3, %v6031_v10  ;;  %v10779_v12 = vcombine.high %v6018_v11, %v6022_v26  ;;  %v6106_v3 = vld [vmem:[#allocation2 + $0x7c0] sm:$0xff] }
 0x8cf   :  { %v6110_v10 = vld [vmem:[#allocation2 + $0x7e0] sm:$0xff] }
 0x8d1   :  { %5929 = vmatpush2.bf16.msra.mxu0 %v10702_v8  ;;  %5970 = vmatpush2.bf16.msra.mxu1 %v10704_v18  ;;  %v6011_v8 = vld [vmem:[#allocation2 + $0x4c8] sm:$0xff] }
 0x8d2   :  { %5930 = vmatprep.subr.bf16.mxu0 %v10695_v50  ;;  %5971 = vmatprep.subr.bf16.mxu1 %v10697_v61  ;;  %v6015_v18 = vld [vmem:[#allocation2 + $0x4e8] sm:$0xff]  ;;  %v10778_v50 = vcombine.low %v6018_v11, %v6022_v26  ;;  %v10780_v61 = vcombine.low %v6019_v19, %v6023_v31  ;;  %v10867_v11 = vcombine.high %v6106_v3, %v6110_v10  ;;  %v6102_v19 = vld [vmem:[#allocation2 + $0x7a0] sm:$0xff] }
 0x8d3   :  { %v10773_v34 = vcombine.high %v6011_v8, %v6015_v18  ;;  %v6099_v31 = vld [vmem:[#allocation2 + $0x788] sm:$0xff] }
 0x8d5   :  { %5931 = vmatpush2.bf16.msra.mxu0 %v10694_v35  ;;  %5972 = vmatpush2.bf16.msra.mxu1 %v10696_v13  ;;  %v6003_v35 = vld [vmem:[#allocation2 + $0x488] sm:$0xff] }
 0x8d6   :  { %5932 = vmatprep.subr.bf16.mxu0 %v10687_v7  ;;  %5973 = vmatprep.subr.bf16.mxu1 %v10689_v49  ;;  %v6007_v13 = vld [vmem:[#allocation2 + $0x4a8] sm:$0xff]  ;;  %v10770_v7 = vcombine.low %v6010_v21, %v6014_v29  ;;  %v10772_v49 = vcombine.low %v6011_v8, %v6015_v18 }
 0x8d7   :  { %v10765_v48 = vcombine.high %v6003_v35, %v6007_v13  ;;  %v6091_v21 = vld [vmem:[#allocation2 + $0x748] sm:$0xff] }
 0x8d8   :  { %v6095_v29 = vld [vmem:[#allocation2 + $0x768] sm:$0xff] }
 0x8d9   :  { %5933 = vmatpush2.bf16.msra.mxu0 %v10686_v37  ;;  %5974 = vmatpush2.bf16.msra.mxu1 %v10688_v23  ;;  %v5995_v37 = vld [vmem:[#allocation2 + $0x448] sm:$0xff] }
 0x8da   :  { %6754 = vmatprep.subr.bf16.mxu0 %v10803_v55  ;;  %6795 = vmatprep.subr.bf16.mxu1 %v10805_v43  ;;  %v5999_v23 = vld [vmem:[#allocation2 + $0x468] sm:$0xff]  ;;  %v10762_v55 = vcombine.low %v6002_v63, %v6006_v57  ;;  %v10764_v43 = vcombine.low %v6003_v35, %v6007_v13  ;;  %v10852_v13 = vcombine.low %v6091_v21, %v6095_v29 }
 0x8db   :  { %v10757_v1 = vcombine.high %v5995_v37, %v5999_v23  ;;  %v6083_v63 = vld [vmem:[#allocation2 + $0x708] sm:$0xff] }
 0x8dc   :  { %v14547_v4 = vpop.f32.mrf.mxu0  ;;  %5935 = vmatmul.mubr.bf16.vlgmr.msra.gmra.mxu0 %v14537_v20  ;;  %v14550_v39 = vpop.f32.mrf.mxu1  ;;  %5976 = vmatmul.mubr.bf16.vlgmr.msra.gmra.mxu1 %v14537_v20  ;;  %v6087_v57 = vld [vmem:[#allocation2 + $0x728] sm:$0xff] }
 0x8dd   :  { %6755 = vmatpush1.bf16.msra.mxu0 %v10802_v0  ;;  %6796 = vmatpush1.bf16.msra.mxu1 %v10804_v30  ;;  %v5987_v0 = vld [vmem:[#allocation2 + $0x408] sm:$0xff] }
 0x8de   :  { %v14553_v14 = vpop.f32.mrf.mxu0  ;;  %6756 = vmatprep.subr.bf16.mxu0 %v10795_v40  ;;  %v14555_v53 = vpop.f32.mrf.mxu1  ;;  %6797 = vmatprep.subr.bf16.mxu1 %v10797_v36  ;;  %v5991_v30 = vld [vmem:[#allocation2 + $0x428] sm:$0xff]  ;;  %v10754_v40 = vcombine.low %v5994_v32, %v5998_v22  ;;  %v10756_v36 = vcombine.low %v5995_v37, %v5999_v23  ;;  %v10844_v23 = vcombine.low %v6083_v63, %v6087_v57 }
 0x8df   :  { %6786 = vmatprep.mubr.bf16.mxu0 %v14545_v9  ;;  %6827 = vmatprep.mubr.bf16.mxu1 %v14545_v9  ;;  %v10749_v58 = vcombine.high %v5987_v0, %v5991_v30  ;;  %v6075_v32 = vld [vmem:[#allocation2 + $0x6c8] sm:$0xff] }
 0x8e0   :  { %v5054_v6 = vpop.f32.mrf.mxu0  ;;  %v5095_v20 = vpop.f32.mrf.mxu1  ;;  %v6079_v22 = vld [vmem:[#allocation2 + $0x6e8] sm:$0xff] }
 0x8e1   :  { %6757 = vmatpush1.bf16.msra.mxu0 %v10794_v38  ;;  %6798 = vmatpush1.bf16.msra.mxu1 %v10796_v25  ;;  %v6107_v38 = vld [vmem:[#allocation2 + $0x7c8] sm:$0xff]  ;;  %v6098_v6 = vld [vmem:[#allocation2 + $0x780] sm:$0xff] }
 0x8e2   :  { %v5055_v59 = vpop.f32.mrf.mxu0  ;;  %6758 = vmatprep.subr.bf16.mxu0 %v10787_v51  ;;  %v5096_v17 = vpop.f32.mrf.mxu1  ;;  %6799 = vmatprep.subr.bf16.mxu1 %v10789_v47  ;;  %v6111_v25 = vld [vmem:[#allocation2 + $0x7e8] sm:$0xff]  ;;  %v10746_v51 = vcombine.low %v5986_v45, %v5990_v62  ;;  %v10748_v47 = vcombine.low %v5987_v0, %v5991_v30  ;;  %v10858_v8 = vcombine.low %v6098_v6, %v6102_v19 }
 0x8e3   :  { %v10869_v26 = vcombine.high %v6107_v38, %v6111_v25  ;;  %v6103_v20 = vld [vmem:[#allocation2 + $0x7a8] sm:$0xff]  ;;  %v10868_v59 = vcombine.low %v6107_v38, %v6111_v25  ;;  %v6090_v17 = vld [vmem:[#allocation2 + $0x740] sm:$0xff]  ;;  %v10836_v30 = vcombine.low %v6075_v32, %v6079_v22 }
 0x8e4   :  { %v10860_v18 = vcombine.low %v6099_v31, %v6103_v20  ;;  %v6067_v45 = vld [vmem:[#allocation2 + $0x688] sm:$0xff] }
 0x8e5   :  { %6759 = vmatpush1.bf16.msra.mxu0 %v10786_v28  ;;  %6800 = vmatpush1.bf16.msra.mxu1 %v10788_v16  ;;  %v10866_v28 = vcombine.low %v6106_v3, %v6110_v10  ;;  %v10859_v16 = vcombine.high %v6098_v6, %v6102_v19  ;;  %v6071_v62 = vld [vmem:[#allocation2 + $0x6a8] sm:$0xff] }
 0x8e6   :  { %6760 = vmatprep.subr.bf16.mxu0 %v10779_v12  ;;  %6801 = vmatprep.subr.bf16.mxu1 %v10781_v60  ;;  %v10861_v12 = vcombine.high %v6099_v31, %v6103_v20  ;;  %v6094_v60 = vld [vmem:[#allocation2 + $0x760] sm:$0xff]  ;;  %v6059_v3 = vld [vmem:[#allocation2 + $0x648] sm:$0xff]  ;;  %v10828_v25 = vcombine.low %v6067_v45, %v6071_v62 }
 0x8e7   :  { %v10850_v35 = vcombine.low %v6090_v17, %v6094_v60  ;;  %v6063_v10 = vld [vmem:[#allocation2 + $0x668] sm:$0xff] }
 0x8e8   :  { %v6051_v6 = vld [vmem:[#allocation2 + $0x608] sm:$0xff]  ;;  %v10820_v20 = vcombine.low %v6059_v3, %v6063_v10 }
 0x8e9   :  { %6761 = vmatpush1.bf16.msra.mxu0 %v10778_v50  ;;  %6802 = vmatpush1.bf16.msra.mxu1 %v10780_v61  ;;  %v10851_v50 = vcombine.high %v6090_v17, %v6094_v60  ;;  %v10853_v61 = vcombine.high %v6091_v21, %v6095_v29  ;;  %v6055_v19 = vld [vmem:[#allocation2 + $0x628] sm:$0xff]  ;;  %v6045_v17 = vld [vmem:[#allocation2 + $0x5d8] sm:$0xff] }
 0x8ea   :  { %6762 = vmatprep.subr.bf16.mxu0 %v10771_v24  ;;  %6803 = vmatprep.subr.bf16.mxu1 %v10773_v34  ;;  %v6082_v24 = vld [vmem:[#allocation2 + $0x700] sm:$0xff]  ;;  %v6049_v60 = vld [vmem:[#allocation2 + $0x5f8] sm:$0xff]  ;;  %v10812_v29 = vcombine.low %v6051_v6, %v6055_v19 }
 0x8eb   :  { %v6086_v34 = vld [vmem:[#allocation2 + $0x720] sm:$0xff] }
 0x8ec   :  { %v10842_v37 = vcombine.low %v6082_v24, %v6086_v34 }
 0x8ed   :  { %6763 = vmatpush1.bf16.msra.mxu0 %v10770_v7  ;;  %6804 = vmatpush1.bf16.msra.mxu1 %v10772_v49  ;;  %v10843_v7 = vcombine.high %v6082_v24, %v6086_v34  ;;  %v10845_v49 = vcombine.high %v6083_v63, %v6087_v57  ;;  %v14561_v24 = vpack.c.bf16 %v14503_v41, %v14503_v41  ;;  %v6037_v34 = vld [vmem:[#allocation2 + $0x598] sm:$0xff] }
 0x8ee   :  { %6764 = vmatprep.subr.bf16.mxu0 %v10763_v2  ;;  %6805 = vmatprep.subr.bf16.mxu1 %v10765_v48  ;;  %v6074_v2 = vld [vmem:[#allocation2 + $0x6c0] sm:$0xff]  ;;  %v6041_v63 = vld [vmem:[#allocation2 + $0x5b8] sm:$0xff] }
 0x8ef   :  { %v6078_v48 = vld [vmem:[#allocation2 + $0x6e0] sm:$0xff] }
 0x8f0   :  { %v10834_v0 = vcombine.low %v6074_v2, %v6078_v48 }
 0x8f1   :  { %6765 = vmatpush1.bf16.msra.mxu0 %v10762_v55  ;;  %6806 = vmatpush1.bf16.msra.mxu1 %v10764_v43  ;;  %v10835_v55 = vcombine.high %v6074_v2, %v6078_v48  ;;  %v10837_v43 = vcombine.high %v6075_v32, %v6079_v22  ;;  %v6032_v2 = vld [vmem:[#allocation2 + $0x570] sm:$0xff]  ;;  %v6029_v32 = vld [vmem:[#allocation2 + $0x558] sm:$0xff] }
 0x8f2   :  { %6766 = vmatprep.subr.bf16.mxu0 %v10755_v5  ;;  %6807 = vmatprep.subr.bf16.mxu1 %v10757_v1  ;;  %v6066_v5 = vld [vmem:[#allocation2 + $0x680] sm:$0xff]  ;;  %v6033_v22 = vld [vmem:[#allocation2 + $0x578] sm:$0xff] }
 0x8f3   :  { %v6070_v1 = vld [vmem:[#allocation2 + $0x6a0] sm:$0xff] }
 0x8f4   :  { %v10826_v38 = vcombine.low %v6066_v5, %v6070_v1 }
 0x8f5   :  { %6767 = vmatpush1.bf16.msra.mxu0 %v10754_v40  ;;  %6808 = vmatpush1.bf16.msra.mxu1 %v10756_v36  ;;  %v10827_v40 = vcombine.high %v6066_v5, %v6070_v1  ;;  %v10829_v36 = vcombine.high %v6067_v45, %v6071_v62  ;;  %v10793_v1 = vcombine.high %v6029_v32, %v6033_v22  ;;  %v6020_v45 = vld [vmem:[#allocation2 + $0x510] sm:$0xff] }
 0x8f6   :  { %6768 = vmatprep.subr.bf16.mxu0 %v10747_v56  ;;  %6809 = vmatprep.subr.bf16.mxu1 %v10749_v58  ;;  %v6058_v56 = vld [vmem:[#allocation2 + $0x640] sm:$0xff]  ;;  %v6024_v62 = vld [vmem:[#allocation2 + $0x530] sm:$0xff] }
 0x8f7   :  { %v6062_v58 = vld [vmem:[#allocation2 + $0x660] sm:$0xff] }
 0x8f8   :  { %v10818_v31 = vcombine.low %v6058_v56, %v6062_v58 }
 0x8f9   :  { %6769 = vmatpush1.bf16.msra.mxu0 %v10746_v51  ;;  %6810 = vmatpush1.bf16.msra.mxu1 %v10748_v47  ;;  %v10819_v51 = vcombine.high %v6058_v56, %v6062_v58  ;;  %v10821_v47 = vcombine.high %v6059_v3, %v6063_v10  ;;  %v10792_v3 = vcombine.low %v6029_v32, %v6033_v22 }
 0x8fa   :  { %6770 = vmatprep.subr.bf16.mxu0 %v10867_v11  ;;  %6811 = vmatprep.subr.bf16.mxu1 %v10869_v26  ;;  %v6050_v11 = vld [vmem:[#allocation2 + $0x600] sm:$0xff]  ;;  %v10783_v10 = vcombine.high %v6020_v45, %v6024_v62 }
 0x8fb   :  { %v6054_v26 = vld [vmem:[#allocation2 + $0x620] sm:$0xff] }
 0x8fc   :  { %v10810_v21 = vcombine.low %v6050_v11, %v6054_v26 }
 0x8fd   :  { %6771 = vmatpush2.bf16.msra.mxu0 %v10866_v28  ;;  %6812 = vmatpush2.bf16.msra.mxu1 %v10868_v59  ;;  %v10811_v28 = vcombine.high %v6050_v11, %v6054_v26  ;;  %v10813_v59 = vcombine.high %v6051_v6, %v6055_v19  ;;  %v6013_v11 = vld [vmem:[#allocation2 + $0x4d8] sm:$0xff]  ;;  %v10782_v6 = vcombine.low %v6020_v45, %v6024_v62 }
 0x8fe   :  { %6772 = vmatprep.subr.bf16.mxu0 %v10859_v16  ;;  %6813 = vmatprep.subr.bf16.mxu1 %v10861_v12  ;;  %v6044_v16 = vld [vmem:[#allocation2 + $0x5d0] sm:$0xff]  ;;  %v6017_v26 = vld [vmem:[#allocation2 + $0x4f8] sm:$0xff] }
 0x8ff   :  { %v6048_v12 = vld [vmem:[#allocation2 + $0x5f0] sm:$0xff]  ;;  %v6113_v45 = vld [vmem:[#allocation2 + $0x7f8] sm:$0xff] }
 0x900   :  { %v10806_v57 = vcombine.low %v6044_v16, %v6048_v12 }
 0x901   :  { %6773 = vmatpush2.bf16.msra.mxu0 %v10858_v8  ;;  %6814 = vmatpush2.bf16.msra.mxu1 %v10860_v18  ;;  %v10807_v8 = vcombine.high %v6044_v16, %v6048_v12  ;;  %v10809_v18 = vcombine.high %v6045_v17, %v6049_v60  ;;  %v6009_v16 = vld [vmem:[#allocation2 + $0x4b8] sm:$0xff] }
 0x902   :  { %6774 = vmatprep.subr.bf16.mxu0 %v10851_v50  ;;  %6815 = vmatprep.subr.bf16.mxu1 %v10853_v61  ;;  %v6036_v50 = vld [vmem:[#allocation2 + $0x590] sm:$0xff] }
 0x903   :  { %v6040_v61 = vld [vmem:[#allocation2 + $0x5b0] sm:$0xff] }
 0x905   :  { %6775 = vmatpush2.bf16.msra.mxu0 %v10850_v35  ;;  %6816 = vmatpush2.bf16.msra.mxu1 %v10852_v13  ;;  %v10808_v35 = vcombine.low %v6045_v17, %v6049_v60  ;;  %v10799_v13 = vcombine.high %v6036_v50, %v6040_v61  ;;  %v10776_v17 = vcombine.low %v6013_v11, %v6017_v26 }
 0x906   :  { %6776 = vmatprep.subr.bf16.mxu0 %v10843_v7  ;;  %6817 = vmatprep.subr.bf16.mxu1 %v10845_v49  ;;  %v10801_v7 = vcombine.high %v6037_v34, %v6041_v63  ;;  %v6028_v49 = vld [vmem:[#allocation2 + $0x550] sm:$0xff] }
 0x907   :  { %v10790_v56 = vcombine.low %v6028_v49, %v6032_v2 }
 0x909   :  { %6777 = vmatpush2.bf16.msra.mxu0 %v10842_v37  ;;  %6818 = vmatpush2.bf16.msra.mxu1 %v10844_v23  ;;  %v10798_v37 = vcombine.low %v6036_v50, %v6040_v61  ;;  %v6001_v50 = vld [vmem:[#allocation2 + $0x478] sm:$0xff] }
 0x90a   :  { %6778 = vmatprep.subr.bf16.mxu0 %v10835_v55  ;;  %6819 = vmatprep.subr.bf16.mxu1 %v10837_v43  ;;  %v10800_v55 = vcombine.low %v6037_v34, %v6041_v63  ;;  %v10791_v43 = vcombine.high %v6028_v49, %v6032_v2  ;;  %v5993_v49 = vld [vmem:[#allocation2 + $0x438] sm:$0xff] }
 0x90d   :  { %6779 = vmatpush2.bf16.msra.mxu0 %v10834_v0  ;;  %6820 = vmatpush2.bf16.msra.mxu1 %v10836_v30  ;;  %v6021_v30 = vld [vmem:[#allocation2 + $0x518] sm:$0xff] }
 0x90e   :  { %6780 = vmatprep.subr.bf16.mxu0 %v10827_v40  ;;  %6821 = vmatprep.subr.bf16.mxu1 %v10829_v36  ;;  %v6025_v40 = vld [vmem:[#allocation2 + $0x538] sm:$0xff] }
 0x911   :  { %6781 = vmatpush2.bf16.msra.mxu0 %v10826_v38  ;;  %6822 = vmatpush2.bf16.msra.mxu1 %v10828_v25  ;;  %v10785_v25 = vcombine.high %v6021_v30, %v6025_v40 }
 0x912   :  { %6782 = vmatprep.subr.bf16.mxu0 %v10819_v51  ;;  %6823 = vmatprep.subr.bf16.mxu1 %v10821_v47  ;;  %v6012_v51 = vld [vmem:[#allocation2 + $0x4d0] sm:$0xff] }
 0x913   :  { %v6016_v47 = vld [vmem:[#allocation2 + $0x4f0] sm:$0xff] }
 0x914   :  { %v10775_v19 = vcombine.high %v6012_v51, %v6016_v47  ;;  %v10774_v12 = vcombine.low %v6012_v51, %v6016_v47  ;;  %v6092_v47 = vld [vmem:[#allocation2 + $0x750] sm:$0xff] }
 0x915   :  { %6783 = vmatpush2.bf16.msra.mxu0 %v10818_v31  ;;  %6824 = vmatpush2.bf16.msra.mxu1 %v10820_v20  ;;  %v10777_v31 = vcombine.high %v6013_v11, %v6017_v26  ;;  %v6004_v20 = vld [vmem:[#allocation2 + $0x490] sm:$0xff]  ;;  %v6093_v26 = vld [vmem:[#allocation2 + $0x758] sm:$0xff] }
 0x916   :  { %6784 = vmatprep.subr.bf16.mxu0 %v10811_v28  ;;  %6825 = vmatprep.subr.bf16.mxu1 %v10813_v59  ;;  %v6008_v28 = vld [vmem:[#allocation2 + $0x4b0] sm:$0xff]  ;;  %v6005_v59 = vld [vmem:[#allocation2 + $0x498] sm:$0xff] }
 0x917   :  { %v10767_v60 = vcombine.high %v6004_v20, %v6008_v28  ;;  %v10766_v61 = vcombine.low %v6004_v20, %v6008_v28  ;;  %v10768_v34 = vcombine.low %v6005_v59, %v6009_v16  ;;  %v6096_v11 = vld [vmem:[#allocation2 + $0x770] sm:$0xff] }
 0x918   :  { %v6084_v28 = vld [vmem:[#allocation2 + $0x710] sm:$0xff] }
 0x919   :  { %6785 = vmatpush2.bf16.msra.mxu0 %v10810_v21  ;;  %6826 = vmatpush2.bf16.msra.mxu1 %v10812_v29  ;;  %v10769_v21 = vcombine.high %v6005_v59, %v6009_v16  ;;  %v5996_v29 = vld [vmem:[#allocation2 + $0x450] sm:$0xff]  ;;  %v6085_v16 = vld [vmem:[#allocation2 + $0x718] sm:$0xff] }
 0x91a   :  { %6836 = vmatprep.subr.bf16.mxu0 %v10807_v8  ;;  %6877 = vmatprep.subr.bf16.mxu1 %v10809_v18  ;;  %v6000_v8 = vld [vmem:[#allocation2 + $0x470] sm:$0xff]  ;;  %v5997_v18 = vld [vmem:[#allocation2 + $0x458] sm:$0xff] }
 0x91b   :  { %v10759_v63 = vcombine.high %v5996_v29, %v6000_v8  ;;  %v10758_v2 = vcombine.low %v5996_v29, %v6000_v8  ;;  %v10760_v32 = vcombine.low %v5997_v18, %v6001_v50  ;;  %v6088_v59 = vld [vmem:[#allocation2 + $0x730] sm:$0xff] }
 0x91c   :  { %v14563_v48 = vpop.f32.mrf.mxu0  ;;  %6787 = vmatmul.mubr.bf16.vlgmr.msra.gmra.mxu0 %v14561_v24  ;;  %v14566_v41 = vpop.f32.mrf.mxu1  ;;  %6828 = vmatmul.mubr.bf16.vlgmr.msra.gmra.mxu1 %v14561_v24  ;;  %v6076_v8 = vld [vmem:[#allocation2 + $0x6d0] sm:$0xff] }
 0x91d   :  { %6837 = vmatpush1.bf16.msra.mxu0 %v10806_v57  ;;  %6878 = vmatpush1.bf16.msra.mxu1 %v10808_v35  ;;  %v10761_v57 = vcombine.high %v5997_v18, %v6001_v50  ;;  %v5988_v35 = vld [vmem:[#allocation2 + $0x410] sm:$0xff]  ;;  %v6077_v50 = vld [vmem:[#allocation2 + $0x6d8] sm:$0xff] }
 0x91e   :  { %v14569_v23 = vpop.f32.mrf.mxu0  ;;  %6838 = vmatprep.subr.bf16.mxu0 %v10799_v13  ;;  %v14571_v5 = vpop.f32.mrf.mxu1  ;;  %6879 = vmatprep.subr.bf16.mxu1 %v10801_v7  ;;  %v5992_v13 = vld [vmem:[#allocation2 + $0x430] sm:$0xff]  ;;  %v5989_v7 = vld [vmem:[#allocation2 + $0x418] sm:$0xff] }
 0x91f   :  { %6868 = vmatprep.mubr.bf16.mxu0 %v14545_v9  ;;  %6909 = vmatprep.mubr.bf16.mxu1 %v14545_v9  ;;  %v10784_v9 = vcombine.low %v6021_v30, %v6025_v40  ;;  %v10751_v22 = vcombine.high %v5988_v35, %v5992_v13  ;;  %v10750_v62 = vcombine.low %v5988_v35, %v5992_v13  ;;  %v6080_v18 = vld [vmem:[#allocation2 + $0x6f0] sm:$0xff] }
 0x920   :  { %v5136_v0 = vpop.f32.mrf.mxu0  ;;  %v5177_v36 = vpop.f32.mrf.mxu1  ;;  %v6068_v13 = vld [vmem:[#allocation2 + $0x690] sm:$0xff] }
 0x921   :  { %6839 = vmatpush1.bf16.msra.mxu0 %v10798_v37  ;;  %6880 = vmatpush1.bf16.msra.mxu1 %v10800_v55  ;;  %v10753_v37 = vcombine.high %v5989_v7, %v5993_v49  ;;  %v6108_v55 = vld [vmem:[#allocation2 + $0x7d0] sm:$0xff]  ;;  %v10752_v0 = vcombine.low %v5989_v7, %v5993_v49  ;;  %v6069_v49 = vld [vmem:[#allocation2 + $0x698] sm:$0xff] }
 0x922   :  { %v5137_v58 = vpop.f32.mrf.mxu0  ;;  %6840 = vmatprep.subr.bf16.mxu0 %v10791_v43  ;;  %v5178_v38 = vpop.f32.mrf.mxu1  ;;  %6881 = vmatprep.subr.bf16.mxu1 %v10793_v1  ;;  %v6112_v43 = vld [vmem:[#allocation2 + $0x7f0] sm:$0xff]  ;;  %v6109_v1 = vld [vmem:[#allocation2 + $0x7d8] sm:$0xff] }
 0x923   :  { %v10871_v30 = vcombine.high %v6108_v55, %v6112_v43  ;;  %v10873_v40 = vcombine.high %v6109_v1, %v6113_v45  ;;  %v6100_v36 = vld [vmem:[#allocation2 + $0x790] sm:$0xff]  ;;  %v6101_v58 = vld [vmem:[#allocation2 + $0x798] sm:$0xff]  ;;  %v10872_v38 = vcombine.low %v6109_v1, %v6113_v45 }
 0x924   :  { %v6072_v7 = vld [vmem:[#allocation2 + $0x6b0] sm:$0xff]  ;;  %v6061_v45 = vld [vmem:[#allocation2 + $0x658] sm:$0xff] }
 0x925   :  { %6841 = vmatpush1.bf16.msra.mxu0 %v10790_v56  ;;  %6882 = vmatpush1.bf16.msra.mxu1 %v10792_v3  ;;  %v6104_v56 = vld [vmem:[#allocation2 + $0x7b0] sm:$0xff]  ;;  %v6105_v3 = vld [vmem:[#allocation2 + $0x7b8] sm:$0xff] }
 0x926   :  { %6842 = vmatprep.subr.bf16.mxu0 %v10783_v10  ;;  %6883 = vmatprep.subr.bf16.mxu1 %v10785_v25  ;;  %v10870_v10 = vcombine.low %v6108_v55, %v6112_v43  ;;  %v10863_v25 = vcombine.high %v6100_v36, %v6104_v56  ;;  %v10865_v51 = vcombine.high %v6101_v58, %v6105_v3  ;;  %v6060_v43 = vld [vmem:[#allocation2 + $0x650] sm:$0xff] }
 0x927   :  { %v6064_v1 = vld [vmem:[#allocation2 + $0x670] sm:$0xff] }
 0x929   :  { %6843 = vmatpush1.bf16.msra.mxu0 %v10782_v6  ;;  %6884 = vmatpush1.bf16.msra.mxu1 %v10784_v9  ;;  %v6097_v6 = vld [vmem:[#allocation2 + $0x778] sm:$0xff]  ;;  %v10862_v9 = vcombine.low %v6100_v36, %v6104_v56  ;;  %v6052_v56 = vld [vmem:[#allocation2 + $0x610] sm:$0xff] }
 0x92a   :  { %6844 = vmatprep.subr.bf16.mxu0 %v10775_v19  ;;  %6885 = vmatprep.subr.bf16.mxu1 %v10777_v31  ;;  %v10864_v19 = vcombine.low %v6101_v58, %v6105_v3  ;;  %v10855_v31 = vcombine.high %v6092_v47, %v6096_v11  ;;  %v10857_v20 = vcombine.high %v6093_v26, %v6097_v6  ;;  %v6056_v58 = vld [vmem:[#allocation2 + $0x630] sm:$0xff]  ;;  %v6053_v3 = vld [vmem:[#allocation2 + $0x618] sm:$0xff] }
 0x92d   :  { %6845 = vmatpush1.bf16.msra.mxu0 %v10774_v12  ;;  %6886 = vmatpush1.bf16.msra.mxu1 %v10776_v17  ;;  %v6089_v12 = vld [vmem:[#allocation2 + $0x738] sm:$0xff]  ;;  %v10854_v17 = vcombine.low %v6092_v47, %v6096_v11  ;;  %v6984_v11 = vld [vmem:[#allocation2 + $0x9c0] sm:$0xff] }
 0x92e   :  { %6846 = vmatprep.subr.bf16.mxu0 %v10767_v60  ;;  %6887 = vmatprep.subr.bf16.mxu1 %v10769_v21  ;;  %v10856_v60 = vcombine.low %v6093_v26, %v6097_v6  ;;  %v10847_v21 = vcombine.high %v6084_v28, %v6088_v59  ;;  %v10849_v29 = vcombine.high %v6085_v16, %v6089_v12  ;;  %v6988_v26 = vld [vmem:[#allocation2 + $0x9e0] sm:$0xff]  ;;  %v6985_v6 = vld [vmem:[#allocation2 + $0x9c8] sm:$0xff] }
 0x931   :  { %6847 = vmatpush1.bf16.msra.mxu0 %v10766_v61  ;;  %6888 = vmatpush1.bf16.msra.mxu1 %v10768_v34  ;;  %v6081_v61 = vld [vmem:[#allocation2 + $0x6f8] sm:$0xff]  ;;  %v10846_v34 = vcombine.low %v6084_v28, %v6088_v59  ;;  %v6976_v59 = vld [vmem:[#allocation2 + $0x980] sm:$0xff] }
 0x932   :  { %6848 = vmatprep.subr.bf16.mxu0 %v10759_v63  ;;  %6889 = vmatprep.subr.bf16.mxu1 %v10761_v57  ;;  %v10848_v63 = vcombine.low %v6085_v16, %v6089_v12  ;;  %v10839_v57 = vcombine.high %v6076_v8, %v6080_v18  ;;  %v10841_v35 = vcombine.high %v6077_v50, %v6081_v61  ;;  %v6980_v16 = vld [vmem:[#allocation2 + $0x9a0] sm:$0xff]  ;;  %v6977_v12 = vld [vmem:[#allocation2 + $0x988] sm:$0xff] }
 0x935   :  { %6849 = vmatpush1.bf16.msra.mxu0 %v10758_v2  ;;  %6890 = vmatpush1.bf16.msra.mxu1 %v10760_v32  ;;  %v6073_v2 = vld [vmem:[#allocation2 + $0x6b8] sm:$0xff]  ;;  %v10838_v32 = vcombine.low %v6076_v8, %v6080_v18  ;;  %v6968_v18 = vld [vmem:[#allocation2 + $0x940] sm:$0xff] }
 0x936   :  { %6850 = vmatprep.subr.bf16.mxu0 %v10751_v22  ;;  %6891 = vmatprep.subr.bf16.mxu1 %v10753_v37  ;;  %v10840_v22 = vcombine.low %v6077_v50, %v6081_v61  ;;  %v10831_v37 = vcombine.high %v6068_v13, %v6072_v7  ;;  %v10833_v55 = vcombine.high %v6069_v49, %v6073_v2  ;;  %v6972_v50 = vld [vmem:[#allocation2 + $0x960] sm:$0xff] }
 0x937   :  { %v14577_v61 = vpack.c.bf16 %v14511_v52, %v14511_v52 }
 0x939   :  { %6851 = vmatpush1.bf16.msra.mxu0 %v10750_v62  ;;  %6892 = vmatpush1.bf16.msra.mxu1 %v10752_v0  ;;  %v6065_v62 = vld [vmem:[#allocation2 + $0x678] sm:$0xff]  ;;  %v10830_v0 = vcombine.low %v6068_v13, %v6072_v7  ;;  %v10922_v13 = vcombine.low %v6976_v59, %v6980_v16 }
 0x93a   :  { %6852 = vmatprep.subr.bf16.mxu0 %v10871_v30  ;;  %6893 = vmatprep.subr.bf16.mxu1 %v10873_v40  ;;  %v10832_v30 = vcombine.low %v6069_v49, %v6073_v2  ;;  %v10823_v40 = vcombine.high %v6060_v43, %v6064_v1  ;;  %v10825_v36 = vcombine.high %v6061_v45, %v6065_v62 }
 0x93b   :  { %v10915_v2 = vcombine.high %v6968_v18, %v6972_v50 }
 0x93d   :  { %6853 = vmatpush2.bf16.msra.mxu0 %v10870_v10  ;;  %6894 = vmatpush2.bf16.msra.mxu1 %v10872_v38  ;;  %v6057_v10 = vld [vmem:[#allocation2 + $0x638] sm:$0xff]  ;;  %v10822_v38 = vcombine.low %v6060_v43, %v6064_v1  ;;  %v6961_v43 = vld [vmem:[#allocation2 + $0x908] sm:$0xff] }
 0x93e   :  { %6854 = vmatprep.subr.bf16.mxu0 %v10863_v25  ;;  %6895 = vmatprep.subr.bf16.mxu1 %v10865_v51  ;;  %v10824_v25 = vcombine.low %v6061_v45, %v6065_v62  ;;  %v10815_v51 = vcombine.high %v6052_v56, %v6056_v58  ;;  %v10817_v47 = vcombine.high %v6053_v3, %v6057_v10  ;;  %v6965_v1 = vld [vmem:[#allocation2 + $0x928] sm:$0xff] }
 0x93f   :  { %v10914_v45 = vcombine.low %v6968_v18, %v6972_v50  ;;  %v6928_v18 = vld [vmem:[#allocation2 + $0x800] sm:$0xff] }
 0x940   :  { %v6932_v50 = vld [vmem:[#allocation2 + $0x820] sm:$0xff] }
 0x941   :  { %6855 = vmatpush2.bf16.msra.mxu0 %v10862_v9  ;;  %6896 = vmatpush2.bf16.msra.mxu1 %v10864_v19  ;;  %v6989_v9 = vld [vmem:[#allocation2 + $0x9e8] sm:$0xff]  ;;  %v10814_v19 = vcombine.low %v6052_v56, %v6056_v58  ;;  %v6952_v56 = vld [vmem:[#allocation2 + $0x8c0] sm:$0xff] }
 0x942   :  { %6856 = vmatprep.subr.bf16.mxu0 %v10855_v31  ;;  %6897 = vmatprep.subr.bf16.mxu1 %v10857_v20  ;;  %v10816_v31 = vcombine.low %v6053_v3, %v6057_v10  ;;  %v10931_v20 = vcombine.high %v6984_v11, %v6988_v26  ;;  %v10933_v28 = vcombine.high %v6985_v6, %v6989_v9  ;;  %v6956_v58 = vld [vmem:[#allocation2 + $0x8e0] sm:$0xff]  ;;  %v6953_v3 = vld [vmem:[#allocation2 + $0x8c8] sm:$0xff] }
 0x943   :  { %v6957_v10 = vld [vmem:[#allocation2 + $0x8e8] sm:$0xff] }
 0x945   :  { %6857 = vmatpush2.bf16.msra.mxu0 %v10854_v17  ;;  %6898 = vmatpush2.bf16.msra.mxu1 %v10856_v60  ;;  %v6981_v17 = vld [vmem:[#allocation2 + $0x9a8] sm:$0xff]  ;;  %v10930_v60 = vcombine.low %v6984_v11, %v6988_v26  ;;  %v6944_v11 = vld [vmem:[#allocation2 + $0x880] sm:$0xff] }
 0x946   :  { %6858 = vmatprep.subr.bf16.mxu0 %v10847_v21  ;;  %6899 = vmatprep.subr.bf16.mxu1 %v10849_v29  ;;  %v10932_v21 = vcombine.low %v6985_v6, %v6989_v9  ;;  %v10923_v29 = vcombine.high %v6976_v59, %v6980_v16  ;;  %v10925_v8 = vcombine.high %v6977_v12, %v6981_v17  ;;  %v6948_v26 = vld [vmem:[#allocation2 + $0x8a0] sm:$0xff]  ;;  %v6945_v6 = vld [vmem:[#allocation2 + $0x888] sm:$0xff] }
 0x947   :  { %v10924_v49 = vcombine.low %v6977_v12, %v6981_v17  ;;  %v6949_v9 = vld [vmem:[#allocation2 + $0x8a8] sm:$0xff]  ;;  %v6936_v59 = vld [vmem:[#allocation2 + $0x840] sm:$0xff] }
 0x948   :  { %v6940_v16 = vld [vmem:[#allocation2 + $0x860] sm:$0xff]  ;;  %v6937_v12 = vld [vmem:[#allocation2 + $0x848] sm:$0xff] }
 0x949   :  { %6859 = vmatpush2.bf16.msra.mxu0 %v10846_v34  ;;  %6900 = vmatpush2.bf16.msra.mxu1 %v10848_v63  ;;  %v6969_v63 = vld [vmem:[#allocation2 + $0x948] sm:$0xff] }
 0x94a   :  { %6860 = vmatprep.subr.bf16.mxu0 %v10839_v57  ;;  %6901 = vmatprep.subr.bf16.mxu1 %v10841_v35  ;;  %v6973_v57 = vld [vmem:[#allocation2 + $0x968] sm:$0xff] }
 0x94b   :  { %v6941_v17 = vld [vmem:[#allocation2 + $0x868] sm:$0xff] }
 0x94d   :  { %6861 = vmatpush2.bf16.msra.mxu0 %v10838_v32  ;;  %6902 = vmatpush2.bf16.msra.mxu1 %v10840_v22  ;;  %v10917_v32 = vcombine.high %v6969_v63, %v6973_v57  ;;  %v6960_v22 = vld [vmem:[#allocation2 + $0x900] sm:$0xff] }
 0x94e   :  { %6862 = vmatprep.subr.bf16.mxu0 %v10831_v37  ;;  %6903 = vmatprep.subr.bf16.mxu1 %v10833_v55  ;;  %v6964_v37 = vld [vmem:[#allocation2 + $0x920] sm:$0xff] }
 0x951   :  { %6863 = vmatpush2.bf16.msra.mxu0 %v10830_v0  ;;  %6904 = vmatpush2.bf16.msra.mxu1 %v10832_v30  ;;  %v10916_v0 = vcombine.low %v6969_v63, %v6973_v57  ;;  %v10907_v30 = vcombine.high %v6960_v22, %v6964_v37  ;;  %v6929_v63 = vld [vmem:[#allocation2 + $0x808] sm:$0xff] }
 0x952   :  { %6864 = vmatprep.subr.bf16.mxu0 %v10823_v40  ;;  %6905 = vmatprep.subr.bf16.mxu1 %v10825_v36  ;;  %v10909_v36 = vcombine.high %v6961_v43, %v6965_v1  ;;  %v6933_v57 = vld [vmem:[#allocation2 + $0x828] sm:$0xff] }
 0x955   :  { %6865 = vmatpush2.bf16.msra.mxu0 %v10822_v38  ;;  %6906 = vmatpush2.bf16.msra.mxu1 %v10824_v25  ;;  %v10906_v38 = vcombine.low %v6960_v22, %v6964_v37  ;;  %v10908_v25 = vcombine.low %v6961_v43, %v6965_v1  ;;  %v7048_v22 = vld [vmem:[#allocation2 + $0xbc0] sm:$0xff]  ;;  %v7053_v43 = vld [vmem:[#allocation2 + $0xbe8] sm:$0xff]  ;;  %v10874_v1 = vcombine.low %v6928_v18, %v6932_v50 }
 0x956   :  { %6866 = vmatprep.subr.bf16.mxu0 %v10815_v51  ;;  %6907 = vmatprep.subr.bf16.mxu1 %v10817_v47  ;;  %v10899_v51 = vcombine.high %v6952_v56, %v6956_v58  ;;  %v10901_v47 = vcombine.high %v6953_v3, %v6957_v10  ;;  %v7052_v37 = vld [vmem:[#allocation2 + $0xbe0] sm:$0xff] }
 0x959   :  { %6867 = vmatpush2.bf16.msra.mxu0 %v10814_v19  ;;  %6908 = vmatpush2.bf16.msra.mxu1 %v10816_v31  ;;  %v10898_v19 = vcombine.low %v6952_v56, %v6956_v58  ;;  %v10900_v31 = vcombine.low %v6953_v3, %v6957_v10  ;;  %v10994_v56 = vcombine.low %v7048_v22, %v7052_v37 }
 0x95a   :  { %7696 = vmatprep.subr.bf16.mxu0 %v10931_v20  ;;  %7737 = vmatprep.subr.bf16.mxu1 %v10933_v28  ;;  %v10891_v20 = vcombine.high %v6944_v11, %v6948_v26  ;;  %v10893_v28 = vcombine.high %v6945_v6, %v6949_v9 }
 0x95c   :  { %v14579_v34 = vpop.f32.mrf.mxu0  ;;  %6869 = vmatmul.mubr.bf16.vlgmr.msra.gmra.mxu0 %v14561_v24  ;;  %v14582_v35 = vpop.f32.mrf.mxu1  ;;  %6910 = vmatmul.mubr.bf16.vlgmr.msra.gmra.mxu1 %v14561_v24 }
 0x95d   :  { %7697 = vmatpush1.bf16.msra.mxu0 %v10930_v60  ;;  %7738 = vmatpush1.bf16.msra.mxu1 %v10932_v21  ;;  %v10890_v60 = vcombine.low %v6944_v11, %v6948_v26  ;;  %v10892_v21 = vcombine.low %v6945_v6, %v6949_v9 }
 0x95e   :  { %v14585_v7 = vpop.f32.mrf.mxu0  ;;  %7698 = vmatprep.subr.bf16.mxu0 %v10923_v29  ;;  %v14587_v52 = vpop.f32.mrf.mxu1  ;;  %7739 = vmatprep.subr.bf16.mxu1 %v10925_v8  ;;  %v10883_v29 = vcombine.high %v6936_v59, %v6940_v16  ;;  %v10885_v8 = vcombine.high %v6937_v12, %v6941_v17 }
 0x95f   :  { %7728 = vmatprep.mubr.bf16.mxu0 %v14577_v61  ;;  %7769 = vmatprep.mubr.bf16.mxu1 %v14577_v61 }
 0x960   :  { %v5858_v55 = vpop.f32.mrf.mxu0  ;;  %v5899_v24 = vpop.f32.mrf.mxu1 }
 0x961   :  { %7699 = vmatpush1.bf16.msra.mxu0 %v10922_v13  ;;  %7740 = vmatpush1.bf16.msra.mxu1 %v10924_v49  ;;  %v10882_v13 = vcombine.low %v6936_v59, %v6940_v16  ;;  %v10884_v49 = vcombine.low %v6937_v12, %v6941_v17  ;;  %v7049_v55 = vld [vmem:[#allocation2 + $0xbc8] sm:$0xff]  ;;  %v10876_v24 = vcombine.low %v6929_v63, %v6933_v57 }
 0x962   :  { %v5859_v62 = vpop.f32.mrf.mxu0  ;;  %7700 = vmatprep.subr.bf16.mxu0 %v10915_v2  ;;  %v5900_v40 = vpop.f32.mrf.mxu1  ;;  %7741 = vmatprep.subr.bf16.mxu1 %v10917_v32  ;;  %v10875_v2 = vcombine.high %v6928_v18, %v6932_v50  ;;  %v10877_v32 = vcombine.high %v6929_v63, %v6933_v57  ;;  %v10996_v58 = vcombine.low %v7049_v55, %v7053_v43 }
 0x963   :  { %v10997_v62 = vcombine.high %v7049_v55, %v7053_v43  ;;  %v7041_v40 = vld [vmem:[#allocation2 + $0xb88] sm:$0xff] }
 0x965   :  { %7701 = vmatpush1.bf16.msra.mxu0 %v10914_v45  ;;  %7742 = vmatpush1.bf16.msra.mxu1 %v10916_v0  ;;  %v10995_v45 = vcombine.high %v7048_v22, %v7052_v37  ;;  %v7040_v0 = vld [vmem:[#allocation2 + $0xb80] sm:$0xff] }
 0x966   :  { %7702 = vmatprep.subr.bf16.mxu0 %v10907_v30  ;;  %7743 = vmatprep.subr.bf16.mxu1 %v10909_v36  ;;  %v7044_v30 = vld [vmem:[#allocation2 + $0xba0] sm:$0xff]  ;;  %v7045_v36 = vld [vmem:[#allocation2 + $0xba8] sm:$0xff] }
 0x967   :  { %v10987_v3 = vcombine.high %v7040_v0, %v7044_v30  ;;  %v10989_v10 = vcombine.high %v7041_v40, %v7045_v36  ;;  %v10986_v11 = vcombine.low %v7040_v0, %v7044_v30  ;;  %v10988_v26 = vcombine.low %v7041_v40, %v7045_v36 }
 0x969   :  { %7703 = vmatpush1.bf16.msra.mxu0 %v10906_v38  ;;  %7744 = vmatpush1.bf16.msra.mxu1 %v10908_v25  ;;  %v7032_v38 = vld [vmem:[#allocation2 + $0xb40] sm:$0xff] }
 0x96a   :  { %7704 = vmatprep.subr.bf16.mxu0 %v10899_v51  ;;  %7745 = vmatprep.subr.bf16.mxu1 %v10901_v47  ;;  %v7036_v25 = vld [vmem:[#allocation2 + $0xb60] sm:$0xff]  ;;  %v7033_v51 = vld [vmem:[#allocation2 + $0xb48] sm:$0xff] }
 0x96b   :  { %v7037_v47 = vld [vmem:[#allocation2 + $0xb68] sm:$0xff]  ;;  %v10979_v6 = vcombine.high %v7032_v38, %v7036_v25  ;;  %v10978_v59 = vcombine.low %v7032_v38, %v7036_v25 }
 0x96c   :  { %v10981_v9 = vcombine.high %v7033_v51, %v7037_v47  ;;  %v10980_v16 = vcombine.low %v7033_v51, %v7037_v47 }
 0x96d   :  { %7705 = vmatpush1.bf16.msra.mxu0 %v10898_v19  ;;  %7746 = vmatpush1.bf16.msra.mxu1 %v10900_v31  ;;  %v7024_v19 = vld [vmem:[#allocation2 + $0xb00] sm:$0xff] }
 0x96e   :  { %7706 = vmatprep.subr.bf16.mxu0 %v10891_v20  ;;  %7747 = vmatprep.subr.bf16.mxu1 %v10893_v28  ;;  %v7028_v31 = vld [vmem:[#allocation2 + $0xb20] sm:$0xff]  ;;  %v7025_v20 = vld [vmem:[#allocation2 + $0xb08] sm:$0xff] }
 0x96f   :  { %v7029_v28 = vld [vmem:[#allocation2 + $0xb28] sm:$0xff]  ;;  %v10971_v12 = vcombine.high %v7024_v19, %v7028_v31  ;;  %v10970_v18 = vcombine.low %v7024_v19, %v7028_v31 }
 0x970   :  { %v10973_v17 = vcombine.high %v7025_v20, %v7029_v28  ;;  %v10972_v50 = vcombine.low %v7025_v20, %v7029_v28 }
 0x971   :  { %7707 = vmatpush1.bf16.msra.mxu0 %v10890_v60  ;;  %7748 = vmatpush1.bf16.msra.mxu1 %v10892_v21  ;;  %v7016_v60 = vld [vmem:[#allocation2 + $0xac0] sm:$0xff] }
 0x972   :  { %7708 = vmatprep.subr.bf16.mxu0 %v10883_v29  ;;  %7749 = vmatprep.subr.bf16.mxu1 %v10885_v8  ;;  %v7020_v21 = vld [vmem:[#allocation2 + $0xae0] sm:$0xff]  ;;  %v7017_v29 = vld [vmem:[#allocation2 + $0xac8] sm:$0xff] }
 0x973   :  { %v7021_v8 = vld [vmem:[#allocation2 + $0xae8] sm:$0xff]  ;;  %v10963_v63 = vcombine.high %v7016_v60, %v7020_v21  ;;  %v10962_v22 = vcombine.low %v7016_v60, %v7020_v21  ;;  %v6983_v60 = vld [vmem:[#allocation2 + $0x9b8] sm:$0xff] }
 0x974   :  { %v10965_v57 = vcombine.high %v7017_v29, %v7021_v8  ;;  %v10964_v37 = vcombine.low %v7017_v29, %v7021_v8 }
 0x975   :  { %7709 = vmatpush1.bf16.msra.mxu0 %v10882_v13  ;;  %7750 = vmatpush1.bf16.msra.mxu1 %v10884_v49  ;;  %v7008_v13 = vld [vmem:[#allocation2 + $0xa80] sm:$0xff] }
 0x976   :  { %7710 = vmatprep.subr.bf16.mxu0 %v10875_v2  ;;  %7751 = vmatprep.subr.bf16.mxu1 %v10877_v32  ;;  %v7012_v49 = vld [vmem:[#allocation2 + $0xaa0] sm:$0xff]  ;;  %v7009_v2 = vld [vmem:[#allocation2 + $0xa88] sm:$0xff] }
 0x977   :  { %v7013_v32 = vld [vmem:[#allocation2 + $0xaa8] sm:$0xff]  ;;  %v10955_v55 = vcombine.high %v7008_v13, %v7012_v49  ;;  %v10954_v0 = vcombine.low %v7008_v13, %v7012_v49  ;;  %v6971_v13 = vld [vmem:[#allocation2 + $0x958] sm:$0xff] }
 0x978   :  { %v10957_v43 = vcombine.high %v7009_v2, %v7013_v32  ;;  %v10956_v30 = vcombine.low %v7009_v2, %v7013_v32  ;;  %v6975_v49 = vld [vmem:[#allocation2 + $0x978] sm:$0xff] }
 0x979   :  { %7711 = vmatpush1.bf16.msra.mxu0 %v10874_v1  ;;  %7752 = vmatpush1.bf16.msra.mxu1 %v10876_v24  ;;  %v7000_v1 = vld [vmem:[#allocation2 + $0xa40] sm:$0xff] }
 0x97a   :  { %7712 = vmatprep.subr.bf16.mxu0 %v10995_v45  ;;  %7753 = vmatprep.subr.bf16.mxu1 %v10997_v62  ;;  %v7004_v24 = vld [vmem:[#allocation2 + $0xa60] sm:$0xff]  ;;  %v7001_v45 = vld [vmem:[#allocation2 + $0xa48] sm:$0xff] }
 0x97b   :  { %v7005_v62 = vld [vmem:[#allocation2 + $0xa68] sm:$0xff]  ;;  %v10947_v40 = vcombine.high %v7000_v1, %v7004_v24  ;;  %v10946_v38 = vcombine.low %v7000_v1, %v7004_v24  ;;  %v6962_v1 = vld [vmem:[#allocation2 + $0x910] sm:$0xff] }
 0x97c   :  { %v10949_v36 = vcombine.high %v7001_v45, %v7005_v62  ;;  %v10948_v25 = vcombine.low %v7001_v45, %v7005_v62  ;;  %v6966_v24 = vld [vmem:[#allocation2 + $0x930] sm:$0xff]  ;;  %v6963_v62 = vld [vmem:[#allocation2 + $0x918] sm:$0xff] }
 0x97d   :  { %7713 = vmatpush2.bf16.msra.mxu0 %v10994_v56  ;;  %7754 = vmatpush2.bf16.msra.mxu1 %v10996_v58  ;;  %v6992_v56 = vld [vmem:[#allocation2 + $0xa00] sm:$0xff] }
 0x97e   :  { %7714 = vmatprep.subr.bf16.mxu0 %v10987_v3  ;;  %7755 = vmatprep.subr.bf16.mxu1 %v10989_v10  ;;  %v6996_v58 = vld [vmem:[#allocation2 + $0xa20] sm:$0xff]  ;;  %v6993_v3 = vld [vmem:[#allocation2 + $0xa08] sm:$0xff] }
 0x97f   :  { %v6997_v10 = vld [vmem:[#allocation2 + $0xa28] sm:$0xff]  ;;  %v10939_v51 = vcombine.high %v6992_v56, %v6996_v58  ;;  %v10938_v19 = vcombine.low %v6992_v56, %v6996_v58  ;;  %v10920_v56 = vcombine.low %v6971_v13, %v6975_v49  ;;  %v10911_v58 = vcombine.high %v6962_v1, %v6966_v24 }
 0x980   :  { %v10941_v47 = vcombine.high %v6993_v3, %v6997_v10  ;;  %v10940_v31 = vcombine.low %v6993_v3, %v6997_v10 }
 0x981   :  { %7715 = vmatpush2.bf16.msra.mxu0 %v10986_v11  ;;  %7756 = vmatpush2.bf16.msra.mxu1 %v10988_v26  ;;  %v6986_v11 = vld [vmem:[#allocation2 + $0x9d0] sm:$0xff] }
 0x982   :  { %7716 = vmatprep.subr.bf16.mxu0 %v10979_v6  ;;  %7757 = vmatprep.subr.bf16.mxu1 %v10981_v9  ;;  %v6990_v26 = vld [vmem:[#allocation2 + $0x9f0] sm:$0xff]  ;;  %v6987_v6 = vld [vmem:[#allocation2 + $0x9d8] sm:$0xff] }
 0x983   :  { %v6991_v9 = vld [vmem:[#allocation2 + $0x9f8] sm:$0xff]  ;;  %v10935_v20 = vcombine.high %v6986_v11, %v6990_v26  ;;  %v10934_v21 = vcombine.low %v6986_v11, %v6990_v26  ;;  %v10910_v11 = vcombine.low %v6962_v1, %v6966_v24 }
 0x984   :  { %v10937_v28 = vcombine.high %v6987_v6, %v6991_v9  ;;  %v10936_v29 = vcombine.low %v6987_v6, %v6991_v9  ;;  %v6946_v9 = vld [vmem:[#allocation2 + $0x890] sm:$0xff] }
 0x985   :  { %7717 = vmatpush2.bf16.msra.mxu0 %v10978_v59  ;;  %7758 = vmatpush2.bf16.msra.mxu1 %v10980_v16  ;;  %v6978_v59 = vld [vmem:[#allocation2 + $0x990] sm:$0xff] }
 0x986   :  { %7718 = vmatprep.subr.bf16.mxu0 %v10971_v12  ;;  %7759 = vmatprep.subr.bf16.mxu1 %v10973_v17  ;;  %v6982_v16 = vld [vmem:[#allocation2 + $0x9b0] sm:$0xff]  ;;  %v14593_v12 = vpack.c.bf16 %v14505_v54, %v14505_v54  ;;  %v6979_v17 = vld [vmem:[#allocation2 + $0x998] sm:$0xff] }
 0x987   :  { %v10927_v8 = vcombine.high %v6978_v59, %v6982_v16  ;;  %v10926_v2 = vcombine.low %v6978_v59, %v6982_v16 }
 0x989   :  { %7719 = vmatpush2.bf16.msra.mxu0 %v10970_v18  ;;  %7760 = vmatpush2.bf16.msra.mxu1 %v10972_v50  ;;  %v10929_v18 = vcombine.high %v6979_v17, %v6983_v60  ;;  %v6970_v50 = vld [vmem:[#allocation2 + $0x950] sm:$0xff] }
 0x98a   :  { %7720 = vmatprep.subr.bf16.mxu0 %v10963_v63  ;;  %7761 = vmatprep.subr.bf16.mxu1 %v10965_v57  ;;  %v6974_v63 = vld [vmem:[#allocation2 + $0x970] sm:$0xff] }
 0x98d   :  { %7721 = vmatpush2.bf16.msra.mxu0 %v10962_v22  ;;  %7762 = vmatpush2.bf16.msra.mxu1 %v10964_v37  ;;  %v10928_v22 = vcombine.low %v6979_v17, %v6983_v60  ;;  %v10919_v37 = vcombine.high %v6970_v50, %v6974_v63  ;;  %v6938_v60 = vld [vmem:[#allocation2 + $0x850] sm:$0xff] }
 0x98e   :  { %7722 = vmatprep.subr.bf16.mxu0 %v10955_v55  ;;  %7763 = vmatprep.subr.bf16.mxu1 %v10957_v43  ;;  %v10921_v43 = vcombine.high %v6971_v13, %v6975_v49  ;;  %v6930_v49 = vld [vmem:[#allocation2 + $0x810] sm:$0xff] }
 0x991   :  { %7723 = vmatpush2.bf16.msra.mxu0 %v10954_v0  ;;  %7764 = vmatpush2.bf16.msra.mxu1 %v10956_v30  ;;  %v6967_v0 = vld [vmem:[#allocation2 + $0x938] sm:$0xff] }
 0x992   :  { %7724 = vmatprep.subr.bf16.mxu0 %v10947_v40  ;;  %7765 = vmatprep.subr.bf16.mxu1 %v10949_v36  ;;  %v10918_v40 = vcombine.low %v6970_v50, %v6974_v63  ;;  %v10913_v10 = vcombine.high %v6963_v62, %v6967_v0 }
 0x995   :  { %7725 = vmatpush2.bf16.msra.mxu0 %v10946_v38  ;;  %7766 = vmatpush2.bf16.msra.mxu1 %v10948_v25  ;;  %v6954_v38 = vld [vmem:[#allocation2 + $0x8d0] sm:$0xff] }
 0x996   :  { %7726 = vmatprep.subr.bf16.mxu0 %v10939_v51  ;;  %7767 = vmatprep.subr.bf16.mxu1 %v10941_v47  ;;  %v6958_v25 = vld [vmem:[#allocation2 + $0x8f0] sm:$0xff]  ;;  %v6955_v51 = vld [vmem:[#allocation2 + $0x8d8] sm:$0xff] }
 0x997   :  { %v6959_v47 = vld [vmem:[#allocation2 + $0x8f8] sm:$0xff]  ;;  %v10903_v26 = vcombine.high %v6954_v38, %v6958_v25 }
 0x998   :  { %v10905_v6 = vcombine.high %v6955_v51, %v6959_v47  ;;  %v10904_v59 = vcombine.low %v6955_v51, %v6959_v47  ;;  %v7047_v51 = vld [vmem:[#allocation2 + $0xbb8] sm:$0xff] }
 0x999   :  { %7727 = vmatpush2.bf16.msra.mxu0 %v10938_v19  ;;  %7768 = vmatpush2.bf16.msra.mxu1 %v10940_v31  ;;  %v6950_v19 = vld [vmem:[#allocation2 + $0x8b0] sm:$0xff]  ;;  %v6947_v31 = vld [vmem:[#allocation2 + $0x898] sm:$0xff] }
 0x99a   :  { %7778 = vmatprep.subr.bf16.mxu0 %v10935_v20  ;;  %7819 = vmatprep.subr.bf16.mxu1 %v10937_v28  ;;  %v6951_v20 = vld [vmem:[#allocation2 + $0x8b8] sm:$0xff]  ;;  %v10902_v28 = vcombine.low %v6954_v38, %v6958_v25  ;;  %v10895_v16 = vcombine.high %v6946_v9, %v6950_v19  ;;  %v7046_v38 = vld [vmem:[#allocation2 + $0xbb0] sm:$0xff] }
 0x99b   :  { %v10897_v17 = vcombine.high %v6947_v31, %v6951_v20  ;;  %v10896_v50 = vcombine.low %v6947_v31, %v6951_v20  ;;  %v7043_v25 = vld [vmem:[#allocation2 + $0xb98] sm:$0xff] }
 0x99c   :  { %v14595_v57 = vpop.f32.mrf.mxu0  ;;  %7729 = vmatmul.mubr.bf16.vlgmr.msra.gmra.mxu0 %v14593_v12  ;;  %v14598_v54 = vpop.f32.mrf.mxu1  ;;  %7770 = vmatmul.mubr.bf16.vlgmr.msra.gmra.mxu1 %v14593_v12  ;;  %v7039_v31 = vld [vmem:[#allocation2 + $0xb78] sm:$0xff] }
 0x99d   :  { %7779 = vmatpush1.bf16.msra.mxu0 %v10934_v21  ;;  %7820 = vmatpush1.bf16.msra.mxu1 %v10936_v29  ;;  %v6942_v21 = vld [vmem:[#allocation2 + $0x870] sm:$0xff]  ;;  %v6939_v29 = vld [vmem:[#allocation2 + $0x858] sm:$0xff] }
 0x99e   :  { %v14601_v32 = vpop.f32.mrf.mxu0  ;;  %7780 = vmatprep.subr.bf16.mxu0 %v10927_v8  ;;  %v14603_v55 = vpop.f32.mrf.mxu1  ;;  %7821 = vmatprep.subr.bf16.mxu1 %v10929_v18  ;;  %v6943_v8 = vld [vmem:[#allocation2 + $0x878] sm:$0xff]  ;;  %v10894_v18 = vcombine.low %v6946_v9, %v6950_v19  ;;  %v10887_v63 = vcombine.high %v6938_v60, %v6942_v21  ;;  %v7038_v9 = vld [vmem:[#allocation2 + $0xb70] sm:$0xff] }
 0x99f   :  { %7810 = vmatprep.mubr.bf16.mxu0 %v14577_v61  ;;  %7851 = vmatprep.mubr.bf16.mxu1 %v14577_v61  ;;  %v10912_v61 = vcombine.low %v6963_v62, %v6967_v0  ;;  %v10889_v13 = vcombine.high %v6939_v29, %v6943_v8  ;;  %v10888_v1 = vcombine.low %v6939_v29, %v6943_v8  ;;  %v7050_v62 = vld [vmem:[#allocation2 + $0xbd0] sm:$0xff]  ;;  %v7035_v19 = vld [vmem:[#allocation2 + $0xb58] sm:$0xff] }
 0x9a0   :  { %v5940_v45 = vpop.f32.mrf.mxu0  ;;  %v5981_v30 = vpop.f32.mrf.mxu1  ;;  %v7054_v0 = vld [vmem:[#allocation2 + $0xbf0] sm:$0xff]  ;;  %v7031_v29 = vld [vmem:[#allocation2 + $0xb38] sm:$0xff] }
 0x9a1   :  { %7781 = vmatpush1.bf16.msra.mxu0 %v10926_v2  ;;  %7822 = vmatpush1.bf16.msra.mxu1 %v10928_v22  ;;  %v6934_v2 = vld [vmem:[#allocation2 + $0x830] sm:$0xff]  ;;  %v6931_v22 = vld [vmem:[#allocation2 + $0x818] sm:$0xff]  ;;  %v10998_v47 = vcombine.low %v7050_v62, %v7054_v0 }
 0x9a2   :  { %v5941_v36 = vpop.f32.mrf.mxu0  ;;  %7782 = vmatprep.subr.bf16.mxu0 %v10919_v37  ;;  %v5982_v3 = vpop.f32.mrf.mxu1  ;;  %7823 = vmatprep.subr.bf16.mxu1 %v10921_v43  ;;  %v6935_v37 = vld [vmem:[#allocation2 + $0x838] sm:$0xff]  ;;  %v10886_v43 = vcombine.low %v6938_v60, %v6942_v21  ;;  %v10879_v24 = vcombine.high %v6930_v49, %v6934_v2  ;;  %v7030_v60 = vld [vmem:[#allocation2 + $0xb30] sm:$0xff] }
 0x9a3   :  { %v10881_v45 = vcombine.high %v6931_v22, %v6935_v37  ;;  %v7051_v30 = vld [vmem:[#allocation2 + $0xbd8] sm:$0xff]  ;;  %v10878_v36 = vcombine.low %v6930_v49, %v6934_v2  ;;  %v7022_v49 = vld [vmem:[#allocation2 + $0xaf0] sm:$0xff] }
 0x9a4   :  { %v7027_v21 = vld [vmem:[#allocation2 + $0xb18] sm:$0xff] }
 0x9a5   :  { %7783 = vmatpush1.bf16.msra.mxu0 %v10918_v40  ;;  %7824 = vmatpush1.bf16.msra.mxu1 %v10920_v56  ;;  %v7055_v40 = vld [vmem:[#allocation2 + $0xbf8] sm:$0xff]  ;;  %v10880_v56 = vcombine.low %v6931_v22, %v6935_v37 }
 0x9a6   :  { %7784 = vmatprep.subr.bf16.mxu0 %v10911_v58  ;;  %7825 = vmatprep.subr.bf16.mxu1 %v10913_v10  ;;  %v10999_v58 = vcombine.high %v7050_v62, %v7054_v0  ;;  %v11001_v3 = vcombine.high %v7051_v30, %v7055_v40  ;;  %v7042_v10 = vld [vmem:[#allocation2 + $0xb90] sm:$0xff]  ;;  %v7019_v2 = vld [vmem:[#allocation2 + $0xad8] sm:$0xff] }
 0x9a7   :  { %v10990_v20 = vcombine.low %v7042_v10, %v7046_v38  ;;  %v7023_v22 = vld [vmem:[#allocation2 + $0xaf8] sm:$0xff]  ;;  %v7014_v62 = vld [vmem:[#allocation2 + $0xab0] sm:$0xff] }
 0x9a8   :  { %v7011_v0 = vld [vmem:[#allocation2 + $0xa98] sm:$0xff] }
 0x9a9   :  { %7785 = vmatpush1.bf16.msra.mxu0 %v10910_v11  ;;  %7826 = vmatpush1.bf16.msra.mxu1 %v10912_v61  ;;  %v11000_v11 = vcombine.low %v7051_v30, %v7055_v40  ;;  %v10991_v61 = vcombine.high %v7042_v10, %v7046_v38  ;;  %v7015_v30 = vld [vmem:[#allocation2 + $0xab8] sm:$0xff]  ;;  %v7006_v10 = vld [vmem:[#allocation2 + $0xa70] sm:$0xff] }
 0x9aa   :  { %7786 = vmatprep.subr.bf16.mxu0 %v10903_v26  ;;  %7827 = vmatprep.subr.bf16.mxu1 %v10905_v6  ;;  %v10993_v26 = vcombine.high %v7043_v25, %v7047_v51  ;;  %v7034_v6 = vld [vmem:[#allocation2 + $0xb50] sm:$0xff]  ;;  %v7003_v38 = vld [vmem:[#allocation2 + $0xa58] sm:$0xff] }
 0x9ab   :  { %v10982_v8 = vcombine.low %v7034_v6, %v7038_v9 }
 0x9ad   :  { %7787 = vmatpush1.bf16.msra.mxu0 %v10902_v28  ;;  %7828 = vmatpush1.bf16.msra.mxu1 %v10904_v59  ;;  %v10992_v28 = vcombine.low %v7043_v25, %v7047_v51  ;;  %v10983_v59 = vcombine.high %v7034_v6, %v7038_v9  ;;  %v7007_v25 = vld [vmem:[#allocation2 + $0xa78] sm:$0xff]  ;;  %v6998_v6 = vld [vmem:[#allocation2 + $0xa30] sm:$0xff] }
 0x9ae   :  { %7788 = vmatprep.subr.bf16.mxu0 %v10895_v16  ;;  %7829 = vmatprep.subr.bf16.mxu1 %v10897_v17  ;;  %v10985_v16 = vcombine.high %v7035_v19, %v7039_v31  ;;  %v7026_v17 = vld [vmem:[#allocation2 + $0xb10] sm:$0xff]  ;;  %v6995_v9 = vld [vmem:[#allocation2 + $0xa18] sm:$0xff] }
 0x9af   :  { %v10974_v37 = vcombine.low %v7026_v17, %v7030_v60 }
 0x9b1   :  { %7789 = vmatpush1.bf16.msra.mxu0 %v10894_v18  ;;  %7830 = vmatpush1.bf16.msra.mxu1 %v10896_v50  ;;  %v10984_v18 = vcombine.low %v7035_v19, %v7039_v31  ;;  %v10975_v50 = vcombine.high %v7026_v17, %v7030_v60  ;;  %v6999_v19 = vld [vmem:[#allocation2 + $0xa38] sm:$0xff]  ;;  %v7930_v17 = vld [vmem:[#allocation2 + $0xde0] sm:$0xff]  ;;  %v7927_v60 = vld [vmem:[#allocation2 + $0xdc8] sm:$0xff] }
 0x9b2   :  { %7790 = vmatprep.subr.bf16.mxu0 %v10887_v63  ;;  %7831 = vmatprep.subr.bf16.mxu1 %v10889_v13  ;;  %v10977_v63 = vcombine.high %v7027_v21, %v7031_v29  ;;  %v7018_v13 = vld [vmem:[#allocation2 + $0xad0] sm:$0xff] }
 0x9b3   :  { %v10966_v40 = vcombine.low %v7018_v13, %v7022_v49 }
 0x9b5   :  { %7791 = vmatpush1.bf16.msra.mxu0 %v10886_v43  ;;  %7832 = vmatpush1.bf16.msra.mxu1 %v10888_v1  ;;  %v10976_v43 = vcombine.low %v7027_v21, %v7031_v29  ;;  %v10967_v1 = vcombine.high %v7018_v13, %v7022_v49  ;;  %v7931_v21 = vld [vmem:[#allocation2 + $0xde8] sm:$0xff]  ;;  %v7922_v13 = vld [vmem:[#allocation2 + $0xda0] sm:$0xff] }
 0x9b6   :  { %7792 = vmatprep.subr.bf16.mxu0 %v10879_v24  ;;  %7833 = vmatprep.subr.bf16.mxu1 %v10881_v45  ;;  %v10969_v24 = vcombine.high %v7019_v2, %v7023_v22  ;;  %v7010_v45 = vld [vmem:[#allocation2 + $0xa90] sm:$0xff]  ;;  %v7919_v49 = vld [vmem:[#allocation2 + $0xd88] sm:$0xff] }
 0x9b7   :  { %v10958_v51 = vcombine.low %v7010_v45, %v7014_v62 }
 0x9b9   :  { %7793 = vmatpush1.bf16.msra.mxu0 %v10878_v36  ;;  %7834 = vmatpush1.bf16.msra.mxu1 %v10880_v56  ;;  %v10968_v36 = vcombine.low %v7019_v2, %v7023_v22  ;;  %v10959_v56 = vcombine.high %v7010_v45, %v7014_v62  ;;  %v7923_v2 = vld [vmem:[#allocation2 + $0xda8] sm:$0xff]  ;;  %v7910_v45 = vld [vmem:[#allocation2 + $0xd40] sm:$0xff] }
 0x9ba   :  { %7794 = vmatprep.subr.bf16.mxu0 %v10999_v58  ;;  %7835 = vmatprep.subr.bf16.mxu1 %v11001_v3  ;;  %v10961_v58 = vcombine.high %v7011_v0, %v7015_v30  ;;  %v7002_v3 = vld [vmem:[#allocation2 + $0xa50] sm:$0xff]  ;;  %v7914_v62 = vld [vmem:[#allocation2 + $0xd60] sm:$0xff] }
 0x9bb   :  { %v10950_v31 = vcombine.low %v7002_v3, %v7006_v10 }
 0x9bd   :  { %7795 = vmatpush2.bf16.msra.mxu0 %v10998_v47  ;;  %7836 = vmatpush2.bf16.msra.mxu1 %v11000_v11  ;;  %v10960_v47 = vcombine.low %v7011_v0, %v7015_v30  ;;  %v10951_v11 = vcombine.high %v7002_v3, %v7006_v10  ;;  %v14611_v0 = vpack.c.bf16 %v14513_v44, %v14513_v44 }
 0x9be   :  { %7796 = vmatprep.subr.bf16.mxu0 %v10991_v61  ;;  %7837 = vmatprep.subr.bf16.mxu1 %v10993_v26  ;;  %v10953_v61 = vcombine.high %v7003_v38, %v7007_v25  ;;  %v6994_v26 = vld [vmem:[#allocation2 + $0xa10] sm:$0xff]  ;;  %v5896_v30 = vadd.f32 %v14582_v35, %v14550_v39  ;;  %v11043_v35 = vcombine.high %v7910_v45, %v7914_v62 }
 0x9bf   :  { %v10942_v29 = vcombine.low %v6994_v26, %v6998_v6 }
 0x9c1   :  { %7797 = vmatpush2.bf16.msra.mxu0 %v10990_v20  ;;  %7838 = vmatpush2.bf16.msra.mxu1 %v10992_v28  ;;  %v10952_v20 = vcombine.low %v7003_v38, %v7007_v25  ;;  %v10943_v28 = vcombine.high %v6994_v26, %v6998_v6  ;;  %v11042_v26 = vcombine.low %v7910_v45, %v7914_v62  ;;  %v7883_v45 = vld [vmem:[#allocation2 + $0xc68] sm:$0xff] }
 0x9c2   :  { %7798 = vmatprep.subr.bf16.mxu0 %v10983_v59  ;;  %7839 = vmatprep.subr.bf16.mxu1 %v10985_v16  ;;  %v10945_v59 = vcombine.high %v6995_v9, %v6999_v19  ;;  %v7926_v16 = vld [vmem:[#allocation2 + $0xdc0] sm:$0xff] }
 0x9c3   :  { %v11058_v22 = vcombine.low %v7926_v16, %v7930_v17 }
 0x9c5   :  { %7799 = vmatpush2.bf16.msra.mxu0 %v10982_v8  ;;  %7840 = vmatpush2.bf16.msra.mxu1 %v10984_v18  ;;  %v10944_v8 = vcombine.low %v6995_v9, %v6999_v19  ;;  %v11059_v18 = vcombine.high %v7926_v16, %v7930_v17  ;;  %v7895_v16 = vld [vmem:[#allocation2 + $0xcc8] sm:$0xff] }
 0x9c6   :  { %7800 = vmatprep.subr.bf16.mxu0 %v10975_v50  ;;  %7841 = vmatprep.subr.bf16.mxu1 %v10977_v63  ;;  %v11061_v50 = vcombine.high %v7927_v60, %v7931_v21  ;;  %v7918_v63 = vld [vmem:[#allocation2 + $0xd80] sm:$0xff]  ;;  %v7899_v17 = vld [vmem:[#allocation2 + $0xce8] sm:$0xff] }
 0x9c7   :  { %v11050_v44 = vcombine.low %v7918_v63, %v7922_v13 }
 0x9c9   :  { %7801 = vmatpush2.bf16.msra.mxu0 %v10974_v37  ;;  %7842 = vmatpush2.bf16.msra.mxu1 %v10976_v43  ;;  %v11060_v37 = vcombine.low %v7927_v60, %v7931_v21  ;;  %v11051_v43 = vcombine.high %v7918_v63, %v7922_v13  ;;  %v7887_v63 = vld [vmem:[#allocation2 + $0xc88] sm:$0xff] }
 0x9ca   :  { %7802 = vmatprep.subr.bf16.mxu0 %v10967_v1  ;;  %7843 = vmatprep.subr.bf16.mxu1 %v10969_v24  ;;  %v5855_v1 = vadd.f32 %v14579_v34, %v14547_v4  ;;  %v11053_v24 = vcombine.high %v7919_v49, %v7923_v2  ;;  %v5898_v4 = vadd.f32 %v14587_v52, %v14555_v53  ;;  %v7902_v53 = vld [vmem:[#allocation2 + $0xd00] sm:$0xff]  ;;  %v7891_v13 = vld [vmem:[#allocation2 + $0xca8] sm:$0xff] }
 0x9cb   :  { %v7906_v52 = vld [vmem:[#allocation2 + $0xd20] sm:$0xff] }
 0x9cc   :  { %v11035_v19 = vcombine.high %v7902_v53, %v7906_v52  ;;  %v11034_v60 = vcombine.low %v7902_v53, %v7906_v52  ;;  %v7991_v53 = vld [vmem:[#allocation2 + $0xfc8] sm:$0xff] }
 0x9cd   :  { %7803 = vmatpush2.bf16.msra.mxu0 %v10966_v40  ;;  %7844 = vmatpush2.bf16.msra.mxu1 %v10968_v36  ;;  %v5857_v40 = vadd.f32 %v14585_v7, %v14553_v14  ;;  %v11052_v14 = vcombine.low %v7919_v49, %v7923_v2  ;;  %v11028_v2 = vcombine.low %v7895_v16, %v7899_v17  ;;  %v7995_v52 = vld [vmem:[#allocation2 + $0xfe8] sm:$0xff] }
 0x9ce   :  { %7804 = vmatprep.subr.bf16.mxu0 %v10959_v56  ;;  %7845 = vmatprep.subr.bf16.mxu1 %v10961_v58  ;;  %v7911_v56 = vld [vmem:[#allocation2 + $0xd48] sm:$0xff] }
 0x9cf   :  { %v7915_v58 = vld [vmem:[#allocation2 + $0xd68] sm:$0xff] }
 0x9d0   :  { %v11045_v25 = vcombine.high %v7911_v56, %v7915_v58  ;;  %v11044_v9 = vcombine.low %v7911_v56, %v7915_v58  ;;  %v7870_v56 = vld [vmem:[#allocation2 + $0xc00] sm:$0xff] }
 0x9d1   :  { %7805 = vmatpush2.bf16.msra.mxu0 %v10958_v51  ;;  %7846 = vmatpush2.bf16.msra.mxu1 %v10960_v47  ;;  %v7903_v47 = vld [vmem:[#allocation2 + $0xd08] sm:$0xff]  ;;  %v7874_v58 = vld [vmem:[#allocation2 + $0xc20] sm:$0xff] }
 0x9d2   :  { %7806 = vmatprep.subr.bf16.mxu0 %v10951_v11  ;;  %7847 = vmatprep.subr.bf16.mxu1 %v10953_v61  ;;  %v7907_v11 = vld [vmem:[#allocation2 + $0xd28] sm:$0xff] }
 0x9d3   :  { %v11036_v21 = vcombine.low %v7903_v47, %v7907_v11 }
 0x9d5   :  { %7807 = vmatpush2.bf16.msra.mxu0 %v10950_v31  ;;  %7848 = vmatpush2.bf16.msra.mxu1 %v10952_v20  ;;  %v11037_v20 = vcombine.high %v7903_v47, %v7907_v11 }
 0x9d6   :  { %7808 = vmatprep.subr.bf16.mxu0 %v10943_v28  ;;  %7849 = vmatprep.subr.bf16.mxu1 %v10945_v59  ;;  %v7894_v28 = vld [vmem:[#allocation2 + $0xcc0] sm:$0xff] }
 0x9d7   :  { %v7898_v59 = vld [vmem:[#allocation2 + $0xce0] sm:$0xff] }
 0x9d8   :  { %v11026_v49 = vcombine.low %v7894_v28, %v7898_v59 }
 0x9d9   :  { %7809 = vmatpush2.bf16.msra.mxu0 %v10942_v29  ;;  %7850 = vmatpush2.bf16.msra.mxu1 %v10944_v8  ;;  %v11027_v29 = vcombine.high %v7894_v28, %v7898_v59  ;;  %v11029_v8 = vcombine.high %v7895_v16, %v7899_v17  ;;  %v7974_v16 = vld [vmem:[#allocation2 + $0xf40] sm:$0xff] }
 0x9da   :  { %8638 = vmatprep.subr.bf16.mxu0 %v11059_v18  ;;  %8679 = vmatprep.subr.bf16.mxu1 %v11061_v50  ;;  %v7886_v18 = vld [vmem:[#allocation2 + $0xc80] sm:$0xff] }
 0x9db   :  { %v7890_v50 = vld [vmem:[#allocation2 + $0xca0] sm:$0xff] }
 0x9dc   :  { %v6788_v36 = vpop.f32.mrf.mxu0  ;;  %7811 = vmatmul.mubr.bf16.vlgmr.msra.gmra.mxu0 %v14593_v12  ;;  %v6829_v3 = vpop.f32.mrf.mxu1  ;;  %7852 = vmatmul.mubr.bf16.vlgmr.msra.gmra.mxu1 %v14593_v12  ;;  %v11018_v62 = vcombine.low %v7886_v18, %v7890_v50  ;;  %v7978_v17 = vld [vmem:[#allocation2 + $0xf60] sm:$0xff] }
 0x9dd   :  { %v14620_v34 = vadd.f32 %v6788_v36, %v5855_v1  ;;  %8639 = vmatpush1.bf16.msra.mxu0 %v11058_v22  ;;  %v14623_v10 = vadd.f32 %v6829_v3, %v5896_v30  ;;  %8680 = vmatpush1.bf16.msra.mxu1 %v11060_v37  ;;  %v11019_v22 = vcombine.high %v7886_v18, %v7890_v50  ;;  %v7882_v1 = vld [vmem:[#allocation2 + $0xc60] sm:$0xff]  ;;  %v7875_v3 = vld [vmem:[#allocation2 + $0xc28] sm:$0xff] }
 0x9de   :  { %v6790_v39 = vpop.f32.mrf.mxu0  ;;  %8640 = vmatprep.subr.bf16.mxu0 %v11051_v43  ;;  %v6831_v38 = vpop.f32.mrf.mxu1  ;;  %8681 = vmatprep.subr.bf16.mxu1 %v11053_v24  ;;  %v11021_v37 = vcombine.high %v7887_v63, %v7891_v13  ;;  %v7878_v43 = vld [vmem:[#allocation2 + $0xc40] sm:$0xff]  ;;  %v7879_v24 = vld [vmem:[#allocation2 + $0xc48] sm:$0xff]  ;;  %v11020_v30 = vcombine.low %v7887_v63, %v7891_v13  ;;  %v11107_v18 = vcombine.high %v7974_v16, %v7978_v17 }
 0x9df   :  { %v14625_v7 = vadd.f32 %v6790_v39, %v5857_v40  ;;  %8670 = vmatprep.mubr.bf16.mxu0 %v14611_v0  ;;  %v14628_v51 = vadd.f32 %v6831_v38, %v5898_v4  ;;  %8711 = vmatprep.mubr.bf16.mxu1 %v14611_v0  ;;  %v11011_v40 = vcombine.high %v7878_v43, %v7882_v1  ;;  %v7871_v4 = vld [vmem:[#allocation2 + $0xc08] sm:$0xff]  ;;  %v7990_v38 = vld [vmem:[#allocation2 + $0xfc0] sm:$0xff] }
 0x9e0   :  { %v6792_v12 = vpop.f32.mrf.mxu0  ;;  %v6833_v61 = vpop.f32.mrf.mxu1  ;;  %v11013_v36 = vcombine.high %v7879_v24, %v7883_v45  ;;  %v11012_v39 = vcombine.low %v7879_v24, %v7883_v45  ;;  %v11004_v47 = vcombine.low %v7871_v4, %v7875_v3  ;;  %v7966_v63 = vld [vmem:[#allocation2 + $0xf00] sm:$0xff] }
 0x9e1   :  { %8641 = vmatpush1.bf16.msra.mxu0 %v11050_v44  ;;  %8682 = vmatpush1.bf16.msra.mxu1 %v11052_v14  ;;  %v11010_v44 = vcombine.low %v7878_v43, %v7882_v1  ;;  %v11003_v14 = vcombine.high %v7870_v56, %v7874_v58  ;;  %v11002_v12 = vcombine.low %v7870_v56, %v7874_v58  ;;  %v7970_v13 = vld [vmem:[#allocation2 + $0xf20] sm:$0xff] }
 0x9e2   :  { %v6793_v6 = vpop.f32.mrf.mxu0  ;;  %8642 = vmatprep.subr.bf16.mxu0 %v11043_v35  ;;  %v6834_v31 = vpop.f32.mrf.mxu1  ;;  %8683 = vmatprep.subr.bf16.mxu1 %v11045_v25  ;;  %v11005_v35 = vcombine.high %v7871_v4, %v7875_v3  ;;  %v7994_v25 = vld [vmem:[#allocation2 + $0xfe0] sm:$0xff]  ;;  %v11125_v61 = vcombine.high %v7991_v53, %v7995_v52  ;;  %v11099_v43 = vcombine.high %v7966_v63, %v7970_v13 }
 0x9e3   :  { %v11123_v11 = vcombine.high %v7990_v38, %v7994_v25  ;;  %v7986_v6 = vld [vmem:[#allocation2 + $0xfa0] sm:$0xff]  ;;  %v11122_v31 = vcombine.low %v7990_v38, %v7994_v25 }
 0x9e4   :  { %v7958_v24 = vld [vmem:[#allocation2 + $0xec0] sm:$0xff] }
 0x9e5   :  { %8643 = vmatpush1.bf16.msra.mxu0 %v11042_v26  ;;  %8684 = vmatpush1.bf16.msra.mxu1 %v11044_v9  ;;  %v7982_v26 = vld [vmem:[#allocation2 + $0xf80] sm:$0xff]  ;;  %v7983_v9 = vld [vmem:[#allocation2 + $0xf88] sm:$0xff] }
 0x9e6   :  { %8644 = vmatprep.subr.bf16.mxu0 %v11035_v19  ;;  %8685 = vmatprep.subr.bf16.mxu1 %v11037_v20  ;;  %v7987_v19 = vld [vmem:[#allocation2 + $0xfa8] sm:$0xff]  ;;  %v11124_v20 = vcombine.low %v7991_v53, %v7995_v52  ;;  %v11115_v28 = vcombine.high %v7982_v26, %v7986_v6  ;;  %v7962_v45 = vld [vmem:[#allocation2 + $0xee0] sm:$0xff] }
 0x9e7   :  { %v11117_v59 = vcombine.high %v7983_v9, %v7987_v19  ;;  %v11091_v56 = vcombine.high %v7958_v24, %v7962_v45  ;;  %v7950_v4 = vld [vmem:[#allocation2 + $0xe80] sm:$0xff] }
 0x9e8   :  { %v7954_v3 = vld [vmem:[#allocation2 + $0xea0] sm:$0xff] }
 0x9e9   :  { %8645 = vmatpush1.bf16.msra.mxu0 %v11034_v60  ;;  %8686 = vmatpush1.bf16.msra.mxu1 %v11036_v21  ;;  %v7975_v60 = vld [vmem:[#allocation2 + $0xf48] sm:$0xff]  ;;  %v11083_v38 = vcombine.high %v7950_v4, %v7954_v3  ;;  %v7942_v53 = vld [vmem:[#allocation2 + $0xe40] sm:$0xff] }
 0x9ea   :  { %8646 = vmatprep.subr.bf16.mxu0 %v11027_v29  ;;  %8687 = vmatprep.subr.bf16.mxu1 %v11029_v8  ;;  %v7979_v21 = vld [vmem:[#allocation2 + $0xf68] sm:$0xff]  ;;  %v11114_v29 = vcombine.low %v7982_v26, %v7986_v6  ;;  %v11116_v8 = vcombine.low %v7983_v9, %v7987_v19  ;;  %v7946_v52 = vld [vmem:[#allocation2 + $0xe60] sm:$0xff] }
 0x9eb   :  { %v11109_v50 = vcombine.high %v7975_v60, %v7979_v21  ;;  %v11075_v26 = vcombine.high %v7942_v53, %v7946_v52  ;;  %v7934_v9 = vld [vmem:[#allocation2 + $0xe00] sm:$0xff] }
 0x9ec   :  { %v7938_v19 = vld [vmem:[#allocation2 + $0xe20] sm:$0xff] }
 0x9ed   :  { %8647 = vmatpush1.bf16.msra.mxu0 %v11026_v49  ;;  %8688 = vmatpush1.bf16.msra.mxu1 %v11028_v2  ;;  %v7967_v49 = vld [vmem:[#allocation2 + $0xf08] sm:$0xff] }
 0x9ee   :  { %8648 = vmatprep.subr.bf16.mxu0 %v11019_v22  ;;  %8689 = vmatprep.subr.bf16.mxu1 %v11021_v37  ;;  %v7971_v2 = vld [vmem:[#allocation2 + $0xf28] sm:$0xff]  ;;  %v11106_v22 = vcombine.low %v7974_v16, %v7978_v17  ;;  %v11108_v37 = vcombine.low %v7975_v60, %v7979_v21  ;;  %v11067_v16 = vcombine.high %v7934_v9, %v7938_v19  ;;  %v7928_v60 = vld [vmem:[#allocation2 + $0xdd0] sm:$0xff] }
 0x9ef   :  { %v11101_v1 = vcombine.high %v7967_v49, %v7971_v2  ;;  %v7932_v21 = vld [vmem:[#allocation2 + $0xdf0] sm:$0xff] }
 0x9f1   :  { %8649 = vmatpush1.bf16.msra.mxu0 %v11018_v62  ;;  %8690 = vmatpush1.bf16.msra.mxu1 %v11020_v30  ;;  %v7959_v62 = vld [vmem:[#allocation2 + $0xec8] sm:$0xff] }
 0x9f2   :  { %8650 = vmatprep.subr.bf16.mxu0 %v11011_v40  ;;  %8691 = vmatprep.subr.bf16.mxu1 %v11013_v36  ;;  %v7963_v30 = vld [vmem:[#allocation2 + $0xee8] sm:$0xff]  ;;  %v11098_v40 = vcombine.low %v7966_v63, %v7970_v13  ;;  %v11100_v36 = vcombine.low %v7967_v49, %v7971_v2  ;;  %v11063_v63 = vcombine.high %v7928_v60, %v7932_v21  ;;  %v7920_v49 = vld [vmem:[#allocation2 + $0xd90] sm:$0xff] }
 0x9f3   :  { %v11093_v58 = vcombine.high %v7959_v62, %v7963_v30  ;;  %v7924_v2 = vld [vmem:[#allocation2 + $0xdb0] sm:$0xff] }
 0x9f5   :  { %8651 = vmatpush1.bf16.msra.mxu0 %v11010_v44  ;;  %8692 = vmatpush1.bf16.msra.mxu1 %v11012_v39  ;;  %v7951_v44 = vld [vmem:[#allocation2 + $0xe88] sm:$0xff] }
 0x9f6   :  { %8652 = vmatprep.subr.bf16.mxu0 %v11003_v14  ;;  %8693 = vmatprep.subr.bf16.mxu1 %v11005_v35  ;;  %v7955_v39 = vld [vmem:[#allocation2 + $0xea8] sm:$0xff]  ;;  %v11090_v14 = vcombine.low %v7958_v24, %v7962_v45  ;;  %v11092_v35 = vcombine.low %v7959_v62, %v7963_v30  ;;  %v11055_v45 = vcombine.high %v7920_v49, %v7924_v2 }
 0x9f7   :  { %v11085_v25 = vcombine.high %v7951_v44, %v7955_v39  ;;  %v5937_v62 = vadd.f32 %v14595_v57, %v14563_v48  ;;  %v11054_v57 = vcombine.low %v7920_v49, %v7924_v2  ;;  %v7880_v2 = vld [vmem:[#allocation2 + $0xc50] sm:$0xff] }
 0x9f9   :  { %8653 = vmatpush1.bf16.msra.mxu0 %v11002_v12  ;;  %8694 = vmatpush1.bf16.msra.mxu1 %v11004_v47  ;;  %v7943_v12 = vld [vmem:[#allocation2 + $0xe48] sm:$0xff] }
 0x9fa   :  { %8654 = vmatprep.subr.bf16.mxu0 %v11123_v11  ;;  %8695 = vmatprep.subr.bf16.mxu1 %v11125_v61  ;;  %v7947_v47 = vld [vmem:[#allocation2 + $0xe68] sm:$0xff]  ;;  %v11082_v11 = vcombine.low %v7950_v4, %v7954_v3  ;;  %v11084_v61 = vcombine.low %v7951_v44, %v7955_v39  ;;  %v7913_v4 = vld [vmem:[#allocation2 + $0xd58] sm:$0xff]  ;;  %v5980_v44 = vadd.f32 %v14603_v55, %v14571_v5  ;;  %v7904_v5 = vld [vmem:[#allocation2 + $0xd10] sm:$0xff] }
 0x9fb   :  { %v11077_v6 = vcombine.high %v7943_v12, %v7947_v47  ;;  %v7917_v3 = vld [vmem:[#allocation2 + $0xd78] sm:$0xff]  ;;  %v7908_v55 = vld [vmem:[#allocation2 + $0xd30] sm:$0xff] }
 0x9fd   :  { %8655 = vmatpush2.bf16.msra.mxu0 %v11122_v31  ;;  %8696 = vmatpush2.bf16.msra.mxu1 %v11124_v20  ;;  %v7935_v31 = vld [vmem:[#allocation2 + $0xe08] sm:$0xff] }
 0x9fe   :  { %8656 = vmatprep.subr.bf16.mxu0 %v11115_v28  ;;  %8697 = vmatprep.subr.bf16.mxu1 %v11117_v59  ;;  %v7939_v20 = vld [vmem:[#allocation2 + $0xe28] sm:$0xff]  ;;  %v11074_v28 = vcombine.low %v7942_v53, %v7946_v52  ;;  %v11076_v59 = vcombine.low %v7943_v12, %v7947_v47  ;;  %v7905_v52 = vld [vmem:[#allocation2 + $0xd18] sm:$0xff] }
 0x9ff   :  { %v11069_v17 = vcombine.high %v7935_v31, %v7939_v20  ;;  %v7909_v12 = vld [vmem:[#allocation2 + $0xd38] sm:$0xff] }
 0xa01   :  { %8657 = vmatpush2.bf16.msra.mxu0 %v11114_v29  ;;  %8698 = vmatpush2.bf16.msra.mxu1 %v11116_v8  ;;  %v7929_v29 = vld [vmem:[#allocation2 + $0xdd8] sm:$0xff] }
 0xa02   :  { %8658 = vmatprep.subr.bf16.mxu0 %v11107_v18  ;;  %8699 = vmatprep.subr.bf16.mxu1 %v11109_v50  ;;  %v7933_v8 = vld [vmem:[#allocation2 + $0xdf8] sm:$0xff]  ;;  %v11066_v18 = vcombine.low %v7934_v9, %v7938_v19  ;;  %v11068_v50 = vcombine.low %v7935_v31, %v7939_v20  ;;  %v11041_v19 = vcombine.high %v7905_v52, %v7909_v12  ;;  %v7896_v31 = vld [vmem:[#allocation2 + $0xcd0] sm:$0xff] }
 0xa03   :  { %v11065_v13 = vcombine.high %v7929_v29, %v7933_v8  ;;  %v11064_v24 = vcombine.low %v7929_v29, %v7933_v8  ;;  %v7900_v20 = vld [vmem:[#allocation2 + $0xcf0] sm:$0xff]  ;;  %v7889_v8 = vld [vmem:[#allocation2 + $0xc98] sm:$0xff] }
 0xa04   :  { %v7892_v29 = vld [vmem:[#allocation2 + $0xcb0] sm:$0xff] }
 0xa05   :  { %8659 = vmatpush2.bf16.msra.mxu0 %v11106_v22  ;;  %8700 = vmatpush2.bf16.msra.mxu1 %v11108_v37  ;;  %v14633_v22 = vpack.c.bf16 %v14507_v33, %v14507_v33  ;;  %v7921_v37 = vld [vmem:[#allocation2 + $0xd98] sm:$0xff]  ;;  %v5939_v33 = vadd.f32 %v14601_v32, %v14569_v23 }
 0xa06   :  { %8660 = vmatprep.subr.bf16.mxu0 %v11099_v43  ;;  %8701 = vmatprep.subr.bf16.mxu1 %v11101_v1  ;;  %v7925_v43 = vld [vmem:[#allocation2 + $0xdb8] sm:$0xff]  ;;  %v11062_v1 = vcombine.low %v7928_v60, %v7932_v21  ;;  %v7888_v21 = vld [vmem:[#allocation2 + $0xc90] sm:$0xff] }
 0xa07   :  { %v11057_v30 = vcombine.high %v7921_v37, %v7925_v43  ;;  %v11056_v23 = vcombine.low %v7921_v37, %v7925_v43  ;;  %v7884_v37 = vld [vmem:[#allocation2 + $0xc70] sm:$0xff]  ;;  %v7881_v43 = vld [vmem:[#allocation2 + $0xc58] sm:$0xff] }
 0xa09   :  { %8661 = vmatpush2.bf16.msra.mxu0 %v11098_v40  ;;  %8702 = vmatpush2.bf16.msra.mxu1 %v11100_v36  ;;  %v7912_v40 = vld [vmem:[#allocation2 + $0xd50] sm:$0xff] }
 0xa0a   :  { %8662 = vmatprep.subr.bf16.mxu0 %v11091_v56  ;;  %8703 = vmatprep.subr.bf16.mxu1 %v11093_v58  ;;  %v7916_v36 = vld [vmem:[#allocation2 + $0xd70] sm:$0xff]  ;;  %v5978_v56 = vadd.f32 %v14598_v54, %v14566_v41 }
 0xa0b   :  { %v11047_v54 = vcombine.high %v7912_v40, %v7916_v36 }
 0xa0d   :  { %8663 = vmatpush2.bf16.msra.mxu0 %v11090_v14  ;;  %8704 = vmatpush2.bf16.msra.mxu1 %v11092_v35 }
 0xa0e   :  { %8664 = vmatprep.subr.bf16.mxu0 %v11083_v38  ;;  %8705 = vmatprep.subr.bf16.mxu1 %v11085_v25  ;;  %v11049_v38 = vcombine.high %v7913_v4, %v7917_v3 }
 0xa11   :  { %8665 = vmatpush2.bf16.msra.mxu0 %v11082_v11  ;;  %8706 = vmatpush2.bf16.msra.mxu1 %v11084_v61  ;;  %v11046_v11 = vcombine.low %v7912_v40, %v7916_v36  ;;  %v7872_v40 = vld [vmem:[#allocation2 + $0xc10] sm:$0xff] }
 0xa12   :  { %8666 = vmatprep.subr.bf16.mxu0 %v11075_v26  ;;  %8707 = vmatprep.subr.bf16.mxu1 %v11077_v6  ;;  %v11048_v26 = vcombine.low %v7913_v4, %v7917_v3  ;;  %v11039_v6 = vcombine.high %v7904_v5, %v7908_v55  ;;  %v7876_v36 = vld [vmem:[#allocation2 + $0xc30] sm:$0xff] }
 0xa13   :  { %v11007_v3 = vcombine.high %v7872_v40, %v7876_v36 }
 0xa15   :  { %8667 = vmatpush2.bf16.msra.mxu0 %v11074_v28  ;;  %8708 = vmatpush2.bf16.msra.mxu1 %v11076_v59  ;;  %v7897_v28 = vld [vmem:[#allocation2 + $0xcd8] sm:$0xff] }
 0xa16   :  { %8668 = vmatprep.subr.bf16.mxu0 %v11067_v16  ;;  %8709 = vmatprep.subr.bf16.mxu1 %v11069_v17  ;;  %v7901_v59 = vld [vmem:[#allocation2 + $0xcf8] sm:$0xff]  ;;  %v11038_v16 = vcombine.low %v7904_v5, %v7908_v55  ;;  %v11031_v17 = vcombine.high %v7896_v31, %v7900_v20  ;;  %v7984_v55 = vld [vmem:[#allocation2 + $0xf90] sm:$0xff] }
 0xa17   :  { %v11033_v60 = vcombine.high %v7897_v28, %v7901_v59 }
 0xa19   :  { %8669 = vmatpush2.bf16.msra.mxu0 %v11066_v18  ;;  %8710 = vmatpush2.bf16.msra.mxu1 %v11068_v50  ;;  %v7893_v18 = vld [vmem:[#allocation2 + $0xcb8] sm:$0xff]  ;;  %v11030_v50 = vcombine.low %v7896_v31, %v7900_v20 }
 0xa1a   :  { %8720 = vmatprep.subr.bf16.mxu0 %v11063_v63  ;;  %8761 = vmatprep.subr.bf16.mxu1 %v11065_v13  ;;  %v11032_v63 = vcombine.low %v7897_v28, %v7901_v59  ;;  %v11023_v13 = vcombine.high %v7888_v21, %v7892_v29  ;;  %v11025_v49 = vcombine.high %v7889_v8, %v7893_v18  ;;  %v7981_v31 = vld [vmem:[#allocation2 + $0xf78] sm:$0xff] }
 0xa1c   :  { %v6870_v58 = vpop.f32.mrf.mxu0  ;;  %8671 = vmatmul.mubr.bf16.vlgmr.msra.gmra.mxu0 %v14633_v22  ;;  %v6911_v48 = vpop.f32.mrf.mxu1  ;;  %8712 = vmatmul.mubr.bf16.vlgmr.msra.gmra.mxu1 %v14633_v22 }
 0xa1d   :  { %v14644_v39 = vadd.f32 %v6870_v58, %v5937_v62  ;;  %8721 = vmatpush1.bf16.msra.mxu0 %v11062_v1  ;;  %v14647_v14 = vadd.f32 %v6911_v48, %v5978_v56  ;;  %8762 = vmatpush1.bf16.msra.mxu1 %v11064_v24  ;;  %v7885_v1 = vld [vmem:[#allocation2 + $0xc78] sm:$0xff]  ;;  %v11022_v24 = vcombine.low %v7888_v21, %v7892_v29  ;;  %v7992_v48 = vld [vmem:[#allocation2 + $0xfd0] sm:$0xff] }
 0xa1e   :  { %v6872_v41 = vpop.f32.mrf.mxu0  ;;  %8722 = vmatprep.subr.bf16.mxu0 %v11055_v45  ;;  %v6913_v35 = vpop.f32.mrf.mxu1  ;;  %8763 = vmatprep.subr.bf16.mxu1 %v11057_v30  ;;  %v11024_v45 = vcombine.low %v7889_v8, %v7893_v18  ;;  %v11015_v62 = vcombine.high %v7880_v2, %v7884_v37  ;;  %v11017_v30 = vcombine.high %v7881_v43, %v7885_v1  ;;  %v7873_v56 = vld [vmem:[#allocation2 + $0xc18] sm:$0xff] }
 0xa1f   :  { %v14649_v32 = vadd.f32 %v6872_v41, %v5939_v33  ;;  %8752 = vmatprep.mubr.bf16.mxu0 %v14611_v0  ;;  %v14652_v25 = vadd.f32 %v6913_v35, %v5980_v44  ;;  %8793 = vmatprep.mubr.bf16.mxu1 %v14611_v0  ;;  %v11040_v0 = vcombine.low %v7905_v52, %v7909_v12  ;;  %v7877_v33 = vld [vmem:[#allocation2 + $0xc38] sm:$0xff] }
 0xa20   :  { %v6874_v53 = vpop.f32.mrf.mxu0  ;;  %v6915_v47 = vpop.f32.mrf.mxu1  ;;  %v11014_v58 = vcombine.low %v7880_v2, %v7884_v37  ;;  %v11016_v4 = vcombine.low %v7881_v43, %v7885_v1  ;;  %v11009_v44 = vcombine.high %v7873_v56, %v7877_v33  ;;  %v7993_v41 = vld [vmem:[#allocation2 + $0xfd8] sm:$0xff]  ;;  %v11008_v35 = vcombine.low %v7873_v56, %v7877_v33 }
 0xa21   :  { %8723 = vmatpush1.bf16.msra.mxu0 %v11054_v57  ;;  %8764 = vmatpush1.bf16.msra.mxu1 %v11056_v23  ;;  %v7996_v57 = vld [vmem:[#allocation2 + $0xff0] sm:$0xff]  ;;  %v7997_v23 = vld [vmem:[#allocation2 + $0xff8] sm:$0xff] }
 0xa22   :  { %v6875_v61 = vpop.f32.mrf.mxu0  ;;  %8724 = vmatprep.subr.bf16.mxu0 %v11047_v54  ;;  %v6916_v9 = vpop.f32.mrf.mxu1  ;;  %8765 = vmatprep.subr.bf16.mxu1 %v11049_v38  ;;  %v11006_v54 = vcombine.low %v7872_v40, %v7876_v36  ;;  %v11127_v38 = vcombine.high %v7992_v48, %v7996_v57  ;;  %v11129_v5 = vcombine.high %v7993_v41, %v7997_v23  ;;  %v7988_v53 = vld [vmem:[#allocation2 + $0xfb0] sm:$0xff]  ;;  %v7985_v52 = vld [vmem:[#allocation2 + $0xf98] sm:$0xff] }
 0xa23   :  { %v7989_v12 = vld [vmem:[#allocation2 + $0xfb8] sm:$0xff]  ;;  %v11126_v47 = vcombine.low %v7992_v48, %v7996_v57  ;;  %v11119_v61 = vcombine.high %v7984_v55, %v7988_v53  ;;  %v7980_v9 = vld [vmem:[#allocation2 + $0xf70] sm:$0xff]  ;;  %v11118_v20 = vcombine.low %v7984_v55, %v7988_v53 }
 0xa24   :  { %v11120_v28 = vcombine.low %v7985_v52, %v7989_v12  ;;  %v7973_v21 = vld [vmem:[#allocation2 + $0xf38] sm:$0xff] }
 0xa25   :  { %8725 = vmatpush1.bf16.msra.mxu0 %v11046_v11  ;;  %8766 = vmatpush1.bf16.msra.mxu1 %v11048_v26  ;;  %v11128_v11 = vcombine.low %v7993_v41, %v7997_v23  ;;  %v11121_v26 = vcombine.high %v7985_v52, %v7989_v12  ;;  %v7965_v2 = vld [vmem:[#allocation2 + $0xef8] sm:$0xff] }
 0xa26   :  { %8726 = vmatprep.subr.bf16.mxu0 %v11039_v6  ;;  %8767 = vmatprep.subr.bf16.mxu1 %v11041_v19  ;;  %v7976_v6 = vld [vmem:[#allocation2 + $0xf50] sm:$0xff]  ;;  %v7977_v19 = vld [vmem:[#allocation2 + $0xf58] sm:$0xff] }
 0xa27   :  { %v11111_v59 = vcombine.high %v7976_v6, %v7980_v9  ;;  %v11110_v29 = vcombine.low %v7976_v6, %v7980_v9  ;;  %v11112_v8 = vcombine.low %v7977_v19, %v7981_v31  ;;  %v7957_v40 = vld [vmem:[#allocation2 + $0xeb8] sm:$0xff] }
 0xa28   :  { %v7949_v48 = vld [vmem:[#allocation2 + $0xe78] sm:$0xff] }
 0xa29   :  { %8727 = vmatpush1.bf16.msra.mxu0 %v11038_v16  ;;  %8768 = vmatpush1.bf16.msra.mxu1 %v11040_v0  ;;  %v11113_v16 = vcombine.high %v7977_v19, %v7981_v31  ;;  %v7968_v0 = vld [vmem:[#allocation2 + $0xf10] sm:$0xff]  ;;  %v7941_v55 = vld [vmem:[#allocation2 + $0xe38] sm:$0xff] }
 0xa2a   :  { %8728 = vmatprep.subr.bf16.mxu0 %v11031_v17  ;;  %8769 = vmatprep.subr.bf16.mxu1 %v11033_v60  ;;  %v7972_v17 = vld [vmem:[#allocation2 + $0xf30] sm:$0xff]  ;;  %v7969_v60 = vld [vmem:[#allocation2 + $0xf18] sm:$0xff] }
 0xa2b   :  { %v11103_v18 = vcombine.high %v7968_v0, %v7972_v17  ;;  %v11102_v37 = vcombine.low %v7968_v0, %v7972_v17  ;;  %v11104_v43 = vcombine.low %v7969_v60, %v7973_v21 }
 0xa2d   :  { %8729 = vmatpush1.bf16.msra.mxu0 %v11030_v50  ;;  %8770 = vmatpush1.bf16.msra.mxu1 %v11032_v63  ;;  %v11105_v50 = vcombine.high %v7969_v60, %v7973_v21  ;;  %v7960_v63 = vld [vmem:[#allocation2 + $0xed0] sm:$0xff] }
 0xa2e   :  { %8730 = vmatprep.subr.bf16.mxu0 %v11023_v13  ;;  %8771 = vmatprep.subr.bf16.mxu1 %v11025_v49  ;;  %v7964_v13 = vld [vmem:[#allocation2 + $0xef0] sm:$0xff]  ;;  %v7961_v49 = vld [vmem:[#allocation2 + $0xed8] sm:$0xff] }
 0xa2f   :  { %v11095_v1 = vcombine.high %v7960_v63, %v7964_v13  ;;  %v11094_v36 = vcombine.low %v7960_v63, %v7964_v13  ;;  %v11096_v56 = vcombine.low %v7961_v49, %v7965_v2 }
 0xa31   :  { %8731 = vmatpush1.bf16.msra.mxu0 %v11022_v24  ;;  %8772 = vmatpush1.bf16.msra.mxu1 %v11024_v45  ;;  %v11097_v24 = vcombine.high %v7961_v49, %v7965_v2  ;;  %v7952_v45 = vld [vmem:[#allocation2 + $0xe90] sm:$0xff]  ;;  %v11998_v49 = vld [vmem:[#allocation33 + $0x78] sm:$0xff]  }
 0xa32   :  { %8732 = vmatprep.subr.bf16.mxu0 %v11015_v62  ;;  %8773 = vmatprep.subr.bf16.mxu1 %v11017_v30  ;;  %v7956_v62 = vld [vmem:[#allocation2 + $0xeb0] sm:$0xff]  ;;  %v7953_v30 = vld [vmem:[#allocation2 + $0xe98] sm:$0xff] }
 0xa33   :  { %v11087_v33 = vcombine.high %v7952_v45, %v7956_v62  ;;  %v11086_v57 = vcombine.low %v7952_v45, %v7956_v62  ;;  %v11088_v41 = vcombine.low %v7953_v30, %v7957_v40  ;;  %v11999_v2 = vld [vmem:[#allocation33 + $0xf8] sm:$0xff]   ;;  %v12008_v45 = vld [vmem:[#allocation33 + $0x28] sm:$0xff]  }
 0xa34   :  { %v12009_v62 = vld [vmem:[#allocation33 + $0xa8] sm:$0xff]  }
 0xa35   :  { %8733 = vmatpush1.bf16.msra.mxu0 %v11014_v58  ;;  %8774 = vmatpush1.bf16.msra.mxu1 %v11016_v4  ;;  %v11089_v58 = vcombine.high %v7953_v30, %v7957_v40  ;;  %v7944_v4 = vld [vmem:[#allocation2 + $0xe50] sm:$0xff]  ;;  %v12010_v30 = vld [vmem:[#allocation33 + $0x60] sm:$0xff]  }
 0xa36   :  { %8734 = vmatprep.subr.bf16.mxu0 %v11007_v3  ;;  %8775 = vmatprep.subr.bf16.mxu1 %v11009_v44  ;;  %v7948_v3 = vld [vmem:[#allocation2 + $0xe70] sm:$0xff]  ;;  %v7945_v44 = vld [vmem:[#allocation2 + $0xe58] sm:$0xff]  ;;  %v12011_v40 = vld [vmem:[#allocation33 + $0xe0] sm:$0xff]  }
 0xa37   :  { %v11079_v23 = vcombine.high %v7944_v4, %v7948_v3  ;;  %v11078_v53 = vcombine.low %v7944_v4, %v7948_v3  ;;  %v11080_v52 = vcombine.low %v7945_v44, %v7949_v48  ;;  %v12016_v4 = vld [vmem:[#allocation33 + $0x18] sm:$0xff]  }
 0xa38   :  { %v12017_v3 = vld [vmem:[#allocation33 + $0x98] sm:$0xff]  }
 0xa39   :  { %8735 = vmatpush1.bf16.msra.mxu0 %v11006_v54  ;;  %8776 = vmatpush1.bf16.msra.mxu1 %v11008_v35  ;;  %v11081_v54 = vcombine.high %v7945_v44, %v7949_v48  ;;  %v7936_v35 = vld [vmem:[#allocation2 + $0xe10] sm:$0xff] }
 0xa3a   :  { %8736 = vmatprep.subr.bf16.mxu0 %v11127_v38  ;;  %8777 = vmatprep.subr.bf16.mxu1 %v11129_v5  ;;  %v7940_v38 = vld [vmem:[#allocation2 + $0xe30] sm:$0xff]  ;;  %v7937_v5 = vld [vmem:[#allocation2 + $0xe18] sm:$0xff] }
 0xa3b   :  { %v11071_v12 = vcombine.high %v7936_v35, %v7940_v38  ;;  %v12018_v44 = vld [vmem:[#allocation33 + $0x50] sm:$0xff]  }
 0xa3c   :  { %v12019_v48 = vld [vmem:[#allocation33 + $0xd0] sm:$0xff]  }
 0xa3d   :  { %8737 = vmatpush2.bf16.msra.mxu0 %v11126_v47  ;;  %8778 = vmatpush2.bf16.msra.mxu1 %v11128_v11  ;;  %v11073_v47 = vcombine.high %v7937_v5, %v7941_v55  ;;  %v11070_v11 = vcombine.low %v7936_v35, %v7940_v38  ;;  %v12024_v35 = vld [vmem:[#allocation33 + $0x8] sm:$0xff]  }
 0xa3e   :  { %8738 = vmatprep.subr.bf16.mxu0 %v11119_v61  ;;  %8779 = vmatprep.subr.bf16.mxu1 %v11121_v26  ;;  %v11072_v61 = vcombine.low %v7937_v5, %v7941_v55  ;;  %v12025_v38 = vld [vmem:[#allocation33 + $0x88] sm:$0xff]   ;;  %v12026_v5 = vld [vmem:[#allocation33 + $0x40] sm:$0xff]  }
 0xa3f   :  { %v12027_v55 = vld [vmem:[#allocation33 + $0xc0] sm:$0xff]  }
 0xa41   :  { %8739 = vmatpush2.bf16.msra.mxu0 %v11118_v20  ;;  %8780 = vmatpush2.bf16.msra.mxu1 %v11120_v28 }
 0xa42   :  { %8740 = vmatprep.subr.bf16.mxu0 %v11111_v59  ;;  %8781 = vmatprep.subr.bf16.mxu1 %v11113_v16 }
 0xa45   :  { %8741 = vmatpush2.bf16.msra.mxu0 %v11110_v29  ;;  %8782 = vmatpush2.bf16.msra.mxu1 %v11112_v8 }
 0xa46   :  { %8742 = vmatprep.subr.bf16.mxu0 %v11103_v18  ;;  %8783 = vmatprep.subr.bf16.mxu1 %v11105_v50 }
 0xa49   :  { %8743 = vmatpush2.bf16.msra.mxu0 %v11102_v37  ;;  %8784 = vmatpush2.bf16.msra.mxu1 %v11104_v43  ;;  %v12001_v37 = vld [vmem:[#allocation33 + $0xb8] sm:$0xff]   ;;  %v12003_v43 = vld [vmem:[#allocation33 + $0xf0] sm:$0xff]  }
 0xa4a   :  { %8744 = vmatprep.subr.bf16.mxu0 %v11095_v1  ;;  %8785 = vmatprep.subr.bf16.mxu1 %v11097_v24  ;;  %v12005_v1 = vld [vmem:[#allocation33 + $0xb0] sm:$0xff]   ;;  %v12007_v24 = vld [vmem:[#allocation33 + $0xe8] sm:$0xff]  }
 0xa4d   :  { %8745 = vmatpush2.bf16.msra.mxu0 %v11094_v36  ;;  %8786 = vmatpush2.bf16.msra.mxu1 %v11096_v56  ;;  %v12012_v36 = vld [vmem:[#allocation33 + $0x20] sm:$0xff]  }
 0xa4e   :  { %8746 = vmatprep.subr.bf16.mxu0 %v11087_v33  ;;  %8787 = vmatprep.subr.bf16.mxu1 %v11089_v58  ;;  %v12013_v56 = vld [vmem:[#allocation33 + $0xa0] sm:$0xff]   ;;  %v12014_v33 = vld [vmem:[#allocation33 + $0x58] sm:$0xff]  }
 0xa4f   :  { %v12015_v58 = vld [vmem:[#allocation33 + $0xd8] sm:$0xff]  }
 0xa51   :  { %8747 = vmatpush2.bf16.msra.mxu0 %v11086_v57  ;;  %8788 = vmatpush2.bf16.msra.mxu1 %v11088_v41  ;;  %v12020_v57 = vld [vmem:[#allocation33 + $0x10] sm:$0xff]  }
 0xa52   :  { %8748 = vmatprep.subr.bf16.mxu0 %v11079_v23  ;;  %8789 = vmatprep.subr.bf16.mxu1 %v11081_v54  ;;  %v12021_v41 = vld [vmem:[#allocation33 + $0x90] sm:$0xff]   ;;  %v12022_v23 = vld [vmem:[#allocation33 + $0x48] sm:$0xff]  }
 0xa53   :  { %v12023_v54 = vld [vmem:[#allocation33 + $0xc8] sm:$0xff]  }
 0xa55   :  { %8749 = vmatpush2.bf16.msra.mxu0 %v11078_v53  ;;  %8790 = vmatpush2.bf16.msra.mxu1 %v11080_v52  ;;  %v14681_v53 = vld [vmem:[#allocation28] sm:$0xff]  ;;  %v12028_v52 = vld [vmem:[#allocation33] sm:$0xff]  }
 0xa56   :  { %8750 = vmatprep.subr.bf16.mxu0 %v11071_v12  ;;  %8791 = vmatprep.subr.bf16.mxu1 %v11073_v47  ;;  %v12029_v12 = vld [vmem:[#allocation33 + $0x80] sm:$0xff]   ;;  %v14684_v47 = vsub.s32 3, %v15418_v42 }
 0xa59   :  { %8751 = vmatpush2.bf16.msra.mxu0 %v11070_v11  ;;  %8792 = vmatpush2.bf16.msra.mxu1 %v11072_v61  ;;  %v8815_v11 = vrot.slane %v14681_v53, %v15348_v27 }
 0xa5a   :  { %11419 = vmatprep.subr.bf16.mxu0 %v11998_v49  ;;  %11441 = vmatprep.subr.bf16.mxu1 %v11999_v2 }
 0xa5c   :  { %v7730_v26 = vpop.f32.mrf.mxu0  ;;  %8753 = vmatmul.mubr.bf16.vlgmr.msra.gmra.mxu0 %v14633_v22  ;;  %v7771_v9 = vpop.f32.mrf.mxu1  ;;  %8794 = vmatmul.mubr.bf16.vlgmr.msra.gmra.mxu1 %v14633_v22 }
 0xa5d   :  { %v14657_v6 = vadd.f32 %v7730_v26, %v14620_v34  ;;  %v14661_v19 = vadd.f32 %v7771_v9, %v14623_v10  ;;  %11442 = vmatpush3.bf16.msra.mxu1 %v12001_v37  ;;  %v15438_v26 = vld [vmem:[#allocation104_spill] sm:$0xff] }
 0xa5e   :  { %v7732_v31 = vpop.f32.mrf.mxu0  ;;  %v7773_v28 = vpop.f32.mrf.mxu1  ;;  %11443 = vmatprep.subr.bf16.mxu1 %v12003_v43  ;;  %v8823_v9 = vrot.slane %v14681_v53, %v15438_v26 }
 0xa5f   :  { %v14664_v20 = vadd.f32 %v7732_v31, %v14625_v7  ;;  %v14667_v59 = vadd.f32 %v7773_v28, %v14628_v51 }
 0xa60   :  { %v7734_v16 = vpop.f32.mrf.mxu0  ;;  %v7775_v0 = vpop.f32.mrf.mxu1 }
 0xa61   :  { %11444 = vmatpush3.bf16.msra.mxu1 %v12005_v1  ;;  %v8819_v16 = vrot.slane %v14681_v53, %v15401_v15  ;;  %v12030_v0 = vld [vmem:[#allocation33 + $0x178] sm:$0xff]  }
 0xa62   :  { %v7735_v17 = vpop.f32.mrf.mxu0  ;;  %v7776_v60 = vpop.f32.mrf.mxu1  ;;  %11445 = vmatprep.subr.bf16.mxu1 %v12007_v24 }
 0xa63   :  { %v12031_v17 = vld [vmem:[#allocation33 + $0x1f8] sm:$0xff]  }
 0xa65   :  { %11446 = vmatpush3.bf16.msra.mxu1 %v12009_v62 }
 0xa66   :  { %11447 = vmatprep.subr.bf16.mxu1 %v12011_v40 }
 0xa69   :  { %11448 = vmatpush3.bf16.msra.mxu1 %v12013_v56 }
 0xa6a   :  { %11449 = vmatprep.subr.bf16.mxu1 %v12015_v58 }
 0xa6d   :  { %11450 = vmatpush3.bf16.msra.mxu1 %v12017_v3 }
 0xa6e   :  { %11451 = vmatprep.subr.bf16.mxu1 %v12019_v48 }
 0xa71   :  { %11452 = vmatpush3.bf16.msra.mxu1 %v12021_v41 }
 0xa72   :  { %11453 = vmatprep.subr.bf16.mxu1 %v12023_v54 }
 0xa75   :  { %11454 = vmatpush3.bf16.msra.mxu1 %v12025_v38 }
 0xa76   :  { %11455 = vmatprep.subr.bf16.mxu1 %v12027_v55 }
 0xa79   :  { %11456 = vmatpush3.bf16.msra.mxu1 %v12029_v12 }
 0xa7a   :  { %11485 = vmatprep.subr.bf16.mxu1 %v12031_v17 }
 0xa9c   :  { %v7812_v34 = vpop.f32.mrf.mxu0  ;;  %v7853_v22 = vpop.f32.mrf.mxu1 }
 0xa9d   :  { %v14670_v21 = vadd.f32 %v7812_v34, %v14644_v39  ;;  %v14673_v10 = vadd.f32 %v7853_v22, %v14647_v14  ;;  %v12000_v39 = vld [vmem:[#allocation33 + $0x38] sm:$0xff]   ;;  %v12002_v14 = vld [vmem:[#allocation33 + $0x70] sm:$0xff]   ;;  %v8827_v22 = vrot.slane %v14681_v53, %v14684_v47 }
 0xa9e   :  { %v7814_v29 = vpop.f32.mrf.mxu0  ;;  %v7855_v8 = vpop.f32.mrf.mxu1  ;;  %11420 = vmatpush3.bf16.msra.mxu0 %v12000_v39 }
 0xa9f   :  { %v14676_v7 = vadd.f32 %v7814_v29, %v14649_v32  ;;  %v14679_v51 = vadd.f32 %v7855_v8, %v14652_v25  ;;  %v12004_v32 = vld [vmem:[#allocation33 + $0x30] sm:$0xff]   ;;  %11421 = vmatprep.subr.bf16.mxu0 %v12002_v14  ;;  %v12006_v25 = vld [vmem:[#allocation33 + $0x68] sm:$0xff]  }
 0xaa0   :  { %v7816_v18 = vpop.f32.mrf.mxu0  ;;  %v7857_v50 = vpop.f32.mrf.mxu1 }
 0xaa2   :  { %v7817_v63 = vpop.f32.mrf.mxu0  ;;  %v7858_v13 = vpop.f32.mrf.mxu1  ;;  %11422 = vmatpush3.bf16.msra.mxu0 %v12004_v32 }
 0xaa3   :  { %11423 = vmatprep.subr.bf16.mxu0 %v12006_v25 }
 0xaa6   :  { %11424 = vmatpush3.bf16.msra.mxu0 %v12008_v45 }
 0xaa7   :  { %11425 = vmatprep.subr.bf16.mxu0 %v12010_v30 }
 0xaaa   :  { %11426 = vmatpush3.bf16.msra.mxu0 %v12012_v36 }
 0xaab   :  { %11427 = vmatprep.subr.bf16.mxu0 %v12014_v33 }
 0xaae   :  { %11428 = vmatpush3.bf16.msra.mxu0 %v12016_v4 }
 0xaaf   :  { %11429 = vmatprep.subr.bf16.mxu0 %v12018_v44 }
 0xab2   :  { %11430 = vmatpush3.bf16.msra.mxu0 %v12020_v57 }
 0xab3   :  { %11431 = vmatprep.subr.bf16.mxu0 %v12022_v23 }
 0xab6   :  { %11432 = vmatpush3.bf16.msra.mxu0 %v12024_v35 }
 0xab7   :  { %11433 = vmatprep.subr.bf16.mxu0 %v12026_v5 }
 0xaba   :  { %11434 = vmatpush3.bf16.msra.mxu0 %v12028_v52 }
 0xabb   :  { %11463 = vmatprep.subr.bf16.mxu0 %v12030_v0 }
 0xadc   :  { %v8672_v61 = vpop.f32.mrf.mxu0  ;;  %v8713_v28 = vpop.f32.mrf.mxu1 }
 0xadd   :  { %v8802_v31 = vadd.f32 %v8672_v61, %v14657_v6  ;;  %v8804_v60 = vadd.f32 %v8713_v28, %v14661_v19 }
 0xade   :  { %v8674_v34 = vpop.f32.mrf.mxu0  ;;  %v8715_v18 = vpop.f32.mrf.mxu1 }
 0xadf   :  { %v14696_v29 = vadd.f32 %v8815_v11, %v8802_v31  ;;  %v8803_v8 = vadd.f32 %v8674_v34, %v14664_v20  ;;  %v14699_v6 = vadd.f32 %v8823_v9, %v8804_v60  ;;  %v8805_v50 = vadd.f32 %v8715_v18, %v14667_v59 }
 0xae0   :  { %v8676_v63 = vpop.f32.mrf.mxu0  ;;  %v8717_v2 = vpop.f32.mrf.mxu1 }
 0xae1   :  { %v8862_v13 = vrot.slane %v14696_v29, 4  ;;  %v8918_v19 = vmul.f32 %v14696_v29, %v14696_v29  ;;  %v14705_v49 = vadd.f32 %v8819_v16, %v8803_v8  ;;  %v8874_v39 = vrot.slane %v14699_v6, 4 }
 0xae2   :  { %v8920_v20 = vmul.f32 %v14699_v6, %v14699_v6  ;;  %v14710_v37 = vadd.f32 %v8827_v22, %v8805_v50  ;;  %v8677_v14 = vpop.f32.mrf.mxu0  ;;  %v8718_v25 = vpop.f32.mrf.mxu1 }
 0xae3   :  { %v8863_v43 = vadd.f32 %v8862_v13, %v14696_v29  ;;  %v8926_v59 = vrot.slane %v8918_v19, 4  ;;  %v8868_v32 = vrot.slane %v14705_v49, 4  ;;  %v8919_v1 = vmul.f32 %v14705_v49, %v14705_v49 }
 0xae4   :  { %v8875_v24 = vadd.f32 %v8874_v39, %v14699_v6  ;;  %v8938_v45 = vrot.slane %v8920_v20, 4  ;;  %v8880_v62 = vrot.slane %v14710_v37, 4  ;;  %v8921_v30 = vmul.f32 %v14710_v37, %v14710_v37 }
 0xae5   :  { %v8864_v40 = vrot.slane %v8863_v43, 2  ;;  %v8927_v36 = vadd.f32 %v8926_v59, %v8918_v19  ;;  %v8869_v56 = vadd.f32 %v8868_v32, %v14705_v49  ;;  %v8932_v33 = vrot.slane %v8919_v1, 4 }
 0xae6   :  { %v8876_v58 = vrot.slane %v8875_v24, 2  ;;  %v8939_v4 = vadd.f32 %v8938_v45, %v8920_v20  ;;  %v8881_v3 = vadd.f32 %v8880_v62, %v14710_v37  ;;  %v8944_v44 = vrot.slane %v8921_v30, 4 }
 0xae7   :  { %v8865_v48 = vadd.f32 %v8864_v40, %v8863_v43  ;;  %v8928_v57 = vrot.slane %v8927_v36, 2  ;;  %v8870_v41 = vrot.slane %v8869_v56, 2  ;;  %v8933_v23 = vadd.f32 %v8932_v33, %v8919_v1 }
 0xae8   :  { %v8877_v54 = vadd.f32 %v8876_v58, %v8875_v24  ;;  %v8940_v35 = vrot.slane %v8939_v4, 2  ;;  %v8882_v38 = vrot.slane %v8881_v3, 2  ;;  %v8945_v5 = vadd.f32 %v8944_v44, %v8921_v30 }
 0xae9   :  { %v8866_v55 = vrot.slane %v8865_v48, 1  ;;  %v8929_v52 = vadd.f32 %v8928_v57, %v8927_v36  ;;  %v8871_v12 = vadd.f32 %v8870_v41, %v8869_v56  ;;  %v8934_v11 = vrot.slane %v8933_v23, 2 }
 0xaea   :  { %v8878_v61 = vrot.slane %v8877_v54, 1  ;;  %v8941_v9 = vadd.f32 %v8940_v35, %v8939_v4  ;;  %v8883_v31 = vadd.f32 %v8882_v38, %v8881_v3  ;;  %v8946_v28 = vrot.slane %v8945_v5, 2 }
 0xaeb   :  { %v8867_v16 = vadd.f32 %v8866_v55, %v8865_v48  ;;  %v8930_v0 = vrot.slane %v8929_v52, 1  ;;  %v8872_v17 = vrot.slane %v8871_v12, 1  ;;  %v8935_v60 = vadd.f32 %v8934_v11, %v8933_v23  ;;  %v14722_v23 = vld [vmem:[#allocation30] sm:$0xff] }
 0xaec   :  { %v8879_v34 = vadd.f32 %v8878_v61, %v8877_v54  ;;  %v8942_v22 = vrot.slane %v8941_v9, 1  ;;  %v8884_v8 = vrot.slane %v8883_v31, 1  ;;  %v8947_v18 = vadd.f32 %v8946_v28, %v8945_v5 }
 0xaed   :  { %v8910_v50 = vmul.f32 0.125, %v8867_v16  ;;  %v8931_v63 = vadd.f32 %v8930_v0, %v8929_v52  ;;  %v8873_v13 = vadd.f32 %v8872_v17, %v8871_v12  ;;  %v8936_v19 = vrot.slane %v8935_v60, 1 }
 0xaee   :  { %v8912_v2 = vmul.f32 0.125, %v8879_v34  ;;  %v8943_v39 = vadd.f32 %v8942_v22, %v8941_v9  ;;  %v8885_v20 = vadd.f32 %v8884_v8, %v8883_v31  ;;  %v8948_v14 = vrot.slane %v8947_v18, 1 }
 0xaef   :  { %v8974_v43 = vmul.f32 0.125, %v8931_v63  ;;  %v8982_v59 = vmul.f32 %v8910_v50, %v8910_v50  ;;  %v8911_v32 = vmul.f32 0.125, %v8873_v13  ;;  %v8937_v1 = vadd.f32 %v8936_v19, %v8935_v60 }
 0xaf0   :  { %v8976_v25 = vmul.f32 0.125, %v8943_v39  ;;  %v8984_v24 = vmul.f32 %v8912_v2, %v8912_v2  ;;  %v8913_v45 = vmul.f32 0.125, %v8885_v20  ;;  %v8949_v62 = vadd.f32 %v8948_v14, %v8947_v18 }
 0xaf1   :  { %v8990_v30 = vsub.f32 %v8974_v43, %v8982_v59  ;;  %v8975_v40 = vmul.f32 0.125, %v8937_v1  ;;  %v8983_v36 = vmul.f32 %v8911_v32, %v8911_v32  ;;  %v9018_v54 = vrot.slane %v14722_v23, %v15348_v27 }
 0xaf2   :  { %v8992_v56 = vsub.f32 %v8976_v25, %v8984_v24  ;;  %v8977_v33 = vmul.f32 0.125, %v8949_v62  ;;  %v8985_v58 = vmul.f32 %v8913_v45, %v8913_v45  ;;  %v9026_v35 = vrot.slane %v14722_v23, %v15438_v26 }
 0xaf3   :  { %v8998_v4 = vadd.f32 1e-05, %v8990_v30  ;;  %v8991_v3 = vsub.f32 %v8975_v40, %v8983_v36  ;;  %v9022_v38 = vrot.slane %v14722_v23, %v15401_v15  ;;  %v9030_v55 = vrot.slane %v14722_v23, %v14684_v47 }
 0xaf4   :  { %v9000_v44 = vadd.f32 1e-05, %v8992_v56  ;;  %v8993_v48 = vsub.f32 %v8977_v33, %v8985_v58  ;;  %v14753_v13 = vsub.s32 4, %v15418_v42  ;;  %v14759_v19 = vsub.s32 5, %v15418_v42 }
 0xaf5   :  { %12062 = vrsqrt.f32 %v8998_v4  ;;  %v8999_v57 = vadd.f32 1e-05, %v8991_v3 }
 0xaf6   :  { %12064 = vrsqrt.f32 %v9000_v44  ;;  %v9001_v41 = vadd.f32 1e-05, %v8993_v48  ;;  %v8831_v39 = vrot.slane %v14681_v53, %v14753_v13 }
 0xaf7   :  { %12066 = vrsqrt.f32 %v8999_v57 }
 0xaf8   :  { %12068 = vrsqrt.f32 %v9001_v41 }
 0xb02   :  { %v12063_v5 = vpop.eup %12062 }
 0xb03   :  { %v12065_v52 = vpop.eup %12064  ;;  %v14732_v12 = vmul.f32 %v12063_v5, %v9018_v54 }
 0xb04   :  { %v12067_v11 = vpop.eup %12066  ;;  %v14734_v61 = vmul.f32 %v12065_v52, %v9026_v35 }
 0xb05   :  { %v12069_v9 = vpop.eup %12068  ;;  %v14736_v31 = vmul.f32 %v12067_v11, %v9022_v38  ;;  %v9063_v16 = vmul.f32 %v14732_v12, %v8910_v50  ;;  %v14756_v50 = vsub.s32 6, %v15418_v42 }
 0xb06   :  { %v14738_v28 = vmul.f32 %v12069_v9, %v9030_v55  ;;  %v9065_v17 = vmul.f32 %v14734_v61, %v8912_v2  ;;  %v14762_v2 = vsub.s32 7, %v15418_v42 }
 0xb07   :  { %v9064_v0 = vmul.f32 %v14736_v31, %v8911_v32  ;;  %v8839_v14 = vrot.slane %v14681_v53, %v14756_v50  ;;  %v8835_v32 = vrot.slane %v14681_v53, %v14759_v19 }
 0xb08   :  { %v9066_v60 = vmul.f32 %v14738_v28, %v8913_v45  ;;  %v8843_v42 = vrot.slane %v14681_v53, %v14762_v2 }
 0xb09   :  { %v9079_v34 = vcombine.low %v9063_v16, %v9064_v0 }
 0xb0a   :  { %v9080_v22 = vcombine.low %v9065_v17, %v9066_v60 }
 0xb0b   :  { %v14745_v8 = vrot.slane %v9079_v34, %v14472_v46 }
 0xb0c   :  { %v14748_v18 = vrot.slane %v9080_v22, %v14472_v46 }
 0xb0e   :  { %v9111_v63 = vcombine.low %v14745_v8, %v14748_v18 }
 0xb1c   :  { %v8754_v20 = vpop.f32.mrf.mxu0  ;;  %v8795_v59 = vpop.f32.mrf.mxu1 }
 0xb1d   :  { %v8806_v43 = vadd.f32 %v8754_v20, %v14670_v21  ;;  %v8808_v1 = vadd.f32 %v8795_v59, %v14673_v10 }
 0xb1e   :  { %v8756_v25 = vpop.f32.mrf.mxu0  ;;  %v8797_v62 = vpop.f32.mrf.mxu1 }
 0xb1f   :  { %v14774_v24 = vadd.f32 %v8831_v39, %v8806_v43  ;;  %v8807_v45 = vadd.f32 %v8756_v25, %v14676_v7  ;;  %v14777_v30 = vadd.f32 %v8839_v14, %v8808_v1  ;;  %v8809_v40 = vadd.f32 %v8797_v62, %v14679_v51 }
 0xb20   :  { %v8758_v21 = vpop.f32.mrf.mxu0  ;;  %v8799_v33 = vpop.f32.mrf.mxu1 }
 0xb21   :  { %v8886_v36 = vrot.slane %v14774_v24, 4  ;;  %v8922_v56 = vmul.f32 %v14774_v24, %v14774_v24  ;;  %v14783_v10 = vadd.f32 %v8835_v32, %v8807_v45  ;;  %v8898_v53 = vrot.slane %v14777_v30, 4 }
 0xb22   :  { %v8924_v58 = vmul.f32 %v14777_v30, %v14777_v30  ;;  %v14788_v7 = vadd.f32 %v8843_v42, %v8809_v40  ;;  %v8759_v4 = vpop.f32.mrf.mxu0  ;;  %v8800_v57 = vpop.f32.mrf.mxu1 }
 0xb23   :  { %v8887_v3 = vadd.f32 %v8886_v36, %v14774_v24  ;;  %v8950_v51 = vrot.slane %v8922_v56, 4  ;;  %v8892_v44 = vrot.slane %v14783_v10, 4  ;;  %v8923_v48 = vmul.f32 %v14783_v10, %v14783_v10 }
 0xb24   :  { %v8899_v41 = vadd.f32 %v8898_v53, %v14777_v30  ;;  %v8962_v54 = vrot.slane %v8924_v58, 4  ;;  %v8904_v35 = vrot.slane %v14788_v7, 4  ;;  %v8925_v38 = vmul.f32 %v14788_v7, %v14788_v7 }
 0xb25   :  { %v8888_v5 = vrot.slane %v8887_v3, 2  ;;  %v8951_v55 = vadd.f32 %v8950_v51, %v8922_v56  ;;  %v8893_v52 = vadd.f32 %v8892_v44, %v14783_v10  ;;  %v8956_v11 = vrot.slane %v8923_v48, 4 }
 0xb26   :  { %v8900_v9 = vrot.slane %v8899_v41, 2  ;;  %v8963_v16 = vadd.f32 %v8962_v54, %v8924_v58  ;;  %v8905_v0 = vadd.f32 %v8904_v35, %v14788_v7  ;;  %v8968_v17 = vrot.slane %v8925_v38, 4 }
 0xb27   :  { %v8889_v60 = vadd.f32 %v8888_v5, %v8887_v3  ;;  %v8952_v34 = vrot.slane %v8951_v55, 2  ;;  %v8894_v22 = vrot.slane %v8893_v52, 2  ;;  %v8957_v39 = vadd.f32 %v8956_v11, %v8923_v48 }
 0xb28   :  { %v8901_v20 = vadd.f32 %v8900_v9, %v8899_v41  ;;  %v8964_v14 = vrot.slane %v8963_v16, 2  ;;  %v8906_v43 = vrot.slane %v8905_v0, 2  ;;  %v8969_v59 = vadd.f32 %v8968_v17, %v8925_v38 }
 0xb29   :  { %v8890_v32 = vrot.slane %v8889_v60, 1  ;;  %v8953_v1 = vadd.f32 %v8952_v34, %v8951_v55  ;;  %v8895_v25 = vadd.f32 %v8894_v22, %v8893_v52  ;;  %v8958_v42 = vrot.slane %v8957_v39, 2 }
 0xb2a   :  { %v8902_v45 = vrot.slane %v8901_v20, 1  ;;  %v8965_v62 = vadd.f32 %v8964_v14, %v8963_v16  ;;  %v8907_v40 = vadd.f32 %v8906_v43, %v8905_v0  ;;  %v8970_v21 = vrot.slane %v8969_v59, 2 }
 0xb2b   :  { %v8891_v36 = vadd.f32 %v8890_v32, %v8889_v60  ;;  %v8954_v56 = vrot.slane %v8953_v1, 1  ;;  %v8896_v33 = vrot.slane %v8895_v25, 1  ;;  %v8959_v53 = vadd.f32 %v8958_v42, %v8957_v39 }
 0xb2c   :  { %v8903_v58 = vadd.f32 %v8902_v45, %v8901_v20  ;;  %v8966_v4 = vrot.slane %v8965_v62, 1  ;;  %v8908_v3 = vrot.slane %v8907_v40, 1  ;;  %v8971_v51 = vadd.f32 %v8970_v21, %v8969_v59 }
 0xb2d   :  { %v8914_v44 = vmul.f32 0.125, %v8891_v36  ;;  %v8955_v48 = vadd.f32 %v8954_v56, %v8953_v1  ;;  %v8897_v57 = vadd.f32 %v8896_v33, %v8895_v25  ;;  %v8960_v41 = vrot.slane %v8959_v53, 1 }
 0xb2e   :  { %v8916_v54 = vmul.f32 0.125, %v8903_v58  ;;  %v8967_v35 = vadd.f32 %v8966_v4, %v8965_v62  ;;  %v8909_v38 = vadd.f32 %v8908_v3, %v8907_v40  ;;  %v8972_v5 = vrot.slane %v8971_v51, 1 }
 0xb2f   :  { %v8978_v55 = vmul.f32 0.125, %v8955_v48  ;;  %v8986_v52 = vmul.f32 %v8914_v44, %v8914_v44  ;;  %v8915_v11 = vmul.f32 0.125, %v8897_v57  ;;  %v8961_v9 = vadd.f32 %v8960_v41, %v8959_v53 }
 0xb30   :  { %v8980_v16 = vmul.f32 0.125, %v8967_v35  ;;  %v8988_v0 = vmul.f32 %v8916_v54, %v8916_v54  ;;  %v8917_v17 = vmul.f32 0.125, %v8909_v38  ;;  %v8973_v60 = vadd.f32 %v8972_v5, %v8971_v51 }
 0xb31   :  { %v8994_v34 = vsub.f32 %v8978_v55, %v8986_v52  ;;  %v8979_v22 = vmul.f32 0.125, %v8961_v9  ;;  %v8987_v39 = vmul.f32 %v8915_v11, %v8915_v11  ;;  %v9034_v62 = vrot.slane %v14722_v23, %v14753_v13 }
 0xb32   :  { %v8996_v20 = vsub.f32 %v8980_v16, %v8988_v0  ;;  %v8981_v14 = vmul.f32 0.125, %v8973_v60  ;;  %v8989_v43 = vmul.f32 %v8917_v17, %v8917_v17  ;;  %v9042_v40 = vrot.slane %v14722_v23, %v14756_v50 }
 0xb33   :  { %v9002_v59 = vadd.f32 1e-05, %v8994_v34  ;;  %v8995_v32 = vsub.f32 %v8979_v22, %v8987_v39  ;;  %v9038_v21 = vrot.slane %v14722_v23, %v14759_v19  ;;  %v9046_v56 = vrot.slane %v14722_v23, %v14762_v2  ;;  %v8861_v39 = vld [vmem:[#allocation31] sm:$0xff] }
 0xb34   :  { %v9004_v1 = vadd.f32 1e-05, %v8996_v20  ;;  %v8997_v25 = vsub.f32 %v8981_v14, %v8989_v43  ;;  %v9133_v22 = vrot.slane %v14732_v12, %v15348_v27 }
 0xb35   :  { %12070 = vrsqrt.f32 %v9002_v59  ;;  %v9003_v42 = vadd.f32 1e-05, %v8995_v32 }
 0xb36   :  { %12072 = vrsqrt.f32 %v9004_v1  ;;  %v9005_v45 = vadd.f32 1e-05, %v8997_v25 }
 0xb37   :  { %12074 = vrsqrt.f32 %v9003_v42 }
 0xb38   :  { %12076 = vrsqrt.f32 %v9005_v45 }
 0xb42   :  { %v12071_v36 = vpop.eup %12070 }
 0xb43   :  { %v12073_v33 = vpop.eup %12072  ;;  %v9059_v53 = vmul.f32 %v12071_v36, %v9034_v62 }
 0xb44   :  { %v12075_v58 = vpop.eup %12074  ;;  %v9061_v4 = vmul.f32 %v12073_v33, %v9042_v40  ;;  %v12032_v33 = vld [vmem:[#allocation33 + $0x138] sm:$0xff]  }
 0xb45   :  { %v12077_v3 = vpop.eup %12076  ;;  %v9149_v51 = vrot.slane %v9059_v53, %v15348_v27  ;;  %v9060_v48 = vmul.f32 %v12075_v58, %v9038_v21  ;;  %v9067_v35 = vmul.f32 %v9059_v53, %v8914_v44  ;;  %v9141_v44 = vrot.slane %v14734_v61, %v15348_v27  ;;  %v12033_v53 = vld [vmem:[#allocation33 + $0x1b8] sm:$0xff]  }
 0xb46   :  { %v9157_v57 = vrot.slane %v9061_v4, %v15348_v27  ;;  %v9062_v41 = vmul.f32 %v12077_v3, %v9046_v56  ;;  %v9069_v55 = vmul.f32 %v9061_v4, %v8916_v54  ;;  %v9137_v54 = vrot.slane %v14736_v31, %v15348_v27 }
 0xb47   :  { %v9166_v38 = vmul.f32 %v9149_v51, %v14774_v24  ;;  %v9068_v5 = vmul.f32 %v9060_v48, %v8915_v11  ;;  %v9119_v24 = vrot.slane %v9111_v63, %v14472_v46  ;;  %v9145_v11 = vrot.slane %v14738_v28, %v15348_v27  ;;  %v12034_v51 = vld [vmem:[#allocation33 + $0x170] sm:$0xff]  }
 0xb48   :  { %v9168_v52 = vmul.f32 %v9157_v57, %v14777_v30  ;;  %v9070_v9 = vmul.f32 %v9062_v41, %v8917_v17  ;;  %v9153_v17 = vrot.slane %v9060_v48, %v15348_v27  ;;  %v9161_v12 = vrot.slane %v9062_v41, %v15348_v27  ;;  %v12035_v57 = vld [vmem:[#allocation33 + $0x1f0] sm:$0xff]  }
 0xb49   :  { %v9081_v23 = vcombine.low %v9067_v35, %v9068_v5  ;;  %v9162_v61 = vmul.f32 %v9133_v22, %v14696_v29  ;;  %v9164_v14 = vmul.f32 %v9141_v44, %v14699_v6  ;;  %v9163_v18 = vmul.f32 %v9137_v54, %v14705_v49  ;;  %v12037_v5 = vld [vmem:[#allocation33 + $0x1b0] sm:$0xff]   ;;  %v12045_v22 = vld [vmem:[#allocation33 + $0x1a0] sm:$0xff]   ;;  %v12046_v44 = vld [vmem:[#allocation33 + $0x158] sm:$0xff]  }
 0xb4a   :  { %v9082_v16 = vcombine.low %v9069_v55, %v9070_v9  ;;  %v9167_v31 = vmul.f32 %v9153_v17, %v14783_v10  ;;  %v9169_v63 = vmul.f32 %v9161_v12, %v14788_v7  ;;  %v12039_v9 = vld [vmem:[#allocation33 + $0x1e8] sm:$0xff]   ;;  %v12049_v54 = vld [vmem:[#allocation33 + $0x198] sm:$0xff]   ;;  %v12051_v17 = vld [vmem:[#allocation33 + $0x1d0] sm:$0xff]  }
 0xb4b   :  { %v9103_v0 = vrot.slane %v9081_v23, %v14472_v46  ;;  %v12040_v23 = vld [vmem:[#allocation33 + $0x128] sm:$0xff]   ;;  %v12053_v12 = vld [vmem:[#allocation33 + $0x190] sm:$0xff]  }
 0xb4c   :  { %v9110_v60 = vrot.slane %v9082_v16, %v14472_v46  ;;  %v12041_v16 = vld [vmem:[#allocation33 + $0x1a8] sm:$0xff]  }
 0xb4e   :  { %v9112_v34 = vcombine.low %v9103_v0, %v9110_v60  ;;  %v12042_v0 = vld [vmem:[#allocation33 + $0x160] sm:$0xff]  }
 0xb4f   :  { %v12043_v60 = vld [vmem:[#allocation33 + $0x1e0] sm:$0xff]  }
 0xb50   :  { %v9126_v30 = vrot.slane %v9112_v34, %v14472_v46  ;;  %v9165_v46 = vmul.f32 %v9145_v11, %v14710_v37  ;;  %v12044_v34 = vld [vmem:[#allocation33 + $0x120] sm:$0xff]   ;;  %v12050_v11 = vld [vmem:[#allocation33 + $0x150] sm:$0xff]  }
 0xb52   :  { %v9127_v20 = vcombine.low %v9119_v24, %v9126_v30  ;;  %v12047_v24 = vld [vmem:[#allocation33 + $0x1d8] sm:$0xff]  }
 0xb53   :  { %v12048_v30 = vld [vmem:[#allocation33 + $0x118] sm:$0xff]  }
 0xb54   :  { %v9129_v8 = vsub.f32 %v8861_v39, %v9127_v20  ;;  %v12052_v39 = vld [vmem:[#allocation33 + $0x110] sm:$0xff]   ;;  %v12054_v20 = vld [vmem:[#allocation33 + $0x148] sm:$0xff]  }
 0xb56   :  { %v9178_v28 = vrot.slane %v9129_v8, %v15401_v15  ;;  %v9186_v43 = vrot.slane %v9129_v8, %v14684_v47  ;;  %v9174_v59 = vrot.slane %v9129_v8, %v15348_v27  ;;  %v9182_v32 = vrot.slane %v9129_v8, %v15438_v26 }
 0xb57   :  { %v9194_v29 = vrot.slane %v9129_v8, %v14759_v19  ;;  %v9202_v6 = vrot.slane %v9129_v8, %v14762_v2  ;;  %v9190_v49 = vrot.slane %v9129_v8, %v14753_v13  ;;  %v9198_v37 = vrot.slane %v9129_v8, %v14756_v50  ;;  %v12057_v8 = vld [vmem:[#allocation33 + $0x188] sm:$0xff]  }
 0xb58   :  { %v9212_v1 = vadd.f32 %v9178_v28, %v9163_v18  ;;  %v9214_v10 = vadd.f32 %v9186_v43, %v9165_v46  ;;  %v9211_v25 = vadd.f32 %v9174_v59, %v9162_v61  ;;  %v9213_v7 = vadd.f32 %v9182_v32, %v9164_v14  ;;  %v12055_v61 = vld [vmem:[#allocation33 + $0x1c8] sm:$0xff]   ;;  %v12058_v18 = vld [vmem:[#allocation33 + $0x140] sm:$0xff]  }
 0xb59   :  { %v9216_v42 = vadd.f32 %v9194_v29, %v9167_v31  ;;  %v9218_v15 = vadd.f32 %v9202_v6, %v9169_v63  ;;  %v14843_v45 = vadd.f32 %v9190_v49, %v9166_v38  ;;  %v14845_v47 = vadd.f32 %v9198_v37, %v9168_v52  ;;  %v12036_v38 = vld [vmem:[#allocation33 + $0x130] sm:$0xff]   ;;  %v12038_v52 = vld [vmem:[#allocation33 + $0x168] sm:$0xff]   ;;  %v12059_v46 = vld [vmem:[#allocation33 + $0x1c0] sm:$0xff]  }
 0xb5a   :  { %vm9220_vm12 = vcmp.gt.f32.partialorder %v9212_v1, 0.0  ;;  %v9228_v27 = vmul.f32 0.01, %v9212_v1  ;;  %vm9222_vm9 = vcmp.gt.f32.partialorder %v9214_v10, 0.0  ;;  %v9230_v26 = vmul.f32 0.01, %v9214_v10 }
 0xb5b   :  { %vm9219_vm2 = vcmp.gt.f32.partialorder %v9211_v25, 0.0  ;;  %v9227_v19 = vmul.f32 0.01, %v9211_v25  ;;  %vm9221_vm0 = vcmp.gt.f32.partialorder %v9213_v7, 0.0  ;;  %v9229_v13 = vmul.f32 0.01, %v9213_v7 }
 0xb5c   :  { %v9236_v2 = vsel %vm9220_vm12, %v9212_v1, %v9228_v27  ;;  %v9238_v50 = vsel %vm9222_vm9, %v9214_v10, %v9230_v26  ;;  %vm9224_vm15 = vcmp.gt.f32.partialorder %v9216_v42, 0.0  ;;  %v9232_v62 = vmul.f32 0.01, %v9216_v42  ;;  %v12056_v14 = vld [vmem:[#allocation33 + $0x108] sm:$0xff]   ;;  %v12060_v28 = vld [vmem:[#allocation33 + $0x100] sm:$0xff]  }
 0xb5d   :  { %v9244_v40 = vpack.c.bf16 %v9236_v2, %v9236_v2  ;;  %v9246_v21 = vpack.c.bf16 %v9238_v50, %v9238_v50  ;;  %v9235_v36 = vsel %vm9219_vm2, %v9211_v25, %v9227_v19  ;;  %v9237_v56 = vsel %vm9221_vm0, %v9213_v7, %v9229_v13  ;;  %v12061_v43 = vld [vmem:[#allocation33 + $0x180] sm:$0xff]  }
 0xb5e   :  { %v9243_v58 = vpack.c.bf16 %v9235_v36, %v9235_v36  ;;  %v9245_v4 = vpack.c.bf16 %v9237_v56, %v9237_v56  ;;  %v9240_v3 = vsel %vm9224_vm15, %v9216_v42, %v9232_v62  ;;  %vm9226_vm1 = vcmp.gt.f32.partialorder %v9218_v15, 0.0  ;;  %v11130_v26 = vld [vmem:[#allocation34] ss:$0 sm:$0xff] }
 0xb5f   :  { %9802 = vmatprep.mubr.bf16.mxu0 %v9244_v40  ;;  %9842 = vmatprep.mubr.bf16.mxu1 %v9246_v21  ;;  %v9234_v48 = vmul.f32 0.01, %v9218_v15  ;;  %v9248_v41 = vpack.c.bf16 %v9240_v3, %v9240_v3  ;;  %v9231_v31 = vmul.f32 0.01, %v14843_v45  ;;  %v9233_v63 = vmul.f32 0.01, %v14845_v47 }
 0xb60   :  { %9803 = vmatmul.mubr.bf16.vlgmr.msra.gmra.mxu0 %v9243_v58  ;;  %9843 = vmatmul.mubr.bf16.vlgmr.msra.gmra.mxu1 %v9245_v4  ;;  %vm9223_vm6 = vcmp.gt.f32.partialorder %v14843_v45, 0.0  ;;  %vm9225_vm3 = vcmp.gt.f32.partialorder %v14845_v47, 0.0 }
 0xb61   :  { %11464 = vmatpush3.bf16.msra.mxu0 %v12032_v33  ;;  %11486 = vmatpush3.bf16.msra.mxu1 %v12033_v53  ;;  %v9242_v35 = vsel %vm9226_vm1, %v9218_v15, %v9234_v48  ;;  %v9239_v59 = vsel %vm9223_vm6, %v14843_v45, %v9231_v31  ;;  %v9241_v32 = vsel %vm9225_vm3, %v14845_v47, %v9233_v63 }
 0xb62   :  { %9882 = vmatprep.mubr.bf16.mxu0 %v9248_v41  ;;  %v9250_v55 = vpack.c.bf16 %v9242_v35, %v9242_v35  ;;  %11465 = vmatprep.subr.bf16.mxu0 %v12034_v51  ;;  %v9247_v29 = vpack.c.bf16 %v9239_v59, %v9239_v59  ;;  %v9249_v6 = vpack.c.bf16 %v9241_v32, %v9241_v32 }
 0xb63   :  { %11487 = vmatprep.subr.bf16.mxu1 %v12035_v57 }
 0xb64   :  { %9922 = vmatprep.mubr.bf16.mxu1 %v9250_v55 }
 0xb65   :  { %11466 = vmatpush3.bf16.msra.mxu0 %v12036_v38  ;;  %11488 = vmatpush3.bf16.msra.mxu1 %v12037_v5 }
 0xb66   :  { %11467 = vmatprep.subr.bf16.mxu0 %v12038_v52  ;;  %11489 = vmatprep.subr.bf16.mxu1 %v12039_v9 }
 0xb69   :  { %11468 = vmatpush3.bf16.msra.mxu0 %v12040_v23  ;;  %11490 = vmatpush3.bf16.msra.mxu1 %v12041_v16 }
 0xb6a   :  { %11469 = vmatprep.subr.bf16.mxu0 %v12042_v0  ;;  %11491 = vmatprep.subr.bf16.mxu1 %v12043_v60 }
 0xb6d   :  { %11470 = vmatpush3.bf16.msra.mxu0 %v12044_v34  ;;  %11492 = vmatpush3.bf16.msra.mxu1 %v12045_v22 }
 0xb6e   :  { %11471 = vmatprep.subr.bf16.mxu0 %v12046_v44  ;;  %11493 = vmatprep.subr.bf16.mxu1 %v12047_v24 }
 0xb71   :  { %11472 = vmatpush3.bf16.msra.mxu0 %v12048_v30  ;;  %11494 = vmatpush3.bf16.msra.mxu1 %v12049_v54 }
 0xb72   :  { %11473 = vmatprep.subr.bf16.mxu0 %v12050_v11  ;;  %11495 = vmatprep.subr.bf16.mxu1 %v12051_v17 }
 0xb75   :  { %11474 = vmatpush3.bf16.msra.mxu0 %v12052_v39  ;;  %11496 = vmatpush3.bf16.msra.mxu1 %v12053_v12 }
 0xb76   :  { %11475 = vmatprep.subr.bf16.mxu0 %v12054_v20  ;;  %11497 = vmatprep.subr.bf16.mxu1 %v12055_v61 }
 0xb79   :  { %11476 = vmatpush3.bf16.msra.mxu0 %v12056_v14  ;;  %11498 = vmatpush3.bf16.msra.mxu1 %v12057_v8 }
 0xb7a   :  { %11477 = vmatprep.subr.bf16.mxu0 %v12058_v18  ;;  %11499 = vmatprep.subr.bf16.mxu1 %v12059_v46 }
 0xb7d   :  { %11478 = vmatpush3.bf16.msra.mxu0 %v12060_v28  ;;  %11500 = vmatpush3.bf16.msra.mxu1 %v12061_v43 }
 0xb80   :  { %9883 = vmatmul.mubr.bf16.vlgmr.msra.gmra.mxu0 %v9247_v29  ;;  %9923 = vmatmul.mubr.bf16.vlgmr.msra.gmra.mxu1 %v9249_v6 }
 0xc20   :  { %v11435_v49 = vpop.f32.mrf.mxu0  ;;  %v11457_v37 = vpop.f32.mrf.mxu1 }
 0xc22   :  { %v11436_v1 = vpop.f32.mrf.mxu0  ;;  %v11458_v10 = vpop.f32.mrf.mxu1 }
 0xc23   :  { %v11437_v27 = vadd.f32 %v11436_v1, %v11435_v49  ;;  %v11459_v47 = vadd.f32 %v11458_v10, %v11457_v37 }
 0xc24   :  { %v11438_v25 = vpop.f32.mrf.mxu0  ;;  %v11460_v7 = vpop.f32.mrf.mxu1 }
 0xc25   :  { %v9805_v19 = vadd.f32 %v11437_v27, %v11130_v26 }
 0xc26   :  { %v11439_v42 = vpop.f32.mrf.mxu0  ;;  %v11461_v15 = vpop.f32.mrf.mxu1 }
 0xc27   :  { %v9845_v62 = vadd.f32 %v11459_v47, %v9805_v19 }
 0xc40   :  { %v11479_v45 = vpop.f32.mrf.mxu0  ;;  %v11501_v13 = vpop.f32.mrf.mxu1 }
 0xc42   :  { %v11480_v2 = vpop.f32.mrf.mxu0  ;;  %v11502_v50 = vpop.f32.mrf.mxu1 }
 0xc43   :  { %v11481_v40 = vadd.f32 %v11480_v2, %v11479_v45  ;;  %v11503_v33 = vadd.f32 %v11502_v50, %v11501_v13 }
 0xc44   :  { %v11482_v21 = vpop.f32.mrf.mxu0  ;;  %v11504_v36 = vpop.f32.mrf.mxu1 }
 0xc45   :  { %v9885_v56 = vadd.f32 %v11481_v40, %v9845_v62 }
 0xc46   :  { %v11483_v53 = vpop.f32.mrf.mxu0  ;;  %v11505_v58 = vpop.f32.mrf.mxu1 }
 0xc47   :  { %v9925_v4 = vadd.f32 %v11503_v33, %v9885_v56 }
 0xc49   :  { %9930 = vst [vmem:[#allocation36] sm:$0xff] %v9925_v4 }
 0xc4a   :  { %12509 = shalt.err (!%p12506_p11)
}
 0xc4b   :  { %s15439_s18 = sld [smem:[#allocation113_spill]] }
 0xc51   :  { %9940 = dma.vmem_to_hbm [thread:$0]  %s9938_s25, 128, %s15439_s18, [#allocation6]  }
 0xc52   :  { %12542 = dma.done.wait [#allocation6], 128  }
 0xc53   :  { %12543 = vsyncadd [#allocation6], 4294967168 }
 0xc54   :  { %9944 = vsyncpa [#allocation5], 1 }
 0xc55   :  { %9945 = vsyncpa [#allocation8], 1 }
 0xc56   :  { %9946 = vsyncpa [#allocation11], 1 }
 0xc57   :  { %9947 = vsyncpa [#allocation14], 1 }
 0xc58   :  { %9948 = vsyncpa [#allocation17], 1 }
 0xc59   :  { %9949 = vsyncpa [#allocation20], 1 }
 0xc5a   :  { %9950 = vsyncpa [#allocation23], 1 }
 0xc5b   :  { %9951 = vsyncpa [#allocation26], 1 }
 0xc5c   :  { %9952 = vsyncpa [#allocation29], 1 }
 0xc5d   :  { %9953 = vsyncpa [#allocation32], 1 }
 0xc5e   :  { %9954 = vsyncpa [#allocation35], 1 }
 0xc5f   :  { %9955 = vsyncpa [#allocation6], 1 }
 0xc60   :  { %9956 = vsyncmov [#allocation3] }
 0xc63   :  { %s9957_s27 = vpop.sfrf %9956 }
 0xc64   :  { %p11195_p12 = scmp.ne.s32.totalorder %s9957_s27, 0 }
 0xc66   :  { %9961 = shalt.err (%p11195_p12)  }

</bundles_post_ra>
